<compile_context>
chip_gen: v6e
topology: v6e:2x2x1
jax: 0.10.0
libtpu: 0.0.40
codegen_flags: <defaults>
</compile_context>

<pallas_src>
import jax
import jax.numpy as jnp
import numpy as np
from jax.experimental import pallas as pl
from jax.experimental.pallas import tpu as pltpu

BN_EPS = 1e-5
# real layer widths: 2048 ->1024 ->512 ->256 ->128 ->64 ->32 ->24
REAL_DIMS = [2048, 1024, 512, 256, 128, 64, 32, 24]
# lane-padded widths used inside the kernel (last dims multiples of 128)
PAD_DIMS = [2048, 1024, 512, 256, 128, 128, 128, 128]


def _carmera_kernel(x_ref,
                    w1, b1, w2, b2, w3, b3, w4, b4, w5, b5, w6, b6,
                    w7, b7,
                    o_ref):
    """Fused 7-layer head: (matmul -> bias -> ReLU) x6 -> matmul -> bias.

    x_ref: (tm, 2048) f32 batch tile.  Weights are bf16, VMEM-resident across
    the whole batch grid (constant index_map).  Each dot runs on the MXU with
    f32 accumulation; bias+ReLU epilogues stay in f32 on the VPU.
    """
    def dense(h, w_ref, b_ref, relu):
        y = jnp.dot(h.astype(jnp.bfloat16), w_ref[...],
                    preferred_element_type=jnp.float32)
        y = y + b_ref[...]
        return jnp.maximum(y, 0.0) if relu else y

    h = x_ref[...]
    h = dense(h, w1, b1, True)
    h = dense(h, w2, b2, True)
    h = dense(h, w3, b3, True)
    h = dense(h, w4, b4, True)
    h = dense(h, w5, b5, True)
    h = dense(h, w6, b6, True)
    o_ref[...] = dense(h, w7, b7, False)


def _round_up(x, m):
    return ((x + m - 1) // m) * m


def _pad_wb(w, b, in_pad, out_pad):
    """Zero-pad a folded (in, out) weight / (out,) bias to lane-friendly sizes.

    Weight stored bf16 (halves HBM traffic), bias kept f32 as (1, out_pad) so
    the in-kernel broadcast over the batch dim is trivial.  Padded columns are
    zero, so ReLU(0*x + 0) = 0 and downstream layers are unaffected.
    """
    w = jnp.pad(w, ((0, in_pad - w.shape[0]), (0, out_pad - w.shape[1])))
    b = jnp.pad(b, ((0, out_pad - b.shape[0]),))
    return [w.astype(jnp.bfloat16), b.reshape(1, out_pad).astype(jnp.float32)]


def init_params(key):
    """Deterministic params: 6 conv+BN blocks folded to linears + final Linear.

    Conv1d / Linear weights: uniform(-1/sqrt(fan_in), 1/sqrt(fan_in)) like the
    PyTorch defaults.  BatchNorm running stats are randomized so the fold is
    actually exercised.  Returns the flat list [w1, b1, ..., w7, b7] in the
    padded / transposed layout the kernel expects.
    """
    keys = jax.random.split(key, 38)
    ki = iter(keys)
    flat = []
    # first_layer + 5 down blocks: Conv1d(k=3,s=2,p=1) + BN + ReLU on length-1 input
    for li in range(6):
        cin, cout = REAL_DIMS[li], REAL_DIMS[li + 1]
        bound = 1.0 / np.sqrt(cin * 3)
        conv_w = jax.random.uniform(next(ki), (cout, cin, 3), jnp.float32,
                                    -bound, bound)
        conv_b = jax.random.uniform(next(ki), (cout,), jnp.float32,
                                    -bound, bound)
        gamma = 1.0 + 0.1 * jax.random.normal(next(ki), (cout,), jnp.float32)
        beta = 0.1 * jax.random.normal(next(ki), (cout,), jnp.float32)
        mean = 0.1 * jax.random.normal(next(ki), (cout,), jnp.float32)
        var = jax.random.uniform(next(ki), (cout,), jnp.float32, 0.5, 1.5)

        # length-1 input, k=3, p=1 -> only the middle conv tap sees real data
        w_mid = conv_w[:, :, 1]                          # (cout, cin)
        scale = gamma / jnp.sqrt(var + BN_EPS)           # inference BN fold
        w_fold = (scale[:, None] * w_mid).T              # (cin, cout)
        b_fold = scale * (conv_b - mean) + beta          # (cout,)
        flat += _pad_wb(w_fold, b_fold, PAD_DIMS[li], PAD_DIMS[li + 1])

    # final Linear(32 -> 24)
    cin, cout = REAL_DIMS[6], REAL_DIMS[7]
    bound = 1.0 / np.sqrt(cin)
    lin_w = jax.random.uniform(next(ki), (cout, cin), jnp.float32, -bound, bound)
    lin_b = jax.random.uniform(next(ki), (cout,), jnp.float32, -bound, bound)
    flat += _pad_wb(lin_w.T, lin_b, PAD_DIMS[6], PAD_DIMS[7])
    return flat


def carmera_net_forward(latent, params, tm=128):
    """latent: (B, 2048) f32 -> domain_clss: (B, 24) f32."""
    B, din = latent.shape
    assert din == REAL_DIMS[0], latent.shape

    tm_eff = min(tm, _round_up(B, 8))          # batch tile (>= 8 sublanes)
    b_pad = _round_up(B, tm_eff)
    x = latent if b_pad == B else jnp.pad(latent, ((0, b_pad - B), (0, 0)))

    grid = (b_pad // tm_eff,)
    x_spec = pl.BlockSpec((tm_eff, din), lambda i: (i, 0))
    # full-array blocks with a constant index_map: weights/biases are DMA'd
    # once and stay VMEM-resident across the whole batch grid
    param_specs = [pl.BlockSpec(p.shape, lambda i: (0, 0)) for p in params]
    out_spec = pl.BlockSpec((tm_eff, PAD_DIMS[-1]), lambda i: (i, 0))

    out = pl.pallas_call(
        _carmera_kernel,
        out_shape=jax.ShapeDtypeStruct((b_pad, PAD_DIMS[-1]), jnp.float32),
        grid=grid,
        in_specs=[x_spec] + param_specs,
        out_specs=out_spec,
        compiler_params=pltpu.CompilerParams(
            dimension_semantics=("parallel",),         # shard batch over TCs (v7x)
            vmem_limit_bytes=32 * 1024 * 1024),        # fits v5e/v6e/v7x VMEM
    )(x, *params)

    return out[:B, :REAL_DIMS[-1]]


def reference_forward(latent, params):
    """Pure-JAX reference using the same folded bf16 weights / f32 biases."""
    h = latent
    n_layers = len(params) // 2
    for li in range(n_layers):
        w = params[2 * li]
        b = params[2 * li + 1]
        y = jnp.dot(h.astype(jnp.bfloat16), w,
                    preferred_element_type=jnp.float32) + b
        h = jnp.maximum(y, 0.0) if li < n_layers - 1 else y
    return h[:, :REAL_DIMS[-1]]


if __name__ == "__main__":
    key = jax.random.PRNGKey(0)
    k_x, k_p = jax.random.split(key)

    B = 16  # small demo batch
    latent = jax.random.normal(k_x, (B, REAL_DIMS[0]), dtype=jnp.float32)
    params = init_params(k_p)

    domain_clss = jax.block_until_ready(carmera_net_forward(latent, params))
    assert domain_clss.shape == (B, REAL_DIMS[-1]), domain_clss.shape

    ref = jax.block_until_ready(reference_forward(latent, params))
    np.testing.assert_allclose(np.asarray(domain_clss), np.asarray(ref),
                               rtol=5e-4, atol=1e-5)

    print("KERNEL_OK")
</pallas_src>

<mosaic_0001>
module attributes {stable_mosaic.version = 11 : i64} {
  func.func @_carmera_kernel(%arg0: i32, %arg1: memref<16x2048xf32, #tpu.memory_space<vmem>>, %arg2: memref<2048x1024xbf16, #tpu.memory_space<vmem>>, %arg3: memref<1x1024xf32, #tpu.memory_space<vmem>>, %arg4: memref<1024x512xbf16, #tpu.memory_space<vmem>>, %arg5: memref<1x512xf32, #tpu.memory_space<vmem>>, %arg6: memref<512x256xbf16, #tpu.memory_space<vmem>>, %arg7: memref<1x256xf32, #tpu.memory_space<vmem>>, %arg8: memref<256x128xbf16, #tpu.memory_space<vmem>>, %arg9: memref<1x128xf32, #tpu.memory_space<vmem>>, %arg10: memref<128x128xbf16, #tpu.memory_space<vmem>>, %arg11: memref<1x128xf32, #tpu.memory_space<vmem>>, %arg12: memref<128x128xbf16, #tpu.memory_space<vmem>>, %arg13: memref<1x128xf32, #tpu.memory_space<vmem>>, %arg14: memref<128x128xbf16, #tpu.memory_space<vmem>>, %arg15: memref<1x128xf32, #tpu.memory_space<vmem>>, %arg16: memref<16x128xf32, #tpu.memory_space<vmem>>) attributes {dimension_semantics = [#tpu.dimension_semantics<parallel>], iteration_bounds = array<i64: 1>, scalar_prefetch = 0 : i64, scratch_operands = 0 : i64, tpu.core_type = #tpu.core_type<tc>, window_params = [{transform_indices = @transform_0, window_bounds = array<i64: 16, 2048>}, {pipeline_mode = #tpu.pipeline_mode<synchronous>, transform_indices = @transform_1, window_bounds = array<i64: 2048, 1024>}, {pipeline_mode = #tpu.pipeline_mode<synchronous>, transform_indices = @transform_2, window_bounds = array<i64: 1, 1024>}, {pipeline_mode = #tpu.pipeline_mode<synchronous>, transform_indices = @transform_3, window_bounds = array<i64: 1024, 512>}, {pipeline_mode = #tpu.pipeline_mode<synchronous>, transform_indices = @transform_4, window_bounds = array<i64: 1, 512>}, {pipeline_mode = #tpu.pipeline_mode<synchronous>, transform_indices = @transform_5, window_bounds = array<i64: 512, 256>}, {pipeline_mode = #tpu.pipeline_mode<synchronous>, transform_indices = @transform_6, window_bounds = array<i64: 1, 256>}, {pipeline_mode = #tpu.pipeline_mode<synchronous>, transform_indices = @transform_7, window_bounds = array<i64: 256, 128>}, {pipeline_mode = #tpu.pipeline_mode<synchronous>, transform_indices = @transform_8, window_bounds = array<i64: 1, 128>}, {pipeline_mode = #tpu.pipeline_mode<synchronous>, transform_indices = @transform_9, window_bounds = array<i64: 128, 128>}, {pipeline_mode = #tpu.pipeline_mode<synchronous>, transform_indices = @transform_10, window_bounds = array<i64: 1, 128>}, {pipeline_mode = #tpu.pipeline_mode<synchronous>, transform_indices = @transform_11, window_bounds = array<i64: 128, 128>}, {pipeline_mode = #tpu.pipeline_mode<synchronous>, transform_indices = @transform_12, window_bounds = array<i64: 1, 128>}, {pipeline_mode = #tpu.pipeline_mode<synchronous>, transform_indices = @transform_13, window_bounds = array<i64: 128, 128>}, {pipeline_mode = #tpu.pipeline_mode<synchronous>, transform_indices = @transform_14, window_bounds = array<i64: 1, 128>}, {transform_indices = @transform_15, window_bounds = array<i64: 16, 128>}]} {
    %c0 = arith.constant 0 : index
    %c0_0 = arith.constant 0 : index
    %0 = vector.load %arg1[%c0, %c0_0] : memref<16x2048xf32, #tpu.memory_space<vmem>>, vector<16x2048xf32>
    %1 = arith.truncf %0 : vector<16x2048xf32> to vector<16x2048xbf16>
    %c0_1 = arith.constant 0 : index
    %c0_2 = arith.constant 0 : index
    %2 = vector.load %arg2[%c0_1, %c0_2] : memref<2048x1024xbf16, #tpu.memory_space<vmem>>, vector<2048x1024xbf16>
    %cst = arith.constant dense<0.000000e+00> : vector<16x1024xf32>
    %3 = tpu.matmul %1, %2, %cst {dimension_numbers = #tpu.dot_dimension_numbers<[1], [0], [0], [1], [0, 0, 1, 1], [], []>} : vector<16x2048xbf16>, vector<2048x1024xbf16>, vector<16x1024xf32> -> vector<16x1024xf32>
    %c0_3 = arith.constant 0 : index
    %c0_4 = arith.constant 0 : index
    %4 = vector.load %arg3[%c0_3, %c0_4] : memref<1x1024xf32, #tpu.memory_space<vmem>>, vector<1x1024xf32>
    %5 = vector.broadcast %4 : vector<1x1024xf32> to vector<16x1024xf32>
    %6 = arith.addf %3, %5 : vector<16x1024xf32>
    %cst_5 = arith.constant 0.000000e+00 : f32
    %7 = vector.broadcast %cst_5 : f32 to vector<16x1024xf32>
    %8 = arith.maximumf %6, %7 : vector<16x1024xf32>
    %9 = arith.truncf %8 : vector<16x1024xf32> to vector<16x1024xbf16>
    %c0_6 = arith.constant 0 : index
    %c0_7 = arith.constant 0 : index
    %10 = vector.load %arg4[%c0_6, %c0_7] : memref<1024x512xbf16, #tpu.memory_space<vmem>>, vector<1024x512xbf16>
    %cst_8 = arith.constant dense<0.000000e+00> : vector<16x512xf32>
    %11 = tpu.matmul %9, %10, %cst_8 {dimension_numbers = #tpu.dot_dimension_numbers<[1], [0], [0], [1], [0, 0, 1, 1], [], []>} : vector<16x1024xbf16>, vector<1024x512xbf16>, vector<16x512xf32> -> vector<16x512xf32>
    %c0_9 = arith.constant 0 : index
    %c0_10 = arith.constant 0 : index
    %12 = vector.load %arg5[%c0_9, %c0_10] : memref<1x512xf32, #tpu.memory_space<vmem>>, vector<1x512xf32>
    %13 = vector.broadcast %12 : vector<1x512xf32> to vector<16x512xf32>
    %14 = arith.addf %11, %13 : vector<16x512xf32>
    %cst_11 = arith.constant 0.000000e+00 : f32
    %15 = vector.broadcast %cst_11 : f32 to vector<16x512xf32>
    %16 = arith.maximumf %14, %15 : vector<16x512xf32>
    %17 = arith.truncf %16 : vector<16x512xf32> to vector<16x512xbf16>
    %c0_12 = arith.constant 0 : index
    %c0_13 = arith.constant 0 : index
    %18 = vector.load %arg6[%c0_12, %c0_13] : memref<512x256xbf16, #tpu.memory_space<vmem>>, vector<512x256xbf16>
    %cst_14 = arith.constant dense<0.000000e+00> : vector<16x256xf32>
    %19 = tpu.matmul %17, %18, %cst_14 {dimension_numbers = #tpu.dot_dimension_numbers<[1], [0], [0], [1], [0, 0, 1, 1], [], []>} : vector<16x512xbf16>, vector<512x256xbf16>, vector<16x256xf32> -> vector<16x256xf32>
    %c0_15 = arith.constant 0 : index
    %c0_16 = arith.constant 0 : index
    %20 = vector.load %arg7[%c0_15, %c0_16] : memref<1x256xf32, #tpu.memory_space<vmem>>, vector<1x256xf32>
    %21 = vector.broadcast %20 : vector<1x256xf32> to vector<16x256xf32>
    %22 = arith.addf %19, %21 : vector<16x256xf32>
    %cst_17 = arith.constant 0.000000e+00 : f32
    %23 = vector.broadcast %cst_17 : f32 to vector<16x256xf32>
    %24 = arith.maximumf %22, %23 : vector<16x256xf32>
    %25 = arith.truncf %24 : vector<16x256xf32> to vector<16x256xbf16>
    %c0_18 = arith.constant 0 : index
    %c0_19 = arith.constant 0 : index
    %26 = vector.load %arg8[%c0_18, %c0_19] : memref<256x128xbf16, #tpu.memory_space<vmem>>, vector<256x128xbf16>
    %cst_20 = arith.constant dense<0.000000e+00> : vector<16x128xf32>
    %27 = tpu.matmul %25, %26, %cst_20 {dimension_numbers = #tpu.dot_dimension_numbers<[1], [0], [0], [1], [0, 0, 1, 1], [], []>} : vector<16x256xbf16>, vector<256x128xbf16>, vector<16x128xf32> -> vector<16x128xf32>
    %c0_21 = arith.constant 0 : index
    %c0_22 = arith.constant 0 : index
    %28 = vector.load %arg9[%c0_21, %c0_22] : memref<1x128xf32, #tpu.memory_space<vmem>>, vector<1x128xf32>
    %29 = vector.broadcast %28 : vector<1x128xf32> to vector<16x128xf32>
    %30 = arith.addf %27, %29 : vector<16x128xf32>
    %cst_23 = arith.constant 0.000000e+00 : f32
    %31 = vector.broadcast %cst_23 : f32 to vector<16x128xf32>
    %32 = arith.maximumf %30, %31 : vector<16x128xf32>
    %33 = arith.truncf %32 : vector<16x128xf32> to vector<16x128xbf16>
    %c0_24 = arith.constant 0 : index
    %c0_25 = arith.constant 0 : index
    %34 = vector.load %arg10[%c0_24, %c0_25] : memref<128x128xbf16, #tpu.memory_space<vmem>>, vector<128x128xbf16>
    %cst_26 = arith.constant dense<0.000000e+00> : vector<16x128xf32>
    %35 = tpu.matmul %33, %34, %cst_26 {dimension_numbers = #tpu.dot_dimension_numbers<[1], [0], [0], [1], [0, 0, 1, 1], [], []>} : vector<16x128xbf16>, vector<128x128xbf16>, vector<16x128xf32> -> vector<16x128xf32>
    %c0_27 = arith.constant 0 : index
    %c0_28 = arith.constant 0 : index
    %36 = vector.load %arg11[%c0_27, %c0_28] : memref<1x128xf32, #tpu.memory_space<vmem>>, vector<1x128xf32>
    %37 = vector.broadcast %36 : vector<1x128xf32> to vector<16x128xf32>
    %38 = arith.addf %35, %37 : vector<16x128xf32>
    %cst_29 = arith.constant 0.000000e+00 : f32
    %39 = vector.broadcast %cst_29 : f32 to vector<16x128xf32>
    %40 = arith.maximumf %38, %39 : vector<16x128xf32>
    %41 = arith.truncf %40 : vector<16x128xf32> to vector<16x128xbf16>
    %c0_30 = arith.constant 0 : index
    %c0_31 = arith.constant 0 : index
    %42 = vector.load %arg12[%c0_30, %c0_31] : memref<128x128xbf16, #tpu.memory_space<vmem>>, vector<128x128xbf16>
    %cst_32 = arith.constant dense<0.000000e+00> : vector<16x128xf32>
    %43 = tpu.matmul %41, %42, %cst_32 {dimension_numbers = #tpu.dot_dimension_numbers<[1], [0], [0], [1], [0, 0, 1, 1], [], []>} : vector<16x128xbf16>, vector<128x128xbf16>, vector<16x128xf32> -> vector<16x128xf32>
    %c0_33 = arith.constant 0 : index
    %c0_34 = arith.constant 0 : index
    %44 = vector.load %arg13[%c0_33, %c0_34] : memref<1x128xf32, #tpu.memory_space<vmem>>, vector<1x128xf32>
    %45 = vector.broadcast %44 : vector<1x128xf32> to vector<16x128xf32>
    %46 = arith.addf %43, %45 : vector<16x128xf32>
    %cst_35 = arith.constant 0.000000e+00 : f32
    %47 = vector.broadcast %cst_35 : f32 to vector<16x128xf32>
    %48 = arith.maximumf %46, %47 : vector<16x128xf32>
    %49 = arith.truncf %48 : vector<16x128xf32> to vector<16x128xbf16>
    %c0_36 = arith.constant 0 : index
    %c0_37 = arith.constant 0 : index
    %50 = vector.load %arg14[%c0_36, %c0_37] : memref<128x128xbf16, #tpu.memory_space<vmem>>, vector<128x128xbf16>
    %cst_38 = arith.constant dense<0.000000e+00> : vector<16x128xf32>
    %51 = tpu.matmul %49, %50, %cst_38 {dimension_numbers = #tpu.dot_dimension_numbers<[1], [0], [0], [1], [0, 0, 1, 1], [], []>} : vector<16x128xbf16>, vector<128x128xbf16>, vector<16x128xf32> -> vector<16x128xf32>
    %c0_39 = arith.constant 0 : index
    %c0_40 = arith.constant 0 : index
    %52 = vector.load %arg15[%c0_39, %c0_40] : memref<1x128xf32, #tpu.memory_space<vmem>>, vector<1x128xf32>
    %53 = vector.broadcast %52 : vector<1x128xf32> to vector<16x128xf32>
    %54 = arith.addf %51, %53 : vector<16x128xf32>
    %c0_41 = arith.constant 0 : index
    %c0_42 = arith.constant 0 : index
    %55 = vector.load %arg16[%c0_41, %c0_42] : memref<16x128xf32, #tpu.memory_space<vmem>>, vector<16x128xf32>
    tpu.vector_store %arg16[%c0_41, %c0_42], %54 {strides = array<i32>} : memref<16x128xf32, #tpu.memory_space<vmem>>, vector<16x128xf32>,
    return
  }
  func.func @transform_0(%arg0: i32) -> (i32, i32) {
    %c0_i32 = arith.constant 0 : i32
    %c0_i32_0 = arith.constant 0 : i32
    return %arg0, %c0_i32 : i32, i32
  }
  func.func @transform_1(%arg0: i32) -> (i32, i32) {
    %c0_i32 = arith.constant 0 : i32
    %c0_i32_0 = arith.constant 0 : i32
    %c0_i32_1 = arith.constant 0 : i32
    return %c0_i32, %c0_i32_0 : i32, i32
  }
  func.func @transform_2(%arg0: i32) -> (i32, i32) {
    %c0_i32 = arith.constant 0 : i32
    %c0_i32_0 = arith.constant 0 : i32
    %c0_i32_1 = arith.constant 0 : i32
    return %c0_i32, %c0_i32_0 : i32, i32
  }
  func.func @transform_3(%arg0: i32) -> (i32, i32) {
    %c0_i32 = arith.constant 0 : i32
    %c0_i32_0 = arith.constant 0 : i32
    %c0_i32_1 = arith.constant 0 : i32
    return %c0_i32, %c0_i32_0 : i32, i32
  }
  func.func @transform_4(%arg0: i32) -> (i32, i32) {
    %c0_i32 = arith.constant 0 : i32
    %c0_i32_0 = arith.constant 0 : i32
    %c0_i32_1 = arith.constant 0 : i32
    return %c0_i32, %c0_i32_0 : i32, i32
  }
  func.func @transform_5(%arg0: i32) -> (i32, i32) {
    %c0_i32 = arith.constant 0 : i32
    %c0_i32_0 = arith.constant 0 : i32
    %c0_i32_1 = arith.constant 0 : i32
    return %c0_i32, %c0_i32_0 : i32, i32
  }
  func.func @transform_6(%arg0: i32) -> (i32, i32) {
    %c0_i32 = arith.constant 0 : i32
    %c0_i32_0 = arith.constant 0 : i32
    %c0_i32_1 = arith.constant 0 : i32
    return %c0_i32, %c0_i32_0 : i32, i32
  }
  func.func @transform_7(%arg0: i32) -> (i32, i32) {
    %c0_i32 = arith.constant 0 : i32
    %c0_i32_0 = arith.constant 0 : i32
    %c0_i32_1 = arith.constant 0 : i32
    return %c0_i32, %c0_i32_0 : i32, i32
  }
  func.func @transform_8(%arg0: i32) -> (i32, i32) {
    %c0_i32 = arith.constant 0 : i32
    %c0_i32_0 = arith.constant 0 : i32
    %c0_i32_1 = arith.constant 0 : i32
    return %c0_i32, %c0_i32_0 : i32, i32
  }
  func.func @transform_9(%arg0: i32) -> (i32, i32) {
    %c0_i32 = arith.constant 0 : i32
    %c0_i32_0 = arith.constant 0 : i32
    %c0_i32_1 = arith.constant 0 : i32
    return %c0_i32, %c0_i32_0 : i32, i32
  }
  func.func @transform_10(%arg0: i32) -> (i32, i32) {
    %c0_i32 = arith.constant 0 : i32
    %c0_i32_0 = arith.constant 0 : i32
    %c0_i32_1 = arith.constant 0 : i32
    return %c0_i32, %c0_i32_0 : i32, i32
  }
  func.func @transform_11(%arg0: i32) -> (i32, i32) {
    %c0_i32 = arith.constant 0 : i32
    %c0_i32_0 = arith.constant 0 : i32
    %c0_i32_1 = arith.constant 0 : i32
    return %c0_i32, %c0_i32_0 : i32, i32
  }
  func.func @transform_12(%arg0: i32) -> (i32, i32) {
    %c0_i32 = arith.constant 0 : i32
    %c0_i32_0 = arith.constant 0 : i32
    %c0_i32_1 = arith.constant 0 : i32
    return %c0_i32, %c0_i32_0 : i32, i32
  }
  func.func @transform_13(%arg0: i32) -> (i32, i32) {
    %c0_i32 = arith.constant 0 : i32
    %c0_i32_0 = arith.constant 0 : i32
    %c0_i32_1 = arith.constant 0 : i32
    return %c0_i32, %c0_i32_0 : i32, i32
  }
  func.func @transform_14(%arg0: i32) -> (i32, i32) {
    %c0_i32 = arith.constant 0 : i32
    %c0_i32_0 = arith.constant 0 : i32
    %c0_i32_1 = arith.constant 0 : i32
    return %c0_i32, %c0_i32_0 : i32, i32
  }
  func.func @transform_15(%arg0: i32) -> (i32, i32) {
    %c0_i32 = arith.constant 0 : i32
    %c0_i32_0 = arith.constant 0 : i32
    return %arg0, %c0_i32 : i32, i32
  }
}

</mosaic_0001>

<bundles_post_ra>
// kernel: tpu_custom_call.1
= control target key start
LH: loop header
LB: loop body
LE: loop exit
PB: predicated region body
PF: predicated region fallthrough
CT: control target
= control target key end

     0   :  { %20 = vsyncpa [#allocation3], 0  ;;  %s13774_s0 = inlined_call_operand.hbm [shape: f32[16,2048], index: 0, kind: input, shape index: {}]   ;;  %s13775_s1 = inlined_call_operand.hbm [shape: bf16[2048,1024], index: 1, kind: input, shape index: {}]   ;;  %s13776_s2 = inlined_call_operand.hbm [shape: f32[1,1024], index: 2, kind: input, shape index: {}]   ;;  %s13777_s3 = inlined_call_operand.hbm [shape: bf16[1024,512], index: 3, kind: input, shape index: {}]   ;;  %s13778_s4 = inlined_call_operand.hbm [shape: f32[1,512], index: 4, kind: input, shape index: {}]   ;;  %s13779_s5 = inlined_call_operand.hbm [shape: bf16[512,256], index: 5, kind: input, shape index: {}]   ;;  %s13780_s6 = inlined_call_operand.hbm [shape: f32[1,256], index: 6, kind: input, shape index: {}]   ;;  %s13781_s7 = inlined_call_operand.hbm [shape: bf16[256,128], index: 7, kind: input, shape index: {}]   ;;  %s13782_s8 = inlined_call_operand.hbm [shape: f32[1,128], index: 8, kind: input, shape index: {}]   ;;  %s13783_s9 = inlined_call_operand.hbm [shape: bf16[128,128], index: 9, kind: input, shape index: {}]   ;;  %s13784_s10 = inlined_call_operand.hbm [shape: f32[1,128], index: 10, kind: input, shape index: {}]   ;;  %s13785_s11 = inlined_call_operand.hbm [shape: bf16[128,128], index: 11, kind: input, shape index: {}]   ;;  %s13786_s12 = inlined_call_operand.hbm [shape: f32[1,128], index: 12, kind: input, shape index: {}]   ;;  %s13787_s13 = inlined_call_operand.hbm [shape: bf16[128,128], index: 13, kind: input, shape index: {}]   ;;  %s13788_s14 = inlined_call_operand.hbm [shape: f32[1,128], index: 14, kind: input, shape index: {}]   ;;  %s13789_s15 = inlined_call_operand.hbm [shape: f32[16,128], index: 15, kind: output, shape index: {}]  }
   0x1   :  { %21 = vsyncpa [#allocation6], 0 }
   0x2   :  { %22 = vsyncpa [#allocation9], 0 }
   0x3   :  { %23 = vsyncpa [#allocation12], 0 }
   0x4   :  { %24 = vsyncpa [#allocation15], 0 }
   0x5   :  { %25 = vsyncpa [#allocation18], 0 }
   0x6   :  { %26 = vsyncpa [#allocation21], 0 }
   0x7   :  { %27 = vsyncpa [#allocation24], 0 }
   0x8   :  { %28 = vsyncpa [#allocation4], 0  ;;  %s13209_s18 = smov [#allocation5]  }
   0x9   :  { %s46_s19 = sshll.u32 %s13209_s18, 4  ;;  %s47_s19 = int_to_ptr.vmem [resolvable:$true] %s46_s19 }
   0xa   :  { %s12879_s20 = scalar_lea.vmem %s47_s19, 131072  ;;  %p12884_p1 = scmp.lt.s32.totalorder %s47_s19, %s47_s19 }
   0xb   :  { %p12880_p0 = scmp.ne.s32.totalorder %s47_s19, %s12879_s20  ;;  %p12885_p2 = scmp.lt.s32.totalorder %s12879_s20, %s12879_s20 }
   0xd   :  { %p12886_p3 = por %p12885_p2, %p12884_p1 }
   0xf   :  { %p12887_p4 = pnand %p12886_p3, %p12880_p0 }
  0x11   :  { %12890 = shalt.err (!%p12887_p4)
}
  0x12   :  { %s13210_s21 = smov 512   ;;  %s13211_s22 = smov 32  }
  0x13   :  { %52 = dma.hbm_to_vmem [thread:$0]  %s13775_s1, 131072, %s47_s19, [#allocation6], %s13210_s21, %s13210_s21, %s13211_s22  }
  0x14   :  { %s13212_s25 = smov [#allocation8]  }
  0x15   :  { %s68_s26 = sshll.u32 %s13212_s25, 4  ;;  %s69_s26 = int_to_ptr.vmem [resolvable:$true] %s68_s26 }
  0x16   :  { %s12899_s27 = scalar_lea.vmem %s69_s26, 32768  ;;  %p12904_p6 = scmp.lt.s32.totalorder %s69_s26, %s69_s26 }
  0x17   :  { %p12900_p5 = scmp.ne.s32.totalorder %s69_s26, %s12899_s27  ;;  %p12905_p7 = scmp.lt.s32.totalorder %s12899_s27, %s12899_s27 }
  0x19   :  { %p12906_p8 = por %p12905_p7, %p12904_p6 }
  0x1b   :  { %p12907_p9 = pnand %p12906_p8, %p12900_p5 }
  0x1d   :  { %12910 = shalt.err (!%p12907_p9)
}
  0x1e   :  { %s13213_s28 = smov 256   ;;  %s13214_s29 = smov 16  }
  0x1f   :  { %74 = dma.hbm_to_vmem [thread:$0]  %s13777_s3, 32768, %s69_s26, [#allocation9], %s13213_s28, %s13213_s28, %s13214_s29  }
  0x20   :  { %s13215_s17 = smov [#allocation11]  }
  0x21   :  { %s90_s18 = sshll.u32 %s13215_s17, 4  ;;  %s91_s18 = int_to_ptr.vmem [resolvable:$true] %s90_s18 }
  0x22   :  { %s12919_s1 = scalar_lea.vmem %s91_s18, 8192  ;;  %p12924_p11 = scmp.lt.s32.totalorder %s91_s18, %s91_s18 }
  0x23   :  { %p12920_p10 = scmp.ne.s32.totalorder %s91_s18, %s12919_s1  ;;  %p12925_p12 = scmp.lt.s32.totalorder %s12919_s1, %s12919_s1 }
  0x25   :  { %p12926_p13 = por %p12925_p12, %p12924_p11 }
  0x27   :  { %p12927_p0 = pnand %p12926_p13, %p12920_p10 }
  0x29   :  { %12930 = shalt.err (!%p12927_p0)
}
  0x2a   :  { %s13216_s19 = smov 128   ;;  %s13217_s20 = smov 8  }
  0x2b   :  { %96 = dma.hbm_to_vmem [thread:$0]  %s13779_s5, 8192, %s91_s18, [#allocation12], %s13216_s19, %s13216_s19, %s13217_s20  }
  0x2c   :  { %s13218_s3 = smov [#allocation14]  }
  0x2d   :  { %s112_s23 = sshll.u32 %s13218_s3, 4  ;;  %s113_s23 = int_to_ptr.vmem [resolvable:$true] %s112_s23 }
  0x2e   :  { %s12939_s24 = scalar_lea.vmem %s113_s23, 2048  ;;  %p12944_p2 = scmp.lt.s32.totalorder %s113_s23, %s113_s23 }
  0x2f   :  { %p12940_p1 = scmp.ne.s32.totalorder %s113_s23, %s12939_s24  ;;  %p12945_p3 = scmp.lt.s32.totalorder %s12939_s24, %s12939_s24 }
  0x31   :  { %p12946_p4 = por %p12945_p3, %p12944_p2 }
  0x33   :  { %p12947_p5 = pnand %p12946_p4, %p12940_p1 }
  0x35   :  { %12950 = shalt.err (!%p12947_p5)
}
  0x36   :  { %s13219_s25 = smov 64   ;;  %s13220_s26 = smov 4  }
  0x37   :  { %118 = dma.hbm_to_vmem [thread:$0]  %s13781_s7, 2048, %s113_s23, [#allocation15], %s13219_s25, %s13219_s25, %s13220_s26  }
  0x38   :  { %s13221_s5 = smov [#allocation17]   ;;  %s13222_s30 = smov [#allocation20]  }
  0x39   :  { %s134_s29 = sshll.u32 %s13221_s5, 4  ;;  %s156_s16 = sshll.u32 %s13222_s30, 4  ;;  %s135_s29 = int_to_ptr.vmem [resolvable:$true] %s134_s29  ;;  %s157_s16 = int_to_ptr.vmem [resolvable:$true] %s156_s16 }
  0x3a   :  { %s12959_s17 = scalar_lea.vmem %s135_s29, 1024  ;;  %p12964_p7 = scmp.lt.s32.totalorder %s135_s29, %s135_s29 }
  0x3b   :  { %p12960_p6 = scmp.ne.s32.totalorder %s135_s29, %s12959_s17  ;;  %p12965_p8 = scmp.lt.s32.totalorder %s12959_s17, %s12959_s17 }
  0x3d   :  { %p12966_p9 = por %p12965_p8, %p12964_p7 }
  0x3f   :  { %p12967_p10 = pnand %p12966_p9, %p12960_p6 }
  0x41   :  { %12970 = shalt.err (!%p12967_p10)
}
  0x42   :  { %140 = dma.hbm_to_vmem [thread:$0]  %s13783_s9, 1024, %s135_s29, [#allocation18], %s13219_s25, %s13219_s25, %s13220_s26  }
  0x43   :  { %s12979_s7 = scalar_lea.vmem %s157_s16, 1024  ;;  %p12984_p12 = scmp.lt.s32.totalorder %s157_s16, %s157_s16 }
  0x44   :  { %p12980_p11 = scmp.ne.s32.totalorder %s157_s16, %s12979_s7  ;;  %p12985_p13 = scmp.lt.s32.totalorder %s12979_s7, %s12979_s7 }
  0x46   :  { %p12986_p0 = por %p12985_p13, %p12984_p12 }
  0x48   :  { %p12987_p1 = pnand %p12986_p0, %p12980_p11 }
  0x4a   :  { %12990 = shalt.err (!%p12987_p1)
}
  0x4b   :  { %162 = dma.hbm_to_vmem [thread:$0]  %s13785_s11, 1024, %s157_s16, [#allocation21], %s13219_s25, %s13219_s25, %s13220_s26  }
  0x4c   :  { %s13223_s3 = smov [#allocation23]   ;;  %s13224_s24 = smov [#allocation2]  }
  0x4d   :  { %s178_s23 = sshll.u32 %s13223_s3, 4  ;;  %s34_s27 = sshll.u32 %s13224_s24, 4  ;;  %s179_s23 = int_to_ptr.vmem [resolvable:$true] %s178_s23  ;;  %s35_s27 = int_to_ptr.vmem [resolvable:$true] %s34_s27 }
  0x4e   :  { %s12999_s9 = scalar_lea.vmem %s179_s23, 1024  ;;  %p13004_p3 = scmp.lt.s32.totalorder %s179_s23, %s179_s23 }
  0x4f   :  { %p13000_p2 = scmp.ne.s32.totalorder %s179_s23, %s12999_s9  ;;  %p13005_p4 = scmp.lt.s32.totalorder %s12999_s9, %s12999_s9 }
  0x51   :  { %p13006_p5 = por %p13005_p4, %p13004_p3 }
  0x53   :  { %p13007_p6 = pnand %p13006_p5, %p13000_p2 }
  0x55   :  { %13010 = shalt.err (!%p13007_p6)
}
  0x56   :  { %184 = dma.hbm_to_vmem [thread:$0]  %s13787_s13, 1024, %s179_s23, [#allocation24], %s13219_s25, %s13219_s25, %s13220_s26  }
  0x57   :  { %s13019_s11 = scalar_lea.vmem %s35_s27, 4096  ;;  %p13024_p8 = scmp.lt.s32.totalorder %s35_s27, %s35_s27 }
  0x58   :  { %p13020_p7 = scmp.ne.s32.totalorder %s35_s27, %s13019_s11  ;;  %p13025_p9 = scmp.lt.s32.totalorder %s13019_s11, %s13019_s11 }
  0x5a   :  { %p13026_p10 = por %p13025_p9, %p13024_p8 }
  0x5c   :  { %p13027_p11 = pnand %p13026_p10, %p13020_p7 }
  0x5e   :  { %13030 = shalt.err (!%p13027_p11)
}
  0x5f   :  { %s13225_s29 = smov 2048   ;;  %s13226_s17 = smov [#allocation7]  }
  0x60   :  { %40 = dma.hbm_to_vmem [thread:$0]  %s13774_s0, 4096, %s35_s27, [#allocation3], %s13225_s29, %s13225_s29, %s13216_s19  }
  0x61   :  { %s59_s18 = sshll.u32 %s13226_s17, 4  ;;  %s13227_s1 = smov [#allocation10]   ;;  %s60_s18 = int_to_ptr.vmem [resolvable:$true] %s59_s18 }
  0x62   :  { %s81_s7 = sshll.u32 %s13227_s1, 4  ;;  %s13039_s21 = scalar_lea.vmem %s60_s18, 128  ;;  %s82_s7 = int_to_ptr.vmem [resolvable:$true] %s81_s7 }
  0x63   :  { %p13040_p12 = scmp.ne.s32.totalorder %s60_s18, %s13039_s21  ;;  %p13044_p13 = scmp.lt.s32.totalorder %s60_s18, %s60_s18 }
  0x64   :  { %p13045_p0 = scmp.lt.s32.totalorder %s13039_s21, %s13039_s21 }
  0x66   :  { %p13046_p1 = por %p13045_p0, %p13044_p13 }
  0x68   :  { %p13047_p2 = pnand %p13046_p1, %p13040_p12 }
  0x6a   :  { %13050 = shalt.err (!%p13047_p2)
}
  0x6b   :  { %62 = dma.hbm_to_vmem [thread:$0]  %s13776_s2, 128, %s60_s18, [#allocation6]  }
  0x6c   :  { %s13059_s26 = scalar_lea.vmem %s82_s7, 64  ;;  %p13064_p4 = scmp.lt.s32.totalorder %s82_s7, %s82_s7 }
  0x6d   :  { %p13060_p3 = scmp.ne.s32.totalorder %s82_s7, %s13059_s26  ;;  %p13065_p5 = scmp.lt.s32.totalorder %s13059_s26, %s13059_s26 }
  0x6f   :  { %p13066_p6 = por %p13065_p5, %p13064_p4 }
  0x71   :  { %p13067_p7 = pnand %p13066_p6, %p13060_p3 }
  0x73   :  { %13070 = shalt.err (!%p13067_p7)
}
  0x74   :  { %84 = dma.hbm_to_vmem [thread:$0]  %s13778_s4, 64, %s82_s7, [#allocation9]  }
  0x75   :  { %s13228_s3 = smov [#allocation13]   ;;  %s13229_s24 = smov [#allocation16]  }
  0x76   :  { %s103_s23 = sshll.u32 %s13228_s3, 4  ;;  %s125_s27 = sshll.u32 %s13229_s24, 4  ;;  %s104_s23 = int_to_ptr.vmem [resolvable:$true] %s103_s23  ;;  %s126_s27 = int_to_ptr.vmem [resolvable:$true] %s125_s27 }
  0x77   :  { %s13079_s9 = scalar_lea.vmem %s104_s23, 32  ;;  %p13084_p9 = scmp.lt.s32.totalorder %s104_s23, %s104_s23 }
  0x78   :  { %p13080_p8 = scmp.ne.s32.totalorder %s104_s23, %s13079_s9  ;;  %p13085_p10 = scmp.lt.s32.totalorder %s13079_s9, %s13079_s9 }
  0x7a   :  { %p13086_p11 = por %p13085_p10, %p13084_p9 }
  0x7c   :  { %p13087_p12 = pnand %p13086_p11, %p13080_p8 }
  0x7e   :  { %13090 = shalt.err (!%p13087_p12)
}
  0x7f   :  { %106 = dma.hbm_to_vmem [thread:$0]  %s13780_s6, 32, %s104_s23, [#allocation12]  }
  0x80   :  { %s13099_s5 = scalar_lea.vmem %s126_s27, 16  ;;  %s13103_s4 = scalar_lea.vmem %s126_s27, 32 }
  0x81   :  { %p13100_p13 = scmp.ne.s32.totalorder %s126_s27, %s13099_s5  ;;  %p13104_p0 = scmp.lt.s32.totalorder %s126_s27, %s126_s27 }
  0x82   :  { %p13105_p1 = scmp.lt.s32.totalorder %s13103_s4, %s13099_s5 }
  0x84   :  { %p13106_p2 = por %p13105_p1, %p13104_p0 }
  0x86   :  { %p13107_p3 = pnand %p13106_p2, %p13100_p13 }
  0x88   :  { %13110 = shalt.err (!%p13107_p3)
}
  0x89   :  { %128 = dma.hbm_to_vmem [thread:$0]  %s13782_s8, 16, %s126_s27, [#allocation15]  }
  0x8a   :  { %s13230_s30 = smov [#allocation19]   ;;  %s13231_s17 = smov [#allocation22]  }
  0x8b   :  { %s147_s16 = sshll.u32 %s13230_s30, 4  ;;  %s169_s18 = sshll.u32 %s13231_s17, 4  ;;  %s148_s16 = int_to_ptr.vmem [resolvable:$true] %s147_s16  ;;  %s170_s18 = int_to_ptr.vmem [resolvable:$true] %s169_s18 }
  0x8c   :  { %s13119_s1 = scalar_lea.vmem %s148_s16, 16  ;;  %s13123_s6 = scalar_lea.vmem %s148_s16, 32 }
  0x8d   :  { %p13120_p4 = scmp.ne.s32.totalorder %s148_s16, %s13119_s1  ;;  %p13124_p5 = scmp.lt.s32.totalorder %s148_s16, %s148_s16 }
  0x8e   :  { %p13125_p6 = scmp.lt.s32.totalorder %s13123_s6, %s13119_s1 }
  0x90   :  { %p13126_p7 = por %p13125_p6, %p13124_p5 }
  0x92   :  { %p13127_p8 = pnand %p13126_p7, %p13120_p4 }
  0x94   :  { %13130 = shalt.err (!%p13127_p8)
}
  0x95   :  { %150 = dma.hbm_to_vmem [thread:$0]  %s13784_s10, 16, %s148_s16, [#allocation18]  }
  0x96   :  { %s13139_s13 = scalar_lea.vmem %s170_s18, 16  ;;  %s13143_s8 = scalar_lea.vmem %s170_s18, 32 }
  0x97   :  { %p13140_p9 = scmp.ne.s32.totalorder %s170_s18, %s13139_s13  ;;  %p13144_p10 = scmp.lt.s32.totalorder %s170_s18, %s170_s18 }
  0x98   :  { %p13145_p11 = scmp.lt.s32.totalorder %s13143_s8, %s13139_s13 }
  0x9a   :  { %p13146_p12 = por %p13145_p11, %p13144_p10 }
  0x9c   :  { %p13147_p13 = pnand %p13146_p12, %p13140_p9 }
  0x9e   :  { %13150 = shalt.err (!%p13147_p13)
}
  0x9f   :  { %172 = dma.hbm_to_vmem [thread:$0]  %s13786_s12, 16, %s170_s18, [#allocation21]  }
  0xa0   :  { %s13232_s0 = smov [#allocation25]  }
  0xa1   :  { %s191_s22 = sshll.u32 %s13232_s0, 4  ;;  %s192_s22 = int_to_ptr.vmem [resolvable:$true] %s191_s22 }
  0xa2   :  { %s13159_s3 = scalar_lea.vmem %s192_s22, 16  ;;  %s13163_s23 = scalar_lea.vmem %s192_s22, 32 }
  0xa3   :  { %p13160_p0 = scmp.ne.s32.totalorder %s192_s22, %s13159_s3  ;;  %p13164_p1 = scmp.lt.s32.totalorder %s192_s22, %s192_s22 }
  0xa4   :  { %p13165_p2 = scmp.lt.s32.totalorder %s13163_s23, %s13159_s3 }
  0xa6   :  { %p13166_p3 = por %p13165_p2, %p13164_p1 }
  0xa8   :  { %p13167_p4 = pnand %p13166_p3, %p13160_p0 }
  0xaa   :  { %13170 = shalt.err (!%p13167_p4)
}
  0xab   :  { %194 = dma.hbm_to_vmem [thread:$0]  %s13788_s14, 16, %s192_s22, [#allocation24]  }
  0xac   :  { %13191 = dma.done.wait [#allocation3], 4096  }
  0xad   :  { %13192 = vsyncadd [#allocation3], 4294963200 }
  0xae   :  { %13193 = dma.done.wait [#allocation6], 131200  }
  0xaf   :  { %13194 = vsyncadd [#allocation6], 4294836096 }
  0xb0   :  { %13195 = dma.done.wait [#allocation9], 32832  }
  0xb1   :  { %13196 = vsyncadd [#allocation9], 4294934464 }
  0xb2   :  { %13197 = dma.done.wait [#allocation12], 8224  }
  0xb3   :  { %13198 = vsyncadd [#allocation12], 4294959072 }
  0xb4   :  { %13199 = dma.done.wait [#allocation15], 2064  }
  0xb5   :  { %13200 = vsyncadd [#allocation15], 4294965232 }
  0xb6   :  { %13201 = dma.done.wait [#allocation18], 1040  }
  0xb7   :  { %13202 = vsyncadd [#allocation18], 4294966256 }
  0xb8   :  { %13203 = dma.done.wait [#allocation21], 1040  }
  0xb9   :  { %13204 = vsyncadd [#allocation21], 4294966256 }
  0xba   :  { %13205 = dma.done.wait [#allocation24], 1040  }
  0xbb   :  { %13206 = vsyncadd [#allocation24], 4294966256  ;;  %v345_v0 = vld [vmem:[#allocation5 + $0x1c0] sm:$0xff]  ;;  %v242_v54 = vld [vmem:[#allocation2 + $0x8] sm:$0xff]  ;;  %vm13234_vm0 = vmmov 0   ;;  %s13235_s12 = smov [#allocation26]  }
  0xbc   :  { %v349_v1 = vld [vmem:[#allocation5 + $0x1e0] sm:$0xff]  ;;  %v258_v55 = vld [vmem:[#allocation2 + $0x88] sm:$0xff]  ;;  %v244_v59 = vld [vmem:[#allocation2 + $0x18] sm:$0xff]  ;;  %s10805_s14 = sshll.u32 %s13235_s12, 4  ;;  %s10806_s14 = int_to_ptr.vmem [resolvable:$true] %s10805_s14 }
  0xbd   :  { %v473_v2 = vld [vmem:[#allocation5 + $0x5c0] sm:$0xff]  ;;  %v10881_v3 = vcombine.high %v345_v0, %v349_v1  ;;  %v10880_v5 = vcombine.low %v345_v0, %v349_v1  ;;  %v13377_v58 = vpack.c.bf16 %v258_v55, %v242_v54  ;;  %v260_v60 = vld [vmem:[#allocation2 + $0x98] sm:$0xff]  ;;  %s13171_s27 = scalar_lea.vmem %s10806_s14, 256  ;;  %p13176_p6 = scmp.lt.s32.totalorder %s10806_s14, %s10806_s14 }
  0xbe   :  { %v477_v4 = vld [vmem:[#allocation5 + $0x5e0] sm:$0xff]  ;;  %v13379_v63 = vpack.c.bf16 %v260_v60, %v244_v59  ;;  %p13172_p5 = scmp.ne.s32.totalorder %s10806_s14, %s13171_s27  ;;  %p13177_p7 = scmp.lt.s32.totalorder %s13171_s27, %s13171_s27 }
  0xbf   :  { %v337_v6 = vld [vmem:[#allocation5 + $0x180] sm:$0xff]  ;;  %v11009_v8 = vcombine.high %v473_v2, %v477_v4  ;;  %v11008_v9 = vcombine.low %v473_v2, %v477_v4  ;;  %6475 = vmatprep.subr.bf16.mxu0 %v10881_v3  ;;  %6507 = vmatprep.mubr.bf16.mxu0 %v13377_v58 }
  0xc0   :  { %v341_v7 = vld [vmem:[#allocation5 + $0x1a0] sm:$0xff]  ;;  %6476 = vmatpush1.bf16.msra.mxu0 %v10880_v5  ;;  %6550 = vmatprep.mubr.bf16.mxu1 %v13379_v63  ;;  %p13178_p8 = por %p13177_p7, %p13176_p6 }
  0xc1   :  { %v10873_v10 = vcombine.high %v337_v6, %v341_v7  ;;  %v465_v11 = vld [vmem:[#allocation5 + $0x580] sm:$0xff]  ;;  %6518 = vmatprep.subr.bf16.mxu1 %v11009_v8  ;;  %v10872_v18 = vcombine.low %v337_v6, %v341_v7 }
  0xc2   :  { %v469_v12 = vld [vmem:[#allocation5 + $0x5a0] sm:$0xff]  ;;  %6519 = vmatpush1.bf16.msra.mxu1 %v11008_v9  ;;  %p13179_p9 = pnand %p13178_p8, %p13172_p5 }
  0xc3   :  { %v329_v13 = vld [vmem:[#allocation5 + $0x140] sm:$0xff]  ;;  %v11001_v14 = vcombine.high %v465_v11, %v469_v12  ;;  %6477 = vmatprep.subr.bf16.mxu0 %v10873_v10  ;;  %v11000_v19 = vcombine.low %v465_v11, %v469_v12 }
  0xc4   :  { %v333_v15 = vld [vmem:[#allocation5 + $0x160] sm:$0xff]  ;;  %6478 = vmatpush1.bf16.msra.mxu0 %v10872_v18 }
  0xc5   :  { %v457_v16 = vld [vmem:[#allocation5 + $0x540] sm:$0xff]  ;;  %v10865_v20 = vcombine.high %v329_v13, %v333_v15  ;;  %6520 = vmatprep.subr.bf16.mxu1 %v11001_v14  ;;  %v10864_v26 = vcombine.low %v329_v13, %v333_v15 }
  0xc6   :  { %v461_v17 = vld [vmem:[#allocation5 + $0x560] sm:$0xff]  ;;  %6521 = vmatpush1.bf16.msra.mxu1 %v11000_v19 }
  0xc7   :  { %v10993_v21 = vcombine.high %v457_v16, %v461_v17  ;;  %v321_v22 = vld [vmem:[#allocation5 + $0x100] sm:$0xff]  ;;  %6479 = vmatprep.subr.bf16.mxu0 %v10865_v20  ;;  %v10992_v27 = vcombine.low %v457_v16, %v461_v17 }
  0xc8   :  { %v325_v23 = vld [vmem:[#allocation5 + $0x120] sm:$0xff]  ;;  %6480 = vmatpush1.bf16.msra.mxu0 %v10864_v26 }
  0xc9   :  { %v449_v24 = vld [vmem:[#allocation5 + $0x500] sm:$0xff]  ;;  %v10857_v28 = vcombine.high %v321_v22, %v325_v23  ;;  %6522 = vmatprep.subr.bf16.mxu1 %v10993_v21  ;;  %v10856_v34 = vcombine.low %v321_v22, %v325_v23 }
  0xca   :  { %v453_v25 = vld [vmem:[#allocation5 + $0x520] sm:$0xff]  ;;  %6523 = vmatpush1.bf16.msra.mxu1 %v10992_v27 }
  0xcb   :  { %v10985_v29 = vcombine.high %v449_v24, %v453_v25  ;;  %v313_v30 = vld [vmem:[#allocation5 + $0xc0] sm:$0xff]  ;;  %6481 = vmatprep.subr.bf16.mxu0 %v10857_v28  ;;  %v10984_v35 = vcombine.low %v449_v24, %v453_v25 }
  0xcc   :  { %v317_v31 = vld [vmem:[#allocation5 + $0xe0] sm:$0xff]  ;;  %6482 = vmatpush1.bf16.msra.mxu0 %v10856_v34 }
  0xcd   :  { %v441_v32 = vld [vmem:[#allocation5 + $0x4c0] sm:$0xff]  ;;  %v10849_v36 = vcombine.high %v313_v30, %v317_v31  ;;  %6524 = vmatprep.subr.bf16.mxu1 %v10985_v29  ;;  %v10848_v42 = vcombine.low %v313_v30, %v317_v31 }
  0xce   :  { %v445_v33 = vld [vmem:[#allocation5 + $0x4e0] sm:$0xff]  ;;  %6525 = vmatpush1.bf16.msra.mxu1 %v10984_v35 }
  0xcf   :  { %v10977_v37 = vcombine.high %v441_v32, %v445_v33  ;;  %v305_v38 = vld [vmem:[#allocation5 + $0x80] sm:$0xff]  ;;  %6483 = vmatprep.subr.bf16.mxu0 %v10849_v36  ;;  %v10976_v43 = vcombine.low %v441_v32, %v445_v33 }
  0xd0   :  { %v309_v39 = vld [vmem:[#allocation5 + $0xa0] sm:$0xff]  ;;  %6484 = vmatpush1.bf16.msra.mxu0 %v10848_v42 }
  0xd1   :  { %v433_v40 = vld [vmem:[#allocation5 + $0x480] sm:$0xff]  ;;  %v10841_v44 = vcombine.high %v305_v38, %v309_v39  ;;  %6526 = vmatprep.subr.bf16.mxu1 %v10977_v37  ;;  %v10840_v50 = vcombine.low %v305_v38, %v309_v39 }
  0xd2   :  { %v437_v41 = vld [vmem:[#allocation5 + $0x4a0] sm:$0xff]  ;;  %6527 = vmatpush1.bf16.msra.mxu1 %v10976_v43 }
  0xd3   :  { %v10969_v45 = vcombine.high %v433_v40, %v437_v41  ;;  %v297_v46 = vld [vmem:[#allocation5 + $0x40] sm:$0xff]  ;;  %6485 = vmatprep.subr.bf16.mxu0 %v10841_v44  ;;  %v10968_v51 = vcombine.low %v433_v40, %v437_v41 }
  0xd4   :  { %v301_v47 = vld [vmem:[#allocation5 + $0x60] sm:$0xff]  ;;  %6486 = vmatpush1.bf16.msra.mxu0 %v10840_v50 }
  0xd5   :  { %v425_v48 = vld [vmem:[#allocation5 + $0x440] sm:$0xff]  ;;  %v10833_v52 = vcombine.high %v297_v46, %v301_v47  ;;  %6528 = vmatprep.subr.bf16.mxu1 %v10969_v45  ;;  %v10832_v0 = vcombine.low %v297_v46, %v301_v47 }
  0xd6   :  { %v429_v49 = vld [vmem:[#allocation5 + $0x460] sm:$0xff]  ;;  %6529 = vmatpush1.bf16.msra.mxu1 %v10968_v51 }
  0xd7   :  { %v289_v53 = vld [vmem:[#allocation5] sm:$0xff]  ;;  %v10961_v56 = vcombine.high %v425_v48, %v429_v49  ;;  %6487 = vmatprep.subr.bf16.mxu0 %v10833_v52  ;;  %v10960_v1 = vcombine.low %v425_v48, %v429_v49 }
  0xd8   :  { %v293_v57 = vld [vmem:[#allocation5 + $0x20] sm:$0xff]  ;;  %6488 = vmatpush1.bf16.msra.mxu0 %v10832_v0 }
  0xd9   :  { %v417_v61 = vld [vmem:[#allocation5 + $0x400] sm:$0xff]  ;;  %v10825_v2 = vcombine.high %v289_v53, %v293_v57  ;;  %6530 = vmatprep.subr.bf16.mxu1 %v10961_v56  ;;  %v10824_v8 = vcombine.low %v289_v53, %v293_v57 }
  0xda   :  { %v421_v62 = vld [vmem:[#allocation5 + $0x420] sm:$0xff]  ;;  %6531 = vmatpush1.bf16.msra.mxu1 %v10960_v1 }
  0xdb   :  { %v10953_v3 = vcombine.high %v417_v61, %v421_v62  ;;  %v409_v4 = vld [vmem:[#allocation5 + $0x3c0] sm:$0xff]  ;;  %6489 = vmatprep.subr.bf16.mxu0 %v10825_v2  ;;  %v10952_v9 = vcombine.low %v417_v61, %v421_v62 }
  0xdc   :  { %v413_v5 = vld [vmem:[#allocation5 + $0x3e0] sm:$0xff]  ;;  %6490 = vmatpush1.bf16.msra.mxu0 %v10824_v8 }
  0xdd   :  { %v537_v6 = vld [vmem:[#allocation5 + $0x7c0] sm:$0xff]  ;;  %v10945_v10 = vcombine.high %v409_v4, %v413_v5  ;;  %6532 = vmatprep.subr.bf16.mxu1 %v10953_v3  ;;  %v10944_v16 = vcombine.low %v409_v4, %v413_v5 }
  0xde   :  { %v541_v7 = vld [vmem:[#allocation5 + $0x7e0] sm:$0xff]  ;;  %6533 = vmatpush1.bf16.msra.mxu1 %v10952_v9 }
  0xdf   :  { %v11073_v11 = vcombine.high %v537_v6, %v541_v7  ;;  %v401_v12 = vld [vmem:[#allocation5 + $0x380] sm:$0xff]  ;;  %6491 = vmatprep.subr.bf16.mxu0 %v10945_v10  ;;  %v11072_v17 = vcombine.low %v537_v6, %v541_v7 }
  0xe0   :  { %v405_v13 = vld [vmem:[#allocation5 + $0x3a0] sm:$0xff]  ;;  %6492 = vmatpush2.bf16.msra.mxu0 %v10944_v16 }
  0xe1   :  { %v529_v14 = vld [vmem:[#allocation5 + $0x780] sm:$0xff]  ;;  %v10937_v18 = vcombine.high %v401_v12, %v405_v13  ;;  %6534 = vmatprep.subr.bf16.mxu1 %v11073_v11  ;;  %v10936_v24 = vcombine.low %v401_v12, %v405_v13 }
  0xe2   :  { %v533_v15 = vld [vmem:[#allocation5 + $0x7a0] sm:$0xff]  ;;  %6535 = vmatpush2.bf16.msra.mxu1 %v11072_v17 }
  0xe3   :  { %v11065_v19 = vcombine.high %v529_v14, %v533_v15  ;;  %v393_v20 = vld [vmem:[#allocation5 + $0x340] sm:$0xff]  ;;  %6493 = vmatprep.subr.bf16.mxu0 %v10937_v18  ;;  %v11064_v25 = vcombine.low %v529_v14, %v533_v15  ;;  %v243_v14 = vld [vmem:[#allocation2 + $0x10] sm:$0xff] }
  0xe4   :  { %v397_v21 = vld [vmem:[#allocation5 + $0x360] sm:$0xff]  ;;  %6494 = vmatpush2.bf16.msra.mxu0 %v10936_v24  ;;  %v259_v15 = vld [vmem:[#allocation2 + $0x90] sm:$0xff]  ;;  %v262_v24 = vld [vmem:[#allocation2 + $0xa8] sm:$0xff] }
  0xe5   :  { %v521_v22 = vld [vmem:[#allocation5 + $0x740] sm:$0xff]  ;;  %v10929_v26 = vcombine.high %v393_v20, %v397_v21  ;;  %6536 = vmatprep.subr.bf16.mxu1 %v11065_v19  ;;  %v10928_v32 = vcombine.low %v393_v20, %v397_v21 }
  0xe6   :  { %v525_v23 = vld [vmem:[#allocation5 + $0x760] sm:$0xff]  ;;  %6537 = vmatpush2.bf16.msra.mxu1 %v11064_v25  ;;  %v13385_v25 = vpack.c.bf16 %v259_v15, %v243_v14 }
  0xe7   :  { %v11057_v27 = vcombine.high %v521_v22, %v525_v23  ;;  %v385_v28 = vld [vmem:[#allocation5 + $0x300] sm:$0xff]  ;;  %6495 = vmatprep.subr.bf16.mxu0 %v10929_v26  ;;  %v11056_v33 = vcombine.low %v521_v22, %v525_v23  ;;  %v246_v23 = vld [vmem:[#allocation2 + $0x28] sm:$0xff] }
  0xe8   :  { %v389_v29 = vld [vmem:[#allocation5 + $0x320] sm:$0xff]  ;;  %6496 = vmatpush2.bf16.msra.mxu0 %v10928_v32 }
  0xe9   :  { %v513_v30 = vld [vmem:[#allocation5 + $0x700] sm:$0xff]  ;;  %v10921_v34 = vcombine.high %v385_v28, %v389_v29  ;;  %6538 = vmatprep.subr.bf16.mxu1 %v11057_v27  ;;  %v10920_v40 = vcombine.low %v385_v28, %v389_v29  ;;  %v248_v27 = vld [vmem:[#allocation2 + $0x38] sm:$0xff] }
  0xea   :  { %v517_v31 = vld [vmem:[#allocation5 + $0x720] sm:$0xff]  ;;  %6539 = vmatpush2.bf16.msra.mxu1 %v11056_v33  ;;  %v264_v28 = vld [vmem:[#allocation2 + $0xb8] sm:$0xff] }
  0xeb   :  { %v11049_v35 = vcombine.high %v513_v30, %v517_v31  ;;  %v377_v36 = vld [vmem:[#allocation5 + $0x2c0] sm:$0xff]  ;;  %6497 = vmatprep.subr.bf16.mxu0 %v10921_v34  ;;  %v11048_v41 = vcombine.low %v513_v30, %v517_v31  ;;  %v13387_v34 = vpack.c.bf16 %v262_v24, %v246_v23 }
  0xec   :  { %v381_v37 = vld [vmem:[#allocation5 + $0x2e0] sm:$0xff]  ;;  %6498 = vmatpush2.bf16.msra.mxu0 %v10920_v40 }
  0xed   :  { %v505_v38 = vld [vmem:[#allocation5 + $0x6c0] sm:$0xff]  ;;  %v10913_v42 = vcombine.high %v377_v36, %v381_v37  ;;  %6540 = vmatprep.subr.bf16.mxu1 %v11049_v35  ;;  %v10912_v48 = vcombine.low %v377_v36, %v381_v37  ;;  %v13390_v37 = vpack.c.bf16 %v264_v28, %v248_v27 }
  0xee   :  { %v509_v39 = vld [vmem:[#allocation5 + $0x6e0] sm:$0xff]  ;;  %6541 = vmatpush2.bf16.msra.mxu1 %v11048_v41 }
  0xef   :  { %v11041_v43 = vcombine.high %v505_v38, %v509_v39  ;;  %v369_v44 = vld [vmem:[#allocation5 + $0x280] sm:$0xff]  ;;  %6499 = vmatprep.subr.bf16.mxu0 %v10913_v42  ;;  %v11040_v49 = vcombine.low %v505_v38, %v509_v39 }
  0xf0   :  { %v373_v45 = vld [vmem:[#allocation5 + $0x2a0] sm:$0xff]  ;;  %6500 = vmatpush2.bf16.msra.mxu0 %v10912_v48 }
  0xf1   :  { %v497_v46 = vld [vmem:[#allocation5 + $0x680] sm:$0xff]  ;;  %v10905_v50 = vcombine.high %v369_v44, %v373_v45  ;;  %6542 = vmatprep.subr.bf16.mxu1 %v11041_v43  ;;  %v10904_v56 = vcombine.low %v369_v44, %v373_v45 }
  0xf2   :  { %v501_v47 = vld [vmem:[#allocation5 + $0x6a0] sm:$0xff]  ;;  %6543 = vmatpush2.bf16.msra.mxu1 %v11040_v49 }
  0xf3   :  { %v11033_v51 = vcombine.high %v497_v46, %v501_v47  ;;  %v361_v52 = vld [vmem:[#allocation5 + $0x240] sm:$0xff]  ;;  %6501 = vmatprep.subr.bf16.mxu0 %v10905_v50  ;;  %v11032_v57 = vcombine.low %v497_v46, %v501_v47 }
  0xf4   :  { %v365_v53 = vld [vmem:[#allocation5 + $0x260] sm:$0xff]  ;;  %6502 = vmatpush2.bf16.msra.mxu0 %v10904_v56 }
  0xf5   :  { %v489_v54 = vld [vmem:[#allocation5 + $0x640] sm:$0xff]  ;;  %v10897_v59 = vcombine.high %v361_v52, %v365_v53  ;;  %6544 = vmatprep.subr.bf16.mxu1 %v11033_v51  ;;  %v10896_v2 = vcombine.low %v361_v52, %v365_v53 }
  0xf6   :  { %v493_v55 = vld [vmem:[#allocation5 + $0x660] sm:$0xff]  ;;  %6545 = vmatpush2.bf16.msra.mxu1 %v11032_v57 }
  0xf7   :  { %v11025_v60 = vcombine.high %v489_v54, %v493_v55  ;;  %v353_v61 = vld [vmem:[#allocation5 + $0x200] sm:$0xff]  ;;  %6503 = vmatprep.subr.bf16.mxu0 %v10897_v59  ;;  %v11024_v3 = vcombine.low %v489_v54, %v493_v55 }
  0xf8   :  { %v357_v62 = vld [vmem:[#allocation5 + $0x220] sm:$0xff]  ;;  %6504 = vmatpush2.bf16.msra.mxu0 %v10896_v2 }
  0xf9   :  { %v481_v0 = vld [vmem:[#allocation5 + $0x600] sm:$0xff]  ;;  %v10889_v4 = vcombine.high %v353_v61, %v357_v62  ;;  %6546 = vmatprep.subr.bf16.mxu1 %v11025_v60  ;;  %v10888_v10 = vcombine.low %v353_v61, %v357_v62 }
  0xfa   :  { %v485_v1 = vld [vmem:[#allocation5 + $0x620] sm:$0xff]  ;;  %6547 = vmatpush2.bf16.msra.mxu1 %v11024_v3 }
  0xfb   :  { %v11017_v5 = vcombine.high %v481_v0, %v485_v1  ;;  %v601_v6 = vld [vmem:[#allocation5 + $0x9c0] sm:$0xff]  ;;  %6505 = vmatprep.subr.bf16.mxu0 %v10889_v4  ;;  %v11016_v13 = vcombine.low %v481_v0, %v485_v1 }
  0xfc   :  { %v605_v7 = vld [vmem:[#allocation5 + $0x9e0] sm:$0xff]  ;;  %6506 = vmatpush2.bf16.msra.mxu0 %v10888_v10 }
  0xfd   :  { %v729_v8 = vld [vmem:[#allocation5 + $0xdc0] sm:$0xff]  ;;  %v11137_v16 = vcombine.high %v601_v6, %v605_v7  ;;  %6548 = vmatprep.subr.bf16.mxu1 %v11017_v5  ;;  %v11136_v26 = vcombine.low %v601_v6, %v605_v7 }
  0xfe   :  { %v733_v9 = vld [vmem:[#allocation5 + $0xde0] sm:$0xff]  ;;  %6549 = vmatpush2.bf16.msra.mxu1 %v11016_v13 }
  0xff   :  { %v241_v11 = vld [vmem:[#allocation2] sm:$0xff]  ;;  %v11265_v17 = vcombine.high %v729_v8, %v733_v9  ;;  %6561 = vmatprep.subr.bf16.mxu0 %v11137_v16  ;;  %v11264_v29 = vcombine.low %v729_v8, %v733_v9 }
 0x100   :  { %v257_v12 = vld [vmem:[#allocation2 + $0x80] sm:$0xff] }
 0x101   :  { %v593_v18 = vld [vmem:[#allocation5 + $0x980] sm:$0xff]  ;;  %v13383_v21 = vpack.c.bf16 %v257_v12, %v241_v11  ;;  %6604 = vmatprep.subr.bf16.mxu1 %v11265_v17  ;;  %6551 = vmatmul.mubr.bf16.vlgmr.msra.gmra.mxu1 %v13385_v25 }
 0x102   :  { %v597_v19 = vld [vmem:[#allocation5 + $0x9a0] sm:$0xff]  ;;  %6605 = vmatpush1.bf16.msra.mxu1 %v11264_v29  ;;  %6636 = vmatprep.mubr.bf16.mxu1 %v13390_v37 }
 0x103   :  { %v721_v20 = vld [vmem:[#allocation5 + $0xd80] sm:$0xff]  ;;  %v11129_v30 = vcombine.high %v593_v18, %v597_v19  ;;  %6508 = vmatmul.mubr.bf16.vlgmr.msra.gmra.mxu0 %v13383_v21  ;;  %v11128_v38 = vcombine.low %v593_v18, %v597_v19 }
 0x104   :  { %v725_v22 = vld [vmem:[#allocation5 + $0xda0] sm:$0xff]  ;;  %6562 = vmatpush1.bf16.msra.mxu0 %v11136_v26  ;;  %6593 = vmatprep.mubr.bf16.mxu0 %v13387_v34 }
 0x105   :  { %v11257_v31 = vcombine.high %v721_v20, %v725_v22  ;;  %v585_v32 = vld [vmem:[#allocation5 + $0x940] sm:$0xff]  ;;  %6563 = vmatprep.subr.bf16.mxu0 %v11129_v30  ;;  %v11256_v39 = vcombine.low %v721_v20, %v725_v22 }
 0x106   :  { %v589_v33 = vld [vmem:[#allocation5 + $0x960] sm:$0xff] }
 0x107   :  { %v713_v35 = vld [vmem:[#allocation5 + $0xd40] sm:$0xff]  ;;  %v11121_v40 = vcombine.high %v585_v32, %v589_v33  ;;  %6606 = vmatprep.subr.bf16.mxu1 %v11257_v31  ;;  %v11120_v46 = vcombine.low %v585_v32, %v589_v33 }
 0x108   :  { %v717_v36 = vld [vmem:[#allocation5 + $0xd60] sm:$0xff]  ;;  %6564 = vmatpush1.bf16.msra.mxu0 %v11128_v38  ;;  %6607 = vmatpush1.bf16.msra.mxu1 %v11256_v39 }
 0x109   :  { %v11249_v41 = vcombine.high %v713_v35, %v717_v36  ;;  %v577_v42 = vld [vmem:[#allocation5 + $0x900] sm:$0xff]  ;;  %6565 = vmatprep.subr.bf16.mxu0 %v11121_v40  ;;  %v11248_v47 = vcombine.low %v713_v35, %v717_v36 }
 0x10a   :  { %v581_v43 = vld [vmem:[#allocation5 + $0x920] sm:$0xff] }
 0x10b   :  { %v705_v44 = vld [vmem:[#allocation5 + $0xd00] sm:$0xff]  ;;  %v11113_v48 = vcombine.high %v577_v42, %v581_v43  ;;  %6608 = vmatprep.subr.bf16.mxu1 %v11249_v41  ;;  %v11112_v54 = vcombine.low %v577_v42, %v581_v43 }
 0x10c   :  { %v709_v45 = vld [vmem:[#allocation5 + $0xd20] sm:$0xff]  ;;  %6566 = vmatpush1.bf16.msra.mxu0 %v11120_v46  ;;  %6609 = vmatpush1.bf16.msra.mxu1 %v11248_v47 }
 0x10d   :  { %v11241_v49 = vcombine.high %v705_v44, %v709_v45  ;;  %v569_v50 = vld [vmem:[#allocation5 + $0x8c0] sm:$0xff]  ;;  %6567 = vmatprep.subr.bf16.mxu0 %v11113_v48  ;;  %v11240_v55 = vcombine.low %v705_v44, %v709_v45 }
 0x10e   :  { %v573_v51 = vld [vmem:[#allocation5 + $0x8e0] sm:$0xff] }
 0x10f   :  { %v697_v52 = vld [vmem:[#allocation5 + $0xcc0] sm:$0xff]  ;;  %v11105_v56 = vcombine.high %v569_v50, %v573_v51  ;;  %6610 = vmatprep.subr.bf16.mxu1 %v11241_v49  ;;  %v11104_v0 = vcombine.low %v569_v50, %v573_v51 }
 0x110   :  { %v701_v53 = vld [vmem:[#allocation5 + $0xce0] sm:$0xff]  ;;  %6568 = vmatpush1.bf16.msra.mxu0 %v11112_v54  ;;  %6611 = vmatpush1.bf16.msra.mxu1 %v11240_v55 }
 0x111   :  { %v561_v57 = vld [vmem:[#allocation5 + $0x880] sm:$0xff]  ;;  %v11233_v61 = vcombine.high %v697_v52, %v701_v53  ;;  %6569 = vmatprep.subr.bf16.mxu0 %v11105_v56  ;;  %v11232_v1 = vcombine.low %v697_v52, %v701_v53 }
 0x112   :  { %v565_v59 = vld [vmem:[#allocation5 + $0x8a0] sm:$0xff] }
 0x113   :  { %v689_v60 = vld [vmem:[#allocation5 + $0xc80] sm:$0xff]  ;;  %v11097_v2 = vcombine.high %v561_v57, %v565_v59  ;;  %6612 = vmatprep.subr.bf16.mxu1 %v11233_v61  ;;  %v11096_v8 = vcombine.low %v561_v57, %v565_v59 }
 0x114   :  { %v693_v62 = vld [vmem:[#allocation5 + $0xca0] sm:$0xff]  ;;  %6570 = vmatpush1.bf16.msra.mxu0 %v11104_v0  ;;  %6613 = vmatpush1.bf16.msra.mxu1 %v11232_v1 }
 0x115   :  { %v553_v3 = vld [vmem:[#allocation5 + $0x840] sm:$0xff]  ;;  %v11225_v6 = vcombine.high %v689_v60, %v693_v62  ;;  %6571 = vmatprep.subr.bf16.mxu0 %v11097_v2  ;;  %v11224_v9 = vcombine.low %v689_v60, %v693_v62 }
 0x116   :  { %v557_v4 = vld [vmem:[#allocation5 + $0x860] sm:$0xff] }
 0x117   :  { %v681_v5 = vld [vmem:[#allocation5 + $0xc40] sm:$0xff]  ;;  %v11089_v10 = vcombine.high %v553_v3, %v557_v4  ;;  %6614 = vmatprep.subr.bf16.mxu1 %v11225_v6  ;;  %v11088_v16 = vcombine.low %v553_v3, %v557_v4 }
 0x118   :  { %v685_v7 = vld [vmem:[#allocation5 + $0xc60] sm:$0xff]  ;;  %6572 = vmatpush1.bf16.msra.mxu0 %v11096_v8  ;;  %6615 = vmatpush1.bf16.msra.mxu1 %v11224_v9 }
 0x119   :  { %v545_v11 = vld [vmem:[#allocation5 + $0x800] sm:$0xff]  ;;  %v11217_v14 = vcombine.high %v681_v5, %v685_v7  ;;  %6573 = vmatprep.subr.bf16.mxu0 %v11089_v10  ;;  %v11216_v17 = vcombine.low %v681_v5, %v685_v7 }
 0x11a   :  { %v549_v12 = vld [vmem:[#allocation5 + $0x820] sm:$0xff] }
 0x11b   :  { %v673_v13 = vld [vmem:[#allocation5 + $0xc00] sm:$0xff]  ;;  %v11081_v18 = vcombine.high %v545_v11, %v549_v12  ;;  %6616 = vmatprep.subr.bf16.mxu1 %v11217_v14  ;;  %v11080_v26 = vcombine.low %v545_v11, %v549_v12 }
 0x11c   :  { %v677_v15 = vld [vmem:[#allocation5 + $0xc20] sm:$0xff]  ;;  %6574 = vmatpush1.bf16.msra.mxu0 %v11088_v16  ;;  %6617 = vmatpush1.bf16.msra.mxu1 %v11216_v17 }
 0x11d   :  { %v665_v19 = vld [vmem:[#allocation5 + $0xbc0] sm:$0xff]  ;;  %v11209_v23 = vcombine.high %v673_v13, %v677_v15  ;;  %6575 = vmatprep.subr.bf16.mxu0 %v11081_v18  ;;  %v11208_v27 = vcombine.low %v673_v13, %v677_v15 }
 0x11e   :  { %v669_v20 = vld [vmem:[#allocation5 + $0xbe0] sm:$0xff] }
 0x11f   :  { %v793_v22 = vld [vmem:[#allocation5 + $0xfc0] sm:$0xff]  ;;  %v11201_v28 = vcombine.high %v665_v19, %v669_v20  ;;  %6618 = vmatprep.subr.bf16.mxu1 %v11209_v23  ;;  %v11200_v35 = vcombine.low %v665_v19, %v669_v20 }
 0x120   :  { %v797_v24 = vld [vmem:[#allocation5 + $0xfe0] sm:$0xff]  ;;  %6576 = vmatpush1.bf16.msra.mxu0 %v11080_v26  ;;  %6619 = vmatpush1.bf16.msra.mxu1 %v11208_v27 }
 0x121   :  { %v657_v29 = vld [vmem:[#allocation5 + $0xb80] sm:$0xff]  ;;  %v11329_v32 = vcombine.high %v793_v22, %v797_v24  ;;  %6577 = vmatprep.subr.bf16.mxu0 %v11201_v28  ;;  %v11328_v36 = vcombine.low %v793_v22, %v797_v24 }
 0x122   :  { %v661_v30 = vld [vmem:[#allocation5 + $0xba0] sm:$0xff] }
 0x123   :  { %v785_v31 = vld [vmem:[#allocation5 + $0xf80] sm:$0xff]  ;;  %v11193_v38 = vcombine.high %v657_v29, %v661_v30  ;;  %6620 = vmatprep.subr.bf16.mxu1 %v11329_v32  ;;  %v11192_v44 = vcombine.low %v657_v29, %v661_v30 }
 0x124   :  { %v789_v33 = vld [vmem:[#allocation5 + $0xfa0] sm:$0xff]  ;;  %6578 = vmatpush2.bf16.msra.mxu0 %v11200_v35  ;;  %6621 = vmatpush2.bf16.msra.mxu1 %v11328_v36  ;;  %v247_v35 = vld [vmem:[#allocation2 + $0x30] sm:$0xff] }
 0x125   :  { %v649_v39 = vld [vmem:[#allocation5 + $0xb40] sm:$0xff]  ;;  %v11321_v42 = vcombine.high %v785_v31, %v789_v33  ;;  %6579 = vmatprep.subr.bf16.mxu0 %v11193_v38  ;;  %v11320_v45 = vcombine.low %v785_v31, %v789_v33  ;;  %v263_v36 = vld [vmem:[#allocation2 + $0xb0] sm:$0xff] }
 0x126   :  { %v653_v40 = vld [vmem:[#allocation5 + $0xb60] sm:$0xff] }
 0x127   :  { %v777_v41 = vld [vmem:[#allocation5 + $0xf40] sm:$0xff]  ;;  %v11185_v46 = vcombine.high %v649_v39, %v653_v40  ;;  %6622 = vmatprep.subr.bf16.mxu1 %v11321_v42  ;;  %v11184_v52 = vcombine.low %v649_v39, %v653_v40 }
 0x128   :  { %v781_v43 = vld [vmem:[#allocation5 + $0xf60] sm:$0xff]  ;;  %6580 = vmatpush2.bf16.msra.mxu0 %v11192_v44  ;;  %6623 = vmatpush2.bf16.msra.mxu1 %v11320_v45  ;;  %v250_v45 = vld [vmem:[#allocation2 + $0x48] sm:$0xff] }
 0x129   :  { %v641_v47 = vld [vmem:[#allocation5 + $0xb00] sm:$0xff]  ;;  %v11313_v50 = vcombine.high %v777_v41, %v781_v43  ;;  %6581 = vmatprep.subr.bf16.mxu0 %v11185_v46  ;;  %v11312_v53 = vcombine.low %v777_v41, %v781_v43 }
 0x12a   :  { %v645_v48 = vld [vmem:[#allocation5 + $0xb20] sm:$0xff] }
 0x12b   :  { %v769_v49 = vld [vmem:[#allocation5 + $0xf00] sm:$0xff]  ;;  %v11177_v54 = vcombine.high %v641_v47, %v645_v48  ;;  %6624 = vmatprep.subr.bf16.mxu1 %v11313_v50  ;;  %v11176_v61 = vcombine.low %v641_v47, %v645_v48  ;;  %v266_v47 = vld [vmem:[#allocation2 + $0xc8] sm:$0xff] }
 0x12c   :  { %v773_v51 = vld [vmem:[#allocation5 + $0xf20] sm:$0xff]  ;;  %6582 = vmatpush2.bf16.msra.mxu0 %v11184_v52  ;;  %6625 = vmatpush2.bf16.msra.mxu1 %v11312_v53  ;;  %v268_v52 = vld [vmem:[#allocation2 + $0xd8] sm:$0xff] }
 0x12d   :  { %v633_v55 = vld [vmem:[#allocation5 + $0xac0] sm:$0xff]  ;;  %v11305_v59 = vcombine.high %v769_v49, %v773_v51  ;;  %6583 = vmatprep.subr.bf16.mxu0 %v11177_v54  ;;  %v11304_v62 = vcombine.low %v769_v49, %v773_v51  ;;  %v13397_v49 = vpack.c.bf16 %v263_v36, %v247_v35  ;;  %v252_v51 = vld [vmem:[#allocation2 + $0x58] sm:$0xff] }
 0x12e   :  { %v637_v56 = vld [vmem:[#allocation5 + $0xae0] sm:$0xff] }
 0x12f   :  { %v761_v57 = vld [vmem:[#allocation5 + $0xec0] sm:$0xff]  ;;  %v11169_v0 = vcombine.high %v633_v55, %v637_v56  ;;  %6626 = vmatprep.subr.bf16.mxu1 %v11305_v59  ;;  %v11168_v6 = vcombine.low %v633_v55, %v637_v56  ;;  %v13399_v59 = vpack.c.bf16 %v266_v47, %v250_v45 }
 0x130   :  { %v765_v60 = vld [vmem:[#allocation5 + $0xee0] sm:$0xff]  ;;  %6584 = vmatpush2.bf16.msra.mxu0 %v11176_v61  ;;  %6627 = vmatpush2.bf16.msra.mxu1 %v11304_v62  ;;  %v13402_v62 = vpack.c.bf16 %v268_v52, %v252_v51 }
 0x131   :  { %v625_v1 = vld [vmem:[#allocation5 + $0xa80] sm:$0xff]  ;;  %v11297_v4 = vcombine.high %v761_v57, %v765_v60  ;;  %6585 = vmatprep.subr.bf16.mxu0 %v11169_v0  ;;  %v11296_v7 = vcombine.low %v761_v57, %v765_v60 }
 0x132   :  { %v629_v2 = vld [vmem:[#allocation5 + $0xaa0] sm:$0xff] }
 0x133   :  { %v753_v3 = vld [vmem:[#allocation5 + $0xe80] sm:$0xff]  ;;  %v11161_v8 = vcombine.high %v625_v1, %v629_v2  ;;  %6628 = vmatprep.subr.bf16.mxu1 %v11297_v4  ;;  %v11160_v14 = vcombine.low %v625_v1, %v629_v2 }
 0x134   :  { %v757_v5 = vld [vmem:[#allocation5 + $0xea0] sm:$0xff]  ;;  %6586 = vmatpush2.bf16.msra.mxu0 %v11168_v6  ;;  %6629 = vmatpush2.bf16.msra.mxu1 %v11296_v7 }
 0x135   :  { %v617_v9 = vld [vmem:[#allocation5 + $0xa40] sm:$0xff]  ;;  %v11289_v12 = vcombine.high %v753_v3, %v757_v5  ;;  %6587 = vmatprep.subr.bf16.mxu0 %v11161_v8  ;;  %v11288_v15 = vcombine.low %v753_v3, %v757_v5 }
 0x136   :  { %v621_v10 = vld [vmem:[#allocation5 + $0xa60] sm:$0xff] }
 0x137   :  { %v745_v11 = vld [vmem:[#allocation5 + $0xe40] sm:$0xff]  ;;  %v11153_v16 = vcombine.high %v617_v9, %v621_v10  ;;  %6630 = vmatprep.subr.bf16.mxu1 %v11289_v12  ;;  %v11152_v23 = vcombine.low %v617_v9, %v621_v10 }
 0x138   :  { %v749_v13 = vld [vmem:[#allocation5 + $0xe60] sm:$0xff]  ;;  %6588 = vmatpush2.bf16.msra.mxu0 %v11160_v14  ;;  %6631 = vmatpush2.bf16.msra.mxu1 %v11288_v15 }
 0x139   :  { %v609_v17 = vld [vmem:[#allocation5 + $0xa00] sm:$0xff]  ;;  %v11281_v20 = vcombine.high %v745_v11, %v749_v13  ;;  %6589 = vmatprep.subr.bf16.mxu0 %v11153_v16  ;;  %v11280_v24 = vcombine.low %v745_v11, %v749_v13 }
 0x13a   :  { %v613_v18 = vld [vmem:[#allocation5 + $0xa20] sm:$0xff] }
 0x13b   :  { %v737_v19 = vld [vmem:[#allocation5 + $0xe00] sm:$0xff]  ;;  %v11145_v26 = vcombine.high %v609_v17, %v613_v18  ;;  %6632 = vmatprep.subr.bf16.mxu1 %v11281_v20  ;;  %v11144_v38 = vcombine.low %v609_v17, %v613_v18 }
 0x13c   :  { %v741_v22 = vld [vmem:[#allocation5 + $0xe20] sm:$0xff]  ;;  %6590 = vmatpush2.bf16.msra.mxu0 %v11152_v23  ;;  %6633 = vmatpush2.bf16.msra.mxu1 %v11280_v24 }
 0x13d   :  { %v857_v27 = vld [vmem:[#allocation5 + $0x11c0] sm:$0xff]  ;;  %v11273_v30 = vcombine.high %v737_v19, %v741_v22  ;;  %6591 = vmatprep.subr.bf16.mxu0 %v11145_v26  ;;  %v11272_v41 = vcombine.low %v737_v19, %v741_v22 }
 0x13e   :  { %v861_v28 = vld [vmem:[#allocation5 + $0x11e0] sm:$0xff] }
 0x13f   :  { %v985_v29 = vld [vmem:[#allocation5 + $0x15c0] sm:$0xff]  ;;  %v11393_v42 = vcombine.high %v857_v27, %v861_v28  ;;  %6634 = vmatprep.subr.bf16.mxu1 %v11273_v30  ;;  %v11392_v50 = vcombine.low %v857_v27, %v861_v28 }
 0x140   :  { %v245_v31 = vld [vmem:[#allocation2 + $0x20] sm:$0xff]  ;;  %6592 = vmatpush2.bf16.msra.mxu0 %v11144_v38  ;;  %6635 = vmatpush2.bf16.msra.mxu1 %v11272_v41 }
 0x141   :  { %v261_v32 = vld [vmem:[#allocation2 + $0xa0] sm:$0xff]  ;;  %6647 = vmatprep.subr.bf16.mxu0 %v11393_v42 }
 0x142   :  { %v989_v33 = vld [vmem:[#allocation5 + $0x15e0] sm:$0xff]  ;;  %v13395_v48 = vpack.c.bf16 %v261_v32, %v245_v31 }
 0x143   :  { %v849_v39 = vld [vmem:[#allocation5 + $0x1180] sm:$0xff]  ;;  %v11521_v46 = vcombine.high %v985_v29, %v989_v33  ;;  %v11520_v53 = vcombine.low %v985_v29, %v989_v33  ;;  %6637 = vmatmul.mubr.bf16.vlgmr.msra.gmra.mxu1 %v13397_v49 }
 0x144   :  { %v853_v40 = vld [vmem:[#allocation5 + $0x11a0] sm:$0xff]  ;;  %6594 = vmatmul.mubr.bf16.vlgmr.msra.gmra.mxu0 %v13395_v48  ;;  %6722 = vmatprep.mubr.bf16.mxu1 %v13402_v62 }
 0x145   :  { %v977_v43 = vld [vmem:[#allocation5 + $0x1580] sm:$0xff]  ;;  %v11385_v54 = vcombine.high %v849_v39, %v853_v40  ;;  %6690 = vmatprep.subr.bf16.mxu1 %v11521_v46  ;;  %6648 = vmatpush1.bf16.msra.mxu0 %v11392_v50  ;;  %v11384_v0 = vcombine.low %v849_v39, %v853_v40 }
 0x146   :  { %v981_v44 = vld [vmem:[#allocation5 + $0x15a0] sm:$0xff]  ;;  %6691 = vmatpush1.bf16.msra.mxu1 %v11520_v53  ;;  %6679 = vmatprep.mubr.bf16.mxu0 %v13399_v59 }
 0x147   :  { %v11513_v55 = vcombine.high %v977_v43, %v981_v44  ;;  %v841_v56 = vld [vmem:[#allocation5 + $0x1140] sm:$0xff]  ;;  %6649 = vmatprep.subr.bf16.mxu0 %v11385_v54  ;;  %v11512_v1 = vcombine.low %v977_v43, %v981_v44 }
 0x148   :  { %v845_v57 = vld [vmem:[#allocation5 + $0x1160] sm:$0xff] }
 0x149   :  { %v969_v60 = vld [vmem:[#allocation5 + $0x1540] sm:$0xff]  ;;  %v11377_v2 = vcombine.high %v841_v56, %v845_v57  ;;  %6692 = vmatprep.subr.bf16.mxu1 %v11513_v55  ;;  %6650 = vmatpush1.bf16.msra.mxu0 %v11384_v0  ;;  %v11376_v8 = vcombine.low %v841_v56, %v845_v57 }
 0x14a   :  { %v973_v61 = vld [vmem:[#allocation5 + $0x1560] sm:$0xff]  ;;  %6693 = vmatpush1.bf16.msra.mxu1 %v11512_v1 }
 0x14b   :  { %v833_v3 = vld [vmem:[#allocation5 + $0x1100] sm:$0xff]  ;;  %v11505_v6 = vcombine.high %v969_v60, %v973_v61  ;;  %6651 = vmatprep.subr.bf16.mxu0 %v11377_v2  ;;  %v11504_v9 = vcombine.low %v969_v60, %v973_v61 }
 0x14c   :  { %v837_v4 = vld [vmem:[#allocation5 + $0x1120] sm:$0xff] }
 0x14d   :  { %v961_v5 = vld [vmem:[#allocation5 + $0x1500] sm:$0xff]  ;;  %v11369_v10 = vcombine.high %v833_v3, %v837_v4  ;;  %6694 = vmatprep.subr.bf16.mxu1 %v11505_v6  ;;  %6652 = vmatpush1.bf16.msra.mxu0 %v11376_v8  ;;  %v11368_v16 = vcombine.low %v833_v3, %v837_v4 }
 0x14e   :  { %v965_v7 = vld [vmem:[#allocation5 + $0x1520] sm:$0xff]  ;;  %6695 = vmatpush1.bf16.msra.mxu1 %v11504_v9 }
 0x14f   :  { %v825_v11 = vld [vmem:[#allocation5 + $0x10c0] sm:$0xff]  ;;  %v11497_v14 = vcombine.high %v961_v5, %v965_v7  ;;  %6653 = vmatprep.subr.bf16.mxu0 %v11369_v10  ;;  %v11496_v17 = vcombine.low %v961_v5, %v965_v7 }
 0x150   :  { %v829_v12 = vld [vmem:[#allocation5 + $0x10e0] sm:$0xff] }
 0x151   :  { %v953_v13 = vld [vmem:[#allocation5 + $0x14c0] sm:$0xff]  ;;  %v11361_v18 = vcombine.high %v825_v11, %v829_v12  ;;  %6696 = vmatprep.subr.bf16.mxu1 %v11497_v14  ;;  %6654 = vmatpush1.bf16.msra.mxu0 %v11368_v16  ;;  %v11360_v26 = vcombine.low %v825_v11, %v829_v12 }
 0x152   :  { %v957_v15 = vld [vmem:[#allocation5 + $0x14e0] sm:$0xff]  ;;  %6697 = vmatpush1.bf16.msra.mxu1 %v11496_v17 }
 0x153   :  { %v817_v19 = vld [vmem:[#allocation5 + $0x1080] sm:$0xff]  ;;  %v11489_v23 = vcombine.high %v953_v13, %v957_v15  ;;  %6655 = vmatprep.subr.bf16.mxu0 %v11361_v18  ;;  %v11488_v27 = vcombine.low %v953_v13, %v957_v15 }
 0x154   :  { %v821_v20 = vld [vmem:[#allocation5 + $0x10a0] sm:$0xff] }
 0x155   :  { %v945_v22 = vld [vmem:[#allocation5 + $0x1480] sm:$0xff]  ;;  %v11353_v28 = vcombine.high %v817_v19, %v821_v20  ;;  %6698 = vmatprep.subr.bf16.mxu1 %v11489_v23  ;;  %6656 = vmatpush1.bf16.msra.mxu0 %v11360_v26  ;;  %v11352_v35 = vcombine.low %v817_v19, %v821_v20 }
 0x156   :  { %v949_v24 = vld [vmem:[#allocation5 + $0x14a0] sm:$0xff]  ;;  %6699 = vmatpush1.bf16.msra.mxu1 %v11488_v27 }
 0x157   :  { %v809_v29 = vld [vmem:[#allocation5 + $0x1040] sm:$0xff]  ;;  %v11481_v32 = vcombine.high %v945_v22, %v949_v24  ;;  %6657 = vmatprep.subr.bf16.mxu0 %v11353_v28  ;;  %v11480_v36 = vcombine.low %v945_v22, %v949_v24 }
 0x158   :  { %v813_v30 = vld [vmem:[#allocation5 + $0x1060] sm:$0xff] }
 0x159   :  { %v937_v31 = vld [vmem:[#allocation5 + $0x1440] sm:$0xff]  ;;  %v11345_v38 = vcombine.high %v809_v29, %v813_v30  ;;  %6700 = vmatprep.subr.bf16.mxu1 %v11481_v32  ;;  %6658 = vmatpush1.bf16.msra.mxu0 %v11352_v35  ;;  %v11344_v44 = vcombine.low %v809_v29, %v813_v30 }
 0x15a   :  { %v941_v33 = vld [vmem:[#allocation5 + $0x1460] sm:$0xff]  ;;  %6701 = vmatpush1.bf16.msra.mxu1 %v11480_v36 }
 0x15b   :  { %v801_v39 = vld [vmem:[#allocation5 + $0x1000] sm:$0xff]  ;;  %v11473_v42 = vcombine.high %v937_v31, %v941_v33  ;;  %6659 = vmatprep.subr.bf16.mxu0 %v11345_v38  ;;  %v11472_v45 = vcombine.low %v937_v31, %v941_v33 }
 0x15c   :  { %v805_v40 = vld [vmem:[#allocation5 + $0x1020] sm:$0xff] }
 0x15d   :  { %v929_v41 = vld [vmem:[#allocation5 + $0x1400] sm:$0xff]  ;;  %v11337_v46 = vcombine.high %v801_v39, %v805_v40  ;;  %6702 = vmatprep.subr.bf16.mxu1 %v11473_v42  ;;  %6660 = vmatpush1.bf16.msra.mxu0 %v11344_v44  ;;  %v11336_v54 = vcombine.low %v801_v39, %v805_v40 }
 0x15e   :  { %v933_v43 = vld [vmem:[#allocation5 + $0x1420] sm:$0xff]  ;;  %6703 = vmatpush1.bf16.msra.mxu1 %v11472_v45 }
 0x15f   :  { %v921_v47 = vld [vmem:[#allocation5 + $0x13c0] sm:$0xff]  ;;  %v11465_v52 = vcombine.high %v929_v41, %v933_v43  ;;  %6661 = vmatprep.subr.bf16.mxu0 %v11337_v46  ;;  %v11464_v55 = vcombine.low %v929_v41, %v933_v43 }
 0x160   :  { %v925_v50 = vld [vmem:[#allocation5 + $0x13e0] sm:$0xff] }
 0x161   :  { %v1049_v51 = vld [vmem:[#allocation5 + $0x17c0] sm:$0xff]  ;;  %v11457_v56 = vcombine.high %v921_v47, %v925_v50  ;;  %6704 = vmatprep.subr.bf16.mxu1 %v11465_v52  ;;  %6662 = vmatpush1.bf16.msra.mxu0 %v11336_v54  ;;  %v11456_v2 = vcombine.low %v921_v47, %v925_v50 }
 0x162   :  { %v1053_v53 = vld [vmem:[#allocation5 + $0x17e0] sm:$0xff]  ;;  %6705 = vmatpush1.bf16.msra.mxu1 %v11464_v55 }
 0x163   :  { %v913_v57 = vld [vmem:[#allocation5 + $0x1380] sm:$0xff]  ;;  %v11585_v0 = vcombine.high %v1049_v51, %v1053_v53  ;;  %6663 = vmatprep.subr.bf16.mxu0 %v11457_v56  ;;  %v11584_v3 = vcombine.low %v1049_v51, %v1053_v53 }
 0x164   :  { %v917_v60 = vld [vmem:[#allocation5 + $0x13a0] sm:$0xff] }
 0x165   :  { %v1041_v61 = vld [vmem:[#allocation5 + $0x1780] sm:$0xff]  ;;  %v11449_v4 = vcombine.high %v913_v57, %v917_v60  ;;  %6706 = vmatprep.subr.bf16.mxu1 %v11585_v0  ;;  %6664 = vmatpush2.bf16.msra.mxu0 %v11456_v2  ;;  %v11448_v10 = vcombine.low %v913_v57, %v917_v60 }
 0x166   :  { %v1045_v1 = vld [vmem:[#allocation5 + $0x17a0] sm:$0xff]  ;;  %6707 = vmatpush2.bf16.msra.mxu1 %v11584_v3 }
 0x167   :  { %v905_v5 = vld [vmem:[#allocation5 + $0x1340] sm:$0xff]  ;;  %v11577_v8 = vcombine.high %v1041_v61, %v1045_v1  ;;  %6665 = vmatprep.subr.bf16.mxu0 %v11449_v4  ;;  %v11576_v11 = vcombine.low %v1041_v61, %v1045_v1 }
 0x168   :  { %v909_v6 = vld [vmem:[#allocation5 + $0x1360] sm:$0xff] }
 0x169   :  { %v1033_v7 = vld [vmem:[#allocation5 + $0x1740] sm:$0xff]  ;;  %v11441_v12 = vcombine.high %v905_v5, %v909_v6  ;;  %6708 = vmatprep.subr.bf16.mxu1 %v11577_v8  ;;  %6666 = vmatpush2.bf16.msra.mxu0 %v11448_v10  ;;  %v11440_v18 = vcombine.low %v905_v5, %v909_v6  ;;  %v251_v6 = vld [vmem:[#allocation2 + $0x50] sm:$0xff] }
 0x16a   :  { %v1037_v9 = vld [vmem:[#allocation5 + $0x1760] sm:$0xff]  ;;  %6709 = vmatpush2.bf16.msra.mxu1 %v11576_v11 }
 0x16b   :  { %v897_v13 = vld [vmem:[#allocation5 + $0x1300] sm:$0xff]  ;;  %v11569_v16 = vcombine.high %v1033_v7, %v1037_v9  ;;  %6667 = vmatprep.subr.bf16.mxu0 %v11441_v12  ;;  %v11568_v19 = vcombine.low %v1033_v7, %v1037_v9  ;;  %v267_v7 = vld [vmem:[#allocation2 + $0xd0] sm:$0xff] }
 0x16c   :  { %v901_v14 = vld [vmem:[#allocation5 + $0x1320] sm:$0xff] }
 0x16d   :  { %v1025_v15 = vld [vmem:[#allocation5 + $0x1700] sm:$0xff]  ;;  %v11433_v20 = vcombine.high %v897_v13, %v901_v14  ;;  %6710 = vmatprep.subr.bf16.mxu1 %v11569_v16  ;;  %6668 = vmatpush2.bf16.msra.mxu0 %v11440_v18  ;;  %v11432_v28 = vcombine.low %v897_v13, %v901_v14  ;;  %v270_v16 = vld [vmem:[#allocation2 + $0xe8] sm:$0xff]  ;;  %v256_v18 = vld [vmem:[#allocation2 + $0x78] sm:$0xff] }
 0x16e   :  { %v1029_v17 = vld [vmem:[#allocation5 + $0x1720] sm:$0xff]  ;;  %6711 = vmatpush2.bf16.msra.mxu1 %v11568_v19  ;;  %v272_v19 = vld [vmem:[#allocation2 + $0xf8] sm:$0xff] }
 0x16f   :  { %v889_v22 = vld [vmem:[#allocation5 + $0x12c0] sm:$0xff]  ;;  %v11561_v26 = vcombine.high %v1025_v15, %v1029_v17  ;;  %6669 = vmatprep.subr.bf16.mxu0 %v11433_v20  ;;  %v11560_v29 = vcombine.low %v1025_v15, %v1029_v17  ;;  %v254_v15 = vld [vmem:[#allocation2 + $0x68] sm:$0xff] }
 0x170   :  { %v893_v23 = vld [vmem:[#allocation5 + $0x12e0] sm:$0xff] }
 0x171   :  { %v1017_v24 = vld [vmem:[#allocation5 + $0x16c0] sm:$0xff]  ;;  %v11425_v30 = vcombine.high %v889_v22, %v893_v23  ;;  %6712 = vmatprep.subr.bf16.mxu1 %v11561_v26  ;;  %6670 = vmatpush2.bf16.msra.mxu0 %v11432_v28  ;;  %v11424_v38 = vcombine.low %v889_v22, %v893_v23  ;;  %v13409_v22 = vpack.c.bf16 %v267_v7, %v251_v6 }
 0x172   :  { %v1021_v27 = vld [vmem:[#allocation5 + $0x16e0] sm:$0xff]  ;;  %6713 = vmatpush2.bf16.msra.mxu1 %v11560_v29 }
 0x173   :  { %v881_v31 = vld [vmem:[#allocation5 + $0x1280] sm:$0xff]  ;;  %v11553_v35 = vcombine.high %v1017_v24, %v1021_v27  ;;  %6671 = vmatprep.subr.bf16.mxu0 %v11425_v30  ;;  %v11552_v39 = vcombine.low %v1017_v24, %v1021_v27 }
 0x174   :  { %v885_v32 = vld [vmem:[#allocation5 + $0x12a0] sm:$0xff] }
 0x175   :  { %v1009_v33 = vld [vmem:[#allocation5 + $0x1680] sm:$0xff]  ;;  %v11417_v40 = vcombine.high %v881_v31, %v885_v32  ;;  %6714 = vmatprep.subr.bf16.mxu1 %v11553_v35  ;;  %6672 = vmatpush2.bf16.msra.mxu0 %v11424_v38  ;;  %v11416_v46 = vcombine.low %v881_v31, %v885_v32  ;;  %v13411_v32 = vpack.c.bf16 %v270_v16, %v254_v15 }
 0x176   :  { %v1013_v36 = vld [vmem:[#allocation5 + $0x16a0] sm:$0xff]  ;;  %6715 = vmatpush2.bf16.msra.mxu1 %v11552_v39 }
 0x177   :  { %v873_v41 = vld [vmem:[#allocation5 + $0x1240] sm:$0xff]  ;;  %v11545_v44 = vcombine.high %v1009_v33, %v1013_v36  ;;  %6673 = vmatprep.subr.bf16.mxu0 %v11417_v40  ;;  %v11544_v47 = vcombine.low %v1009_v33, %v1013_v36  ;;  %v13414_v33 = vpack.c.bf16 %v272_v19, %v256_v18 }
 0x178   :  { %v877_v42 = vld [vmem:[#allocation5 + $0x1260] sm:$0xff] }
 0x179   :  { %v1001_v43 = vld [vmem:[#allocation5 + $0x1640] sm:$0xff]  ;;  %v11409_v50 = vcombine.high %v873_v41, %v877_v42  ;;  %6716 = vmatprep.subr.bf16.mxu1 %v11545_v44  ;;  %6674 = vmatpush2.bf16.msra.mxu0 %v11416_v46  ;;  %v11408_v56 = vcombine.low %v873_v41, %v877_v42 }
 0x17a   :  { %v1005_v45 = vld [vmem:[#allocation5 + $0x1660] sm:$0xff]  ;;  %6717 = vmatpush2.bf16.msra.mxu1 %v11544_v47 }
 0x17b   :  { %v865_v51 = vld [vmem:[#allocation5 + $0x1200] sm:$0xff]  ;;  %v11537_v54 = vcombine.high %v1001_v43, %v1005_v45  ;;  %6675 = vmatprep.subr.bf16.mxu0 %v11409_v50  ;;  %v11536_v57 = vcombine.low %v1001_v43, %v1005_v45 }
 0x17c   :  { %v869_v52 = vld [vmem:[#allocation5 + $0x1220] sm:$0xff] }
 0x17d   :  { %v993_v53 = vld [vmem:[#allocation5 + $0x1600] sm:$0xff]  ;;  %v11401_v60 = vcombine.high %v865_v51, %v869_v52  ;;  %6718 = vmatprep.subr.bf16.mxu1 %v11537_v54  ;;  %6676 = vmatpush2.bf16.msra.mxu0 %v11408_v56  ;;  %v11400_v8 = vcombine.low %v865_v51, %v869_v52 }
 0x17e   :  { %v997_v55 = vld [vmem:[#allocation5 + $0x1620] sm:$0xff]  ;;  %6719 = vmatpush2.bf16.msra.mxu1 %v11536_v57 }
 0x17f   :  { %v1113_v61 = vld [vmem:[#allocation5 + $0x19c0] sm:$0xff]  ;;  %v11529_v2 = vcombine.high %v993_v53, %v997_v55  ;;  %6677 = vmatprep.subr.bf16.mxu0 %v11401_v60  ;;  %v11528_v11 = vcombine.low %v993_v53, %v997_v55 }
 0x180   :  { %v1117_v0 = vld [vmem:[#allocation5 + $0x19e0] sm:$0xff] }
 0x181   :  { %v1241_v1 = vld [vmem:[#allocation5 + $0x1dc0] sm:$0xff]  ;;  %v11649_v12 = vcombine.high %v1113_v61, %v1117_v0  ;;  %6720 = vmatprep.subr.bf16.mxu1 %v11529_v2  ;;  %6678 = vmatpush2.bf16.msra.mxu0 %v11400_v8  ;;  %v11648_v23 = vcombine.low %v1113_v61, %v1117_v0 }
 0x182   :  { %v249_v3 = vld [vmem:[#allocation2 + $0x40] sm:$0xff]  ;;  %6721 = vmatpush2.bf16.msra.mxu1 %v11528_v11 }
 0x183   :  { %v265_v4 = vld [vmem:[#allocation2 + $0xc0] sm:$0xff]  ;;  %6733 = vmatprep.subr.bf16.mxu0 %v11649_v12 }
 0x184   :  { %v1245_v5 = vld [vmem:[#allocation5 + $0x1de0] sm:$0xff]  ;;  %v13407_v20 = vpack.c.bf16 %v265_v4, %v249_v3 }
 0x185   :  { %v1105_v9 = vld [vmem:[#allocation5 + $0x1980] sm:$0xff]  ;;  %v11777_v17 = vcombine.high %v1241_v1, %v1245_v5  ;;  %v11776_v24 = vcombine.low %v1241_v1, %v1245_v5  ;;  %6723 = vmatmul.mubr.bf16.vlgmr.msra.gmra.mxu1 %v13409_v22 }
 0x186   :  { %v1109_v10 = vld [vmem:[#allocation5 + $0x19a0] sm:$0xff]  ;;  %6680 = vmatmul.mubr.bf16.vlgmr.msra.gmra.mxu0 %v13407_v20  ;;  %6808 = vmatprep.mubr.bf16.mxu1 %v13414_v33 }
 0x187   :  { %v1233_v13 = vld [vmem:[#allocation5 + $0x1d80] sm:$0xff]  ;;  %v11641_v26 = vcombine.high %v1105_v9, %v1109_v10  ;;  %6776 = vmatprep.subr.bf16.mxu1 %v11777_v17  ;;  %6734 = vmatpush1.bf16.msra.mxu0 %v11648_v23  ;;  %v11640_v35 = vcombine.low %v1105_v9, %v1109_v10 }
 0x188   :  { %v1237_v14 = vld [vmem:[#allocation5 + $0x1da0] sm:$0xff]  ;;  %6777 = vmatpush1.bf16.msra.mxu1 %v11776_v24  ;;  %6765 = vmatprep.mubr.bf16.mxu0 %v13411_v32 }
 0x189   :  { %v1097_v27 = vld [vmem:[#allocation5 + $0x1940] sm:$0xff]  ;;  %v11769_v30 = vcombine.high %v1233_v13, %v1237_v14  ;;  %6735 = vmatprep.subr.bf16.mxu0 %v11641_v26  ;;  %v11768_v36 = vcombine.low %v1233_v13, %v1237_v14 }
 0x18a   :  { %v1101_v28 = vld [vmem:[#allocation5 + $0x1960] sm:$0xff] }
 0x18b   :  { %v1225_v29 = vld [vmem:[#allocation5 + $0x1d40] sm:$0xff]  ;;  %v11633_v38 = vcombine.high %v1097_v27, %v1101_v28  ;;  %6778 = vmatprep.subr.bf16.mxu1 %v11769_v30  ;;  %6736 = vmatpush1.bf16.msra.mxu0 %v11640_v35  ;;  %v11632_v44 = vcombine.low %v1097_v27, %v1101_v28 }
 0x18c   :  { %v1229_v31 = vld [vmem:[#allocation5 + $0x1d60] sm:$0xff]  ;;  %6779 = vmatpush1.bf16.msra.mxu1 %v11768_v36 }
 0x18d   :  { %v1089_v39 = vld [vmem:[#allocation5 + $0x1900] sm:$0xff]  ;;  %v11761_v42 = vcombine.high %v1225_v29, %v1229_v31  ;;  %6737 = vmatprep.subr.bf16.mxu0 %v11633_v38  ;;  %v11760_v45 = vcombine.low %v1225_v29, %v1229_v31 }
 0x18e   :  { %v1093_v40 = vld [vmem:[#allocation5 + $0x1920] sm:$0xff] }
 0x18f   :  { %v1217_v41 = vld [vmem:[#allocation5 + $0x1d00] sm:$0xff]  ;;  %v11625_v46 = vcombine.high %v1089_v39, %v1093_v40  ;;  %6780 = vmatprep.subr.bf16.mxu1 %v11761_v42  ;;  %6738 = vmatpush1.bf16.msra.mxu0 %v11632_v44  ;;  %v11624_v54 = vcombine.low %v1089_v39, %v1093_v40 }
 0x190   :  { %v1221_v43 = vld [vmem:[#allocation5 + $0x1d20] sm:$0xff]  ;;  %6781 = vmatpush1.bf16.msra.mxu1 %v11760_v45 }
 0x191   :  { %v1081_v47 = vld [vmem:[#allocation5 + $0x18c0] sm:$0xff]  ;;  %v11753_v52 = vcombine.high %v1217_v41, %v1221_v43  ;;  %6739 = vmatprep.subr.bf16.mxu0 %v11625_v46  ;;  %v11752_v55 = vcombine.low %v1217_v41, %v1221_v43 }
 0x192   :  { %v1085_v50 = vld [vmem:[#allocation5 + $0x18e0] sm:$0xff] }
 0x193   :  { %v1209_v51 = vld [vmem:[#allocation5 + $0x1cc0] sm:$0xff]  ;;  %v11617_v56 = vcombine.high %v1081_v47, %v1085_v50  ;;  %6782 = vmatprep.subr.bf16.mxu1 %v11753_v52  ;;  %6740 = vmatpush1.bf16.msra.mxu0 %v11624_v54  ;;  %v11616_v2 = vcombine.low %v1081_v47, %v1085_v50 }
 0x194   :  { %v1213_v53 = vld [vmem:[#allocation5 + $0x1ce0] sm:$0xff]  ;;  %6783 = vmatpush1.bf16.msra.mxu1 %v11752_v55 }
 0x195   :  { %v1073_v57 = vld [vmem:[#allocation5 + $0x1880] sm:$0xff]  ;;  %v11745_v0 = vcombine.high %v1209_v51, %v1213_v53  ;;  %6741 = vmatprep.subr.bf16.mxu0 %v11617_v56  ;;  %v11744_v3 = vcombine.low %v1209_v51, %v1213_v53 }
 0x196   :  { %v1077_v60 = vld [vmem:[#allocation5 + $0x18a0] sm:$0xff] }
 0x197   :  { %v1201_v61 = vld [vmem:[#allocation5 + $0x1c80] sm:$0xff]  ;;  %v11609_v4 = vcombine.high %v1073_v57, %v1077_v60  ;;  %6784 = vmatprep.subr.bf16.mxu1 %v11745_v0  ;;  %6742 = vmatpush1.bf16.msra.mxu0 %v11616_v2  ;;  %v11608_v10 = vcombine.low %v1073_v57, %v1077_v60 }
 0x198   :  { %v1205_v1 = vld [vmem:[#allocation5 + $0x1ca0] sm:$0xff]  ;;  %6785 = vmatpush1.bf16.msra.mxu1 %v11744_v3 }
 0x199   :  { %v1065_v5 = vld [vmem:[#allocation5 + $0x1840] sm:$0xff]  ;;  %v11737_v8 = vcombine.high %v1201_v61, %v1205_v1  ;;  %6743 = vmatprep.subr.bf16.mxu0 %v11609_v4  ;;  %v11736_v11 = vcombine.low %v1201_v61, %v1205_v1 }
 0x19a   :  { %v1069_v6 = vld [vmem:[#allocation5 + $0x1860] sm:$0xff] }
 0x19b   :  { %v1193_v7 = vld [vmem:[#allocation5 + $0x1c40] sm:$0xff]  ;;  %v11601_v12 = vcombine.high %v1065_v5, %v1069_v6  ;;  %6786 = vmatprep.subr.bf16.mxu1 %v11737_v8  ;;  %6744 = vmatpush1.bf16.msra.mxu0 %v11608_v10  ;;  %v11600_v18 = vcombine.low %v1065_v5, %v1069_v6 }
 0x19c   :  { %v1197_v9 = vld [vmem:[#allocation5 + $0x1c60] sm:$0xff]  ;;  %6787 = vmatpush1.bf16.msra.mxu1 %v11736_v11 }
 0x19d   :  { %v1057_v13 = vld [vmem:[#allocation5 + $0x1800] sm:$0xff]  ;;  %v11729_v16 = vcombine.high %v1193_v7, %v1197_v9  ;;  %6745 = vmatprep.subr.bf16.mxu0 %v11601_v12  ;;  %v11728_v19 = vcombine.low %v1193_v7, %v1197_v9 }
 0x19e   :  { %v1061_v14 = vld [vmem:[#allocation5 + $0x1820] sm:$0xff] }
 0x19f   :  { %v1185_v15 = vld [vmem:[#allocation5 + $0x1c00] sm:$0xff]  ;;  %v11593_v23 = vcombine.high %v1057_v13, %v1061_v14  ;;  %6788 = vmatprep.subr.bf16.mxu1 %v11729_v16  ;;  %6746 = vmatpush1.bf16.msra.mxu0 %v11600_v18  ;;  %v11592_v30 = vcombine.low %v1057_v13, %v1061_v14 }
 0x1a0   :  { %v1189_v17 = vld [vmem:[#allocation5 + $0x1c20] sm:$0xff]  ;;  %6789 = vmatpush1.bf16.msra.mxu1 %v11728_v19 }
 0x1a1   :  { %v1177_v24 = vld [vmem:[#allocation5 + $0x1bc0] sm:$0xff]  ;;  %v11721_v28 = vcombine.high %v1185_v15, %v1189_v17  ;;  %6747 = vmatprep.subr.bf16.mxu0 %v11593_v23  ;;  %v11720_v31 = vcombine.low %v1185_v15, %v1189_v17 }
 0x1a2   :  { %v1181_v26 = vld [vmem:[#allocation5 + $0x1be0] sm:$0xff] }
 0x1a3   :  { %v1305_v27 = vld [vmem:[#allocation5 + $0x1fc0] sm:$0xff]  ;;  %v11713_v35 = vcombine.high %v1177_v24, %v1181_v26  ;;  %6790 = vmatprep.subr.bf16.mxu1 %v11721_v28  ;;  %6748 = vmatpush1.bf16.msra.mxu0 %v11592_v30  ;;  %v11712_v42 = vcombine.low %v1177_v24, %v1181_v26  ;;  %v1315_v28 = vlaneseq }
 0x1a4   :  { %v1309_v29 = vld [vmem:[#allocation5 + $0x1fe0] sm:$0xff]  ;;  %6791 = vmatpush1.bf16.msra.mxu1 %v11720_v31 }
 0x1a5   :  { %v1169_v36 = vld [vmem:[#allocation5 + $0x1b80] sm:$0xff]  ;;  %v11841_v40 = vcombine.high %v1305_v27, %v1309_v29  ;;  %6749 = vmatprep.subr.bf16.mxu0 %v11713_v35  ;;  %v11840_v43 = vcombine.low %v1305_v27, %v1309_v29 }
 0x1a6   :  { %v1173_v38 = vld [vmem:[#allocation5 + $0x1ba0] sm:$0xff] }
 0x1a7   :  { %v1297_v39 = vld [vmem:[#allocation5 + $0x1f80] sm:$0xff]  ;;  %v11705_v44 = vcombine.high %v1169_v36, %v1173_v38  ;;  %6792 = vmatprep.subr.bf16.mxu1 %v11841_v40  ;;  %6750 = vmatpush2.bf16.msra.mxu0 %v11712_v42  ;;  %v11704_v52 = vcombine.low %v1169_v36, %v1173_v38 }
 0x1a8   :  { %v1301_v41 = vld [vmem:[#allocation5 + $0x1fa0] sm:$0xff]  ;;  %6793 = vmatpush2.bf16.msra.mxu1 %v11840_v43 }
 0x1a9   :  { %v1161_v45 = vld [vmem:[#allocation5 + $0x1b40] sm:$0xff]  ;;  %v11833_v50 = vcombine.high %v1297_v39, %v1301_v41  ;;  %6751 = vmatprep.subr.bf16.mxu0 %v11705_v44  ;;  %v11832_v53 = vcombine.low %v1297_v39, %v1301_v41  ;;  %v13419_v41 = vshrl.u32 %v1315_v28, 7  ;;  %v322_v28 = vld [vmem:[#allocation5 + $0x108] sm:$0xff] }
 0x1aa   :  { %v1165_v46 = vld [vmem:[#allocation5 + $0x1b60] sm:$0xff] }
 0x1ab   :  { %v1289_v47 = vld [vmem:[#allocation5 + $0x1f40] sm:$0xff]  ;;  %v11697_v54 = vcombine.high %v1161_v45, %v1165_v46  ;;  %6794 = vmatprep.subr.bf16.mxu1 %v11833_v50  ;;  %6752 = vmatpush2.bf16.msra.mxu0 %v11704_v52  ;;  %v11696_v0 = vcombine.low %v1161_v45, %v1165_v46  ;;  %v346_v45 = vld [vmem:[#allocation5 + $0x1c8] sm:$0xff] }
 0x1ac   :  { %v1293_v51 = vld [vmem:[#allocation5 + $0x1f60] sm:$0xff]  ;;  %6795 = vmatpush2.bf16.msra.mxu1 %v11832_v53  ;;  %v350_v46 = vld [vmem:[#allocation5 + $0x1e8] sm:$0xff] }
 0x1ad   :  { %v1153_v55 = vld [vmem:[#allocation5 + $0x1b00] sm:$0xff]  ;;  %v11825_v60 = vcombine.high %v1289_v47, %v1293_v51  ;;  %6753 = vmatprep.subr.bf16.mxu0 %v11697_v54  ;;  %v11824_v1 = vcombine.low %v1289_v47, %v1293_v51  ;;  %v474_v47 = vld [vmem:[#allocation5 + $0x5c8] sm:$0xff]  ;;  %v13422_v51 = vsub.s32 0, %v13419_v41 }
 0x1ae   :  { %v1157_v56 = vld [vmem:[#allocation5 + $0x1b20] sm:$0xff]  ;;  %v478_v54 = vld [vmem:[#allocation5 + $0x5e8] sm:$0xff] }
 0x1af   :  { %v1281_v57 = vld [vmem:[#allocation5 + $0x1f00] sm:$0xff]  ;;  %v11689_v2 = vcombine.high %v1153_v55, %v1157_v56  ;;  %6796 = vmatprep.subr.bf16.mxu1 %v11825_v60  ;;  %6754 = vmatpush2.bf16.msra.mxu0 %v11696_v0  ;;  %v11688_v8 = vcombine.low %v1153_v55, %v1157_v56  ;;  %13796 = vst [vmem:[#allocation36_spill] sm:$0xff] %v13422_v51  ;;  %v255_v56 = vld [vmem:[#allocation2 + $0x70] sm:$0xff] }
 0x1b0   :  { %v1285_v61 = vld [vmem:[#allocation5 + $0x1f20] sm:$0xff]  ;;  %6797 = vmatpush2.bf16.msra.mxu1 %v11824_v1  ;;  %v10883_v0 = vcombine.high %v346_v45, %v350_v46  ;;  %v338_v1 = vld [vmem:[#allocation5 + $0x188] sm:$0xff] }
 0x1b1   :  { %v1145_v3 = vld [vmem:[#allocation5 + $0x1ac0] sm:$0xff]  ;;  %v11817_v6 = vcombine.high %v1281_v57, %v1285_v61  ;;  %6755 = vmatprep.subr.bf16.mxu0 %v11689_v2  ;;  %v11816_v9 = vcombine.low %v1281_v57, %v1285_v61  ;;  %v271_v57 = vld [vmem:[#allocation2 + $0xf0] sm:$0xff]  ;;  %v342_v2 = vld [vmem:[#allocation5 + $0x1a8] sm:$0xff] }
 0x1b2   :  { %v1149_v4 = vld [vmem:[#allocation5 + $0x1ae0] sm:$0xff] }
 0x1b3   :  { %v1273_v5 = vld [vmem:[#allocation5 + $0x1ec0] sm:$0xff]  ;;  %v11681_v10 = vcombine.high %v1145_v3, %v1149_v4  ;;  %6798 = vmatprep.subr.bf16.mxu1 %v11817_v6  ;;  %6756 = vmatpush2.bf16.msra.mxu0 %v11688_v8  ;;  %v11680_v16 = vcombine.low %v1145_v3, %v1149_v4  ;;  %v466_v3 = vld [vmem:[#allocation5 + $0x588] sm:$0xff]  ;;  %v11011_v4 = vcombine.high %v474_v47, %v478_v54 }
 0x1b4   :  { %v1277_v7 = vld [vmem:[#allocation5 + $0x1ee0] sm:$0xff]  ;;  %6799 = vmatpush2.bf16.msra.mxu1 %v11816_v9  ;;  %v13427_v8 = vpack.c.bf16 %v271_v57, %v255_v56  ;;  %v10882_v9 = vcombine.low %v346_v45, %v350_v46  ;;  %v314_v46 = vld [vmem:[#allocation5 + $0xc8] sm:$0xff] }
 0x1b5   :  { %v1137_v11 = vld [vmem:[#allocation5 + $0x1a80] sm:$0xff]  ;;  %v11809_v14 = vcombine.high %v1273_v5, %v1277_v7  ;;  %6757 = vmatprep.subr.bf16.mxu0 %v11681_v10  ;;  %v11808_v17 = vcombine.low %v1273_v5, %v1277_v7  ;;  %v470_v5 = vld [vmem:[#allocation5 + $0x5a8] sm:$0xff]  ;;  %v11010_v10 = vcombine.low %v474_v47, %v478_v54 }
 0x1b6   :  { %v1141_v12 = vld [vmem:[#allocation5 + $0x1aa0] sm:$0xff]  ;;  %v318_v47 = vld [vmem:[#allocation5 + $0xe8] sm:$0xff] }
 0x1b7   :  { %v1265_v13 = vld [vmem:[#allocation5 + $0x1e80] sm:$0xff]  ;;  %v11673_v18 = vcombine.high %v1137_v11, %v1141_v12  ;;  %6800 = vmatprep.subr.bf16.mxu1 %v11809_v14  ;;  %6758 = vmatpush2.bf16.msra.mxu0 %v11680_v16  ;;  %v11672_v29 = vcombine.low %v1137_v11, %v1141_v12  ;;  %v10875_v11 = vcombine.high %v338_v1, %v342_v2  ;;  %v330_v12 = vld [vmem:[#allocation5 + $0x148] sm:$0xff] }
 0x1b8   :  { %v1269_v15 = vld [vmem:[#allocation5 + $0x1ea0] sm:$0xff]  ;;  %6801 = vmatpush2.bf16.msra.mxu1 %v11808_v17  ;;  %v458_v14 = vld [vmem:[#allocation5 + $0x548] sm:$0xff]  ;;  %v10851_v57 = vcombine.high %v314_v46, %v318_v47 }
 0x1b9   :  { %v1129_v19 = vld [vmem:[#allocation5 + $0x1a40] sm:$0xff]  ;;  %v11801_v26 = vcombine.high %v1265_v13, %v1269_v15  ;;  %6759 = vmatprep.subr.bf16.mxu0 %v11673_v18  ;;  %v11800_v30 = vcombine.low %v1265_v13, %v1269_v15  ;;  %v334_v13 = vld [vmem:[#allocation5 + $0x168] sm:$0xff]  ;;  %v11003_v15 = vcombine.high %v466_v3, %v470_v5 }
 0x1ba   :  { %v1133_v23 = vld [vmem:[#allocation5 + $0x1a60] sm:$0xff]  ;;  %v462_v16 = vld [vmem:[#allocation5 + $0x568] sm:$0xff] }
 0x1bb   :  { %v1257_v24 = vld [vmem:[#allocation5 + $0x1e40] sm:$0xff]  ;;  %v11665_v31 = vcombine.high %v1129_v19, %v1133_v23  ;;  %6802 = vmatprep.subr.bf16.mxu1 %v11801_v26  ;;  %6760 = vmatpush2.bf16.msra.mxu0 %v11672_v29  ;;  %v11664_v42 = vcombine.low %v1129_v19, %v1133_v23  ;;  %v10874_v23 = vcombine.low %v338_v1, %v342_v2  ;;  %v326_v29 = vld [vmem:[#allocation5 + $0x128] sm:$0xff] }
 0x1bc   :  { %v1261_v27 = vld [vmem:[#allocation5 + $0x1e60] sm:$0xff]  ;;  %6803 = vmatpush2.bf16.msra.mxu1 %v11800_v30  ;;  %v11002_v26 = vcombine.low %v466_v3, %v470_v5  ;;  %v450_v30 = vld [vmem:[#allocation5 + $0x508] sm:$0xff]  ;;  %v10859_v45 = vcombine.high %v322_v28, %v326_v29  ;;  %v10850_v3 = vcombine.low %v314_v46, %v318_v47 }
 0x1bd   :  { %v1121_v35 = vld [vmem:[#allocation5 + $0x1a00] sm:$0xff]  ;;  %v11793_v39 = vcombine.high %v1257_v24, %v1261_v27  ;;  %6761 = vmatprep.subr.bf16.mxu0 %v11665_v31  ;;  %v11792_v43 = vcombine.low %v1257_v24, %v1261_v27  ;;  %v10867_v27 = vcombine.high %v330_v12, %v334_v13  ;;  %v446_v54 = vld [vmem:[#allocation5 + $0x4e8] sm:$0xff] }
 0x1be   :  { %v1125_v36 = vld [vmem:[#allocation5 + $0x1a20] sm:$0xff]  ;;  %v438_v2 = vld [vmem:[#allocation5 + $0x4a8] sm:$0xff] }
 0x1bf   :  { %v1249_v38 = vld [vmem:[#allocation5 + $0x1e00] sm:$0xff]  ;;  %v11657_v44 = vcombine.high %v1121_v35, %v1125_v36  ;;  %6804 = vmatprep.subr.bf16.mxu1 %v11793_v39  ;;  %6762 = vmatpush2.bf16.msra.mxu0 %v11664_v42  ;;  %v11656_v60 = vcombine.low %v1121_v35, %v1125_v36  ;;  %v10995_v36 = vcombine.high %v458_v14, %v462_v16  ;;  %v406_v46 = vld [vmem:[#allocation5 + $0x3a8] sm:$0xff] }
 0x1c0   :  { %v1253_v40 = vld [vmem:[#allocation5 + $0x1e20] sm:$0xff]  ;;  %6805 = vmatpush2.bf16.msra.mxu1 %v11792_v43  ;;  %v10866_v42 = vcombine.low %v330_v12, %v334_v13  ;;  %v430_v12 = vld [vmem:[#allocation5 + $0x468] sm:$0xff] }
 0x1c1   :  { %v11785_v50 = vcombine.high %v1249_v38, %v1253_v40  ;;  %v253_v52 = vld [vmem:[#allocation2 + $0x60] sm:$0xff]  ;;  %6763 = vmatprep.subr.bf16.mxu0 %v11657_v44  ;;  %v11784_v61 = vcombine.low %v1249_v38, %v1253_v40  ;;  %v6552_v19 = vpop.f32.mrf.mxu1  ;;  %v454_v38 = vld [vmem:[#allocation5 + $0x528] sm:$0xff]  ;;  %v10994_v44 = vcombine.low %v458_v14, %v462_v16 }
 0x1c2   :  { %v269_v53 = vld [vmem:[#allocation2 + $0xe0] sm:$0xff]  ;;  %v10986_v56 = vcombine.low %v450_v30, %v454_v38  ;;  %v290_v16 = vld [vmem:[#allocation5 + $0x8] sm:$0xff] }
 0x1c3   :  { %v1313_v55 = vld [vmem:[#allocation7] sm:$0xff]  ;;  %6806 = vmatprep.subr.bf16.mxu1 %v11785_v50  ;;  %v13424_v6 = vpack.c.bf16 %v269_v53, %v253_v52  ;;  %6764 = vmatpush2.bf16.msra.mxu0 %v11656_v60  ;;  %v6509_v17 = vpop.f32.mrf.mxu0  ;;  %v13435_v35 = vpop.f32.mrf.mxu1  ;;  %v442_v50 = vld [vmem:[#allocation5 + $0x4c8] sm:$0xff]  ;;  %v10987_v53 = vcombine.high %v450_v30, %v454_v38 }
 0x1c4   :  { %v1318_v7 = vrot.slane %v1313_v55, %v13422_v51  ;;  %6807 = vmatpush2.bf16.msra.mxu1 %v11784_v61  ;;  %6819 = vmatprep.subr.bf16.mxu0 %v10883_v0  ;;  %v10858_v55 = vcombine.low %v322_v28, %v326_v29  ;;  %v306_v60 = vld [vmem:[#allocation5 + $0x88] sm:$0xff]  ;;  %v10979_v1 = vcombine.high %v442_v50, %v446_v54  ;;  %v583_v51 = vld [vmem:[#allocation5 + $0x930] sm:$0xff] }
 0x1c5   :  { %6862 = vmatprep.subr.bf16.mxu1 %v11011_v4  ;;  %v13431_v24 = vpop.f32.mrf.mxu0  ;;  %v6556_v43 = vpop.f32.mrf.mxu1  ;;  %v310_v61 = vld [vmem:[#allocation5 + $0xa8] sm:$0xff]  ;;  %v10978_v4 = vcombine.low %v442_v50, %v446_v54 }
 0x1c6   :  { %6766 = vmatmul.mubr.bf16.vlgmr.msra.gmra.mxu0 %v13424_v6  ;;  %v6510_v18 = vadd.f32 %v6509_v17, %v1318_v7  ;;  %v434_v0 = vld [vmem:[#allocation5 + $0x488] sm:$0xff]  ;;  %v10843_v5 = vcombine.high %v306_v60, %v310_v61  ;;  %v10842_v13 = vcombine.low %v306_v60, %v310_v61 }
 0x1c7   :  { %6809 = vmatmul.mubr.bf16.vlgmr.msra.gmra.mxu1 %v13427_v8  ;;  %6820 = vmatpush1.bf16.msra.mxu0 %v10882_v9  ;;  %v6513_v39 = vpop.f32.mrf.mxu0  ;;  %v302_v9 = vld [vmem:[#allocation5 + $0x68] sm:$0xff]  ;;  %v10970_v14 = vcombine.low %v434_v0, %v438_v2 }
 0x1c8   :  { %6863 = vmatpush1.bf16.msra.mxu1 %v11010_v10  ;;  %6821 = vmatprep.subr.bf16.mxu0 %v10875_v11  ;;  %v13433_v31 = vadd.f32 %v6552_v19, %v6510_v18  ;;  %v6514_v40 = vadd.f32 %v6513_v39, %v1318_v7  ;;  %v298_v7 = vld [vmem:[#allocation5 + $0x48] sm:$0xff]  ;;  %v10971_v11 = vcombine.high %v434_v0, %v438_v2 }
 0x1c9   :  { %6864 = vmatprep.subr.bf16.mxu1 %v11003_v15  ;;  %6851 = vmatprep.mubr.bf16.mxu0 %v13377_v58  ;;  %v426_v10 = vld [vmem:[#allocation5 + $0x448] sm:$0xff]  ;;  %v10835_v15 = vcombine.high %v298_v7, %v302_v9 }
 0x1ca   :  { %6894 = vmatprep.mubr.bf16.mxu1 %v13379_v63  ;;  %v13439_v52 = vadd.f32 %v6556_v43, %v6514_v40  ;;  %v294_v17 = vld [vmem:[#allocation5 + $0x28] sm:$0xff]  ;;  %v10963_v19 = vcombine.high %v426_v10, %v430_v12 }
 0x1cb   :  { %6822 = vmatpush1.bf16.msra.mxu0 %v10874_v23  ;;  %v418_v18 = vld [vmem:[#allocation5 + $0x408] sm:$0xff]  ;;  %v10827_v28 = vcombine.high %v290_v16, %v294_v17  ;;  %v10826_v40 = vcombine.low %v290_v16, %v294_v17 }
 0x1cc   :  { %6865 = vmatpush1.bf16.msra.mxu1 %v11002_v26  ;;  %6823 = vmatprep.subr.bf16.mxu0 %v10867_v27  ;;  %v422_v23 = vld [vmem:[#allocation5 + $0x428] sm:$0xff]  ;;  %v10834_v26 = vcombine.low %v298_v7, %v302_v9  ;;  %v10962_v27 = vcombine.low %v426_v10, %v430_v12 }
 0x1cd   :  { %6866 = vmatprep.subr.bf16.mxu1 %v10995_v36  ;;  %v10955_v29 = vcombine.high %v418_v18, %v422_v23  ;;  %v410_v30 = vld [vmem:[#allocation5 + $0x3c8] sm:$0xff] }
 0x1ce   :  { %v414_v36 = vld [vmem:[#allocation5 + $0x3e8] sm:$0xff] }
 0x1cf   :  { %6824 = vmatpush1.bf16.msra.mxu0 %v10866_v42  ;;  %v538_v38 = vld [vmem:[#allocation5 + $0x7c8] sm:$0xff]  ;;  %v10954_v42 = vcombine.low %v418_v18, %v422_v23  ;;  %v10947_v43 = vcombine.high %v410_v30, %v414_v36 }
 0x1d0   :  { %6867 = vmatpush1.bf16.msra.mxu1 %v10994_v44  ;;  %6825 = vmatprep.subr.bf16.mxu0 %v10859_v45  ;;  %v542_v39 = vld [vmem:[#allocation5 + $0x7e8] sm:$0xff] }
 0x1d1   :  { %6868 = vmatprep.subr.bf16.mxu1 %v10987_v53  ;;  %v11075_v44 = vcombine.high %v538_v38, %v542_v39  ;;  %v402_v45 = vld [vmem:[#allocation5 + $0x388] sm:$0xff]  ;;  %v10946_v53 = vcombine.low %v410_v30, %v414_v36  ;;  %v11074_v54 = vcombine.low %v538_v38, %v542_v39 }
 0x1d2   :  { %v530_v47 = vld [vmem:[#allocation5 + $0x788] sm:$0xff] }
 0x1d3   :  { %6826 = vmatpush1.bf16.msra.mxu0 %v10858_v55  ;;  %v534_v50 = vld [vmem:[#allocation5 + $0x7a8] sm:$0xff]  ;;  %v10939_v55 = vcombine.high %v402_v45, %v406_v46 }
 0x1d4   :  { %6869 = vmatpush1.bf16.msra.mxu1 %v10986_v56  ;;  %6827 = vmatprep.subr.bf16.mxu0 %v10851_v57  ;;  %v11067_v56 = vcombine.high %v530_v47, %v534_v50  ;;  %v394_v57 = vld [vmem:[#allocation5 + $0x348] sm:$0xff]  ;;  %v11066_v2 = vcombine.low %v530_v47, %v534_v50 }
 0x1d5   :  { %6870 = vmatprep.subr.bf16.mxu1 %v10979_v1  ;;  %v398_v60 = vld [vmem:[#allocation5 + $0x368] sm:$0xff]  ;;  %v10938_v1 = vcombine.low %v402_v45, %v406_v46 }
 0x1d6   :  { %v522_v61 = vld [vmem:[#allocation5 + $0x748] sm:$0xff] }
 0x1d7   :  { %6828 = vmatpush1.bf16.msra.mxu0 %v10850_v3  ;;  %v526_v0 = vld [vmem:[#allocation5 + $0x768] sm:$0xff]  ;;  %v10931_v3 = vcombine.high %v394_v57, %v398_v60 }
 0x1d8   :  { %6871 = vmatpush1.bf16.msra.mxu1 %v10978_v4  ;;  %6829 = vmatprep.subr.bf16.mxu0 %v10843_v5  ;;  %v11059_v4 = vcombine.high %v522_v61, %v526_v0  ;;  %v386_v5 = vld [vmem:[#allocation5 + $0x308] sm:$0xff]  ;;  %v11058_v12 = vcombine.low %v522_v61, %v526_v0 }
 0x1d9   :  { %6872 = vmatprep.subr.bf16.mxu1 %v10971_v11  ;;  %v390_v7 = vld [vmem:[#allocation5 + $0x328] sm:$0xff]  ;;  %v10930_v11 = vcombine.low %v394_v57, %v398_v60 }
 0x1da   :  { %v514_v9 = vld [vmem:[#allocation5 + $0x708] sm:$0xff] }
 0x1db   :  { %6830 = vmatpush1.bf16.msra.mxu0 %v10842_v13  ;;  %v518_v10 = vld [vmem:[#allocation5 + $0x728] sm:$0xff]  ;;  %v10923_v13 = vcombine.high %v386_v5, %v390_v7 }
 0x1dc   :  { %6873 = vmatpush1.bf16.msra.mxu1 %v10970_v14  ;;  %6831 = vmatprep.subr.bf16.mxu0 %v10835_v15  ;;  %v11051_v14 = vcombine.high %v514_v9, %v518_v10  ;;  %v378_v15 = vld [vmem:[#allocation5 + $0x2c8] sm:$0xff]  ;;  %v11050_v23 = vcombine.low %v514_v9, %v518_v10 }
 0x1dd   :  { %6874 = vmatprep.subr.bf16.mxu1 %v10963_v19  ;;  %v382_v16 = vld [vmem:[#allocation5 + $0x2e8] sm:$0xff]  ;;  %v10922_v19 = vcombine.low %v386_v5, %v390_v7 }
 0x1de   :  { %v506_v17 = vld [vmem:[#allocation5 + $0x6c8] sm:$0xff]  ;;  %v10914_v38 = vcombine.low %v378_v15, %v382_v16 }
 0x1df   :  { %6832 = vmatpush1.bf16.msra.mxu0 %v10834_v26  ;;  %v510_v18 = vld [vmem:[#allocation5 + $0x6e8] sm:$0xff]  ;;  %v10915_v26 = vcombine.high %v378_v15, %v382_v16 }
 0x1e0   :  { %6875 = vmatpush1.bf16.msra.mxu1 %v10962_v27  ;;  %6833 = vmatprep.subr.bf16.mxu0 %v10827_v28  ;;  %v11043_v27 = vcombine.high %v506_v17, %v510_v18  ;;  %v370_v28 = vld [vmem:[#allocation5 + $0x288] sm:$0xff]  ;;  %v11042_v39 = vcombine.low %v506_v17, %v510_v18  ;;  %v13441_v18 = vpop.f32.mrf.mxu0 }
 0x1e1   :  { %6876 = vmatprep.subr.bf16.mxu1 %v10955_v29  ;;  %v374_v29 = vld [vmem:[#allocation5 + $0x2a8] sm:$0xff] }
 0x1e2   :  { %v498_v30 = vld [vmem:[#allocation5 + $0x688] sm:$0xff]  ;;  %v10906_v47 = vcombine.low %v370_v28, %v374_v29 }
 0x1e3   :  { %6834 = vmatpush1.bf16.msra.mxu0 %v10826_v40  ;;  %v502_v36 = vld [vmem:[#allocation5 + $0x6a8] sm:$0xff]  ;;  %v10907_v40 = vcombine.high %v370_v28, %v374_v29 }
 0x1e4   :  { %6877 = vmatpush1.bf16.msra.mxu1 %v10954_v42  ;;  %6835 = vmatprep.subr.bf16.mxu0 %v10947_v43  ;;  %v11035_v42 = vcombine.high %v498_v30, %v502_v36  ;;  %v362_v43 = vld [vmem:[#allocation5 + $0x248] sm:$0xff]  ;;  %v11034_v50 = vcombine.low %v498_v30, %v502_v36 }
 0x1e5   :  { %6878 = vmatprep.subr.bf16.mxu1 %v11075_v44  ;;  %v366_v44 = vld [vmem:[#allocation5 + $0x268] sm:$0xff] }
 0x1e6   :  { %v490_v45 = vld [vmem:[#allocation5 + $0x648] sm:$0xff]  ;;  %v10898_v61 = vcombine.low %v362_v43, %v366_v44 }
 0x1e7   :  { %6836 = vmatpush2.bf16.msra.mxu0 %v10946_v53  ;;  %v494_v46 = vld [vmem:[#allocation5 + $0x668] sm:$0xff]  ;;  %v10899_v53 = vcombine.high %v362_v43, %v366_v44 }
 0x1e8   :  { %6879 = vmatpush2.bf16.msra.mxu1 %v11074_v54  ;;  %6837 = vmatprep.subr.bf16.mxu0 %v10939_v55  ;;  %v11027_v54 = vcombine.high %v490_v45, %v494_v46  ;;  %v354_v55 = vld [vmem:[#allocation5 + $0x208] sm:$0xff]  ;;  %v11026_v0 = vcombine.low %v490_v45, %v494_v46 }
 0x1e9   :  { %6880 = vmatprep.subr.bf16.mxu1 %v11067_v56  ;;  %v358_v56 = vld [vmem:[#allocation5 + $0x228] sm:$0xff] }
 0x1ea   :  { %v482_v57 = vld [vmem:[#allocation5 + $0x608] sm:$0xff]  ;;  %v10890_v9 = vcombine.low %v354_v55, %v358_v56 }
 0x1eb   :  { %6838 = vmatpush2.bf16.msra.mxu0 %v10938_v1  ;;  %v486_v60 = vld [vmem:[#allocation5 + $0x628] sm:$0xff]  ;;  %v10891_v1 = vcombine.high %v354_v55, %v358_v56 }
 0x1ec   :  { %6881 = vmatpush2.bf16.msra.mxu1 %v11066_v2  ;;  %6839 = vmatprep.subr.bf16.mxu0 %v10931_v3  ;;  %v11019_v2 = vcombine.high %v482_v57, %v486_v60  ;;  %v602_v3 = vld [vmem:[#allocation5 + $0x9c8] sm:$0xff]  ;;  %v11018_v10 = vcombine.low %v482_v57, %v486_v60 }
 0x1ed   :  { %6882 = vmatprep.subr.bf16.mxu1 %v11059_v4  ;;  %v606_v4 = vld [vmem:[#allocation5 + $0x9e8] sm:$0xff] }
 0x1ee   :  { %v730_v5 = vld [vmem:[#allocation5 + $0xdc8] sm:$0xff]  ;;  %v11138_v17 = vcombine.low %v602_v3, %v606_v4 }
 0x1ef   :  { %6840 = vmatpush2.bf16.msra.mxu0 %v10930_v11  ;;  %v734_v7 = vld [vmem:[#allocation5 + $0xde8] sm:$0xff]  ;;  %v11139_v11 = vcombine.high %v602_v3, %v606_v4 }
 0x1f0   :  { %6883 = vmatpush2.bf16.msra.mxu1 %v11058_v12  ;;  %6841 = vmatprep.subr.bf16.mxu0 %v10923_v13  ;;  %v11267_v12 = vcombine.high %v730_v5, %v734_v7  ;;  %v594_v13 = vld [vmem:[#allocation5 + $0x988] sm:$0xff] }
 0x1f1   :  { %6884 = vmatprep.subr.bf16.mxu1 %v11051_v14  ;;  %v598_v14 = vld [vmem:[#allocation5 + $0x9a8] sm:$0xff] }
 0x1f2   :  { %v722_v15 = vld [vmem:[#allocation5 + $0xd88] sm:$0xff] }
 0x1f3   :  { %6842 = vmatpush2.bf16.msra.mxu0 %v10922_v19  ;;  %v726_v16 = vld [vmem:[#allocation5 + $0xda8] sm:$0xff]  ;;  %v11266_v19 = vcombine.low %v730_v5, %v734_v7 }
 0x1f4   :  { %6885 = vmatpush2.bf16.msra.mxu1 %v11050_v23  ;;  %6843 = vmatprep.subr.bf16.mxu0 %v10915_v26  ;;  %v11131_v23 = vcombine.high %v594_v13, %v598_v14  ;;  %v13443_v26 = vpop.f32.mrf.mxu1  ;;  %v586_v28 = vld [vmem:[#allocation5 + $0x948] sm:$0xff]  ;;  %v11258_v44 = vcombine.low %v722_v15, %v726_v16 }
 0x1f5   :  { %6886 = vmatprep.subr.bf16.mxu1 %v11043_v27  ;;  %v11259_v27 = vcombine.high %v722_v15, %v726_v16  ;;  %v590_v29 = vld [vmem:[#allocation5 + $0x968] sm:$0xff] }
 0x1f6   :  { %v714_v36 = vld [vmem:[#allocation5 + $0xd48] sm:$0xff]  ;;  %v11123_v45 = vcombine.high %v586_v28, %v590_v29  ;;  %v11122_v60 = vcombine.low %v586_v28, %v590_v29 }
 0x1f7   :  { %6844 = vmatpush2.bf16.msra.mxu0 %v10914_v38  ;;  %v718_v38 = vld [vmem:[#allocation5 + $0xd68] sm:$0xff] }
 0x1f8   :  { %6887 = vmatpush2.bf16.msra.mxu1 %v11042_v39  ;;  %6845 = vmatprep.subr.bf16.mxu0 %v10907_v40  ;;  %v706_v55 = vld [vmem:[#allocation5 + $0xd08] sm:$0xff] }
 0x1f9   :  { %6888 = vmatprep.subr.bf16.mxu1 %v11035_v42  ;;  %v11130_v42 = vcombine.low %v594_v13, %v598_v14  ;;  %v710_v56 = vld [vmem:[#allocation5 + $0xd28] sm:$0xff] }
 0x1fa   :  { %v11243_v3 = vcombine.high %v706_v55, %v710_v56  ;;  %v570_v4 = vld [vmem:[#allocation5 + $0x8c8] sm:$0xff] }
 0x1fb   :  { %6846 = vmatpush2.bf16.msra.mxu0 %v10906_v47  ;;  %v574_v5 = vld [vmem:[#allocation5 + $0x8e8] sm:$0xff] }
 0x1fc   :  { %6889 = vmatpush2.bf16.msra.mxu1 %v11034_v50  ;;  %6847 = vmatprep.subr.bf16.mxu0 %v10899_v53  ;;  %v11251_v50 = vcombine.high %v714_v36, %v718_v38  ;;  %v578_v53 = vld [vmem:[#allocation5 + $0x908] sm:$0xff] }
 0x1fd   :  { %6890 = vmatprep.subr.bf16.mxu1 %v11027_v54  ;;  %v582_v54 = vld [vmem:[#allocation5 + $0x928] sm:$0xff] }
 0x1fe   :  { %v698_v7 = vld [vmem:[#allocation5 + $0xcc8] sm:$0xff] }
 0x1ff   :  { %6848 = vmatpush2.bf16.msra.mxu0 %v10898_v61  ;;  %v562_v13 = vld [vmem:[#allocation5 + $0x888] sm:$0xff] }
 0x200   :  { %6891 = vmatpush2.bf16.msra.mxu1 %v11026_v0  ;;  %6849 = vmatprep.subr.bf16.mxu0 %v10891_v1  ;;  %v11250_v0 = vcombine.low %v714_v36, %v718_v38  ;;  %v11115_v1 = vcombine.high %v578_v53, %v582_v54  ;;  %v566_v14 = vld [vmem:[#allocation5 + $0x8a8] sm:$0xff] }
 0x201   :  { %6892 = vmatprep.subr.bf16.mxu1 %v11019_v2  ;;  %v690_v15 = vld [vmem:[#allocation5 + $0xc88] sm:$0xff]  ;;  %v11098_v38 = vcombine.low %v562_v13, %v566_v14 }
 0x202   :  { %v694_v16 = vld [vmem:[#allocation5 + $0xca8] sm:$0xff] }
 0x203   :  { %6850 = vmatpush2.bf16.msra.mxu0 %v10890_v9  ;;  %v6638_v40 = vpop.f32.mrf.mxu1  ;;  %v702_v9 = vld [vmem:[#allocation5 + $0xce8] sm:$0xff] }
 0x204   :  { %6893 = vmatpush2.bf16.msra.mxu1 %v11018_v10  ;;  %6905 = vmatprep.subr.bf16.mxu0 %v11139_v11  ;;  %v6595_v30 = vpop.f32.mrf.mxu0  ;;  %v11114_v10 = vcombine.low %v578_v53, %v582_v54  ;;  %v11107_v11 = vcombine.high %v570_v4, %v574_v5  ;;  %v554_v28 = vld [vmem:[#allocation5 + $0x848] sm:$0xff] }
 0x205   :  { %6948 = vmatprep.subr.bf16.mxu1 %v11267_v12  ;;  %v6596_v39 = vadd.f32 %v6595_v30, %v13433_v31  ;;  %v13452_v47 = vpop.f32.mrf.mxu1  ;;  %v11235_v12 = vcombine.high %v698_v7, %v702_v9  ;;  %v558_v29 = vld [vmem:[#allocation5 + $0x868] sm:$0xff] }
 0x206   :  { %6852 = vmatmul.mubr.bf16.vlgmr.msra.gmra.mxu0 %v13383_v21  ;;  %v13448_v43 = vpop.f32.mrf.mxu0  ;;  %v682_v30 = vld [vmem:[#allocation5 + $0xc48] sm:$0xff]  ;;  %v11090_v54 = vcombine.low %v554_v28, %v558_v29 }
 0x207   :  { %6895 = vmatmul.mubr.bf16.vlgmr.msra.gmra.mxu1 %v13385_v25  ;;  %6906 = vmatpush1.bf16.msra.mxu0 %v11138_v17  ;;  %v13450_v46 = vadd.f32 %v6638_v40, %v6596_v39  ;;  %v6642_v61 = vpop.f32.mrf.mxu1  ;;  %v11106_v17 = vcombine.low %v570_v4, %v574_v5  ;;  %v686_v36 = vld [vmem:[#allocation5 + $0xc68] sm:$0xff]  ;;  %v11226_v39 = vcombine.low %v690_v15, %v694_v16 }
 0x208   :  { %6949 = vmatpush1.bf16.msra.mxu1 %v11266_v19  ;;  %6907 = vmatprep.subr.bf16.mxu0 %v11131_v23  ;;  %v6599_v31 = vpop.f32.mrf.mxu0  ;;  %v11234_v19 = vcombine.low %v698_v7, %v702_v9  ;;  %v11099_v23 = vcombine.high %v562_v13, %v566_v14  ;;  %v11091_v40 = vcombine.high %v554_v28, %v558_v29  ;;  %v678_v53 = vld [vmem:[#allocation5 + $0xc28] sm:$0xff] }
 0x209   :  { %6950 = vmatprep.subr.bf16.mxu1 %v11259_v27  ;;  %6937 = vmatprep.mubr.bf16.mxu0 %v13387_v34  ;;  %v6600_v57 = vadd.f32 %v6599_v31, %v13439_v52  ;;  %v11242_v52 = vcombine.low %v706_v55, %v710_v56  ;;  %v11227_v27 = vcombine.high %v690_v15, %v694_v16  ;;  %v658_v7 = vld [vmem:[#allocation5 + $0xb88] sm:$0xff] }
 0x20a   :  { %6980 = vmatprep.mubr.bf16.mxu1 %v13390_v37  ;;  %v11218_v31 = vcombine.low %v682_v30, %v686_v36  ;;  %v662_v9 = vld [vmem:[#allocation5 + $0xba8] sm:$0xff] }
 0x20b   :  { %6908 = vmatpush1.bf16.msra.mxu0 %v11130_v42  ;;  %v13457_v2 = vadd.f32 %v6642_v61, %v6600_v57  ;;  %v11219_v42 = vcombine.high %v682_v30, %v686_v36  ;;  %v666_v57 = vld [vmem:[#allocation5 + $0xbc8] sm:$0xff]  ;;  %v11195_v13 = vcombine.high %v658_v7, %v662_v9 }
 0x20c   :  { %6951 = vmatpush1.bf16.msra.mxu1 %v11258_v44  ;;  %6909 = vmatprep.subr.bf16.mxu0 %v11123_v45  ;;  %v546_v44 = vld [vmem:[#allocation5 + $0x808] sm:$0xff] }
 0x20d   :  { %6952 = vmatprep.subr.bf16.mxu1 %v11251_v50  ;;  %v550_v45 = vld [vmem:[#allocation5 + $0x828] sm:$0xff] }
 0x20e   :  { %v674_v50 = vld [vmem:[#allocation5 + $0xc08] sm:$0xff]  ;;  %v11083_v55 = vcombine.high %v546_v44, %v550_v45 }
 0x20f   :  { %6910 = vmatpush1.bf16.msra.mxu0 %v11122_v60  ;;  %v11211_v56 = vcombine.high %v674_v50, %v678_v53  ;;  %v670_v60 = vld [vmem:[#allocation5 + $0xbe8] sm:$0xff] }
 0x210   :  { %6953 = vmatpush1.bf16.msra.mxu1 %v11250_v0  ;;  %6911 = vmatprep.subr.bf16.mxu0 %v11115_v1  ;;  %v794_v61 = vld [vmem:[#allocation5 + $0xfc8] sm:$0xff]  ;;  %v11082_v1 = vcombine.low %v546_v44, %v550_v45  ;;  %v11203_v4 = vcombine.high %v666_v57, %v670_v60 }
 0x211   :  { %6954 = vmatprep.subr.bf16.mxu1 %v11243_v3  ;;  %v798_v0 = vld [vmem:[#allocation5 + $0xfe8] sm:$0xff]  ;;  %v11210_v3 = vcombine.low %v674_v50, %v678_v53 }
 0x212   :  { %v11331_v5 = vcombine.high %v794_v61, %v798_v0  ;;  %v650_v15 = vld [vmem:[#allocation5 + $0xb48] sm:$0xff] }
 0x213   :  { %6912 = vmatpush1.bf16.msra.mxu0 %v11114_v10  ;;  %v786_v10 = vld [vmem:[#allocation5 + $0xf88] sm:$0xff] }
 0x214   :  { %6955 = vmatpush1.bf16.msra.mxu1 %v11242_v52  ;;  %6913 = vmatprep.subr.bf16.mxu0 %v11107_v11  ;;  %v790_v52 = vld [vmem:[#allocation5 + $0xfa8] sm:$0xff]  ;;  %v11202_v11 = vcombine.low %v666_v57, %v670_v60 }
 0x215   :  { %6956 = vmatprep.subr.bf16.mxu1 %v11235_v12  ;;  %v11330_v12 = vcombine.low %v794_v61, %v798_v0  ;;  %v11323_v14 = vcombine.high %v786_v10, %v790_v52  ;;  %v654_v16 = vld [vmem:[#allocation5 + $0xb68] sm:$0xff] }
 0x216   :  { %v11187_v28 = vcombine.high %v650_v15, %v654_v16  ;;  %v642_v30 = vld [vmem:[#allocation5 + $0xb08] sm:$0xff] }
 0x217   :  { %6914 = vmatpush1.bf16.msra.mxu0 %v11106_v17  ;;  %v778_v17 = vld [vmem:[#allocation5 + $0xf48] sm:$0xff] }
 0x218   :  { %6957 = vmatpush1.bf16.msra.mxu1 %v11234_v19  ;;  %6915 = vmatprep.subr.bf16.mxu0 %v11099_v23  ;;  %v782_v19 = vld [vmem:[#allocation5 + $0xf68] sm:$0xff]  ;;  %v11194_v23 = vcombine.low %v658_v7, %v662_v9 }
 0x219   :  { %6958 = vmatprep.subr.bf16.mxu1 %v11227_v27  ;;  %v11322_v27 = vcombine.low %v786_v10, %v790_v52  ;;  %v11315_v29 = vcombine.high %v778_v17, %v782_v19  ;;  %v646_v36 = vld [vmem:[#allocation5 + $0xb28] sm:$0xff] }
 0x21a   :  { %v11179_v44 = vcombine.high %v642_v30, %v646_v36  ;;  %v634_v50 = vld [vmem:[#allocation5 + $0xac8] sm:$0xff] }
 0x21b   :  { %6916 = vmatpush1.bf16.msra.mxu0 %v11098_v38  ;;  %v770_v38 = vld [vmem:[#allocation5 + $0xf08] sm:$0xff] }
 0x21c   :  { %6959 = vmatpush1.bf16.msra.mxu1 %v11226_v39  ;;  %6917 = vmatprep.subr.bf16.mxu0 %v11091_v40  ;;  %v774_v39 = vld [vmem:[#allocation5 + $0xf28] sm:$0xff]  ;;  %v11186_v40 = vcombine.low %v650_v15, %v654_v16 }
 0x21d   :  { %6960 = vmatprep.subr.bf16.mxu1 %v11219_v42  ;;  %v11314_v42 = vcombine.low %v778_v17, %v782_v19  ;;  %v11307_v45 = vcombine.high %v770_v38, %v774_v39  ;;  %v638_v53 = vld [vmem:[#allocation5 + $0xae8] sm:$0xff] }
 0x21e   :  { %v11171_v57 = vcombine.high %v634_v50, %v638_v53  ;;  %v626_v61 = vld [vmem:[#allocation5 + $0xa88] sm:$0xff] }
 0x21f   :  { %6918 = vmatpush1.bf16.msra.mxu0 %v11090_v54  ;;  %v762_v54 = vld [vmem:[#allocation5 + $0xec8] sm:$0xff] }
 0x220   :  { %6961 = vmatpush1.bf16.msra.mxu1 %v11218_v31  ;;  %6919 = vmatprep.subr.bf16.mxu0 %v11083_v55  ;;  %v766_v31 = vld [vmem:[#allocation5 + $0xee8] sm:$0xff]  ;;  %v11178_v55 = vcombine.low %v642_v30, %v646_v36 }
 0x221   :  { %6962 = vmatprep.subr.bf16.mxu1 %v11211_v56  ;;  %v11306_v56 = vcombine.low %v770_v38, %v774_v39  ;;  %v11299_v60 = vcombine.high %v762_v54, %v766_v31  ;;  %v630_v0 = vld [vmem:[#allocation5 + $0xaa8] sm:$0xff] }
 0x222   :  { %v11163_v7 = vcombine.high %v626_v61, %v630_v0  ;;  %v618_v10 = vld [vmem:[#allocation5 + $0xa48] sm:$0xff] }
 0x223   :  { %6920 = vmatpush1.bf16.msra.mxu0 %v11082_v1  ;;  %v754_v1 = vld [vmem:[#allocation5 + $0xe88] sm:$0xff] }
 0x224   :  { %6963 = vmatpush1.bf16.msra.mxu1 %v11210_v3  ;;  %6921 = vmatprep.subr.bf16.mxu0 %v11203_v4  ;;  %v758_v3 = vld [vmem:[#allocation5 + $0xea8] sm:$0xff]  ;;  %v11170_v4 = vcombine.low %v634_v50, %v638_v53 }
 0x225   :  { %6964 = vmatprep.subr.bf16.mxu1 %v11331_v5  ;;  %v11298_v5 = vcombine.low %v762_v54, %v766_v31  ;;  %v11291_v9 = vcombine.high %v754_v1, %v758_v3  ;;  %v622_v52 = vld [vmem:[#allocation5 + $0xa68] sm:$0xff] }
 0x226   :  { %v11155_v15 = vcombine.high %v618_v10, %v622_v52  ;;  %v610_v17 = vld [vmem:[#allocation5 + $0xa08] sm:$0xff] }
 0x227   :  { %6922 = vmatpush2.bf16.msra.mxu0 %v11202_v11  ;;  %v746_v11 = vld [vmem:[#allocation5 + $0xe48] sm:$0xff] }
 0x228   :  { %6965 = vmatpush2.bf16.msra.mxu1 %v11330_v12  ;;  %6923 = vmatprep.subr.bf16.mxu0 %v11195_v13  ;;  %v750_v12 = vld [vmem:[#allocation5 + $0xe68] sm:$0xff]  ;;  %v11162_v13 = vcombine.low %v626_v61, %v630_v0 }
 0x229   :  { %6966 = vmatprep.subr.bf16.mxu1 %v11323_v14  ;;  %v11290_v14 = vcombine.low %v754_v1, %v758_v3  ;;  %v11283_v16 = vcombine.high %v746_v11, %v750_v12  ;;  %v614_v19 = vld [vmem:[#allocation5 + $0xa28] sm:$0xff]  ;;  %v13461_v1 = vpop.f32.mrf.mxu1 }
 0x22a   :  { %v11147_v30 = vcombine.high %v610_v17, %v614_v19  ;;  %v858_v38 = vld [vmem:[#allocation5 + $0x11c8] sm:$0xff] }
 0x22b   :  { %6924 = vmatpush2.bf16.msra.mxu0 %v11194_v23  ;;  %v738_v23 = vld [vmem:[#allocation5 + $0xe08] sm:$0xff] }
 0x22c   :  { %6967 = vmatpush2.bf16.msra.mxu1 %v11322_v27  ;;  %6925 = vmatprep.subr.bf16.mxu0 %v11187_v28  ;;  %v742_v27 = vld [vmem:[#allocation5 + $0xe28] sm:$0xff]  ;;  %v11154_v28 = vcombine.low %v618_v10, %v622_v52 }
 0x22d   :  { %6968 = vmatprep.subr.bf16.mxu1 %v11315_v29  ;;  %v11282_v29 = vcombine.low %v746_v11, %v750_v12  ;;  %v11275_v36 = vcombine.high %v738_v23, %v742_v27  ;;  %v862_v39 = vld [vmem:[#allocation5 + $0x11e8] sm:$0xff] }
 0x22e   :  { %v11395_v50 = vcombine.high %v858_v38, %v862_v39  ;;  %v850_v54 = vld [vmem:[#allocation5 + $0x1188] sm:$0xff] }
 0x22f   :  { %6926 = vmatpush2.bf16.msra.mxu0 %v11186_v40  ;;  %v986_v40 = vld [vmem:[#allocation5 + $0x15c8] sm:$0xff] }
 0x230   :  { %6969 = vmatpush2.bf16.msra.mxu1 %v11314_v42  ;;  %6927 = vmatprep.subr.bf16.mxu0 %v11179_v44  ;;  %v990_v42 = vld [vmem:[#allocation5 + $0x15e8] sm:$0xff]  ;;  %v11146_v44 = vcombine.low %v610_v17, %v614_v19 }
 0x231   :  { %6970 = vmatprep.subr.bf16.mxu1 %v11307_v45  ;;  %v11274_v45 = vcombine.low %v738_v23, %v742_v27  ;;  %v11523_v53 = vcombine.high %v986_v40, %v990_v42  ;;  %v854_v31 = vld [vmem:[#allocation5 + $0x11a8] sm:$0xff]  ;;  %v11522_v61 = vcombine.low %v986_v40, %v990_v42 }
 0x232   :  { %v11387_v0 = vcombine.high %v850_v54, %v854_v31  ;;  %v974_v10 = vld [vmem:[#allocation5 + $0x1568] sm:$0xff]  ;;  %v11386_v12 = vcombine.low %v850_v54, %v854_v31 }
 0x233   :  { %6928 = vmatpush2.bf16.msra.mxu0 %v11178_v55  ;;  %v978_v55 = vld [vmem:[#allocation5 + $0x1588] sm:$0xff] }
 0x234   :  { %6971 = vmatpush2.bf16.msra.mxu1 %v11306_v56  ;;  %6929 = vmatprep.subr.bf16.mxu0 %v11171_v57  ;;  %v982_v56 = vld [vmem:[#allocation5 + $0x15a8] sm:$0xff]  ;;  %v11394_v57 = vcombine.low %v858_v38, %v862_v39 }
 0x235   :  { %6972 = vmatprep.subr.bf16.mxu1 %v11299_v60  ;;  %v13459_v60 = vpop.f32.mrf.mxu0  ;;  %v11515_v3 = vcombine.high %v978_v55, %v982_v56  ;;  %v834_v23 = vld [vmem:[#allocation5 + $0x1108] sm:$0xff] }
 0x236   :  { %v838_v27 = vld [vmem:[#allocation5 + $0x1128] sm:$0xff] }
 0x237   :  { %6930 = vmatpush2.bf16.msra.mxu0 %v11170_v4  ;;  %v842_v4 = vld [vmem:[#allocation5 + $0x1148] sm:$0xff]  ;;  %v11371_v40 = vcombine.high %v834_v23, %v838_v27  ;;  %v11370_v31 = vcombine.low %v834_v23, %v838_v27 }
 0x238   :  { %6973 = vmatpush2.bf16.msra.mxu1 %v11298_v5  ;;  %6931 = vmatprep.subr.bf16.mxu0 %v11163_v7  ;;  %v846_v5 = vld [vmem:[#allocation5 + $0x1168] sm:$0xff] }
 0x239   :  { %6974 = vmatprep.subr.bf16.mxu1 %v11291_v9  ;;  %v970_v9 = vld [vmem:[#allocation5 + $0x1548] sm:$0xff] }
 0x23a   :  { %v11507_v19 = vcombine.high %v970_v9, %v974_v10  ;;  %v11506_v39 = vcombine.low %v970_v9, %v974_v10  ;;  %v958_v54 = vld [vmem:[#allocation5 + $0x14e8] sm:$0xff] }
 0x23b   :  { %6932 = vmatpush2.bf16.msra.mxu0 %v11162_v13  ;;  %v810_v10 = vld [vmem:[#allocation5 + $0x1048] sm:$0xff] }
 0x23c   :  { %6975 = vmatpush2.bf16.msra.mxu1 %v11290_v14  ;;  %6933 = vmatprep.subr.bf16.mxu0 %v11155_v15  ;;  %v11514_v14 = vcombine.low %v978_v55, %v982_v56  ;;  %v11379_v15 = vcombine.high %v842_v4, %v846_v5  ;;  %v802_v27 = vld [vmem:[#allocation5 + $0x1008] sm:$0xff] }
 0x23d   :  { %6976 = vmatprep.subr.bf16.mxu1 %v11283_v16 }
 0x23f   :  { %6934 = vmatpush2.bf16.msra.mxu0 %v11154_v28  ;;  %v962_v28 = vld [vmem:[#allocation5 + $0x1508] sm:$0xff] }
 0x240   :  { %6977 = vmatpush2.bf16.msra.mxu1 %v11282_v29  ;;  %6935 = vmatprep.subr.bf16.mxu0 %v11147_v30  ;;  %v966_v29 = vld [vmem:[#allocation5 + $0x1528] sm:$0xff] }
 0x241   :  { %6978 = vmatprep.subr.bf16.mxu1 %v11275_v36  ;;  %v11378_v36 = vcombine.low %v842_v4, %v846_v5 }
 0x243   :  { %6936 = vmatpush2.bf16.msra.mxu0 %v11146_v44  ;;  %v11499_v44 = vcombine.high %v962_v28, %v966_v29 }
 0x244   :  { %6979 = vmatpush2.bf16.msra.mxu1 %v11274_v45  ;;  %6991 = vmatprep.subr.bf16.mxu0 %v11395_v50  ;;  %v826_v45 = vld [vmem:[#allocation5 + $0x10c8] sm:$0xff] }
 0x245   :  { %7034 = vmatprep.subr.bf16.mxu1 %v11523_v53  ;;  %v6724_v11 = vpop.f32.mrf.mxu1  ;;  %v830_v50 = vld [vmem:[#allocation5 + $0x10e8] sm:$0xff] }
 0x246   :  { %v6681_v7 = vpop.f32.mrf.mxu0  ;;  %6938 = vmatmul.mubr.bf16.vlgmr.msra.gmra.mxu0 %v13395_v48  ;;  %v954_v53 = vld [vmem:[#allocation5 + $0x14c8] sm:$0xff]  ;;  %v11363_v55 = vcombine.high %v826_v45, %v830_v50  ;;  %v11362_v4 = vcombine.low %v826_v45, %v830_v50 }
 0x247   :  { %v6682_v52 = vadd.f32 %v6681_v7, %v13450_v46  ;;  %6981 = vmatmul.mubr.bf16.vlgmr.msra.gmra.mxu1 %v13397_v49  ;;  %6992 = vmatpush1.bf16.msra.mxu0 %v11394_v57  ;;  %v13470_v17 = vpop.f32.mrf.mxu1  ;;  %v11491_v56 = vcombine.high %v954_v53, %v958_v54  ;;  %v818_v57 = vld [vmem:[#allocation5 + $0x1088] sm:$0xff]  ;;  %v11490_v5 = vcombine.low %v954_v53, %v958_v54 }
 0x248   :  { %7035 = vmatpush1.bf16.msra.mxu1 %v11522_v61  ;;  %v13466_v13 = vpop.f32.mrf.mxu0  ;;  %6993 = vmatprep.subr.bf16.mxu0 %v11387_v0  ;;  %13798 = vst [vmem:[#allocation38_spill] sm:$0xff] %v13470_v17  ;;  %v822_v61 = vld [vmem:[#allocation5 + $0x10a8] sm:$0xff] }
 0x249   :  { %13797 = vst [vmem:[#allocation37_spill] sm:$0xff] %v13466_v13  ;;  %v13468_v16 = vadd.f32 %v6724_v11, %v6682_v52  ;;  %7036 = vmatprep.subr.bf16.mxu1 %v11515_v3  ;;  %7023 = vmatprep.mubr.bf16.mxu0 %v13399_v59  ;;  %v6728_v38 = vpop.f32.mrf.mxu1  ;;  %v946_v0 = vld [vmem:[#allocation5 + $0x1488] sm:$0xff]  ;;  %v11355_v7 = vcombine.high %v818_v57, %v822_v61 }
 0x24a   :  { %v6685_v46 = vpop.f32.mrf.mxu0  ;;  %7066 = vmatprep.mubr.bf16.mxu1 %v13402_v62  ;;  %v950_v3 = vld [vmem:[#allocation5 + $0x14a8] sm:$0xff] }
 0x24b   :  { %v6686_v30 = vadd.f32 %v6685_v46, %v13457_v2  ;;  %6994 = vmatpush1.bf16.msra.mxu0 %v11386_v12  ;;  %v11498_v2 = vcombine.low %v962_v28, %v966_v29  ;;  %v11483_v9 = vcombine.high %v946_v0, %v950_v3  ;;  %v814_v52 = vld [vmem:[#allocation5 + $0x1068] sm:$0xff] }
 0x24c   :  { %7037 = vmatpush1.bf16.msra.mxu1 %v11514_v14  ;;  %6995 = vmatprep.subr.bf16.mxu0 %v11379_v15  ;;  %v938_v11 = vld [vmem:[#allocation5 + $0x1448] sm:$0xff]  ;;  %v11354_v14 = vcombine.low %v818_v57, %v822_v61  ;;  %v11482_v15 = vcombine.low %v946_v0, %v950_v3 }
 0x24d   :  { %v13475_v42 = vadd.f32 %v6728_v38, %v6686_v30  ;;  %7038 = vmatprep.subr.bf16.mxu1 %v11507_v19  ;;  %v942_v12 = vld [vmem:[#allocation5 + $0x1468] sm:$0xff]  ;;  %v11347_v19 = vcombine.high %v810_v10, %v814_v52  ;;  %v11346_v30 = vcombine.low %v810_v10, %v814_v52 }
 0x24e   :  { %v11475_v23 = vcombine.high %v938_v11, %v942_v12  ;;  %v806_v46 = vld [vmem:[#allocation5 + $0x1028] sm:$0xff] }
 0x24f   :  { %6996 = vmatpush1.bf16.msra.mxu0 %v11378_v36  ;;  %v930_v28 = vld [vmem:[#allocation5 + $0x1408] sm:$0xff]  ;;  %v11474_v36 = vcombine.low %v938_v11, %v942_v12  ;;  %v11339_v38 = vcombine.high %v802_v27, %v806_v46  ;;  %v11338_v53 = vcombine.low %v802_v27, %v806_v46 }
 0x250   :  { %7039 = vmatpush1.bf16.msra.mxu1 %v11506_v39  ;;  %6997 = vmatprep.subr.bf16.mxu0 %v11371_v40  ;;  %v934_v29 = vld [vmem:[#allocation5 + $0x1428] sm:$0xff] }
 0x251   :  { %7040 = vmatprep.subr.bf16.mxu1 %v11499_v44  ;;  %v11467_v39 = vcombine.high %v930_v28, %v934_v29  ;;  %v922_v40 = vld [vmem:[#allocation5 + $0x13c8] sm:$0xff]  ;;  %v11466_v54 = vcombine.low %v930_v28, %v934_v29 }
 0x252   :  { %v926_v44 = vld [vmem:[#allocation5 + $0x13e8] sm:$0xff] }
 0x253   :  { %6998 = vmatpush1.bf16.msra.mxu0 %v11370_v31  ;;  %v1050_v45 = vld [vmem:[#allocation5 + $0x17c8] sm:$0xff]  ;;  %v11459_v31 = vcombine.high %v922_v40, %v926_v44  ;;  %v11458_v0 = vcombine.low %v922_v40, %v926_v44 }
 0x254   :  { %7041 = vmatpush1.bf16.msra.mxu1 %v11498_v2  ;;  %6999 = vmatprep.subr.bf16.mxu0 %v11363_v55  ;;  %v1054_v50 = vld [vmem:[#allocation5 + $0x17e8] sm:$0xff] }
 0x255   :  { %7042 = vmatprep.subr.bf16.mxu1 %v11491_v56  ;;  %v11587_v2 = vcombine.high %v1050_v45, %v1054_v50  ;;  %v914_v55 = vld [vmem:[#allocation5 + $0x1388] sm:$0xff]  ;;  %v11586_v3 = vcombine.low %v1050_v45, %v1054_v50 }
 0x256   :  { %v918_v56 = vld [vmem:[#allocation5 + $0x13a8] sm:$0xff] }
 0x257   :  { %7000 = vmatpush1.bf16.msra.mxu0 %v11362_v4  ;;  %v1042_v57 = vld [vmem:[#allocation5 + $0x1788] sm:$0xff]  ;;  %v11451_v4 = vcombine.high %v914_v55, %v918_v56  ;;  %v11450_v11 = vcombine.low %v914_v55, %v918_v56 }
 0x258   :  { %7043 = vmatpush1.bf16.msra.mxu1 %v11490_v5  ;;  %7001 = vmatprep.subr.bf16.mxu0 %v11355_v7  ;;  %v1046_v61 = vld [vmem:[#allocation5 + $0x17a8] sm:$0xff] }
 0x259   :  { %7044 = vmatprep.subr.bf16.mxu1 %v11483_v9  ;;  %v11579_v5 = vcombine.high %v1042_v57, %v1046_v61  ;;  %v906_v7 = vld [vmem:[#allocation5 + $0x1348] sm:$0xff]  ;;  %v11578_v12 = vcombine.low %v1042_v57, %v1046_v61 }
 0x25a   :  { %v910_v9 = vld [vmem:[#allocation5 + $0x1368] sm:$0xff] }
 0x25b   :  { %7002 = vmatpush1.bf16.msra.mxu0 %v11354_v14  ;;  %v1034_v10 = vld [vmem:[#allocation5 + $0x1748] sm:$0xff]  ;;  %v11443_v14 = vcombine.high %v906_v7, %v910_v9  ;;  %v11442_v28 = vcombine.low %v906_v7, %v910_v9 }
 0x25c   :  { %7045 = vmatpush1.bf16.msra.mxu1 %v11482_v15  ;;  %7003 = vmatprep.subr.bf16.mxu0 %v11347_v19  ;;  %v1038_v52 = vld [vmem:[#allocation5 + $0x1768] sm:$0xff] }
 0x25d   :  { %7046 = vmatprep.subr.bf16.mxu1 %v11475_v23  ;;  %v11571_v15 = vcombine.high %v1034_v10, %v1038_v52  ;;  %v898_v19 = vld [vmem:[#allocation5 + $0x1308] sm:$0xff]  ;;  %v11570_v29 = vcombine.low %v1034_v10, %v1038_v52 }
 0x25e   :  { %v902_v23 = vld [vmem:[#allocation5 + $0x1328] sm:$0xff] }
 0x25f   :  { %7004 = vmatpush1.bf16.msra.mxu0 %v11346_v30  ;;  %v1026_v27 = vld [vmem:[#allocation5 + $0x1708] sm:$0xff]  ;;  %v11435_v30 = vcombine.high %v898_v19, %v902_v23  ;;  %v11434_v45 = vcombine.low %v898_v19, %v902_v23 }
 0x260   :  { %7047 = vmatpush1.bf16.msra.mxu1 %v11474_v36  ;;  %7005 = vmatprep.subr.bf16.mxu0 %v11339_v38  ;;  %v1030_v46 = vld [vmem:[#allocation5 + $0x1728] sm:$0xff] }
 0x261   :  { %7048 = vmatprep.subr.bf16.mxu1 %v11467_v39  ;;  %v11563_v36 = vcombine.high %v1026_v27, %v1030_v46  ;;  %v890_v38 = vld [vmem:[#allocation5 + $0x12c8] sm:$0xff]  ;;  %v11562_v50 = vcombine.low %v1026_v27, %v1030_v46 }
 0x262   :  { %v894_v39 = vld [vmem:[#allocation5 + $0x12e8] sm:$0xff] }
 0x263   :  { %7006 = vmatpush1.bf16.msra.mxu0 %v11338_v53  ;;  %v1018_v40 = vld [vmem:[#allocation5 + $0x16c8] sm:$0xff]  ;;  %v11427_v53 = vcombine.high %v890_v38, %v894_v39  ;;  %v11426_v57 = vcombine.low %v890_v38, %v894_v39 }
 0x264   :  { %7049 = vmatpush1.bf16.msra.mxu1 %v11466_v54  ;;  %7007 = vmatprep.subr.bf16.mxu0 %v11459_v31  ;;  %v1022_v44 = vld [vmem:[#allocation5 + $0x16e8] sm:$0xff] }
 0x265   :  { %7050 = vmatprep.subr.bf16.mxu1 %v11587_v2  ;;  %v11555_v54 = vcombine.high %v1018_v40, %v1022_v44  ;;  %v882_v31 = vld [vmem:[#allocation5 + $0x1288] sm:$0xff]  ;;  %v11554_v61 = vcombine.low %v1018_v40, %v1022_v44 }
 0x266   :  { %v886_v2 = vld [vmem:[#allocation5 + $0x12a8] sm:$0xff] }
 0x267   :  { %7008 = vmatpush2.bf16.msra.mxu0 %v11458_v0  ;;  %v1010_v55 = vld [vmem:[#allocation5 + $0x1688] sm:$0xff]  ;;  %v11419_v0 = vcombine.high %v882_v31, %v886_v2  ;;  %v11418_v10 = vcombine.low %v882_v31, %v886_v2 }
 0x268   :  { %7051 = vmatpush2.bf16.msra.mxu1 %v11586_v3  ;;  %7009 = vmatprep.subr.bf16.mxu0 %v11451_v4  ;;  %v1014_v56 = vld [vmem:[#allocation5 + $0x16a8] sm:$0xff] }
 0x269   :  { %7052 = vmatprep.subr.bf16.mxu1 %v11579_v5  ;;  %v11547_v3 = vcombine.high %v1010_v55, %v1014_v56  ;;  %v874_v4 = vld [vmem:[#allocation5 + $0x1248] sm:$0xff]  ;;  %v11546_v52 = vcombine.low %v1010_v55, %v1014_v56  ;;  %v13477_v56 = vpop.f32.mrf.mxu0 }
 0x26a   :  { %v878_v5 = vld [vmem:[#allocation5 + $0x1268] sm:$0xff] }
 0x26b   :  { %7010 = vmatpush2.bf16.msra.mxu0 %v11450_v11  ;;  %v1002_v7 = vld [vmem:[#allocation5 + $0x1648] sm:$0xff]  ;;  %v11411_v11 = vcombine.high %v874_v4, %v878_v5  ;;  %v11410_v27 = vcombine.low %v874_v4, %v878_v5 }
 0x26c   :  { %7053 = vmatpush2.bf16.msra.mxu1 %v11578_v12  ;;  %7011 = vmatprep.subr.bf16.mxu0 %v11443_v14  ;;  %v1006_v9 = vld [vmem:[#allocation5 + $0x1668] sm:$0xff] }
 0x26d   :  { %7054 = vmatprep.subr.bf16.mxu1 %v11571_v15  ;;  %v11539_v12 = vcombine.high %v1002_v7, %v1006_v9  ;;  %v866_v14 = vld [vmem:[#allocation5 + $0x1208] sm:$0xff]  ;;  %v11538_v46 = vcombine.low %v1002_v7, %v1006_v9 }
 0x26e   :  { %v870_v15 = vld [vmem:[#allocation5 + $0x1228] sm:$0xff] }
 0x26f   :  { %7012 = vmatpush2.bf16.msra.mxu0 %v11442_v28  ;;  %v994_v19 = vld [vmem:[#allocation5 + $0x1608] sm:$0xff]  ;;  %v11403_v28 = vcombine.high %v866_v14, %v870_v15  ;;  %v11402_v40 = vcombine.low %v866_v14, %v870_v15 }
 0x270   :  { %7055 = vmatpush2.bf16.msra.mxu1 %v11570_v29  ;;  %7013 = vmatprep.subr.bf16.mxu0 %v11435_v30  ;;  %v998_v23 = vld [vmem:[#allocation5 + $0x1628] sm:$0xff] }
 0x271   :  { %7056 = vmatprep.subr.bf16.mxu1 %v11563_v36  ;;  %v11531_v29 = vcombine.high %v994_v19, %v998_v23  ;;  %v1114_v30 = vld [vmem:[#allocation5 + $0x19c8] sm:$0xff]  ;;  %v11530_v44 = vcombine.low %v994_v19, %v998_v23 }
 0x272   :  { %v1118_v36 = vld [vmem:[#allocation5 + $0x19e8] sm:$0xff] }
 0x273   :  { %7014 = vmatpush2.bf16.msra.mxu0 %v11434_v45  ;;  %v1242_v38 = vld [vmem:[#allocation5 + $0x1dc8] sm:$0xff]  ;;  %v11651_v45 = vcombine.high %v1114_v30, %v1118_v36  ;;  %v11650_v55 = vcombine.low %v1114_v30, %v1118_v36 }
 0x274   :  { %7057 = vmatpush2.bf16.msra.mxu1 %v11562_v50  ;;  %7015 = vmatprep.subr.bf16.mxu0 %v11427_v53  ;;  %v1246_v39 = vld [vmem:[#allocation5 + $0x1de8] sm:$0xff] }
 0x275   :  { %7058 = vmatprep.subr.bf16.mxu1 %v11555_v54  ;;  %v11779_v50 = vcombine.high %v1242_v38, %v1246_v39  ;;  %v1106_v53 = vld [vmem:[#allocation5 + $0x1988] sm:$0xff] }
 0x276   :  { %v1110_v54 = vld [vmem:[#allocation5 + $0x19a8] sm:$0xff] }
 0x277   :  { %7016 = vmatpush2.bf16.msra.mxu0 %v11426_v57  ;;  %v1234_v31 = vld [vmem:[#allocation5 + $0x1d88] sm:$0xff]  ;;  %v11778_v57 = vcombine.low %v1242_v38, %v1246_v39 }
 0x278   :  { %7059 = vmatpush2.bf16.msra.mxu1 %v11554_v61  ;;  %7017 = vmatprep.subr.bf16.mxu0 %v11419_v0  ;;  %v1238_v2 = vld [vmem:[#allocation5 + $0x1da8] sm:$0xff]  ;;  %v11643_v61 = vcombine.high %v1106_v53, %v1110_v54  ;;  %v13479_v0 = vpop.f32.mrf.mxu1 }
 0x279   :  { %7060 = vmatprep.subr.bf16.mxu1 %v11547_v3  ;;  %13799 = vst [vmem:[#allocation39_spill] sm:$0xff] %v13479_v0  ;;  %v11771_v3 = vcombine.high %v1234_v31, %v1238_v2  ;;  %v1098_v4 = vld [vmem:[#allocation5 + $0x1948] sm:$0xff]  ;;  %v11770_v15 = vcombine.low %v1234_v31, %v1238_v2  ;;  %v1223_v0 = vld [vmem:[#allocation5 + $0x1d30] sm:$0xff] }
 0x27a   :  { %v1102_v5 = vld [vmem:[#allocation5 + $0x1968] sm:$0xff] }
 0x27b   :  { %7018 = vmatpush2.bf16.msra.mxu0 %v11418_v10  ;;  %v1226_v9 = vld [vmem:[#allocation5 + $0x1d48] sm:$0xff]  ;;  %v11635_v19 = vcombine.high %v1098_v4, %v1102_v5  ;;  %v11634_v39 = vcombine.low %v1098_v4, %v1102_v5 }
 0x27c   :  { %7061 = vmatpush2.bf16.msra.mxu1 %v11546_v52  ;;  %7019 = vmatprep.subr.bf16.mxu0 %v11411_v11  ;;  %v1230_v10 = vld [vmem:[#allocation5 + $0x1d68] sm:$0xff] }
 0x27d   :  { %7062 = vmatprep.subr.bf16.mxu1 %v11539_v12  ;;  %v11642_v12 = vcombine.low %v1106_v53, %v1110_v54  ;;  %v1218_v30 = vld [vmem:[#allocation5 + $0x1d08] sm:$0xff] }
 0x27e   :  { %v1222_v36 = vld [vmem:[#allocation5 + $0x1d28] sm:$0xff] }
 0x27f   :  { %7020 = vmatpush2.bf16.msra.mxu0 %v11410_v27  ;;  %v11755_v53 = vcombine.high %v1218_v30, %v1222_v36  ;;  %v1082_v54 = vld [vmem:[#allocation5 + $0x18c8] sm:$0xff] }
 0x280   :  { %7063 = vmatpush2.bf16.msra.mxu1 %v11538_v46  ;;  %7021 = vmatprep.subr.bf16.mxu0 %v11403_v28  ;;  %v11763_v46 = vcombine.high %v1226_v9, %v1230_v10  ;;  %v1090_v28 = vld [vmem:[#allocation5 + $0x1908] sm:$0xff] }
 0x281   :  { %7064 = vmatprep.subr.bf16.mxu1 %v11531_v29  ;;  %v1094_v29 = vld [vmem:[#allocation5 + $0x1928] sm:$0xff] }
 0x282   :  { %v1086_v31 = vld [vmem:[#allocation5 + $0x18e8] sm:$0xff] }
 0x283   :  { %7022 = vmatpush2.bf16.msra.mxu0 %v11402_v40  ;;  %v1210_v2 = vld [vmem:[#allocation5 + $0x1cc8] sm:$0xff]  ;;  %v11619_v4 = vcombine.high %v1082_v54, %v1086_v31 }
 0x284   :  { %7065 = vmatpush2.bf16.msra.mxu1 %v11530_v44  ;;  %7077 = vmatprep.subr.bf16.mxu0 %v11651_v45  ;;  %v11762_v44 = vcombine.low %v1226_v9, %v1230_v10  ;;  %v11627_v45 = vcombine.high %v1090_v28, %v1094_v29  ;;  %v1074_v9 = vld [vmem:[#allocation5 + $0x1888] sm:$0xff] }
 0x285   :  { %7120 = vmatprep.subr.bf16.mxu1 %v11779_v50  ;;  %v1078_v10 = vld [vmem:[#allocation5 + $0x18a8] sm:$0xff] }
 0x286   :  { %v6767_v7 = vpop.f32.mrf.mxu0  ;;  %7024 = vmatmul.mubr.bf16.vlgmr.msra.gmra.mxu0 %v13407_v20 }
 0x287   :  { %v6768_v52 = vadd.f32 %v6767_v7, %v13468_v16  ;;  %v6810_v11 = vpop.f32.mrf.mxu1  ;;  %7067 = vmatmul.mubr.bf16.vlgmr.msra.gmra.mxu1 %v13409_v22  ;;  %7078 = vmatpush1.bf16.msra.mxu0 %v11650_v55  ;;  %v1214_v55 = vld [vmem:[#allocation5 + $0x1ce8] sm:$0xff] }
 0x288   :  { %7121 = vmatpush1.bf16.msra.mxu1 %v11778_v57  ;;  %v13484_v14 = vpop.f32.mrf.mxu0  ;;  %7079 = vmatprep.subr.bf16.mxu0 %v11643_v61  ;;  %v11747_v7 = vcombine.high %v1210_v2, %v1214_v55 }
 0x289   :  { %13800 = vst [vmem:[#allocation40_spill] sm:$0xff] %v13484_v14  ;;  %v6811_v23 = vadd.f32 %v6810_v11, %v6768_v52  ;;  %v13486_v27 = vpop.f32.mrf.mxu1  ;;  %7122 = vmatprep.subr.bf16.mxu1 %v11771_v3  ;;  %7109 = vmatprep.mubr.bf16.mxu0 %v13411_v32  ;;  %v11626_v3 = vcombine.low %v1090_v28, %v1094_v29  ;;  %v1202_v52 = vld [vmem:[#allocation5 + $0x1c88] sm:$0xff]  ;;  %v839_v14 = vld [vmem:[#allocation5 + $0x1130] sm:$0xff] }
 0x28a   :  { %13801 = vst [vmem:[#allocation41_spill] sm:$0xff] %v13486_v27  ;;  %v6771_v16 = vpop.f32.mrf.mxu0  ;;  %7152 = vmatprep.mubr.bf16.mxu1 %v13414_v33  ;;  %v1206_v11 = vld [vmem:[#allocation5 + $0x1ca8] sm:$0xff]  ;;  %v703_v27 = vld [vmem:[#allocation5 + $0xcf0] sm:$0xff] }
 0x28b   :  { %v6772_v38 = vadd.f32 %v6771_v16, %v13475_v42  ;;  %7080 = vmatpush1.bf16.msra.mxu0 %v11642_v12  ;;  %v6814_v40 = vpop.f32.mrf.mxu1  ;;  %v7851_v57 = vmax.f32 %v6811_v23, 0.0  ;;  %v11754_v42 = vcombine.low %v1218_v30, %v1222_v36  ;;  %v11618_v12 = vcombine.low %v1082_v54, %v1086_v31  ;;  %v1070_v28 = vld [vmem:[#allocation5 + $0x1868] sm:$0xff] }
 0x28c   :  { %7123 = vmatpush1.bf16.msra.mxu1 %v11770_v15  ;;  %7081 = vmatprep.subr.bf16.mxu0 %v11635_v19  ;;  %v11746_v15 = vcombine.low %v1210_v2, %v1214_v55  ;;  %v11611_v19 = vcombine.high %v1074_v9, %v1078_v10  ;;  %v11739_v23 = vcombine.high %v1202_v52, %v1206_v11  ;;  %v1194_v29 = vld [vmem:[#allocation5 + $0x1c48] sm:$0xff] }
 0x28d   :  { %v6815_v50 = vadd.f32 %v6814_v40, %v6772_v38  ;;  %7124 = vmatprep.subr.bf16.mxu1 %v11763_v46  ;;  %v1066_v46 = vld [vmem:[#allocation5 + $0x1848] sm:$0xff]  ;;  %v11610_v30 = vcombine.low %v1074_v9, %v1078_v10  ;;  %v11738_v36 = vcombine.low %v1202_v52, %v1206_v11 }
 0x28e   :  { %v1198_v16 = vld [vmem:[#allocation5 + $0x1c68] sm:$0xff]  ;;  %v11603_v38 = vcombine.high %v1066_v46, %v1070_v28 }
 0x28f   :  { %v7859_v61 = vmax.f32 %v6815_v50, 0.0  ;;  %7082 = vmatpush1.bf16.msra.mxu0 %v11634_v39  ;;  %v11731_v39 = vcombine.high %v1194_v29, %v1198_v16  ;;  %v1058_v40 = vld [vmem:[#allocation5 + $0x1808] sm:$0xff]  ;;  %v11730_v54 = vcombine.low %v1194_v29, %v1198_v16 }
 0x290   :  { %7125 = vmatpush1.bf16.msra.mxu1 %v11762_v44  ;;  %7083 = vmatprep.subr.bf16.mxu0 %v11627_v45  ;;  %v1062_v44 = vld [vmem:[#allocation5 + $0x1828] sm:$0xff] }
 0x291   :  { %v13491_v5 = vpack.c.bf16 %v7859_v61, %v7851_v57  ;;  %7126 = vmatprep.subr.bf16.mxu1 %v11755_v53  ;;  %v1186_v45 = vld [vmem:[#allocation5 + $0x1c08] sm:$0xff]  ;;  %v11602_v53 = vcombine.low %v1066_v46, %v1070_v28  ;;  %v11595_v31 = vcombine.high %v1058_v40, %v1062_v44 }
 0x292   :  { %v1190_v50 = vld [vmem:[#allocation5 + $0x1c28] sm:$0xff] }
 0x293   :  { %13802 = vst [vmem:[#allocation42_spill] sm:$0xff] %v13491_v5  ;;  %7084 = vmatpush1.bf16.msra.mxu0 %v11626_v3  ;;  %v11723_v2 = vcombine.high %v1186_v45, %v1190_v50  ;;  %v1178_v55 = vld [vmem:[#allocation5 + $0x1bc8] sm:$0xff]  ;;  %v699_v5 = vld [vmem:[#allocation5 + $0xcd0] sm:$0xff] }
 0x294   :  { %7127 = vmatpush1.bf16.msra.mxu1 %v11754_v42  ;;  %7085 = vmatprep.subr.bf16.mxu0 %v11619_v4  ;;  %v1182_v57 = vld [vmem:[#allocation5 + $0x1be8] sm:$0xff]  ;;  %v11594_v42 = vcombine.low %v1058_v40, %v1062_v44  ;;  %v11722_v4 = vcombine.low %v1186_v45, %v1190_v50 }
 0x295   :  { %7128 = vmatprep.subr.bf16.mxu1 %v11747_v7  ;;  %v1306_v61 = vld [vmem:[#allocation5 + $0x1fc8] sm:$0xff]  ;;  %v11715_v7 = vcombine.high %v1178_v55, %v1182_v57 }
 0x296   :  { %v1310_v3 = vld [vmem:[#allocation5 + $0x1fe8] sm:$0xff] }
 0x297   :  { %7086 = vmatpush1.bf16.msra.mxu0 %v11618_v12  ;;  %v11843_v9 = vcombine.high %v1306_v61, %v1310_v3  ;;  %v1170_v10 = vld [vmem:[#allocation5 + $0x1b88] sm:$0xff] }
 0x298   :  { %7129 = vmatpush1.bf16.msra.mxu1 %v11746_v15  ;;  %7087 = vmatprep.subr.bf16.mxu0 %v11611_v19  ;;  %v1174_v52 = vld [vmem:[#allocation5 + $0x1ba8] sm:$0xff]  ;;  %v11714_v15 = vcombine.low %v1178_v55, %v1182_v57  ;;  %v11842_v19 = vcombine.low %v1306_v61, %v1310_v3 }
 0x299   :  { %7130 = vmatprep.subr.bf16.mxu1 %v11739_v23  ;;  %v1298_v11 = vld [vmem:[#allocation5 + $0x1f88] sm:$0xff]  ;;  %v11707_v23 = vcombine.high %v1170_v10, %v1174_v52 }
 0x29a   :  { %v1302_v12 = vld [vmem:[#allocation5 + $0x1fa8] sm:$0xff] }
 0x29b   :  { %7088 = vmatpush1.bf16.msra.mxu0 %v11610_v30  ;;  %v11835_v46 = vcombine.high %v1298_v11, %v1302_v12  ;;  %v1162_v28 = vld [vmem:[#allocation5 + $0x1b48] sm:$0xff] }
 0x29c   :  { %7131 = vmatpush1.bf16.msra.mxu1 %v11738_v36  ;;  %7089 = vmatprep.subr.bf16.mxu0 %v11603_v38  ;;  %v1166_v29 = vld [vmem:[#allocation5 + $0x1b68] sm:$0xff]  ;;  %v11706_v36 = vcombine.low %v1170_v10, %v1174_v52  ;;  %v11834_v38 = vcombine.low %v1298_v11, %v1302_v12 }
 0x29d   :  { %7132 = vmatprep.subr.bf16.mxu1 %v11731_v39  ;;  %v1290_v16 = vld [vmem:[#allocation5 + $0x1f48] sm:$0xff]  ;;  %v11699_v39 = vcombine.high %v1162_v28, %v1166_v29 }
 0x29e   :  { %v1294_v30 = vld [vmem:[#allocation5 + $0x1f68] sm:$0xff] }
 0x29f   :  { %7090 = vmatpush1.bf16.msra.mxu0 %v11602_v53  ;;  %v11827_v40 = vcombine.high %v1290_v16, %v1294_v30  ;;  %v1154_v44 = vld [vmem:[#allocation5 + $0x1b08] sm:$0xff] }
 0x2a0   :  { %7133 = vmatpush1.bf16.msra.mxu1 %v11730_v54  ;;  %7091 = vmatprep.subr.bf16.mxu0 %v11595_v31  ;;  %v1158_v45 = vld [vmem:[#allocation5 + $0x1b28] sm:$0xff]  ;;  %v11698_v54 = vcombine.low %v1162_v28, %v1166_v29  ;;  %v11826_v31 = vcombine.low %v1290_v16, %v1294_v30 }
 0x2a1   :  { %7134 = vmatprep.subr.bf16.mxu1 %v11723_v2  ;;  %v1282_v50 = vld [vmem:[#allocation5 + $0x1f08] sm:$0xff]  ;;  %v11691_v2 = vcombine.high %v1154_v44, %v1158_v45 }
 0x2a2   :  { %v1286_v53 = vld [vmem:[#allocation5 + $0x1f28] sm:$0xff] }
 0x2a3   :  { %7092 = vmatpush1.bf16.msra.mxu0 %v11594_v42  ;;  %v11819_v55 = vcombine.high %v1282_v50, %v1286_v53  ;;  %v1146_v57 = vld [vmem:[#allocation5 + $0x1ac8] sm:$0xff] }
 0x2a4   :  { %7135 = vmatpush1.bf16.msra.mxu1 %v11722_v4  ;;  %7093 = vmatprep.subr.bf16.mxu0 %v11715_v7  ;;  %v1150_v61 = vld [vmem:[#allocation5 + $0x1ae8] sm:$0xff]  ;;  %v11690_v4 = vcombine.low %v1154_v44, %v1158_v45  ;;  %v11818_v7 = vcombine.low %v1282_v50, %v1286_v53 }
 0x2a5   :  { %7136 = vmatprep.subr.bf16.mxu1 %v11843_v9  ;;  %v1274_v3 = vld [vmem:[#allocation5 + $0x1ec8] sm:$0xff]  ;;  %v11683_v9 = vcombine.high %v1146_v57, %v1150_v61 }
 0x2a6   :  { %v1278_v42 = vld [vmem:[#allocation5 + $0x1ee8] sm:$0xff] }
 0x2a7   :  { %7094 = vmatpush2.bf16.msra.mxu0 %v11714_v15  ;;  %v11811_v10 = vcombine.high %v1274_v3, %v1278_v42  ;;  %v1138_v52 = vld [vmem:[#allocation5 + $0x1a88] sm:$0xff] }
 0x2a8   :  { %7137 = vmatpush2.bf16.msra.mxu1 %v11842_v19  ;;  %7095 = vmatprep.subr.bf16.mxu0 %v11707_v23  ;;  %v1142_v11 = vld [vmem:[#allocation5 + $0x1aa8] sm:$0xff]  ;;  %v11682_v19 = vcombine.low %v1146_v57, %v1150_v61  ;;  %v11810_v23 = vcombine.low %v1274_v3, %v1278_v42  ;;  %v347_v61 = vld [vmem:[#allocation5 + $0x1d0] sm:$0xff] }
 0x2a9   :  { %7138 = vmatprep.subr.bf16.mxu1 %v11835_v46  ;;  %v1266_v12 = vld [vmem:[#allocation5 + $0x1e88] sm:$0xff]  ;;  %v11675_v46 = vcombine.high %v1138_v52, %v1142_v11  ;;  %v351_v3 = vld [vmem:[#allocation5 + $0x1f0] sm:$0xff] }
 0x2aa   :  { %v1270_v15 = vld [vmem:[#allocation5 + $0x1ea8] sm:$0xff]  ;;  %v475_v42 = vld [vmem:[#allocation5 + $0x5d0] sm:$0xff] }
 0x2ab   :  { %7096 = vmatpush2.bf16.msra.mxu0 %v11706_v36  ;;  %v11803_v28 = vcombine.high %v1266_v12, %v1270_v15  ;;  %v1130_v29 = vld [vmem:[#allocation5 + $0x1a48] sm:$0xff] }
 0x2ac   :  { %7139 = vmatpush2.bf16.msra.mxu1 %v11834_v38  ;;  %7097 = vmatprep.subr.bf16.mxu0 %v11699_v39  ;;  %v1134_v16 = vld [vmem:[#allocation5 + $0x1a68] sm:$0xff]  ;;  %v11674_v38 = vcombine.low %v1138_v52, %v1142_v11  ;;  %v11802_v39 = vcombine.low %v1266_v12, %v1270_v15  ;;  %v10885_v52 = vcombine.high %v347_v61, %v351_v3  ;;  %v339_v12 = vld [vmem:[#allocation5 + $0x190] sm:$0xff] }
 0x2ad   :  { %7140 = vmatprep.subr.bf16.mxu1 %v11827_v40  ;;  %v1258_v30 = vld [vmem:[#allocation5 + $0x1e48] sm:$0xff]  ;;  %v11667_v40 = vcombine.high %v1130_v29, %v1134_v16  ;;  %v343_v15 = vld [vmem:[#allocation5 + $0x1b0] sm:$0xff] }
 0x2ae   :  { %v1262_v36 = vld [vmem:[#allocation5 + $0x1e68] sm:$0xff] }
 0x2af   :  { %7098 = vmatpush2.bf16.msra.mxu0 %v11698_v54  ;;  %v11795_v44 = vcombine.high %v1258_v30, %v1262_v36  ;;  %v1122_v45 = vld [vmem:[#allocation5 + $0x1a08] sm:$0xff] }
 0x2b0   :  { %7141 = vmatpush2.bf16.msra.mxu1 %v11826_v31  ;;  %7099 = vmatprep.subr.bf16.mxu0 %v11691_v2  ;;  %v1126_v50 = vld [vmem:[#allocation5 + $0x1a28] sm:$0xff]  ;;  %v11666_v31 = vcombine.low %v1130_v29, %v1134_v16  ;;  %v11794_v2 = vcombine.low %v1258_v30, %v1262_v36  ;;  %v10884_v29 = vcombine.low %v347_v61, %v351_v3  ;;  %v13496_v16 = vpop.f32.mrf.mxu0 }
 0x2b1   :  { %7142 = vmatprep.subr.bf16.mxu1 %v11819_v55  ;;  %v1250_v53 = vld [vmem:[#allocation5 + $0x1e08] sm:$0xff]  ;;  %v11659_v55 = vcombine.high %v1122_v45, %v1126_v50  ;;  %13803 = vst [vmem:[#allocation43_spill] sm:$0xff] %v13496_v16  ;;  %v10877_v36 = vcombine.high %v339_v12, %v343_v15  ;;  %v959_v16 = vld [vmem:[#allocation5 + $0x14f0] sm:$0xff] }
 0x2b2   :  { %v1254_v54 = vld [vmem:[#allocation5 + $0x1e28] sm:$0xff] }
 0x2b3   :  { %7100 = vmatpush2.bf16.msra.mxu0 %v11690_v4  ;;  %v11787_v57 = vcombine.high %v1250_v53, %v1254_v54  ;;  %v479_v4 = vld [vmem:[#allocation5 + $0x5f0] sm:$0xff] }
 0x2b4   :  { %7143 = vmatpush2.bf16.msra.mxu1 %v11818_v7  ;;  %7101 = vmatprep.subr.bf16.mxu0 %v11683_v9  ;;  %v11658_v7 = vcombine.low %v1122_v45, %v1126_v50  ;;  %v13790_v9 = vsub.s32 2, %v13419_v41  ;;  %v11013_v11 = vcombine.high %v475_v42, %v479_v4  ;;  %v11012_v30 = vcombine.low %v475_v42, %v479_v4  ;;  %v459_v50 = vld [vmem:[#allocation5 + $0x550] sm:$0xff] }
 0x2b5   :  { %7144 = vmatprep.subr.bf16.mxu1 %v11811_v10  ;;  %v11786_v10 = vcombine.low %v1250_v53, %v1254_v54  ;;  %v463_v53 = vld [vmem:[#allocation5 + $0x570] sm:$0xff] }
 0x2b6   :  { %v10997_v4 = vcombine.high %v459_v50, %v463_v53 }
 0x2b7   :  { %7102 = vmatpush2.bf16.msra.mxu0 %v11682_v19  ;;  %v467_v19 = vld [vmem:[#allocation5 + $0x590] sm:$0xff] }
 0x2b8   :  { %7145 = vmatpush2.bf16.msra.mxu1 %v11810_v23  ;;  %7103 = vmatprep.subr.bf16.mxu0 %v11675_v46  ;;  %v471_v23 = vld [vmem:[#allocation5 + $0x5b0] sm:$0xff]  ;;  %v12868_v46 = vld [vmem:[#allocation7] sm:$0xff] }
 0x2b9   :  { %7146 = vmatprep.subr.bf16.mxu1 %v11803_v28  ;;  %v1326_v28 = vrot.slane %v12868_v46, %v13790_v9  ;;  %v455_v46 = vld [vmem:[#allocation5 + $0x530] sm:$0xff] }
 0x2bb   :  { %7104 = vmatpush2.bf16.msra.mxu0 %v11674_v38  ;;  %v13498_v38 = vpop.f32.mrf.mxu1 }
 0x2bc   :  { %7147 = vmatpush2.bf16.msra.mxu1 %v11802_v39  ;;  %7105 = vmatprep.subr.bf16.mxu0 %v11667_v40  ;;  %13804 = vst [vmem:[#allocation44_spill] sm:$0xff] %v13498_v38  ;;  %v11005_v39 = vcombine.high %v467_v19, %v471_v23  ;;  %v331_v40 = vld [vmem:[#allocation5 + $0x150] sm:$0xff] }
 0x2bd   :  { %7148 = vmatprep.subr.bf16.mxu1 %v11795_v44  ;;  %v335_v44 = vld [vmem:[#allocation5 + $0x170] sm:$0xff] }
 0x2be   :  { %v10869_v61 = vcombine.high %v331_v40, %v335_v44 }
 0x2bf   :  { %7106 = vmatpush2.bf16.msra.mxu0 %v11666_v31 }
 0x2c0   :  { %7149 = vmatpush2.bf16.msra.mxu1 %v11794_v2  ;;  %7107 = vmatprep.subr.bf16.mxu0 %v11659_v55  ;;  %v10876_v2 = vcombine.low %v339_v12, %v343_v15  ;;  %v10868_v15 = vcombine.low %v331_v40, %v335_v44  ;;  %v307_v44 = vld [vmem:[#allocation5 + $0x90] sm:$0xff] }
 0x2c1   :  { %7150 = vmatprep.subr.bf16.mxu1 %v11787_v57  ;;  %v11004_v57 = vcombine.low %v467_v19, %v471_v23  ;;  %v10996_v23 = vcombine.low %v459_v50, %v463_v53  ;;  %v435_v50 = vld [vmem:[#allocation5 + $0x490] sm:$0xff] }
 0x2c2   :  { %v439_v53 = vld [vmem:[#allocation5 + $0x4b0] sm:$0xff] }
 0x2c3   :  { %7108 = vmatpush2.bf16.msra.mxu0 %v11658_v7  ;;  %v323_v7 = vld [vmem:[#allocation5 + $0x110] sm:$0xff] }
 0x2c4   :  { %7151 = vmatpush2.bf16.msra.mxu1 %v11786_v10  ;;  %7163 = vmatprep.subr.bf16.mxu0 %v10885_v52  ;;  %v327_v10 = vld [vmem:[#allocation5 + $0x130] sm:$0xff] }
 0x2c5   :  { %7206 = vmatprep.subr.bf16.mxu1 %v11013_v11  ;;  %v451_v11 = vld [vmem:[#allocation5 + $0x510] sm:$0xff]  ;;  %v10860_v9 = vcombine.low %v323_v7, %v327_v10 }
 0x2c6   :  { %v6853_v45 = vpop.f32.mrf.mxu0  ;;  %7110 = vmatmul.mubr.bf16.vlgmr.msra.gmra.mxu0 %v13424_v6 }
 0x2c7   :  { %v6854_v54 = vadd.f32 %v6853_v45, %v1326_v28  ;;  %v6896_v31 = vpop.f32.mrf.mxu1  ;;  %7153 = vmatmul.mubr.bf16.vlgmr.msra.gmra.mxu1 %v13427_v8  ;;  %7164 = vmatpush1.bf16.msra.mxu0 %v10884_v29  ;;  %v10861_v29 = vcombine.high %v323_v7, %v327_v10  ;;  %v319_v45 = vld [vmem:[#allocation5 + $0xf0] sm:$0xff] }
 0x2c8   :  { %7207 = vmatpush1.bf16.msra.mxu1 %v11012_v30  ;;  %v13502_v55 = vpop.f32.mrf.mxu0  ;;  %7165 = vmatprep.subr.bf16.mxu0 %v10877_v36  ;;  %v10989_v36 = vcombine.high %v451_v11, %v455_v46  ;;  %v303_v7 = vld [vmem:[#allocation5 + $0x70] sm:$0xff] }
 0x2c9   :  { %v13504_v3 = vadd.f32 %v6896_v31, %v6854_v54  ;;  %v13506_v42 = vpop.f32.mrf.mxu1  ;;  %7208 = vmatprep.subr.bf16.mxu1 %v11005_v39  ;;  %7195 = vmatprep.mubr.bf16.mxu0 %v13377_v58  ;;  %v315_v39 = vld [vmem:[#allocation5 + $0xd0] sm:$0xff] }
 0x2ca   :  { %v6857_v52 = vpop.f32.mrf.mxu0  ;;  %7238 = vmatprep.mubr.bf16.mxu1 %v13379_v63  ;;  %v443_v54 = vld [vmem:[#allocation5 + $0x4d0] sm:$0xff] }
 0x2cb   :  { %v6858_v12 = vadd.f32 %v6857_v52, %v1326_v28  ;;  %7166 = vmatpush1.bf16.msra.mxu0 %v10876_v2  ;;  %v6900_v19 = vpop.f32.mrf.mxu1  ;;  %v447_v31 = vld [vmem:[#allocation5 + $0x4f0] sm:$0xff]  ;;  %v10988_v28 = vcombine.low %v451_v11, %v455_v46  ;;  %v10853_v2 = vcombine.high %v315_v39, %v319_v45  ;;  %v10972_v46 = vcombine.low %v435_v50, %v439_v53 }
 0x2cc   :  { %7209 = vmatpush1.bf16.msra.mxu1 %v11004_v57  ;;  %7167 = vmatprep.subr.bf16.mxu0 %v10869_v61  ;;  %v10981_v40 = vcombine.high %v443_v54, %v447_v31  ;;  %v311_v57 = vld [vmem:[#allocation5 + $0xb0] sm:$0xff]  ;;  %v10852_v61 = vcombine.low %v315_v39, %v319_v45 }
 0x2cd   :  { %v13510_v30 = vadd.f32 %v6900_v19, %v6858_v12  ;;  %7210 = vmatprep.subr.bf16.mxu1 %v10997_v4  ;;  %v10980_v4 = vcombine.low %v443_v54, %v447_v31  ;;  %v10845_v52 = vcombine.high %v307_v44, %v311_v57  ;;  %v10973_v12 = vcombine.high %v435_v50, %v439_v53  ;;  %v427_v10 = vld [vmem:[#allocation5 + $0x450] sm:$0xff] }
 0x2ce   :  { %v431_v19 = vld [vmem:[#allocation5 + $0x470] sm:$0xff]  ;;  %v10844_v11 = vcombine.low %v307_v44, %v311_v57 }
 0x2cf   :  { %7168 = vmatpush1.bf16.msra.mxu0 %v10868_v15  ;;  %v299_v15 = vld [vmem:[#allocation5 + $0x50] sm:$0xff]  ;;  %v10964_v31 = vcombine.low %v427_v10, %v431_v19 }
 0x2d0   :  { %7211 = vmatpush1.bf16.msra.mxu1 %v10996_v23  ;;  %7169 = vmatprep.subr.bf16.mxu0 %v10861_v29  ;;  %v10837_v23 = vcombine.high %v299_v15, %v303_v7  ;;  %v10965_v29 = vcombine.high %v427_v10, %v431_v19  ;;  %v419_v39 = vld [vmem:[#allocation5 + $0x410] sm:$0xff]  ;;  %v10836_v54 = vcombine.low %v299_v15, %v303_v7 }
 0x2d1   :  { %7212 = vmatprep.subr.bf16.mxu1 %v10989_v36  ;;  %v295_v36 = vld [vmem:[#allocation5 + $0x30] sm:$0xff] }
 0x2d2   :  { %v423_v45 = vld [vmem:[#allocation5 + $0x430] sm:$0xff] }
 0x2d3   :  { %7170 = vmatpush1.bf16.msra.mxu0 %v10860_v9  ;;  %v291_v9 = vld [vmem:[#allocation5 + $0x10] sm:$0xff]  ;;  %v10956_v53 = vcombine.low %v419_v39, %v423_v45 }
 0x2d4   :  { %7213 = vmatpush1.bf16.msra.mxu1 %v10988_v28  ;;  %7171 = vmatprep.subr.bf16.mxu0 %v10853_v2  ;;  %v10829_v28 = vcombine.high %v291_v9, %v295_v36  ;;  %v10957_v2 = vcombine.high %v419_v39, %v423_v45  ;;  %v415_v44 = vld [vmem:[#allocation5 + $0x3f0] sm:$0xff]  ;;  %v10828_v50 = vcombine.low %v291_v9, %v295_v36 }
 0x2d5   :  { %7214 = vmatprep.subr.bf16.mxu1 %v10981_v40  ;;  %v411_v40 = vld [vmem:[#allocation5 + $0x3d0] sm:$0xff] }
 0x2d6   :  { %v539_v57 = vld [vmem:[#allocation5 + $0x7d0] sm:$0xff]  ;;  %v10948_v10 = vcombine.low %v411_v40, %v415_v44 }
 0x2d7   :  { %7172 = vmatpush1.bf16.msra.mxu0 %v10852_v61  ;;  %v543_v61 = vld [vmem:[#allocation5 + $0x7f0] sm:$0xff] }
 0x2d8   :  { %7215 = vmatpush1.bf16.msra.mxu1 %v10980_v4  ;;  %7173 = vmatprep.subr.bf16.mxu0 %v10845_v52  ;;  %v10949_v4 = vcombine.high %v411_v40, %v415_v44  ;;  %v11077_v52 = vcombine.high %v539_v57, %v543_v61  ;;  %v407_v15 = vld [vmem:[#allocation5 + $0x3b0] sm:$0xff]  ;;  %v11076_v19 = vcombine.low %v539_v57, %v543_v61 }
 0x2d9   :  { %7216 = vmatprep.subr.bf16.mxu1 %v10973_v12  ;;  %v403_v12 = vld [vmem:[#allocation5 + $0x390] sm:$0xff] }
 0x2da   :  { %v531_v7 = vld [vmem:[#allocation5 + $0x790] sm:$0xff]  ;;  %v10940_v39 = vcombine.low %v403_v12, %v407_v15 }
 0x2db   :  { %7174 = vmatpush1.bf16.msra.mxu0 %v10844_v11  ;;  %v535_v11 = vld [vmem:[#allocation5 + $0x7b0] sm:$0xff] }
 0x2dc   :  { %7217 = vmatpush1.bf16.msra.mxu1 %v10972_v46  ;;  %7175 = vmatprep.subr.bf16.mxu0 %v10837_v23  ;;  %v10941_v46 = vcombine.high %v403_v12, %v407_v15  ;;  %v11069_v23 = vcombine.high %v531_v7, %v535_v11  ;;  %v399_v9 = vld [vmem:[#allocation5 + $0x370] sm:$0xff]  ;;  %v11068_v45 = vcombine.low %v531_v7, %v535_v11 }
 0x2dd   :  { %7218 = vmatprep.subr.bf16.mxu1 %v10965_v29  ;;  %v395_v29 = vld [vmem:[#allocation5 + $0x350] sm:$0xff] }
 0x2de   :  { %v523_v36 = vld [vmem:[#allocation5 + $0x750] sm:$0xff]  ;;  %v10932_v57 = vcombine.low %v395_v29, %v399_v9 }
 0x2df   :  { %7176 = vmatpush1.bf16.msra.mxu0 %v10836_v54  ;;  %v527_v54 = vld [vmem:[#allocation5 + $0x770] sm:$0xff] }
 0x2e0   :  { %7219 = vmatpush1.bf16.msra.mxu1 %v10964_v31  ;;  %7177 = vmatprep.subr.bf16.mxu0 %v10829_v28  ;;  %v10933_v31 = vcombine.high %v395_v29, %v399_v9  ;;  %v11061_v28 = vcombine.high %v523_v36, %v527_v54  ;;  %v391_v40 = vld [vmem:[#allocation5 + $0x330] sm:$0xff]  ;;  %v11060_v61 = vcombine.low %v523_v36, %v527_v54 }
 0x2e1   :  { %7220 = vmatprep.subr.bf16.mxu1 %v10957_v2  ;;  %v387_v2 = vld [vmem:[#allocation5 + $0x310] sm:$0xff] }
 0x2e2   :  { %v515_v44 = vld [vmem:[#allocation5 + $0x710] sm:$0xff]  ;;  %v10924_v7 = vcombine.low %v387_v2, %v391_v40 }
 0x2e3   :  { %7178 = vmatpush1.bf16.msra.mxu0 %v10828_v50  ;;  %v519_v50 = vld [vmem:[#allocation5 + $0x730] sm:$0xff] }
 0x2e4   :  { %7221 = vmatpush1.bf16.msra.mxu1 %v10956_v53  ;;  %7179 = vmatprep.subr.bf16.mxu0 %v10949_v4  ;;  %v10925_v53 = vcombine.high %v387_v2, %v391_v40  ;;  %v11053_v4 = vcombine.high %v515_v44, %v519_v50  ;;  %v383_v12 = vld [vmem:[#allocation5 + $0x2f0] sm:$0xff]  ;;  %v11052_v11 = vcombine.low %v515_v44, %v519_v50 }
 0x2e5   :  { %7222 = vmatprep.subr.bf16.mxu1 %v11077_v52  ;;  %v379_v52 = vld [vmem:[#allocation5 + $0x2d0] sm:$0xff] }
 0x2e6   :  { %v507_v15 = vld [vmem:[#allocation5 + $0x6d0] sm:$0xff]  ;;  %v10916_v36 = vcombine.low %v379_v52, %v383_v12 }
 0x2e7   :  { %7180 = vmatpush2.bf16.msra.mxu0 %v10948_v10  ;;  %v511_v10 = vld [vmem:[#allocation5 + $0x6f0] sm:$0xff] }
 0x2e8   :  { %7223 = vmatpush2.bf16.msra.mxu1 %v11076_v19  ;;  %7181 = vmatprep.subr.bf16.mxu0 %v10941_v46  ;;  %v10917_v19 = vcombine.high %v379_v52, %v383_v12  ;;  %v11045_v46 = vcombine.high %v507_v15, %v511_v10  ;;  %v375_v29 = vld [vmem:[#allocation5 + $0x2b0] sm:$0xff]  ;;  %v11044_v54 = vcombine.low %v507_v15, %v511_v10 }
 0x2e9   :  { %7224 = vmatprep.subr.bf16.mxu1 %v11069_v23  ;;  %v371_v23 = vld [vmem:[#allocation5 + $0x290] sm:$0xff] }
 0x2ea   :  { %v499_v9 = vld [vmem:[#allocation5 + $0x690] sm:$0xff]  ;;  %v10908_v44 = vcombine.low %v371_v23, %v375_v29 }
 0x2eb   :  { %7182 = vmatpush2.bf16.msra.mxu0 %v10940_v39  ;;  %v503_v39 = vld [vmem:[#allocation5 + $0x6b0] sm:$0xff] }
 0x2ec   :  { %7225 = vmatpush2.bf16.msra.mxu1 %v11068_v45  ;;  %7183 = vmatprep.subr.bf16.mxu0 %v10933_v31  ;;  %v10909_v45 = vcombine.high %v371_v23, %v375_v29  ;;  %v11037_v31 = vcombine.high %v499_v9, %v503_v39  ;;  %v367_v2 = vld [vmem:[#allocation5 + $0x270] sm:$0xff]  ;;  %v11036_v50 = vcombine.low %v499_v9, %v503_v39 }
 0x2ed   :  { %7226 = vmatprep.subr.bf16.mxu1 %v11061_v28  ;;  %v363_v28 = vld [vmem:[#allocation5 + $0x250] sm:$0xff] }
 0x2ee   :  { %v491_v40 = vld [vmem:[#allocation5 + $0x650] sm:$0xff]  ;;  %v10900_v15 = vcombine.low %v363_v28, %v367_v2 }
 0x2ef   :  { %7184 = vmatpush2.bf16.msra.mxu0 %v10932_v57  ;;  %v495_v57 = vld [vmem:[#allocation5 + $0x670] sm:$0xff] }
 0x2f0   :  { %7227 = vmatpush2.bf16.msra.mxu1 %v11060_v61  ;;  %7185 = vmatprep.subr.bf16.mxu0 %v10925_v53  ;;  %v10901_v61 = vcombine.high %v363_v28, %v367_v2  ;;  %v11029_v53 = vcombine.high %v491_v40, %v495_v57  ;;  %v359_v52 = vld [vmem:[#allocation5 + $0x230] sm:$0xff]  ;;  %v11028_v10 = vcombine.low %v491_v40, %v495_v57  ;;  %v13512_v57 = vpop.f32.mrf.mxu0 }
 0x2f1   :  { %7228 = vmatprep.subr.bf16.mxu1 %v11053_v4  ;;  %v355_v4 = vld [vmem:[#allocation5 + $0x210] sm:$0xff] }
 0x2f2   :  { %v483_v12 = vld [vmem:[#allocation5 + $0x610] sm:$0xff]  ;;  %v10892_v9 = vcombine.low %v355_v4, %v359_v52 }
 0x2f3   :  { %7186 = vmatpush2.bf16.msra.mxu0 %v10924_v7  ;;  %v487_v7 = vld [vmem:[#allocation5 + $0x630] sm:$0xff] }
 0x2f4   :  { %7229 = vmatpush2.bf16.msra.mxu1 %v11052_v11  ;;  %7187 = vmatprep.subr.bf16.mxu0 %v10917_v19  ;;  %v10893_v11 = vcombine.high %v355_v4, %v359_v52  ;;  %v11021_v19 = vcombine.high %v483_v12, %v487_v7  ;;  %v607_v23 = vld [vmem:[#allocation5 + $0x9f0] sm:$0xff]  ;;  %v11020_v39 = vcombine.low %v483_v12, %v487_v7 }
 0x2f5   :  { %7230 = vmatprep.subr.bf16.mxu1 %v11045_v46  ;;  %v603_v46 = vld [vmem:[#allocation5 + $0x9d0] sm:$0xff] }
 0x2f6   :  { %v731_v29 = vld [vmem:[#allocation5 + $0xdd0] sm:$0xff]  ;;  %v11140_v40 = vcombine.low %v603_v46, %v607_v23 }
 0x2f7   :  { %7188 = vmatpush2.bf16.msra.mxu0 %v10916_v36  ;;  %v735_v36 = vld [vmem:[#allocation5 + $0xdf0] sm:$0xff] }
 0x2f8   :  { %7231 = vmatpush2.bf16.msra.mxu1 %v11044_v54  ;;  %7189 = vmatprep.subr.bf16.mxu0 %v10909_v45  ;;  %v11141_v54 = vcombine.high %v603_v46, %v607_v23  ;;  %v11269_v45 = vcombine.high %v731_v29, %v735_v36  ;;  %v599_v28 = vld [vmem:[#allocation5 + $0x9b0] sm:$0xff] }
 0x2f9   :  { %7232 = vmatprep.subr.bf16.mxu1 %v11037_v31  ;;  %v595_v31 = vld [vmem:[#allocation5 + $0x990] sm:$0xff] }
 0x2fa   :  { %v723_v2 = vld [vmem:[#allocation5 + $0xd90] sm:$0xff]  ;;  %v11132_v46 = vcombine.low %v595_v31, %v599_v28 }
 0x2fb   :  { %7190 = vmatpush2.bf16.msra.mxu0 %v10908_v44  ;;  %v727_v44 = vld [vmem:[#allocation5 + $0xdb0] sm:$0xff] }
 0x2fc   :  { %7233 = vmatpush2.bf16.msra.mxu1 %v11036_v50  ;;  %7191 = vmatprep.subr.bf16.mxu0 %v10901_v61  ;;  %v11268_v50 = vcombine.low %v731_v29, %v735_v36  ;;  %v11133_v61 = vcombine.high %v595_v31, %v599_v28  ;;  %v11261_v4 = vcombine.high %v723_v2, %v727_v44  ;;  %v587_v52 = vld [vmem:[#allocation5 + $0x950] sm:$0xff] }
 0x2fd   :  { %7234 = vmatprep.subr.bf16.mxu1 %v11029_v53  ;;  %v13514_v53 = vpop.f32.mrf.mxu1  ;;  %v591_v12 = vld [vmem:[#allocation5 + $0x970] sm:$0xff]  ;;  %v11260_v29 = vcombine.low %v723_v2, %v727_v44 }
 0x2fe   :  { %v11125_v36 = vcombine.high %v587_v52, %v591_v12  ;;  %v11124_v28 = vcombine.low %v587_v52, %v591_v12  ;;  %v11237_v52 = vcombine.high %v699_v5, %v703_v27  ;;  %v563_v12 = vld [vmem:[#allocation5 + $0x890] sm:$0xff] }
 0x2ff   :  { %7192 = vmatpush2.bf16.msra.mxu0 %v10900_v15  ;;  %v715_v15 = vld [vmem:[#allocation5 + $0xd50] sm:$0xff] }
 0x300   :  { %7235 = vmatpush2.bf16.msra.mxu1 %v11028_v10  ;;  %7193 = vmatprep.subr.bf16.mxu0 %v10893_v11  ;;  %v719_v10 = vld [vmem:[#allocation5 + $0xd70] sm:$0xff] }
 0x301   :  { %7236 = vmatprep.subr.bf16.mxu1 %v11021_v19  ;;  %v11252_v44 = vcombine.low %v715_v15, %v719_v10 }
 0x303   :  { %7194 = vmatpush2.bf16.msra.mxu0 %v10892_v9 }
 0x304   :  { %7237 = vmatpush2.bf16.msra.mxu1 %v11020_v39  ;;  %7249 = vmatprep.subr.bf16.mxu0 %v11141_v54  ;;  %v11253_v54 = vcombine.high %v715_v15, %v719_v10  ;;  %v691_v15 = vld [vmem:[#allocation5 + $0xc90] sm:$0xff] }
 0x305   :  { %7292 = vmatprep.subr.bf16.mxu1 %v11269_v45  ;;  %v579_v45 = vld [vmem:[#allocation5 + $0x910] sm:$0xff] }
 0x306   :  { %v6939_v7 = vpop.f32.mrf.mxu0  ;;  %7196 = vmatmul.mubr.bf16.vlgmr.msra.gmra.mxu0 %v13383_v21  ;;  %v11116_v38 = vcombine.low %v579_v45, %v583_v51  ;;  %v695_v10 = vld [vmem:[#allocation5 + $0xcb0] sm:$0xff] }
 0x307   :  { %v6940_v11 = vadd.f32 %v6939_v7, %v13504_v3  ;;  %v6982_v19 = vpop.f32.mrf.mxu1  ;;  %7239 = vmatmul.mubr.bf16.vlgmr.msra.gmra.mxu1 %v13385_v25  ;;  %7250 = vmatpush1.bf16.msra.mxu0 %v11140_v40  ;;  %v707_v7 = vld [vmem:[#allocation5 + $0xd10] sm:$0xff] }
 0x308   :  { %7293 = vmatpush1.bf16.msra.mxu1 %v11268_v50  ;;  %v13519_v23 = vpop.f32.mrf.mxu0  ;;  %7251 = vmatprep.subr.bf16.mxu0 %v11133_v61  ;;  %v711_v40 = vld [vmem:[#allocation5 + $0xd30] sm:$0xff]  ;;  %v11117_v50 = vcombine.high %v579_v45, %v583_v51 }
 0x309   :  { %v13521_v9 = vadd.f32 %v6982_v19, %v6940_v11  ;;  %v13523_v39 = vpop.f32.mrf.mxu1  ;;  %7294 = vmatprep.subr.bf16.mxu1 %v11261_v4  ;;  %7281 = vmatprep.mubr.bf16.mxu0 %v13387_v34  ;;  %v11245_v4 = vcombine.high %v707_v7, %v711_v40  ;;  %v571_v11 = vld [vmem:[#allocation5 + $0x8d0] sm:$0xff] }
 0x30a   :  { %v6943_v3 = vpop.f32.mrf.mxu0  ;;  %7324 = vmatprep.mubr.bf16.mxu1 %v13390_v37  ;;  %v575_v19 = vld [vmem:[#allocation5 + $0x8f0] sm:$0xff] }
 0x30b   :  { %v6944_v31 = vadd.f32 %v6943_v3, %v13510_v30  ;;  %7252 = vmatpush1.bf16.msra.mxu0 %v11132_v46  ;;  %v6986_v2 = vpop.f32.mrf.mxu1  ;;  %v11244_v30 = vcombine.low %v707_v7, %v711_v40  ;;  %v11109_v46 = vcombine.high %v571_v11, %v575_v19  ;;  %v559_v51 = vld [vmem:[#allocation5 + $0x870] sm:$0xff]  ;;  %v11228_v40 = vcombine.low %v691_v15, %v695_v10 }
 0x30c   :  { %7295 = vmatpush1.bf16.msra.mxu1 %v11260_v29  ;;  %7253 = vmatprep.subr.bf16.mxu0 %v11125_v36  ;;  %v567_v29 = vld [vmem:[#allocation5 + $0x8b0] sm:$0xff]  ;;  %v11108_v36 = vcombine.low %v571_v11, %v575_v19 }
 0x30d   :  { %v13528_v61 = vadd.f32 %v6986_v2, %v6944_v31  ;;  %7296 = vmatprep.subr.bf16.mxu1 %v11253_v54  ;;  %v11236_v54 = vcombine.low %v699_v5, %v703_v27  ;;  %v11101_v3 = vcombine.high %v563_v12, %v567_v29  ;;  %v11229_v31 = vcombine.high %v691_v15, %v695_v10  ;;  %v683_v45 = vld [vmem:[#allocation5 + $0xc50] sm:$0xff] }
 0x30e   :  { %v687_v2 = vld [vmem:[#allocation5 + $0xc70] sm:$0xff]  ;;  %v11100_v7 = vcombine.low %v563_v12, %v567_v29 }
 0x30f   :  { %7254 = vmatpush1.bf16.msra.mxu0 %v11124_v28  ;;  %v555_v28 = vld [vmem:[#allocation5 + $0x850] sm:$0xff]  ;;  %v11220_v5 = vcombine.low %v683_v45, %v687_v2 }
 0x310   :  { %7297 = vmatpush1.bf16.msra.mxu1 %v11252_v44  ;;  %7255 = vmatprep.subr.bf16.mxu0 %v11117_v50  ;;  %v11093_v44 = vcombine.high %v555_v28, %v559_v51  ;;  %v11221_v50 = vcombine.high %v683_v45, %v687_v2  ;;  %v675_v11 = vld [vmem:[#allocation5 + $0xc10] sm:$0xff]  ;;  %v11092_v27 = vcombine.low %v555_v28, %v559_v51 }
 0x311   :  { %7298 = vmatprep.subr.bf16.mxu1 %v11245_v4  ;;  %v551_v4 = vld [vmem:[#allocation5 + $0x830] sm:$0xff] }
 0x312   :  { %v679_v19 = vld [vmem:[#allocation5 + $0xc30] sm:$0xff] }
 0x313   :  { %7256 = vmatpush1.bf16.msra.mxu0 %v11116_v38  ;;  %v547_v38 = vld [vmem:[#allocation5 + $0x810] sm:$0xff]  ;;  %v11212_v10 = vcombine.low %v675_v11, %v679_v19 }
 0x314   :  { %7299 = vmatpush1.bf16.msra.mxu1 %v11244_v30  ;;  %7257 = vmatprep.subr.bf16.mxu0 %v11109_v46  ;;  %v11085_v30 = vcombine.high %v547_v38, %v551_v4  ;;  %v11213_v46 = vcombine.high %v675_v11, %v679_v19  ;;  %v671_v12 = vld [vmem:[#allocation5 + $0xbf0] sm:$0xff]  ;;  %v11084_v15 = vcombine.low %v547_v38, %v551_v4 }
 0x315   :  { %7300 = vmatprep.subr.bf16.mxu1 %v11237_v52  ;;  %v667_v52 = vld [vmem:[#allocation5 + $0xbd0] sm:$0xff] }
 0x316   :  { %v795_v29 = vld [vmem:[#allocation5 + $0xfd0] sm:$0xff]  ;;  %v11204_v45 = vcombine.low %v667_v52, %v671_v12 }
 0x317   :  { %7258 = vmatpush1.bf16.msra.mxu0 %v11108_v36  ;;  %v799_v36 = vld [vmem:[#allocation5 + $0xff0] sm:$0xff] }
 0x318   :  { %7301 = vmatpush1.bf16.msra.mxu1 %v11236_v54  ;;  %7259 = vmatprep.subr.bf16.mxu0 %v11101_v3  ;;  %v11205_v54 = vcombine.high %v667_v52, %v671_v12  ;;  %v11333_v3 = vcombine.high %v795_v29, %v799_v36  ;;  %v663_v28 = vld [vmem:[#allocation5 + $0xbb0] sm:$0xff]  ;;  %v11332_v2 = vcombine.low %v795_v29, %v799_v36 }
 0x319   :  { %7302 = vmatprep.subr.bf16.mxu1 %v11229_v31  ;;  %v659_v31 = vld [vmem:[#allocation5 + $0xb90] sm:$0xff] }
 0x31a   :  { %v787_v51 = vld [vmem:[#allocation5 + $0xf90] sm:$0xff]  ;;  %v11196_v11 = vcombine.low %v659_v31, %v663_v28 }
 0x31b   :  { %7260 = vmatpush1.bf16.msra.mxu0 %v11100_v7  ;;  %v791_v7 = vld [vmem:[#allocation5 + $0xfb0] sm:$0xff] }
 0x31c   :  { %7303 = vmatpush1.bf16.msra.mxu1 %v11228_v40  ;;  %7261 = vmatprep.subr.bf16.mxu0 %v11093_v44  ;;  %v11197_v40 = vcombine.high %v659_v31, %v663_v28  ;;  %v11325_v44 = vcombine.high %v787_v51, %v791_v7  ;;  %v655_v38 = vld [vmem:[#allocation5 + $0xb70] sm:$0xff]  ;;  %v11324_v19 = vcombine.low %v787_v51, %v791_v7 }
 0x31d   :  { %7304 = vmatprep.subr.bf16.mxu1 %v11221_v50  ;;  %v651_v50 = vld [vmem:[#allocation5 + $0xb50] sm:$0xff] }
 0x31e   :  { %v779_v4 = vld [vmem:[#allocation5 + $0xf50] sm:$0xff]  ;;  %v11188_v29 = vcombine.low %v651_v50, %v655_v38 }
 0x31f   :  { %7262 = vmatpush1.bf16.msra.mxu0 %v11092_v27  ;;  %v783_v27 = vld [vmem:[#allocation5 + $0xf70] sm:$0xff] }
 0x320   :  { %7305 = vmatpush1.bf16.msra.mxu1 %v11220_v5  ;;  %7263 = vmatprep.subr.bf16.mxu0 %v11085_v30  ;;  %v11189_v5 = vcombine.high %v651_v50, %v655_v38  ;;  %v11317_v30 = vcombine.high %v779_v4, %v783_v27  ;;  %v647_v52 = vld [vmem:[#allocation5 + $0xb30] sm:$0xff]  ;;  %v11316_v36 = vcombine.low %v779_v4, %v783_v27 }
 0x321   :  { %7306 = vmatprep.subr.bf16.mxu1 %v11213_v46  ;;  %v643_v46 = vld [vmem:[#allocation5 + $0xb10] sm:$0xff] }
 0x322   :  { %v771_v12 = vld [vmem:[#allocation5 + $0xf10] sm:$0xff]  ;;  %v11180_v51 = vcombine.low %v643_v46, %v647_v52 }
 0x323   :  { %7264 = vmatpush1.bf16.msra.mxu0 %v11084_v15  ;;  %v775_v15 = vld [vmem:[#allocation5 + $0xf30] sm:$0xff] }
 0x324   :  { %7307 = vmatpush1.bf16.msra.mxu1 %v11212_v10  ;;  %7265 = vmatprep.subr.bf16.mxu0 %v11205_v54  ;;  %v11181_v10 = vcombine.high %v643_v46, %v647_v52  ;;  %v11309_v54 = vcombine.high %v771_v12, %v775_v15  ;;  %v639_v31 = vld [vmem:[#allocation5 + $0xaf0] sm:$0xff]  ;;  %v11308_v7 = vcombine.low %v771_v12, %v775_v15 }
 0x325   :  { %7308 = vmatprep.subr.bf16.mxu1 %v11333_v3  ;;  %v635_v3 = vld [vmem:[#allocation5 + $0xad0] sm:$0xff] }
 0x326   :  { %v763_v28 = vld [vmem:[#allocation5 + $0xed0] sm:$0xff]  ;;  %v11172_v4 = vcombine.low %v635_v3, %v639_v31 }
 0x327   :  { %7266 = vmatpush2.bf16.msra.mxu0 %v11204_v45  ;;  %v767_v45 = vld [vmem:[#allocation5 + $0xef0] sm:$0xff] }
 0x328   :  { %7309 = vmatpush2.bf16.msra.mxu1 %v11332_v2  ;;  %7267 = vmatprep.subr.bf16.mxu0 %v11197_v40  ;;  %v11173_v2 = vcombine.high %v635_v3, %v639_v31  ;;  %v11301_v40 = vcombine.high %v763_v28, %v767_v45  ;;  %v631_v50 = vld [vmem:[#allocation5 + $0xab0] sm:$0xff]  ;;  %v11300_v27 = vcombine.low %v763_v28, %v767_v45 }
 0x329   :  { %7310 = vmatprep.subr.bf16.mxu1 %v11325_v44  ;;  %v627_v44 = vld [vmem:[#allocation5 + $0xa90] sm:$0xff] }
 0x32a   :  { %v755_v38 = vld [vmem:[#allocation5 + $0xe90] sm:$0xff]  ;;  %v11164_v12 = vcombine.low %v627_v44, %v631_v50 }
 0x32b   :  { %7268 = vmatpush2.bf16.msra.mxu0 %v11196_v11  ;;  %v759_v11 = vld [vmem:[#allocation5 + $0xeb0] sm:$0xff] }
 0x32c   :  { %7311 = vmatpush2.bf16.msra.mxu1 %v11324_v19  ;;  %7269 = vmatprep.subr.bf16.mxu0 %v11189_v5  ;;  %v11165_v19 = vcombine.high %v627_v44, %v631_v50  ;;  %v11293_v5 = vcombine.high %v755_v38, %v759_v11  ;;  %v623_v46 = vld [vmem:[#allocation5 + $0xa70] sm:$0xff]  ;;  %v11292_v15 = vcombine.low %v755_v38, %v759_v11 }
 0x32d   :  { %7312 = vmatprep.subr.bf16.mxu1 %v11317_v30  ;;  %v619_v30 = vld [vmem:[#allocation5 + $0xa50] sm:$0xff] }
 0x32e   :  { %v747_v52 = vld [vmem:[#allocation5 + $0xe50] sm:$0xff]  ;;  %v11156_v28 = vcombine.low %v619_v30, %v623_v46 }
 0x32f   :  { %7270 = vmatpush2.bf16.msra.mxu0 %v11188_v29  ;;  %v751_v29 = vld [vmem:[#allocation5 + $0xe70] sm:$0xff] }
 0x330   :  { %7313 = vmatpush2.bf16.msra.mxu1 %v11316_v36  ;;  %7271 = vmatprep.subr.bf16.mxu0 %v11181_v10  ;;  %v11157_v36 = vcombine.high %v619_v30, %v623_v46  ;;  %v11285_v10 = vcombine.high %v747_v52, %v751_v29  ;;  %v615_v3 = vld [vmem:[#allocation5 + $0xa30] sm:$0xff]  ;;  %v11284_v45 = vcombine.low %v747_v52, %v751_v29  ;;  %v13530_v29 = vpop.f32.mrf.mxu0 }
 0x331   :  { %7314 = vmatprep.subr.bf16.mxu1 %v11309_v54  ;;  %v611_v54 = vld [vmem:[#allocation5 + $0xa10] sm:$0xff] }
 0x332   :  { %v739_v31 = vld [vmem:[#allocation5 + $0xe10] sm:$0xff]  ;;  %v11148_v38 = vcombine.low %v611_v54, %v615_v3 }
 0x333   :  { %7272 = vmatpush2.bf16.msra.mxu0 %v11180_v51  ;;  %v743_v51 = vld [vmem:[#allocation5 + $0xe30] sm:$0xff] }
 0x334   :  { %7315 = vmatpush2.bf16.msra.mxu1 %v11308_v7  ;;  %7273 = vmatprep.subr.bf16.mxu0 %v11173_v2  ;;  %v11149_v7 = vcombine.high %v611_v54, %v615_v3  ;;  %v11277_v2 = vcombine.high %v739_v31, %v743_v51  ;;  %v863_v44 = vld [vmem:[#allocation5 + $0x11f0] sm:$0xff]  ;;  %v11276_v11 = vcombine.low %v739_v31, %v743_v51 }
 0x335   :  { %7316 = vmatprep.subr.bf16.mxu1 %v11301_v40  ;;  %v859_v40 = vld [vmem:[#allocation5 + $0x11d0] sm:$0xff] }
 0x336   :  { %v987_v50 = vld [vmem:[#allocation5 + $0x15d0] sm:$0xff]  ;;  %v11396_v52 = vcombine.low %v859_v40, %v863_v44 }
 0x337   :  { %7274 = vmatpush2.bf16.msra.mxu0 %v11172_v4  ;;  %v991_v4 = vld [vmem:[#allocation5 + $0x15f0] sm:$0xff] }
 0x338   :  { %7317 = vmatpush2.bf16.msra.mxu1 %v11300_v27  ;;  %7275 = vmatprep.subr.bf16.mxu0 %v11165_v19  ;;  %v11397_v27 = vcombine.high %v859_v40, %v863_v44  ;;  %v11525_v19 = vcombine.high %v987_v50, %v991_v4  ;;  %v855_v30 = vld [vmem:[#allocation5 + $0x11b0] sm:$0xff] }
 0x339   :  { %7318 = vmatprep.subr.bf16.mxu1 %v11293_v5  ;;  %v851_v5 = vld [vmem:[#allocation5 + $0x1190] sm:$0xff] }
 0x33a   :  { %v979_v46 = vld [vmem:[#allocation5 + $0x1590] sm:$0xff]  ;;  %v11388_v40 = vcombine.low %v851_v5, %v855_v30 }
 0x33b   :  { %7276 = vmatpush2.bf16.msra.mxu0 %v11164_v12  ;;  %v983_v12 = vld [vmem:[#allocation5 + $0x15b0] sm:$0xff] }
 0x33c   :  { %7319 = vmatpush2.bf16.msra.mxu1 %v11292_v15  ;;  %7277 = vmatprep.subr.bf16.mxu0 %v11157_v36  ;;  %v11524_v15 = vcombine.low %v987_v50, %v991_v4  ;;  %v11389_v36 = vcombine.high %v851_v5, %v855_v30  ;;  %v11517_v54 = vcombine.high %v979_v46, %v983_v12  ;;  %v843_v3 = vld [vmem:[#allocation5 + $0x1150] sm:$0xff] }
 0x33d   :  { %7320 = vmatprep.subr.bf16.mxu1 %v11285_v10  ;;  %v13532_v10 = vpop.f32.mrf.mxu1  ;;  %v847_v31 = vld [vmem:[#allocation5 + $0x1170] sm:$0xff]  ;;  %v11516_v50 = vcombine.low %v979_v46, %v983_v12 }
 0x33e   :  { %v11381_v4 = vcombine.high %v843_v3, %v847_v31  ;;  %v11380_v30 = vcombine.low %v843_v3, %v847_v31  ;;  %v819_v31 = vld [vmem:[#allocation5 + $0x1090] sm:$0xff] }
 0x33f   :  { %7278 = vmatpush2.bf16.msra.mxu0 %v11156_v28  ;;  %v971_v28 = vld [vmem:[#allocation5 + $0x1550] sm:$0xff] }
 0x340   :  { %7321 = vmatpush2.bf16.msra.mxu1 %v11284_v45  ;;  %7279 = vmatprep.subr.bf16.mxu0 %v11149_v7  ;;  %v975_v45 = vld [vmem:[#allocation5 + $0x1570] sm:$0xff] }
 0x341   :  { %7322 = vmatprep.subr.bf16.mxu1 %v11277_v2  ;;  %v11508_v12 = vcombine.low %v971_v28, %v975_v45 }
 0x343   :  { %7280 = vmatpush2.bf16.msra.mxu0 %v11148_v38 }
 0x344   :  { %7323 = vmatpush2.bf16.msra.mxu1 %v11276_v11  ;;  %7335 = vmatprep.subr.bf16.mxu0 %v11397_v27  ;;  %v11509_v27 = vcombine.high %v971_v28, %v975_v45  ;;  %v947_v28 = vld [vmem:[#allocation5 + $0x1490] sm:$0xff] }
 0x345   :  { %7378 = vmatprep.subr.bf16.mxu1 %v11525_v19  ;;  %v835_v19 = vld [vmem:[#allocation5 + $0x1110] sm:$0xff] }
 0x346   :  { %v7025_v51 = vpop.f32.mrf.mxu0  ;;  %7282 = vmatmul.mubr.bf16.vlgmr.msra.gmra.mxu0 %v13395_v48  ;;  %v11372_v17 = vcombine.low %v835_v19, %v839_v14  ;;  %v951_v45 = vld [vmem:[#allocation5 + $0x14b0] sm:$0xff] }
 0x347   :  { %v7026_v7 = vadd.f32 %v7025_v51, %v13521_v9  ;;  %v7068_v2 = vpop.f32.mrf.mxu1  ;;  %7325 = vmatmul.mubr.bf16.vlgmr.msra.gmra.mxu1 %v13397_v49  ;;  %7336 = vmatpush1.bf16.msra.mxu0 %v11396_v52  ;;  %v963_v51 = vld [vmem:[#allocation5 + $0x1510] sm:$0xff] }
 0x348   :  { %7379 = vmatpush1.bf16.msra.mxu1 %v11524_v15  ;;  %v13537_v44 = vpop.f32.mrf.mxu0  ;;  %7337 = vmatprep.subr.bf16.mxu0 %v11389_v36  ;;  %v967_v52 = vld [vmem:[#allocation5 + $0x1530] sm:$0xff]  ;;  %v11373_v15 = vcombine.high %v835_v19, %v839_v14 }
 0x349   :  { %13805 = vst [vmem:[#allocation45_spill] sm:$0xff] %v13537_v44  ;;  %v13539_v38 = vadd.f32 %v7068_v2, %v7026_v7  ;;  %v13541_v11 = vpop.f32.mrf.mxu1  ;;  %7380 = vmatprep.subr.bf16.mxu1 %v11517_v54  ;;  %7367 = vmatprep.mubr.bf16.mxu0 %v13399_v59  ;;  %v11501_v54 = vcombine.high %v963_v51, %v967_v52  ;;  %v827_v7 = vld [vmem:[#allocation5 + $0x10d0] sm:$0xff] }
 0x34a   :  { %13806 = vst [vmem:[#allocation46_spill] sm:$0xff] %v13541_v11  ;;  %v7029_v9 = vpop.f32.mrf.mxu0  ;;  %7410 = vmatprep.mubr.bf16.mxu1 %v13402_v62  ;;  %v831_v2 = vld [vmem:[#allocation5 + $0x10f0] sm:$0xff] }
 0x34b   :  { %v7030_v5 = vadd.f32 %v7029_v9, %v13528_v61  ;;  %7338 = vmatpush1.bf16.msra.mxu0 %v11388_v40  ;;  %v7072_v46 = vpop.f32.mrf.mxu1  ;;  %v955_v11 = vld [vmem:[#allocation5 + $0x14d0] sm:$0xff]  ;;  %v11500_v61 = vcombine.low %v963_v51, %v967_v52  ;;  %v11365_v40 = vcombine.high %v827_v7, %v831_v2  ;;  %v11484_v52 = vcombine.low %v947_v28, %v951_v45 }
 0x34c   :  { %7381 = vmatpush1.bf16.msra.mxu1 %v11516_v50  ;;  %7339 = vmatprep.subr.bf16.mxu0 %v11381_v4  ;;  %v11493_v3 = vcombine.high %v955_v11, %v959_v16  ;;  %v823_v50 = vld [vmem:[#allocation5 + $0x10b0] sm:$0xff]  ;;  %v11364_v4 = vcombine.low %v827_v7, %v831_v2 }
 0x34d   :  { %v13546_v36 = vadd.f32 %v7072_v46, %v7030_v5  ;;  %7382 = vmatprep.subr.bf16.mxu1 %v11509_v27  ;;  %v11492_v27 = vcombine.low %v955_v11, %v959_v16  ;;  %v11357_v9 = vcombine.high %v819_v31, %v823_v50  ;;  %v11485_v5 = vcombine.high %v947_v28, %v951_v45  ;;  %v815_v14 = vld [vmem:[#allocation5 + $0x1070] sm:$0xff] }
 0x34e   :  { %v939_v19 = vld [vmem:[#allocation5 + $0x1450] sm:$0xff]  ;;  %v11356_v51 = vcombine.low %v819_v31, %v823_v50 }
 0x34f   :  { %7340 = vmatpush1.bf16.msra.mxu0 %v11380_v30  ;;  %v811_v30 = vld [vmem:[#allocation5 + $0x1050] sm:$0xff] }
 0x350   :  { %7383 = vmatpush1.bf16.msra.mxu1 %v11508_v12  ;;  %7341 = vmatprep.subr.bf16.mxu0 %v11373_v15  ;;  %v943_v46 = vld [vmem:[#allocation5 + $0x1470] sm:$0xff]  ;;  %v11349_v12 = vcombine.high %v811_v30, %v815_v14  ;;  %v11348_v16 = vcombine.low %v811_v30, %v815_v14 }
 0x351   :  { %7384 = vmatprep.subr.bf16.mxu1 %v11501_v54  ;;  %v11477_v15 = vcombine.high %v939_v19, %v943_v46  ;;  %v807_v54 = vld [vmem:[#allocation5 + $0x1030] sm:$0xff]  ;;  %v11476_v11 = vcombine.low %v939_v19, %v943_v46 }
 0x352   :  { %v931_v7 = vld [vmem:[#allocation5 + $0x1410] sm:$0xff] }
 0x353   :  { %7342 = vmatpush1.bf16.msra.mxu0 %v11372_v17  ;;  %v803_v17 = vld [vmem:[#allocation5 + $0x1010] sm:$0xff] }
 0x354   :  { %7385 = vmatpush1.bf16.msra.mxu1 %v11500_v61  ;;  %7343 = vmatprep.subr.bf16.mxu0 %v11365_v40  ;;  %v935_v2 = vld [vmem:[#allocation5 + $0x1430] sm:$0xff]  ;;  %v11341_v61 = vcombine.high %v803_v17, %v807_v54  ;;  %v11340_v28 = vcombine.low %v803_v17, %v807_v54 }
 0x355   :  { %7386 = vmatprep.subr.bf16.mxu1 %v11493_v3  ;;  %v11469_v40 = vcombine.high %v931_v7, %v935_v2  ;;  %v923_v3 = vld [vmem:[#allocation5 + $0x13d0] sm:$0xff]  ;;  %v11468_v45 = vcombine.low %v931_v7, %v935_v2 }
 0x356   :  { %v927_v31 = vld [vmem:[#allocation5 + $0x13f0] sm:$0xff] }
 0x357   :  { %7344 = vmatpush1.bf16.msra.mxu0 %v11364_v4  ;;  %v1051_v50 = vld [vmem:[#allocation5 + $0x17d0] sm:$0xff]  ;;  %v11460_v19 = vcombine.low %v923_v3, %v927_v31 }
 0x358   :  { %7387 = vmatpush1.bf16.msra.mxu1 %v11492_v27  ;;  %7345 = vmatprep.subr.bf16.mxu0 %v11357_v9  ;;  %v1055_v4 = vld [vmem:[#allocation5 + $0x17f0] sm:$0xff]  ;;  %v11461_v27 = vcombine.high %v923_v3, %v927_v31 }
 0x359   :  { %7388 = vmatprep.subr.bf16.mxu1 %v11485_v5  ;;  %v11589_v9 = vcombine.high %v1051_v50, %v1055_v4  ;;  %v915_v5 = vld [vmem:[#allocation5 + $0x1390] sm:$0xff]  ;;  %v11588_v46 = vcombine.low %v1051_v50, %v1055_v4 }
 0x35a   :  { %v919_v30 = vld [vmem:[#allocation5 + $0x13b0] sm:$0xff] }
 0x35b   :  { %7346 = vmatpush1.bf16.msra.mxu0 %v11356_v51  ;;  %v1043_v14 = vld [vmem:[#allocation5 + $0x1790] sm:$0xff]  ;;  %v11452_v7 = vcombine.low %v915_v5, %v919_v30 }
 0x35c   :  { %7389 = vmatpush1.bf16.msra.mxu1 %v11484_v52  ;;  %7347 = vmatprep.subr.bf16.mxu0 %v11349_v12  ;;  %v1047_v51 = vld [vmem:[#allocation5 + $0x17b0] sm:$0xff]  ;;  %v11453_v52 = vcombine.high %v915_v5, %v919_v30 }
 0x35d   :  { %7390 = vmatprep.subr.bf16.mxu1 %v11477_v15  ;;  %v11581_v12 = vcombine.high %v1043_v14, %v1047_v51  ;;  %v907_v15 = vld [vmem:[#allocation5 + $0x1350] sm:$0xff]  ;;  %v11580_v2 = vcombine.low %v1043_v14, %v1047_v51 }
 0x35e   :  { %v911_v17 = vld [vmem:[#allocation5 + $0x1370] sm:$0xff] }
 0x35f   :  { %7348 = vmatpush1.bf16.msra.mxu0 %v11348_v16  ;;  %v1035_v54 = vld [vmem:[#allocation5 + $0x1750] sm:$0xff]  ;;  %v11444_v50 = vcombine.low %v907_v15, %v911_v17 }
 0x360   :  { %7391 = vmatpush1.bf16.msra.mxu1 %v11476_v11  ;;  %7349 = vmatprep.subr.bf16.mxu0 %v11341_v61  ;;  %v1039_v16 = vld [vmem:[#allocation5 + $0x1770] sm:$0xff]  ;;  %v11445_v11 = vcombine.high %v907_v15, %v911_v17 }
 0x361   :  { %7392 = vmatprep.subr.bf16.mxu1 %v11469_v40  ;;  %v11573_v61 = vcombine.high %v1035_v54, %v1039_v16  ;;  %v899_v40 = vld [vmem:[#allocation5 + $0x1310] sm:$0xff]  ;;  %v11572_v4 = vcombine.low %v1035_v54, %v1039_v16 }
 0x362   :  { %v903_v3 = vld [vmem:[#allocation5 + $0x1330] sm:$0xff] }
 0x363   :  { %7350 = vmatpush1.bf16.msra.mxu0 %v11340_v28  ;;  %v1027_v31 = vld [vmem:[#allocation5 + $0x1710] sm:$0xff]  ;;  %v11436_v14 = vcombine.low %v899_v40, %v903_v3 }
 0x364   :  { %7393 = vmatpush1.bf16.msra.mxu1 %v11468_v45  ;;  %7351 = vmatprep.subr.bf16.mxu0 %v11461_v27  ;;  %v1031_v28 = vld [vmem:[#allocation5 + $0x1730] sm:$0xff]  ;;  %v11437_v45 = vcombine.high %v899_v40, %v903_v3 }
 0x365   :  { %7394 = vmatprep.subr.bf16.mxu1 %v11589_v9  ;;  %v11565_v27 = vcombine.high %v1027_v31, %v1031_v28  ;;  %v891_v9 = vld [vmem:[#allocation5 + $0x12d0] sm:$0xff]  ;;  %v11564_v51 = vcombine.low %v1027_v31, %v1031_v28 }
 0x366   :  { %v895_v5 = vld [vmem:[#allocation5 + $0x12f0] sm:$0xff] }
 0x367   :  { %7352 = vmatpush2.bf16.msra.mxu0 %v11460_v19  ;;  %v1019_v30 = vld [vmem:[#allocation5 + $0x16d0] sm:$0xff]  ;;  %v11428_v54 = vcombine.low %v891_v9, %v895_v5 }
 0x368   :  { %7395 = vmatpush2.bf16.msra.mxu1 %v11588_v46  ;;  %7353 = vmatprep.subr.bf16.mxu0 %v11453_v52  ;;  %v1023_v19 = vld [vmem:[#allocation5 + $0x16f0] sm:$0xff]  ;;  %v11429_v46 = vcombine.high %v891_v9, %v895_v5 }
 0x369   :  { %7396 = vmatprep.subr.bf16.mxu1 %v11581_v12  ;;  %v11557_v52 = vcombine.high %v1019_v30, %v1023_v19  ;;  %v883_v12 = vld [vmem:[#allocation5 + $0x1290] sm:$0xff]  ;;  %v11556_v16 = vcombine.low %v1019_v30, %v1023_v19 }
 0x36a   :  { %v887_v15 = vld [vmem:[#allocation5 + $0x12b0] sm:$0xff] }
 0x36b   :  { %7354 = vmatpush2.bf16.msra.mxu0 %v11452_v7  ;;  %v1011_v17 = vld [vmem:[#allocation5 + $0x1690] sm:$0xff]  ;;  %v11420_v31 = vcombine.low %v883_v12, %v887_v15 }
 0x36c   :  { %7397 = vmatpush2.bf16.msra.mxu1 %v11580_v2  ;;  %7355 = vmatprep.subr.bf16.mxu0 %v11445_v11  ;;  %v1015_v7 = vld [vmem:[#allocation5 + $0x16b0] sm:$0xff]  ;;  %v11421_v2 = vcombine.high %v883_v12, %v887_v15 }
 0x36d   :  { %7398 = vmatprep.subr.bf16.mxu1 %v11573_v61  ;;  %v11549_v11 = vcombine.high %v1011_v17, %v1015_v7  ;;  %v875_v61 = vld [vmem:[#allocation5 + $0x1250] sm:$0xff]  ;;  %v11548_v28 = vcombine.low %v1011_v17, %v1015_v7 }
 0x36e   :  { %v879_v40 = vld [vmem:[#allocation5 + $0x1270] sm:$0xff] }
 0x36f   :  { %7356 = vmatpush2.bf16.msra.mxu0 %v11444_v50  ;;  %v1003_v3 = vld [vmem:[#allocation5 + $0x1650] sm:$0xff]  ;;  %v11412_v30 = vcombine.low %v875_v61, %v879_v40 }
 0x370   :  { %7399 = vmatpush2.bf16.msra.mxu1 %v11572_v4  ;;  %7357 = vmatprep.subr.bf16.mxu0 %v11437_v45  ;;  %v1007_v50 = vld [vmem:[#allocation5 + $0x1670] sm:$0xff]  ;;  %v11413_v4 = vcombine.high %v875_v61, %v879_v40 }
 0x371   :  { %7400 = vmatprep.subr.bf16.mxu1 %v11565_v27  ;;  %v11541_v45 = vcombine.high %v1003_v3, %v1007_v50  ;;  %v867_v27 = vld [vmem:[#allocation5 + $0x1210] sm:$0xff]  ;;  %v11540_v19 = vcombine.low %v1003_v3, %v1007_v50  ;;  %v13548_v50 = vpop.f32.mrf.mxu0 }
 0x372   :  { %v871_v9 = vld [vmem:[#allocation5 + $0x1230] sm:$0xff] }
 0x373   :  { %7358 = vmatpush2.bf16.msra.mxu0 %v11436_v14  ;;  %v995_v5 = vld [vmem:[#allocation5 + $0x1610] sm:$0xff]  ;;  %v11404_v17 = vcombine.low %v867_v27, %v871_v9 }
 0x374   :  { %7401 = vmatpush2.bf16.msra.mxu1 %v11564_v51  ;;  %7359 = vmatprep.subr.bf16.mxu0 %v11429_v46  ;;  %v999_v14 = vld [vmem:[#allocation5 + $0x1630] sm:$0xff]  ;;  %v11405_v51 = vcombine.high %v867_v27, %v871_v9 }
 0x375   :  { %7402 = vmatprep.subr.bf16.mxu1 %v11557_v52  ;;  %v11533_v46 = vcombine.high %v995_v5, %v999_v14  ;;  %v1115_v52 = vld [vmem:[#allocation5 + $0x19d0] sm:$0xff]  ;;  %v11532_v7 = vcombine.low %v995_v5, %v999_v14 }
 0x376   :  { %v1119_v12 = vld [vmem:[#allocation5 + $0x19f0] sm:$0xff] }
 0x377   :  { %7360 = vmatpush2.bf16.msra.mxu0 %v11428_v54  ;;  %v1243_v15 = vld [vmem:[#allocation5 + $0x1dd0] sm:$0xff]  ;;  %v11652_v3 = vcombine.low %v1115_v52, %v1119_v12 }
 0x378   :  { %7403 = vmatpush2.bf16.msra.mxu1 %v11556_v16  ;;  %7361 = vmatprep.subr.bf16.mxu0 %v11421_v2  ;;  %v1247_v54 = vld [vmem:[#allocation5 + $0x1df0] sm:$0xff]  ;;  %v11653_v16 = vcombine.high %v1115_v52, %v1119_v12 }
 0x379   :  { %7404 = vmatprep.subr.bf16.mxu1 %v11549_v11  ;;  %v11781_v2 = vcombine.high %v1243_v15, %v1247_v54  ;;  %v1107_v11 = vld [vmem:[#allocation5 + $0x1990] sm:$0xff] }
 0x37a   :  { %v1111_v61 = vld [vmem:[#allocation5 + $0x19b0] sm:$0xff] }
 0x37b   :  { %7362 = vmatpush2.bf16.msra.mxu0 %v11420_v31  ;;  %v1235_v40 = vld [vmem:[#allocation5 + $0x1d90] sm:$0xff]  ;;  %v11644_v52 = vcombine.low %v1107_v11, %v1111_v61 }
 0x37c   :  { %7405 = vmatpush2.bf16.msra.mxu1 %v11548_v28  ;;  %7363 = vmatprep.subr.bf16.mxu0 %v11413_v4  ;;  %v1239_v31 = vld [vmem:[#allocation5 + $0x1db0] sm:$0xff]  ;;  %v11780_v28 = vcombine.low %v1243_v15, %v1247_v54  ;;  %v11645_v4 = vcombine.high %v1107_v11, %v1111_v61 }
 0x37d   :  { %7406 = vmatprep.subr.bf16.mxu1 %v11541_v45  ;;  %v13550_v45 = vpop.f32.mrf.mxu1  ;;  %v11773_v27 = vcombine.high %v1235_v40, %v1239_v31  ;;  %v1099_v9 = vld [vmem:[#allocation5 + $0x1950] sm:$0xff]  ;;  %v11772_v15 = vcombine.low %v1235_v40, %v1239_v31 }
 0x37e   :  { %13807 = vst [vmem:[#allocation47_spill] sm:$0xff] %v13550_v45  ;;  %v1103_v5 = vld [vmem:[#allocation5 + $0x1970] sm:$0xff] }
 0x37f   :  { %7364 = vmatpush2.bf16.msra.mxu0 %v11412_v30  ;;  %v1227_v30 = vld [vmem:[#allocation5 + $0x1d50] sm:$0xff]  ;;  %v11637_v54 = vcombine.high %v1099_v9, %v1103_v5  ;;  %v11636_v61 = vcombine.low %v1099_v9, %v1103_v5 }
 0x380   :  { %7407 = vmatpush2.bf16.msra.mxu1 %v11540_v19  ;;  %7365 = vmatprep.subr.bf16.mxu0 %v11405_v51  ;;  %v1231_v19 = vld [vmem:[#allocation5 + $0x1d70] sm:$0xff] }
 0x381   :  { %7408 = vmatprep.subr.bf16.mxu1 %v11533_v46  ;;  %v1095_v45 = vld [vmem:[#allocation5 + $0x1930] sm:$0xff]  ;;  %v11764_v31 = vcombine.low %v1227_v30, %v1231_v19 }
 0x383   :  { %7366 = vmatpush2.bf16.msra.mxu0 %v11404_v17 }
 0x384   :  { %7409 = vmatpush2.bf16.msra.mxu1 %v11532_v7  ;;  %7421 = vmatprep.subr.bf16.mxu0 %v11653_v16  ;;  %v11765_v16 = vcombine.high %v1227_v30, %v1231_v19  ;;  %v1075_v19 = vld [vmem:[#allocation5 + $0x1890] sm:$0xff] }
 0x385   :  { %7464 = vmatprep.subr.bf16.mxu1 %v11781_v2  ;;  %v1091_v2 = vld [vmem:[#allocation5 + $0x1910] sm:$0xff] }
 0x386   :  { %v7111_v14 = vpop.f32.mrf.mxu0  ;;  %7368 = vmatmul.mubr.bf16.vlgmr.msra.gmra.mxu0 %v13407_v20  ;;  %v11628_v13 = vcombine.low %v1091_v2, %v1095_v45 }
 0x387   :  { %v7112_v51 = vadd.f32 %v7111_v14, %v13539_v38  ;;  %v7154_v46 = vpop.f32.mrf.mxu1  ;;  %7411 = vmatmul.mubr.bf16.vlgmr.msra.gmra.mxu1 %v13409_v22  ;;  %7422 = vmatpush1.bf16.msra.mxu0 %v11652_v3  ;;  %v1219_v14 = vld [vmem:[#allocation5 + $0x1d10] sm:$0xff]  ;;  %v11629_v3 = vcombine.high %v1091_v2, %v1095_v45 }
 0x388   :  { %7465 = vmatpush1.bf16.msra.mxu1 %v11780_v28  ;;  %v13555_v12 = vpop.f32.mrf.mxu0  ;;  %7423 = vmatprep.subr.bf16.mxu0 %v11645_v4  ;;  %v11757_v4 = vcombine.high %v1219_v14, %v1223_v0  ;;  %v1067_v2 = vld [vmem:[#allocation5 + $0x1850] sm:$0xff] }
 0x389   :  { %13808 = vst [vmem:[#allocation48_spill] sm:$0xff] %v13555_v12  ;;  %v7155_v17 = vadd.f32 %v7154_v46, %v7112_v51  ;;  %v13557_v7 = vpop.f32.mrf.mxu1  ;;  %7466 = vmatprep.subr.bf16.mxu1 %v11773_v27  ;;  %7453 = vmatprep.mubr.bf16.mxu0 %v13411_v32  ;;  %v1083_v27 = vld [vmem:[#allocation5 + $0x18d0] sm:$0xff] }
 0x38a   :  { %13809 = vst [vmem:[#allocation49_spill] sm:$0xff] %v13557_v7  ;;  %v7115_v38 = vpop.f32.mrf.mxu0  ;;  %7496 = vmatprep.mubr.bf16.mxu1 %v13414_v33  ;;  %v1087_v51 = vld [vmem:[#allocation5 + $0x18f0] sm:$0xff] }
 0x38b   :  { %v7116_v11 = vadd.f32 %v7115_v38, %v13546_v36  ;;  %7424 = vmatpush1.bf16.msra.mxu0 %v11644_v52  ;;  %v7158_v40 = vpop.f32.mrf.mxu1  ;;  %v1211_v46 = vld [vmem:[#allocation5 + $0x1cd0] sm:$0xff]  ;;  %v7853_v12 = vmax.f32 %v7155_v17, 0.0  ;;  %v11756_v36 = vcombine.low %v1219_v14, %v1223_v0  ;;  %v11621_v9 = vcombine.high %v1083_v27, %v1087_v51 }
 0x38c   :  { %7467 = vmatpush1.bf16.msra.mxu1 %v11772_v15  ;;  %7425 = vmatprep.subr.bf16.mxu0 %v11637_v54  ;;  %v1215_v7 = vld [vmem:[#allocation5 + $0x1cf0] sm:$0xff] }
 0x38d   :  { %v7159_v28 = vadd.f32 %v7158_v40, %v7116_v11  ;;  %7468 = vmatprep.subr.bf16.mxu1 %v11765_v16  ;;  %v11749_v30 = vcombine.high %v1211_v46, %v1215_v7  ;;  %v1079_v52 = vld [vmem:[#allocation5 + $0x18b0] sm:$0xff]  ;;  %v11620_v16 = vcombine.low %v1083_v27, %v1087_v51  ;;  %v11748_v17 = vcombine.low %v1211_v46, %v1215_v7 }
 0x38e   :  { %v1203_v15 = vld [vmem:[#allocation5 + $0x1c90] sm:$0xff]  ;;  %v11613_v38 = vcombine.high %v1075_v19, %v1079_v52 }
 0x38f   :  { %v7861_v44 = vmax.f32 %v7159_v28, 0.0  ;;  %7426 = vmatpush1.bf16.msra.mxu0 %v11636_v61  ;;  %v1207_v54 = vld [vmem:[#allocation5 + $0x1cb0] sm:$0xff] }
 0x390   :  { %7469 = vmatpush1.bf16.msra.mxu1 %v11764_v31  ;;  %7427 = vmatprep.subr.bf16.mxu0 %v11629_v3  ;;  %v11741_v45 = vcombine.high %v1203_v15, %v1207_v54  ;;  %v1071_v11 = vld [vmem:[#allocation5 + $0x1870] sm:$0xff] }
 0x391   :  { %v13562_v5 = vpack.c.bf16 %v7861_v44, %v7853_v12  ;;  %7470 = vmatprep.subr.bf16.mxu1 %v11757_v4  ;;  %v1195_v0 = vld [vmem:[#allocation5 + $0x1c50] sm:$0xff]  ;;  %v11612_v44 = vcombine.low %v1075_v19, %v1079_v52  ;;  %v11740_v12 = vcombine.low %v1203_v15, %v1207_v54  ;;  %v11605_v61 = vcombine.high %v1067_v2, %v1071_v11 }
 0x392   :  { %v1199_v14 = vld [vmem:[#allocation5 + $0x1c70] sm:$0xff]  ;;  %v11604_v7 = vcombine.low %v1067_v2, %v1071_v11 }
 0x393   :  { %13810 = vst [vmem:[#allocation50_spill] sm:$0xff] %v13562_v5  ;;  %7428 = vmatpush1.bf16.msra.mxu0 %v11628_v13  ;;  %v11733_v40 = vcombine.high %v1195_v0, %v1199_v14  ;;  %v1059_v13 = vld [vmem:[#allocation5 + $0x1810] sm:$0xff]  ;;  %v11732_v4 = vcombine.low %v1195_v0, %v1199_v14  ;;  %v448_v5 = vld [vmem:[#allocation5 + $0x4f8] sm:$0xff] }
 0x394   :  { %7471 = vmatpush1.bf16.msra.mxu1 %v11756_v36  ;;  %7429 = vmatprep.subr.bf16.mxu0 %v11621_v9  ;;  %v1063_v31 = vld [vmem:[#allocation5 + $0x1830] sm:$0xff] }
 0x395   :  { %7472 = vmatprep.subr.bf16.mxu1 %v11749_v30  ;;  %v1187_v3 = vld [vmem:[#allocation5 + $0x1c10] sm:$0xff]  ;;  %v11597_v27 = vcombine.high %v1059_v13, %v1063_v31  ;;  %v11596_v19 = vcombine.low %v1059_v13, %v1063_v31 }
 0x396   :  { %v1191_v28 = vld [vmem:[#allocation5 + $0x1c30] sm:$0xff] }
 0x397   :  { %7430 = vmatpush1.bf16.msra.mxu0 %v11620_v16  ;;  %v11725_v51 = vcombine.high %v1187_v3, %v1191_v28  ;;  %v1179_v46 = vld [vmem:[#allocation5 + $0x1bd0] sm:$0xff]  ;;  %v11724_v52 = vcombine.low %v1187_v3, %v1191_v28 }
 0x398   :  { %7473 = vmatpush1.bf16.msra.mxu1 %v11748_v17  ;;  %7431 = vmatprep.subr.bf16.mxu0 %v11613_v38  ;;  %v1183_v36 = vld [vmem:[#allocation5 + $0x1bf0] sm:$0xff] }
 0x399   :  { %7474 = vmatprep.subr.bf16.mxu1 %v11741_v45  ;;  %v1307_v9 = vld [vmem:[#allocation5 + $0x1fd0] sm:$0xff]  ;;  %v11717_v15 = vcombine.high %v1179_v46, %v1183_v36  ;;  %v11716_v2 = vcombine.low %v1179_v46, %v1183_v36 }
 0x39a   :  { %v1311_v30 = vld [vmem:[#allocation5 + $0x1ff0] sm:$0xff] }
 0x39b   :  { %7432 = vmatpush1.bf16.msra.mxu0 %v11612_v44  ;;  %v11845_v54 = vcombine.high %v1307_v9, %v1311_v30  ;;  %v1171_v16 = vld [vmem:[#allocation5 + $0x1b90] sm:$0xff]  ;;  %v11844_v11 = vcombine.low %v1307_v9, %v1311_v30 }
 0x39c   :  { %7475 = vmatpush1.bf16.msra.mxu1 %v11740_v12  ;;  %7433 = vmatprep.subr.bf16.mxu0 %v11605_v61  ;;  %v1175_v17 = vld [vmem:[#allocation5 + $0x1bb0] sm:$0xff] }
 0x39d   :  { %7476 = vmatprep.subr.bf16.mxu1 %v11733_v40  ;;  %v1299_v38 = vld [vmem:[#allocation5 + $0x1f90] sm:$0xff]  ;;  %v11709_v0 = vcombine.high %v1171_v16, %v1175_v17  ;;  %v11708_v13 = vcombine.low %v1171_v16, %v1175_v17 }
 0x39e   :  { %v1303_v45 = vld [vmem:[#allocation5 + $0x1fb0] sm:$0xff] }
 0x39f   :  { %7434 = vmatpush1.bf16.msra.mxu0 %v11604_v7  ;;  %v11837_v14 = vcombine.high %v1299_v38, %v1303_v45  ;;  %v1163_v44 = vld [vmem:[#allocation5 + $0x1b50] sm:$0xff]  ;;  %v11836_v31 = vcombine.low %v1299_v38, %v1303_v45 }
 0x3a0   :  { %7477 = vmatpush1.bf16.msra.mxu1 %v11732_v4  ;;  %7435 = vmatprep.subr.bf16.mxu0 %v11597_v27  ;;  %v1167_v12 = vld [vmem:[#allocation5 + $0x1b70] sm:$0xff] }
 0x3a1   :  { %7478 = vmatprep.subr.bf16.mxu1 %v11725_v51  ;;  %v1291_v61 = vld [vmem:[#allocation5 + $0x1f50] sm:$0xff]  ;;  %v11701_v3 = vcombine.high %v1163_v44, %v1167_v12  ;;  %v11700_v46 = vcombine.low %v1163_v44, %v1167_v12 }
 0x3a2   :  { %v1295_v40 = vld [vmem:[#allocation5 + $0x1f70] sm:$0xff] }
 0x3a3   :  { %7436 = vmatpush1.bf16.msra.mxu0 %v11596_v19  ;;  %v11829_v28 = vcombine.high %v1291_v61, %v1295_v40  ;;  %v1155_v7 = vld [vmem:[#allocation5 + $0x1b10] sm:$0xff]  ;;  %v11828_v36 = vcombine.low %v1291_v61, %v1295_v40 }
 0x3a4   :  { %7479 = vmatpush1.bf16.msra.mxu1 %v11724_v52  ;;  %7437 = vmatprep.subr.bf16.mxu0 %v11717_v15  ;;  %v1159_v4 = vld [vmem:[#allocation5 + $0x1b30] sm:$0xff] }
 0x3a5   :  { %7480 = vmatprep.subr.bf16.mxu1 %v11845_v54  ;;  %v1283_v27 = vld [vmem:[#allocation5 + $0x1f10] sm:$0xff]  ;;  %v11693_v9 = vcombine.high %v1155_v7, %v1159_v4  ;;  %v11692_v16 = vcombine.low %v1155_v7, %v1159_v4 }
 0x3a6   :  { %v1287_v51 = vld [vmem:[#allocation5 + $0x1f30] sm:$0xff] }
 0x3a7   :  { %7438 = vmatpush2.bf16.msra.mxu0 %v11716_v2  ;;  %v11821_v30 = vcombine.high %v1283_v27, %v1287_v51  ;;  %v1147_v19 = vld [vmem:[#allocation5 + $0x1ad0] sm:$0xff]  ;;  %v11820_v17 = vcombine.low %v1283_v27, %v1287_v51 }
 0x3a8   :  { %7481 = vmatpush2.bf16.msra.mxu1 %v11844_v11  ;;  %7439 = vmatprep.subr.bf16.mxu0 %v11709_v0  ;;  %v1151_v52 = vld [vmem:[#allocation5 + $0x1af0] sm:$0xff] }
 0x3a9   :  { %7482 = vmatprep.subr.bf16.mxu1 %v11837_v14  ;;  %v1275_v15 = vld [vmem:[#allocation5 + $0x1ed0] sm:$0xff]  ;;  %v11685_v38 = vcombine.high %v1147_v19, %v1151_v52  ;;  %v11684_v44 = vcombine.low %v1147_v19, %v1151_v52 }
 0x3aa   :  { %v1279_v54 = vld [vmem:[#allocation5 + $0x1ef0] sm:$0xff] }
 0x3ab   :  { %7440 = vmatpush2.bf16.msra.mxu0 %v11708_v13  ;;  %v11813_v45 = vcombine.high %v1275_v15, %v1279_v54  ;;  %v1139_v2 = vld [vmem:[#allocation5 + $0x1a90] sm:$0xff]  ;;  %v11812_v12 = vcombine.low %v1275_v15, %v1279_v54 }
 0x3ac   :  { %7483 = vmatpush2.bf16.msra.mxu1 %v11836_v31  ;;  %7441 = vmatprep.subr.bf16.mxu0 %v11701_v3  ;;  %v1143_v11 = vld [vmem:[#allocation5 + $0x1ab0] sm:$0xff] }
 0x3ad   :  { %7484 = vmatprep.subr.bf16.mxu1 %v11829_v28  ;;  %v1267_v0 = vld [vmem:[#allocation5 + $0x1e90] sm:$0xff]  ;;  %v11677_v61 = vcombine.high %v1139_v2, %v1143_v11  ;;  %v11676_v7 = vcombine.low %v1139_v2, %v1143_v11  ;;  %v1333_v11 = vsub.s32 4, %v13419_v41 }
 0x3ae   :  { %v1271_v14 = vld [vmem:[#allocation5 + $0x1eb0] sm:$0xff] }
 0x3af   :  { %7442 = vmatpush2.bf16.msra.mxu0 %v11700_v46  ;;  %v11805_v40 = vcombine.high %v1267_v0, %v1271_v14  ;;  %v1131_v13 = vld [vmem:[#allocation5 + $0x1a50] sm:$0xff]  ;;  %v11804_v4 = vcombine.low %v1267_v0, %v1271_v14 }
 0x3b0   :  { %7485 = vmatpush2.bf16.msra.mxu1 %v11828_v36  ;;  %7443 = vmatprep.subr.bf16.mxu0 %v11693_v9  ;;  %v1135_v31 = vld [vmem:[#allocation5 + $0x1a70] sm:$0xff] }
 0x3b1   :  { %7486 = vmatprep.subr.bf16.mxu1 %v11821_v30  ;;  %v1259_v3 = vld [vmem:[#allocation5 + $0x1e50] sm:$0xff]  ;;  %v11669_v27 = vcombine.high %v1131_v13, %v1135_v31  ;;  %v11668_v19 = vcombine.low %v1131_v13, %v1135_v31  ;;  %v472_v13 = vld [vmem:[#allocation5 + $0x5b8] sm:$0xff]  ;;  %v12869_v31 = vld [vmem:[#allocation7] sm:$0xff] }
 0x3b2   :  { %v1263_v28 = vld [vmem:[#allocation5 + $0x1e70] sm:$0xff] }
 0x3b3   :  { %7444 = vmatpush2.bf16.msra.mxu0 %v11692_v16  ;;  %v11797_v51 = vcombine.high %v1259_v3, %v1263_v28  ;;  %v1123_v46 = vld [vmem:[#allocation5 + $0x1a10] sm:$0xff]  ;;  %v11796_v52 = vcombine.low %v1259_v3, %v1263_v28  ;;  %v348_v16 = vld [vmem:[#allocation5 + $0x1d8] sm:$0xff]  ;;  %v1334_v3 = vrot.slane %v12869_v31, %v1333_v11 }
 0x3b4   :  { %7487 = vmatpush2.bf16.msra.mxu1 %v11820_v17  ;;  %7445 = vmatprep.subr.bf16.mxu0 %v11685_v38  ;;  %v1127_v36 = vld [vmem:[#allocation5 + $0x1a30] sm:$0xff]  ;;  %v352_v17 = vld [vmem:[#allocation5 + $0x1f8] sm:$0xff] }
 0x3b5   :  { %7488 = vmatprep.subr.bf16.mxu1 %v11813_v45  ;;  %v1251_v9 = vld [vmem:[#allocation5 + $0x1e10] sm:$0xff]  ;;  %v11661_v15 = vcombine.high %v1123_v46, %v1127_v36  ;;  %v476_v38 = vld [vmem:[#allocation5 + $0x5d8] sm:$0xff]  ;;  %v11660_v2 = vcombine.low %v1123_v46, %v1127_v36  ;;  %v10887_v14 = vcombine.high %v348_v16, %v352_v17  ;;  %v10886_v28 = vcombine.low %v348_v16, %v352_v17 }
 0x3b6   :  { %v1255_v30 = vld [vmem:[#allocation5 + $0x1e30] sm:$0xff]  ;;  %v480_v45 = vld [vmem:[#allocation5 + $0x5f8] sm:$0xff] }
 0x3b7   :  { %7446 = vmatpush2.bf16.msra.mxu0 %v11684_v44  ;;  %v11789_v54 = vcombine.high %v1251_v9, %v1255_v30  ;;  %v11788_v0 = vcombine.low %v1251_v9, %v1255_v30  ;;  %v11015_v44 = vcombine.high %v476_v38, %v480_v45  ;;  %v332_v36 = vld [vmem:[#allocation5 + $0x158] sm:$0xff] }
 0x3b8   :  { %7489 = vmatpush2.bf16.msra.mxu1 %v11812_v12  ;;  %7447 = vmatprep.subr.bf16.mxu0 %v11677_v61  ;;  %v340_v12 = vld [vmem:[#allocation5 + $0x198] sm:$0xff] }
 0x3b9   :  { %7490 = vmatprep.subr.bf16.mxu1 %v11805_v40  ;;  %v344_v61 = vld [vmem:[#allocation5 + $0x1b8] sm:$0xff] }
 0x3ba   :  { %v468_v40 = vld [vmem:[#allocation5 + $0x598] sm:$0xff]  ;;  %v10878_v16 = vcombine.low %v340_v12, %v344_v61 }
 0x3bb   :  { %7448 = vmatpush2.bf16.msra.mxu0 %v11676_v7  ;;  %v13565_v7 = vpop.f32.mrf.mxu0  ;;  %v11007_v46 = vcombine.high %v468_v40, %v472_v13  ;;  %v336_v9 = vld [vmem:[#allocation5 + $0x178] sm:$0xff] }
 0x3bc   :  { %7491 = vmatpush2.bf16.msra.mxu1 %v11804_v4  ;;  %7449 = vmatprep.subr.bf16.mxu0 %v11669_v27  ;;  %v11014_v4 = vcombine.low %v476_v38, %v480_v45  ;;  %v10879_v27 = vcombine.high %v340_v12, %v344_v61  ;;  %v11006_v38 = vcombine.low %v468_v40, %v472_v13 }
 0x3bd   :  { %7492 = vmatprep.subr.bf16.mxu1 %v11797_v51  ;;  %v13567_v51 = vpop.f32.mrf.mxu1  ;;  %v10871_v45 = vcombine.high %v332_v36, %v336_v9  ;;  %v10870_v61 = vcombine.low %v332_v36, %v336_v9  ;;  %v308_v9 = vld [vmem:[#allocation5 + $0x98] sm:$0xff] }
 0x3bf   :  { %7450 = vmatpush2.bf16.msra.mxu0 %v11668_v19  ;;  %v460_v19 = vld [vmem:[#allocation5 + $0x558] sm:$0xff] }
 0x3c0   :  { %7493 = vmatpush2.bf16.msra.mxu1 %v11796_v52  ;;  %7451 = vmatprep.subr.bf16.mxu0 %v11661_v15  ;;  %v464_v52 = vld [vmem:[#allocation5 + $0x578] sm:$0xff] }
 0x3c1   :  { %7494 = vmatprep.subr.bf16.mxu1 %v11789_v54  ;;  %v10998_v13 = vcombine.low %v460_v19, %v464_v52 }
 0x3c3   :  { %7452 = vmatpush2.bf16.msra.mxu0 %v11660_v2 }
 0x3c4   :  { %7495 = vmatpush2.bf16.msra.mxu1 %v11788_v0  ;;  %7507 = vmatprep.subr.bf16.mxu0 %v10887_v14  ;;  %v10999_v0 = vcombine.high %v460_v19, %v464_v52  ;;  %v324_v14 = vld [vmem:[#allocation5 + $0x118] sm:$0xff] }
 0x3c5   :  { %7550 = vmatprep.subr.bf16.mxu1 %v11015_v44  ;;  %v328_v44 = vld [vmem:[#allocation5 + $0x138] sm:$0xff] }
 0x3c6   :  { %v7197_v30 = vpop.f32.mrf.mxu0  ;;  %7454 = vmatmul.mubr.bf16.vlgmr.msra.gmra.mxu0 %v13424_v6  ;;  %v436_v19 = vld [vmem:[#allocation5 + $0x498] sm:$0xff] }
 0x3c7   :  { %v7198_v15 = vadd.f32 %v7197_v30, %v1334_v3  ;;  %v7240_v54 = vpop.f32.mrf.mxu1  ;;  %7497 = vmatmul.mubr.bf16.vlgmr.msra.gmra.mxu1 %v13427_v8  ;;  %7508 = vmatpush1.bf16.msra.mxu0 %v10886_v28  ;;  %v452_v30 = vld [vmem:[#allocation5 + $0x518] sm:$0xff] }
 0x3c8   :  { %7551 = vmatpush1.bf16.msra.mxu1 %v11014_v4  ;;  %v13571_v17 = vpop.f32.mrf.mxu0  ;;  %7509 = vmatprep.subr.bf16.mxu0 %v10879_v27  ;;  %v456_v28 = vld [vmem:[#allocation5 + $0x538] sm:$0xff]  ;;  %v10863_v4 = vcombine.high %v324_v14, %v328_v44 }
 0x3c9   :  { %v13573_v2 = vadd.f32 %v7240_v54, %v7198_v15  ;;  %v13575_v11 = vpop.f32.mrf.mxu1  ;;  %7552 = vmatprep.subr.bf16.mxu1 %v11007_v46  ;;  %7539 = vmatprep.mubr.bf16.mxu0 %v13377_v58  ;;  %v10991_v46 = vcombine.high %v452_v30, %v456_v28  ;;  %v316_v15 = vld [vmem:[#allocation5 + $0xd8] sm:$0xff] }
 0x3ca   :  { %13811 = vst [vmem:[#allocation51_spill] sm:$0xff] %v13575_v11  ;;  %v7201_v31 = vpop.f32.mrf.mxu0  ;;  %7582 = vmatprep.mubr.bf16.mxu1 %v13379_v63  ;;  %v320_v54 = vld [vmem:[#allocation5 + $0xf8] sm:$0xff]  ;;  %v10862_v11 = vcombine.low %v324_v14, %v328_v44  ;;  %v10990_v63 = vcombine.low %v452_v30, %v456_v28 }
 0x3cb   :  { %v7202_v12 = vadd.f32 %v7201_v31, %v1334_v3  ;;  %7510 = vmatpush1.bf16.msra.mxu0 %v10878_v16  ;;  %v7244_v40 = vpop.f32.mrf.mxu1  ;;  %v444_v58 = vld [vmem:[#allocation5 + $0x4d8] sm:$0xff]  ;;  %v10855_v3 = vcombine.high %v316_v15, %v320_v54 }
 0x3cc   :  { %7553 = vmatpush1.bf16.msra.mxu1 %v11006_v38  ;;  %7511 = vmatprep.subr.bf16.mxu0 %v10871_v45  ;;  %v10983_v36 = vcombine.high %v444_v58, %v448_v5  ;;  %v312_v16 = vld [vmem:[#allocation5 + $0xb8] sm:$0xff]  ;;  %v10854_v38 = vcombine.low %v316_v15, %v320_v54  ;;  %v10982_v45 = vcombine.low %v444_v58, %v448_v5 }
 0x3cd   :  { %v13579_v27 = vadd.f32 %v7244_v40, %v7202_v12  ;;  %7554 = vmatprep.subr.bf16.mxu1 %v10999_v0  ;;  %v440_v52 = vld [vmem:[#allocation5 + $0x4b8] sm:$0xff]  ;;  %v10847_v0 = vcombine.high %v308_v9, %v312_v16  ;;  %v10846_v30 = vcombine.low %v308_v9, %v312_v16 }
 0x3ce   :  { %v10975_v31 = vcombine.high %v436_v19, %v440_v52  ;;  %v300_v12 = vld [vmem:[#allocation5 + $0x58] sm:$0xff]  ;;  %v10974_v28 = vcombine.low %v436_v19, %v440_v52 }
 0x3cf   :  { %7512 = vmatpush1.bf16.msra.mxu0 %v10870_v61  ;;  %v304_v14 = vld [vmem:[#allocation5 + $0x78] sm:$0xff] }
 0x3d0   :  { %7555 = vmatpush1.bf16.msra.mxu1 %v10998_v13  ;;  %7513 = vmatprep.subr.bf16.mxu0 %v10863_v4  ;;  %v428_v44 = vld [vmem:[#allocation5 + $0x458] sm:$0xff]  ;;  %v10839_v40 = vcombine.high %v300_v12, %v304_v14  ;;  %v10838_v5 = vcombine.low %v300_v12, %v304_v14 }
 0x3d1   :  { %7556 = vmatprep.subr.bf16.mxu1 %v10991_v46  ;;  %v432_v61 = vld [vmem:[#allocation5 + $0x478] sm:$0xff] }
 0x3d2   :  { %v10967_v13 = vcombine.high %v428_v44, %v432_v61  ;;  %v296_v4 = vld [vmem:[#allocation5 + $0x38] sm:$0xff]  ;;  %v10966_v54 = vcombine.low %v428_v44, %v432_v61 }
 0x3d3   :  { %7514 = vmatpush1.bf16.msra.mxu0 %v10862_v11  ;;  %v292_v11 = vld [vmem:[#allocation5 + $0x18] sm:$0xff] }
 0x3d4   :  { %7557 = vmatpush1.bf16.msra.mxu1 %v10990_v63  ;;  %7515 = vmatprep.subr.bf16.mxu0 %v10855_v3  ;;  %v420_v46 = vld [vmem:[#allocation5 + $0x418] sm:$0xff]  ;;  %v10831_v58 = vcombine.high %v292_v11, %v296_v4  ;;  %v10830_v19 = vcombine.low %v292_v11, %v296_v4 }
 0x3d5   :  { %7558 = vmatprep.subr.bf16.mxu1 %v10983_v36  ;;  %v424_v15 = vld [vmem:[#allocation5 + $0x438] sm:$0xff] }
 0x3d6   :  { %v10959_v63 = vcombine.high %v420_v46, %v424_v15  ;;  %v412_v3 = vld [vmem:[#allocation5 + $0x3d8] sm:$0xff]  ;;  %v10958_v52 = vcombine.low %v420_v46, %v424_v15 }
 0x3d7   :  { %7516 = vmatpush1.bf16.msra.mxu0 %v10854_v38  ;;  %v416_v36 = vld [vmem:[#allocation5 + $0x3f8] sm:$0xff] }
 0x3d8   :  { %7559 = vmatpush1.bf16.msra.mxu1 %v10982_v45  ;;  %7517 = vmatprep.subr.bf16.mxu0 %v10847_v0  ;;  %v540_v9 = vld [vmem:[#allocation5 + $0x7d8] sm:$0xff]  ;;  %v10951_v38 = vcombine.high %v412_v3, %v416_v36  ;;  %v10950_v44 = vcombine.low %v412_v3, %v416_v36 }
 0x3d9   :  { %7560 = vmatprep.subr.bf16.mxu1 %v10975_v31  ;;  %v544_v16 = vld [vmem:[#allocation5 + $0x7f8] sm:$0xff] }
 0x3da   :  { %v11079_v45 = vcombine.high %v540_v9, %v544_v16  ;;  %v404_v0 = vld [vmem:[#allocation5 + $0x398] sm:$0xff]  ;;  %v11078_v61 = vcombine.low %v540_v9, %v544_v16 }
 0x3db   :  { %7518 = vmatpush1.bf16.msra.mxu0 %v10846_v30  ;;  %v408_v31 = vld [vmem:[#allocation5 + $0x3b8] sm:$0xff] }
 0x3dc   :  { %7561 = vmatpush1.bf16.msra.mxu1 %v10974_v28  ;;  %7519 = vmatprep.subr.bf16.mxu0 %v10839_v40  ;;  %v532_v12 = vld [vmem:[#allocation5 + $0x798] sm:$0xff]  ;;  %v10943_v30 = vcombine.high %v404_v0, %v408_v31  ;;  %v10942_v46 = vcombine.low %v404_v0, %v408_v31 }
 0x3dd   :  { %7562 = vmatprep.subr.bf16.mxu1 %v10967_v13  ;;  %v536_v14 = vld [vmem:[#allocation5 + $0x7b8] sm:$0xff] }
 0x3de   :  { %v11071_v28 = vcombine.high %v532_v12, %v536_v14  ;;  %v396_v40 = vld [vmem:[#allocation5 + $0x358] sm:$0xff]  ;;  %v11070_v15 = vcombine.low %v532_v12, %v536_v14 }
 0x3df   :  { %7520 = vmatpush1.bf16.msra.mxu0 %v10838_v5  ;;  %v400_v13 = vld [vmem:[#allocation5 + $0x378] sm:$0xff] }
 0x3e0   :  { %7563 = vmatpush1.bf16.msra.mxu1 %v10966_v54  ;;  %7521 = vmatprep.subr.bf16.mxu0 %v10831_v58  ;;  %v524_v11 = vld [vmem:[#allocation5 + $0x758] sm:$0xff]  ;;  %v10935_v5 = vcombine.high %v396_v40, %v400_v13  ;;  %v10934_v9 = vcombine.low %v396_v40, %v400_v13 }
 0x3e1   :  { %7564 = vmatprep.subr.bf16.mxu1 %v10959_v63  ;;  %v528_v4 = vld [vmem:[#allocation5 + $0x778] sm:$0xff] }
 0x3e2   :  { %v11063_v54 = vcombine.high %v524_v11, %v528_v4  ;;  %v388_v58 = vld [vmem:[#allocation5 + $0x318] sm:$0xff]  ;;  %v11062_v16 = vcombine.low %v524_v11, %v528_v4 }
 0x3e3   :  { %7522 = vmatpush1.bf16.msra.mxu0 %v10830_v19  ;;  %v392_v63 = vld [vmem:[#allocation5 + $0x338] sm:$0xff] }
 0x3e4   :  { %7565 = vmatpush1.bf16.msra.mxu1 %v10958_v52  ;;  %7523 = vmatprep.subr.bf16.mxu0 %v10951_v38  ;;  %v516_v3 = vld [vmem:[#allocation5 + $0x718] sm:$0xff]  ;;  %v10927_v19 = vcombine.high %v388_v58, %v392_v63  ;;  %v10926_v12 = vcombine.low %v388_v58, %v392_v63 }
 0x3e5   :  { %7566 = vmatprep.subr.bf16.mxu1 %v11079_v45  ;;  %v520_v36 = vld [vmem:[#allocation5 + $0x738] sm:$0xff] }
 0x3e6   :  { %v11055_v52 = vcombine.high %v516_v3, %v520_v36  ;;  %v380_v38 = vld [vmem:[#allocation5 + $0x2d8] sm:$0xff]  ;;  %v11054_v14 = vcombine.low %v516_v3, %v520_v36 }
 0x3e7   :  { %7524 = vmatpush2.bf16.msra.mxu0 %v10950_v44  ;;  %v384_v45 = vld [vmem:[#allocation5 + $0x2f8] sm:$0xff] }
 0x3e8   :  { %7567 = vmatpush2.bf16.msra.mxu1 %v11078_v61  ;;  %7525 = vmatprep.subr.bf16.mxu0 %v10943_v30  ;;  %v508_v0 = vld [vmem:[#allocation5 + $0x6d8] sm:$0xff]  ;;  %v10919_v44 = vcombine.high %v380_v38, %v384_v45  ;;  %v10918_v11 = vcombine.low %v380_v38, %v384_v45 }
 0x3e9   :  { %7568 = vmatprep.subr.bf16.mxu1 %v11071_v28  ;;  %v512_v31 = vld [vmem:[#allocation5 + $0x6f8] sm:$0xff] }
 0x3ea   :  { %v11047_v61 = vcombine.high %v508_v0, %v512_v31  ;;  %v372_v30 = vld [vmem:[#allocation5 + $0x298] sm:$0xff]  ;;  %v11046_v4 = vcombine.low %v508_v0, %v512_v31 }
 0x3eb   :  { %7526 = vmatpush2.bf16.msra.mxu0 %v10942_v46  ;;  %v376_v28 = vld [vmem:[#allocation5 + $0x2b8] sm:$0xff] }
 0x3ec   :  { %7569 = vmatpush2.bf16.msra.mxu1 %v11070_v15  ;;  %7527 = vmatprep.subr.bf16.mxu0 %v10935_v5  ;;  %v500_v40 = vld [vmem:[#allocation5 + $0x698] sm:$0xff]  ;;  %v10911_v46 = vcombine.high %v372_v30, %v376_v28  ;;  %v10910_v3 = vcombine.low %v372_v30, %v376_v28 }
 0x3ed   :  { %7570 = vmatprep.subr.bf16.mxu1 %v11063_v54  ;;  %v504_v13 = vld [vmem:[#allocation5 + $0x6b8] sm:$0xff] }
 0x3ee   :  { %v11039_v15 = vcombine.high %v500_v40, %v504_v13  ;;  %v364_v5 = vld [vmem:[#allocation5 + $0x258] sm:$0xff]  ;;  %v11038_v36 = vcombine.low %v500_v40, %v504_v13 }
 0x3ef   :  { %7528 = vmatpush2.bf16.msra.mxu0 %v10934_v9  ;;  %v368_v54 = vld [vmem:[#allocation5 + $0x278] sm:$0xff] }
 0x3f0   :  { %7571 = vmatpush2.bf16.msra.mxu1 %v11062_v16  ;;  %7529 = vmatprep.subr.bf16.mxu0 %v10927_v19  ;;  %v492_v58 = vld [vmem:[#allocation5 + $0x658] sm:$0xff]  ;;  %v10903_v9 = vcombine.high %v364_v5, %v368_v54  ;;  %v10902_v0 = vcombine.low %v364_v5, %v368_v54 }
 0x3f1   :  { %7572 = vmatprep.subr.bf16.mxu1 %v11055_v52  ;;  %v496_v63 = vld [vmem:[#allocation5 + $0x678] sm:$0xff] }
 0x3f2   :  { %v11031_v16 = vcombine.high %v492_v58, %v496_v63  ;;  %v356_v19 = vld [vmem:[#allocation5 + $0x218] sm:$0xff]  ;;  %v11030_v31 = vcombine.low %v492_v58, %v496_v63  ;;  %v13581_v63 = vpop.f32.mrf.mxu0 }
 0x3f3   :  { %7530 = vmatpush2.bf16.msra.mxu0 %v10926_v12  ;;  %v360_v52 = vld [vmem:[#allocation5 + $0x238] sm:$0xff] }
 0x3f4   :  { %7573 = vmatpush2.bf16.msra.mxu1 %v11054_v14  ;;  %7531 = vmatprep.subr.bf16.mxu0 %v10919_v44  ;;  %v484_v38 = vld [vmem:[#allocation5 + $0x618] sm:$0xff]  ;;  %v10895_v12 = vcombine.high %v356_v19, %v360_v52  ;;  %v10894_v40 = vcombine.low %v356_v19, %v360_v52 }
 0x3f5   :  { %7574 = vmatprep.subr.bf16.mxu1 %v11047_v61  ;;  %v488_v45 = vld [vmem:[#allocation5 + $0x638] sm:$0xff] }
 0x3f6   :  { %v11023_v14 = vcombine.high %v484_v38, %v488_v45  ;;  %v604_v44 = vld [vmem:[#allocation5 + $0x9d8] sm:$0xff]  ;;  %v11022_v13 = vcombine.low %v484_v38, %v488_v45 }
 0x3f7   :  { %7532 = vmatpush2.bf16.msra.mxu0 %v10918_v11  ;;  %v608_v61 = vld [vmem:[#allocation5 + $0x9f8] sm:$0xff] }
 0x3f8   :  { %7575 = vmatpush2.bf16.msra.mxu1 %v11046_v4  ;;  %7533 = vmatprep.subr.bf16.mxu0 %v10911_v46  ;;  %v732_v30 = vld [vmem:[#allocation5 + $0xdd8] sm:$0xff]  ;;  %v11143_v11 = vcombine.high %v604_v44, %v608_v61  ;;  %v11142_v58 = vcombine.low %v604_v44, %v608_v61 }
 0x3f9   :  { %7576 = vmatprep.subr.bf16.mxu1 %v11039_v15  ;;  %v736_v28 = vld [vmem:[#allocation5 + $0xdf8] sm:$0xff] }
 0x3fa   :  { %v11271_v4 = vcombine.high %v732_v30, %v736_v28  ;;  %v596_v46 = vld [vmem:[#allocation5 + $0x998] sm:$0xff] }
 0x3fb   :  { %7534 = vmatpush2.bf16.msra.mxu0 %v10910_v3  ;;  %v600_v15 = vld [vmem:[#allocation5 + $0x9b8] sm:$0xff]  ;;  %v11270_v3 = vcombine.low %v732_v30, %v736_v28 }
 0x3fc   :  { %7577 = vmatpush2.bf16.msra.mxu1 %v11038_v36  ;;  %7535 = vmatprep.subr.bf16.mxu0 %v10903_v9  ;;  %v724_v5 = vld [vmem:[#allocation5 + $0xd98] sm:$0xff]  ;;  %v11135_v36 = vcombine.high %v596_v46, %v600_v15  ;;  %v13583_v9 = vpop.f32.mrf.mxu1 }
 0x3fd   :  { %7578 = vmatprep.subr.bf16.mxu1 %v11031_v16  ;;  %v728_v54 = vld [vmem:[#allocation5 + $0xdb8] sm:$0xff] }
 0x3fe   :  { %v11263_v16 = vcombine.high %v724_v5, %v728_v54  ;;  %v588_v19 = vld [vmem:[#allocation5 + $0x958] sm:$0xff]  ;;  %v11262_v61 = vcombine.low %v724_v5, %v728_v54 }
 0x3ff   :  { %7536 = vmatpush2.bf16.msra.mxu0 %v10902_v0  ;;  %v592_v52 = vld [vmem:[#allocation5 + $0x978] sm:$0xff] }
 0x400   :  { %7579 = vmatpush2.bf16.msra.mxu1 %v11030_v31  ;;  %7537 = vmatprep.subr.bf16.mxu0 %v10895_v12  ;;  %v716_v45 = vld [vmem:[#allocation5 + $0xd58] sm:$0xff]  ;;  %v11127_v30 = vcombine.high %v588_v19, %v592_v52 }
 0x401   :  { %7580 = vmatprep.subr.bf16.mxu1 %v11023_v14  ;;  %v720_v0 = vld [vmem:[#allocation5 + $0xd78] sm:$0xff]  ;;  %v11134_v14 = vcombine.low %v596_v46, %v600_v15  ;;  %v11126_v15 = vcombine.low %v588_v19, %v592_v52 }
 0x402   :  { %v11254_v54 = vcombine.low %v716_v45, %v720_v0  ;;  %v564_v52 = vld [vmem:[#allocation5 + $0x898] sm:$0xff] }
 0x403   :  { %7538 = vmatpush2.bf16.msra.mxu0 %v10894_v40 }
 0x404   :  { %7581 = vmatpush2.bf16.msra.mxu1 %v11022_v13  ;;  %7593 = vmatprep.subr.bf16.mxu0 %v11143_v11  ;;  %v580_v13 = vld [vmem:[#allocation5 + $0x918] sm:$0xff] }
 0x405   :  { %7636 = vmatprep.subr.bf16.mxu1 %v11271_v4  ;;  %v584_v11 = vld [vmem:[#allocation5 + $0x938] sm:$0xff] }
 0x406   :  { %v7283_v38 = vpop.f32.mrf.mxu0  ;;  %7540 = vmatmul.mubr.bf16.vlgmr.msra.gmra.mxu0 %v13383_v21  ;;  %v11255_v21 = vcombine.high %v716_v45, %v720_v0  ;;  %v712_v4 = vld [vmem:[#allocation5 + $0xd38] sm:$0xff] }
 0x407   :  { %v7284_v31 = vadd.f32 %v7283_v38, %v13573_v2  ;;  %v7326_v12 = vpop.f32.mrf.mxu1  ;;  %7583 = vmatmul.mubr.bf16.vlgmr.msra.gmra.mxu1 %v13385_v25  ;;  %7594 = vmatpush1.bf16.msra.mxu0 %v11142_v58  ;;  %v708_v25 = vld [vmem:[#allocation5 + $0xd18] sm:$0xff]  ;;  %v11119_v58 = vcombine.high %v580_v13, %v584_v11 }
 0x408   :  { %7637 = vmatpush1.bf16.msra.mxu1 %v11270_v3  ;;  %v13588_v44 = vpop.f32.mrf.mxu0  ;;  %7595 = vmatprep.subr.bf16.mxu0 %v11135_v36  ;;  %v11247_v36 = vcombine.high %v708_v25, %v712_v4  ;;  %v700_v38 = vld [vmem:[#allocation5 + $0xcd8] sm:$0xff] }
 0x409   :  { %v13590_v28 = vadd.f32 %v7326_v12, %v7284_v31  ;;  %v13592_v40 = vpop.f32.mrf.mxu1  ;;  %7638 = vmatprep.subr.bf16.mxu1 %v11263_v16  ;;  %7625 = vmatprep.mubr.bf16.mxu0 %v13387_v34  ;;  %v572_v16 = vld [vmem:[#allocation5 + $0x8d8] sm:$0xff]  ;;  %v11118_v12 = vcombine.low %v580_v13, %v584_v11 }
 0x40a   :  { %v7287_v2 = vpop.f32.mrf.mxu0  ;;  %7668 = vmatprep.mubr.bf16.mxu1 %v13390_v37  ;;  %v576_v34 = vld [vmem:[#allocation5 + $0x8f8] sm:$0xff]  ;;  %v11246_v37 = vcombine.low %v708_v25, %v712_v4 }
 0x40b   :  { %v7288_v46 = vadd.f32 %v7287_v2, %v13579_v27  ;;  %7596 = vmatpush1.bf16.msra.mxu0 %v11134_v14  ;;  %v7330_v5 = vpop.f32.mrf.mxu1  ;;  %v704_v31 = vld [vmem:[#allocation5 + $0xcf8] sm:$0xff]  ;;  %v11111_v27 = vcombine.high %v572_v16, %v576_v34 }
 0x40c   :  { %7639 = vmatpush1.bf16.msra.mxu1 %v11262_v61  ;;  %7597 = vmatprep.subr.bf16.mxu0 %v11127_v30  ;;  %v11239_v19 = vcombine.high %v700_v38, %v704_v31  ;;  %v568_v14 = vld [vmem:[#allocation5 + $0x8b8] sm:$0xff]  ;;  %v11110_v61 = vcombine.low %v572_v16, %v576_v34  ;;  %v11238_v30 = vcombine.low %v700_v38, %v704_v31 }
 0x40d   :  { %v13597_v3 = vadd.f32 %v7330_v5, %v7288_v46  ;;  %7640 = vmatprep.subr.bf16.mxu1 %v11255_v21  ;;  %v692_v45 = vld [vmem:[#allocation5 + $0xc98] sm:$0xff]  ;;  %v11103_v21 = vcombine.high %v564_v52, %v568_v14  ;;  %v11102_v25 = vcombine.low %v564_v52, %v568_v14 }
 0x40e   :  { %v696_v0 = vld [vmem:[#allocation5 + $0xcb8] sm:$0xff] }
 0x40f   :  { %7598 = vmatpush1.bf16.msra.mxu0 %v11126_v15  ;;  %v11231_v2 = vcombine.high %v692_v45, %v696_v0  ;;  %v556_v46 = vld [vmem:[#allocation5 + $0x858] sm:$0xff]  ;;  %v11230_v4 = vcombine.low %v692_v45, %v696_v0 }
 0x410   :  { %7641 = vmatpush1.bf16.msra.mxu1 %v11254_v54  ;;  %7599 = vmatprep.subr.bf16.mxu0 %v11119_v58  ;;  %v560_v13 = vld [vmem:[#allocation5 + $0x878] sm:$0xff] }
 0x411   :  { %7642 = vmatprep.subr.bf16.mxu1 %v11247_v36  ;;  %v684_v11 = vld [vmem:[#allocation5 + $0xc58] sm:$0xff]  ;;  %v11095_v5 = vcombine.high %v556_v46, %v560_v13  ;;  %v11094_v38 = vcombine.low %v556_v46, %v560_v13 }
 0x412   :  { %v688_v15 = vld [vmem:[#allocation5 + $0xc78] sm:$0xff] }
 0x413   :  { %7600 = vmatpush1.bf16.msra.mxu0 %v11118_v12  ;;  %v11223_v54 = vcombine.high %v684_v11, %v688_v15  ;;  %v548_v58 = vld [vmem:[#allocation5 + $0x818] sm:$0xff]  ;;  %v11222_v31 = vcombine.low %v684_v11, %v688_v15 }
 0x414   :  { %7643 = vmatpush1.bf16.msra.mxu1 %v11246_v37  ;;  %7601 = vmatprep.subr.bf16.mxu0 %v11111_v27  ;;  %v552_v36 = vld [vmem:[#allocation5 + $0x838] sm:$0xff] }
 0x415   :  { %7644 = vmatprep.subr.bf16.mxu1 %v11239_v19  ;;  %v676_v16 = vld [vmem:[#allocation5 + $0xc18] sm:$0xff]  ;;  %v11087_v12 = vcombine.high %v548_v58, %v552_v36  ;;  %v11086_v45 = vcombine.low %v548_v58, %v552_v36 }
 0x416   :  { %v680_v34 = vld [vmem:[#allocation5 + $0xc38] sm:$0xff] }
 0x417   :  { %7602 = vmatpush1.bf16.msra.mxu0 %v11110_v61  ;;  %v11215_v37 = vcombine.high %v676_v16, %v680_v34  ;;  %v668_v27 = vld [vmem:[#allocation5 + $0xbd8] sm:$0xff]  ;;  %v11214_v0 = vcombine.low %v676_v16, %v680_v34 }
 0x418   :  { %7645 = vmatpush1.bf16.msra.mxu1 %v11238_v30  ;;  %7603 = vmatprep.subr.bf16.mxu0 %v11103_v21  ;;  %v672_v19 = vld [vmem:[#allocation5 + $0xbf8] sm:$0xff] }
 0x419   :  { %7646 = vmatprep.subr.bf16.mxu1 %v11231_v2  ;;  %v796_v52 = vld [vmem:[#allocation5 + $0xfd8] sm:$0xff]  ;;  %v11207_v61 = vcombine.high %v668_v27, %v672_v19  ;;  %v11206_v11 = vcombine.low %v668_v27, %v672_v19 }
 0x41a   :  { %v800_v14 = vld [vmem:[#allocation5 + $0xff8] sm:$0xff] }
 0x41b   :  { %7604 = vmatpush1.bf16.msra.mxu0 %v11102_v25  ;;  %v11335_v30 = vcombine.high %v796_v52, %v800_v14  ;;  %v660_v21 = vld [vmem:[#allocation5 + $0xb98] sm:$0xff]  ;;  %v11334_v15 = vcombine.low %v796_v52, %v800_v14 }
 0x41c   :  { %7647 = vmatpush1.bf16.msra.mxu1 %v11230_v4  ;;  %7605 = vmatprep.subr.bf16.mxu0 %v11095_v5  ;;  %v664_v2 = vld [vmem:[#allocation5 + $0xbb8] sm:$0xff] }
 0x41d   :  { %7648 = vmatprep.subr.bf16.mxu1 %v11223_v54  ;;  %v788_v46 = vld [vmem:[#allocation5 + $0xf98] sm:$0xff]  ;;  %v11199_v25 = vcombine.high %v660_v21, %v664_v2  ;;  %v11198_v16 = vcombine.low %v660_v21, %v664_v2 }
 0x41e   :  { %v792_v13 = vld [vmem:[#allocation5 + $0xfb8] sm:$0xff] }
 0x41f   :  { %7606 = vmatpush1.bf16.msra.mxu0 %v11094_v38  ;;  %v11327_v4 = vcombine.high %v788_v46, %v792_v13  ;;  %v652_v5 = vld [vmem:[#allocation5 + $0xb58] sm:$0xff]  ;;  %v11326_v34 = vcombine.low %v788_v46, %v792_v13 }
 0x420   :  { %7649 = vmatpush1.bf16.msra.mxu1 %v11222_v31  ;;  %7607 = vmatprep.subr.bf16.mxu0 %v11087_v12  ;;  %v656_v54 = vld [vmem:[#allocation5 + $0xb78] sm:$0xff] }
 0x421   :  { %7650 = vmatprep.subr.bf16.mxu1 %v11215_v37  ;;  %v780_v58 = vld [vmem:[#allocation5 + $0xf58] sm:$0xff]  ;;  %v11191_v38 = vcombine.high %v652_v5, %v656_v54  ;;  %v11190_v52 = vcombine.low %v652_v5, %v656_v54 }
 0x422   :  { %v784_v36 = vld [vmem:[#allocation5 + $0xf78] sm:$0xff] }
 0x423   :  { %7608 = vmatpush1.bf16.msra.mxu0 %v11086_v45  ;;  %v11319_v31 = vcombine.high %v780_v58, %v784_v36  ;;  %v644_v12 = vld [vmem:[#allocation5 + $0xb18] sm:$0xff]  ;;  %v11318_v14 = vcombine.low %v780_v58, %v784_v36 }
 0x424   :  { %7651 = vmatpush1.bf16.msra.mxu1 %v11214_v0  ;;  %7609 = vmatprep.subr.bf16.mxu0 %v11207_v61  ;;  %v648_v37 = vld [vmem:[#allocation5 + $0xb38] sm:$0xff] }
 0x425   :  { %7652 = vmatprep.subr.bf16.mxu1 %v11335_v30  ;;  %v772_v27 = vld [vmem:[#allocation5 + $0xf18] sm:$0xff]  ;;  %v11183_v45 = vcombine.high %v644_v12, %v648_v37  ;;  %v11182_v46 = vcombine.low %v644_v12, %v648_v37 }
 0x426   :  { %v776_v19 = vld [vmem:[#allocation5 + $0xf38] sm:$0xff] }
 0x427   :  { %7610 = vmatpush2.bf16.msra.mxu0 %v11206_v11  ;;  %v11311_v0 = vcombine.high %v772_v27, %v776_v19  ;;  %v636_v61 = vld [vmem:[#allocation5 + $0xad8] sm:$0xff]  ;;  %v11310_v13 = vcombine.low %v772_v27, %v776_v19 }
 0x428   :  { %7653 = vmatpush2.bf16.msra.mxu1 %v11334_v15  ;;  %7611 = vmatprep.subr.bf16.mxu0 %v11199_v25  ;;  %v640_v30 = vld [vmem:[#allocation5 + $0xaf8] sm:$0xff] }
 0x429   :  { %7654 = vmatprep.subr.bf16.mxu1 %v11327_v4  ;;  %v764_v21 = vld [vmem:[#allocation5 + $0xed8] sm:$0xff]  ;;  %v11175_v11 = vcombine.high %v636_v61, %v640_v30  ;;  %v11174_v58 = vcombine.low %v636_v61, %v640_v30 }
 0x42a   :  { %v768_v2 = vld [vmem:[#allocation5 + $0xef8] sm:$0xff] }
 0x42b   :  { %7612 = vmatpush2.bf16.msra.mxu0 %v11198_v16  ;;  %v11303_v15 = vcombine.high %v764_v21, %v768_v2  ;;  %v628_v25 = vld [vmem:[#allocation5 + $0xa98] sm:$0xff]  ;;  %v11302_v36 = vcombine.low %v764_v21, %v768_v2 }
 0x42c   :  { %7655 = vmatpush2.bf16.msra.mxu1 %v11326_v34  ;;  %7613 = vmatprep.subr.bf16.mxu0 %v11191_v38  ;;  %v632_v4 = vld [vmem:[#allocation5 + $0xab8] sm:$0xff] }
 0x42d   :  { %7656 = vmatprep.subr.bf16.mxu1 %v11319_v31  ;;  %v756_v5 = vld [vmem:[#allocation5 + $0xe98] sm:$0xff]  ;;  %v11167_v16 = vcombine.high %v628_v25, %v632_v4  ;;  %v11166_v27 = vcombine.low %v628_v25, %v632_v4 }
 0x42e   :  { %v760_v54 = vld [vmem:[#allocation5 + $0xeb8] sm:$0xff] }
 0x42f   :  { %7614 = vmatpush2.bf16.msra.mxu0 %v11190_v52  ;;  %v11295_v34 = vcombine.high %v756_v5, %v760_v54  ;;  %v620_v38 = vld [vmem:[#allocation5 + $0xa58] sm:$0xff]  ;;  %v11294_v19 = vcombine.low %v756_v5, %v760_v54 }
 0x430   :  { %7657 = vmatpush2.bf16.msra.mxu1 %v11318_v14  ;;  %7615 = vmatprep.subr.bf16.mxu0 %v11183_v45  ;;  %v624_v31 = vld [vmem:[#allocation5 + $0xa78] sm:$0xff] }
 0x431   :  { %7658 = vmatprep.subr.bf16.mxu1 %v11311_v0  ;;  %v748_v12 = vld [vmem:[#allocation5 + $0xe58] sm:$0xff]  ;;  %v11159_v52 = vcombine.high %v620_v38, %v624_v31  ;;  %v11158_v21 = vcombine.low %v620_v38, %v624_v31 }
 0x432   :  { %v752_v37 = vld [vmem:[#allocation5 + $0xe78] sm:$0xff] }
 0x433   :  { %7616 = vmatpush2.bf16.msra.mxu0 %v11182_v46  ;;  %v11287_v14 = vcombine.high %v748_v12, %v752_v37  ;;  %v612_v45 = vld [vmem:[#allocation5 + $0xa18] sm:$0xff]  ;;  %v11286_v2 = vcombine.low %v748_v12, %v752_v37  ;;  %v13599_v37 = vpop.f32.mrf.mxu0 }
 0x434   :  { %7659 = vmatpush2.bf16.msra.mxu1 %v11310_v13  ;;  %7617 = vmatprep.subr.bf16.mxu0 %v11175_v11  ;;  %v616_v0 = vld [vmem:[#allocation5 + $0xa38] sm:$0xff] }
 0x435   :  { %7660 = vmatprep.subr.bf16.mxu1 %v11303_v15  ;;  %v740_v61 = vld [vmem:[#allocation5 + $0xe18] sm:$0xff]  ;;  %v11151_v46 = vcombine.high %v612_v45, %v616_v0  ;;  %v11150_v5 = vcombine.low %v612_v45, %v616_v0 }
 0x436   :  { %v744_v30 = vld [vmem:[#allocation5 + $0xe38] sm:$0xff] }
 0x437   :  { %7618 = vmatpush2.bf16.msra.mxu0 %v11174_v58  ;;  %v11279_v13 = vcombine.high %v740_v61, %v744_v30  ;;  %v860_v11 = vld [vmem:[#allocation5 + $0x11d8] sm:$0xff]  ;;  %v11278_v54 = vcombine.low %v740_v61, %v744_v30 }
 0x438   :  { %7661 = vmatpush2.bf16.msra.mxu1 %v11302_v36  ;;  %7619 = vmatprep.subr.bf16.mxu0 %v11167_v16  ;;  %v864_v15 = vld [vmem:[#allocation5 + $0x11f8] sm:$0xff] }
 0x439   :  { %7662 = vmatprep.subr.bf16.mxu1 %v11295_v34  ;;  %v988_v25 = vld [vmem:[#allocation5 + $0x15d8] sm:$0xff]  ;;  %v11399_v58 = vcombine.high %v860_v11, %v864_v15  ;;  %v11398_v12 = vcombine.low %v860_v11, %v864_v15 }
 0x43a   :  { %v992_v4 = vld [vmem:[#allocation5 + $0x15f8] sm:$0xff] }
 0x43b   :  { %7620 = vmatpush2.bf16.msra.mxu0 %v11166_v27  ;;  %v11527_v36 = vcombine.high %v988_v25, %v992_v4  ;;  %v852_v16 = vld [vmem:[#allocation5 + $0x1198] sm:$0xff]  ;;  %v11526_v27 = vcombine.low %v988_v25, %v992_v4 }
 0x43c   :  { %7663 = vmatpush2.bf16.msra.mxu1 %v11294_v19  ;;  %7621 = vmatprep.subr.bf16.mxu0 %v11159_v52  ;;  %v856_v34 = vld [vmem:[#allocation5 + $0x11b8] sm:$0xff]  ;;  %v13601_v52 = vpop.f32.mrf.mxu1 }
 0x43d   :  { %7664 = vmatprep.subr.bf16.mxu1 %v11287_v14  ;;  %v980_v38 = vld [vmem:[#allocation5 + $0x1598] sm:$0xff]  ;;  %v11391_v19 = vcombine.high %v852_v16, %v856_v34 }
 0x43e   :  { %v984_v31 = vld [vmem:[#allocation5 + $0x15b8] sm:$0xff] }
 0x43f   :  { %7622 = vmatpush2.bf16.msra.mxu0 %v11158_v21  ;;  %v11519_v14 = vcombine.high %v980_v38, %v984_v31  ;;  %v844_v45 = vld [vmem:[#allocation5 + $0x1158] sm:$0xff]  ;;  %v11518_v15 = vcombine.low %v980_v38, %v984_v31 }
 0x440   :  { %7665 = vmatpush2.bf16.msra.mxu1 %v11286_v2  ;;  %7623 = vmatprep.subr.bf16.mxu0 %v11151_v46  ;;  %v848_v0 = vld [vmem:[#allocation5 + $0x1178] sm:$0xff] }
 0x441   :  { %7666 = vmatprep.subr.bf16.mxu1 %v11279_v13  ;;  %v972_v30 = vld [vmem:[#allocation5 + $0x1558] sm:$0xff]  ;;  %v11390_v13 = vcombine.low %v852_v16, %v856_v34  ;;  %v11383_v25 = vcombine.high %v844_v45, %v848_v0  ;;  %v11382_v34 = vcombine.low %v844_v45, %v848_v0 }
 0x442   :  { %v976_v21 = vld [vmem:[#allocation5 + $0x1578] sm:$0xff] }
 0x443   :  { %7624 = vmatpush2.bf16.msra.mxu0 %v11150_v5  ;;  %v11510_v31 = vcombine.low %v972_v30, %v976_v21  ;;  %v820_v0 = vld [vmem:[#allocation5 + $0x1098] sm:$0xff] }
 0x444   :  { %7667 = vmatpush2.bf16.msra.mxu1 %v11278_v54  ;;  %7679 = vmatprep.subr.bf16.mxu0 %v11399_v58  ;;  %v836_v54 = vld [vmem:[#allocation5 + $0x1118] sm:$0xff] }
 0x445   :  { %7722 = vmatprep.subr.bf16.mxu1 %v11527_v36  ;;  %v840_v58 = vld [vmem:[#allocation5 + $0x1138] sm:$0xff] }
 0x446   :  { %v7369_v61 = vpop.f32.mrf.mxu0  ;;  %7626 = vmatmul.mubr.bf16.vlgmr.msra.gmra.mxu0 %v13395_v48  ;;  %v11511_v48 = vcombine.high %v972_v30, %v976_v21  ;;  %v968_v36 = vld [vmem:[#allocation5 + $0x1538] sm:$0xff] }
 0x447   :  { %v7370_v2 = vadd.f32 %v7369_v61, %v13590_v28  ;;  %v7412_v46 = vpop.f32.mrf.mxu1  ;;  %7669 = vmatmul.mubr.bf16.vlgmr.msra.gmra.mxu1 %v13397_v49  ;;  %7680 = vmatpush1.bf16.msra.mxu0 %v11398_v12  ;;  %v964_v49 = vld [vmem:[#allocation5 + $0x1518] sm:$0xff]  ;;  %v11375_v12 = vcombine.high %v836_v54, %v840_v58 }
 0x448   :  { %7723 = vmatpush1.bf16.msra.mxu1 %v11526_v27  ;;  %v13606_v11 = vpop.f32.mrf.mxu0  ;;  %7681 = vmatprep.subr.bf16.mxu0 %v11391_v19  ;;  %v11503_v19 = vcombine.high %v964_v49, %v968_v36  ;;  %v956_v61 = vld [vmem:[#allocation5 + $0x14d8] sm:$0xff] }
 0x449   :  { %v13608_v4 = vadd.f32 %v7412_v46, %v7370_v2  ;;  %v13610_v5 = vpop.f32.mrf.mxu1  ;;  %7724 = vmatprep.subr.bf16.mxu1 %v11519_v14  ;;  %7711 = vmatprep.mubr.bf16.mxu0 %v13399_v59  ;;  %v828_v14 = vld [vmem:[#allocation5 + $0x10d8] sm:$0xff]  ;;  %v11374_v46 = vcombine.low %v836_v54, %v840_v58 }
 0x44a   :  { %v7373_v28 = vpop.f32.mrf.mxu0  ;;  %7754 = vmatprep.mubr.bf16.mxu1 %v13402_v62  ;;  %v832_v59 = vld [vmem:[#allocation5 + $0x10f8] sm:$0xff]  ;;  %v11502_v62 = vcombine.low %v964_v49, %v968_v36 }
 0x44b   :  { %v7374_v16 = vadd.f32 %v7373_v28, %v13597_v3  ;;  %7682 = vmatpush1.bf16.msra.mxu0 %v11390_v13  ;;  %v7416_v38 = vpop.f32.mrf.mxu1  ;;  %v960_v2 = vld [vmem:[#allocation5 + $0x14f8] sm:$0xff]  ;;  %v11367_v3 = vcombine.high %v828_v14, %v832_v59 }
 0x44c   :  { %7725 = vmatpush1.bf16.msra.mxu1 %v11518_v15  ;;  %7683 = vmatprep.subr.bf16.mxu0 %v11383_v25  ;;  %v11495_v45 = vcombine.high %v956_v61, %v960_v2  ;;  %v824_v13 = vld [vmem:[#allocation5 + $0x10b8] sm:$0xff]  ;;  %v11366_v15 = vcombine.low %v828_v14, %v832_v59  ;;  %v11494_v25 = vcombine.low %v956_v61, %v960_v2 }
 0x44d   :  { %v13615_v27 = vadd.f32 %v7416_v38, %v7374_v16  ;;  %7726 = vmatprep.subr.bf16.mxu1 %v11511_v48  ;;  %v948_v30 = vld [vmem:[#allocation5 + $0x1498] sm:$0xff]  ;;  %v11359_v48 = vcombine.high %v820_v0, %v824_v13  ;;  %v11358_v49 = vcombine.low %v820_v0, %v824_v13 }
 0x44e   :  { %v952_v21 = vld [vmem:[#allocation5 + $0x14b8] sm:$0xff] }
 0x44f   :  { %7684 = vmatpush1.bf16.msra.mxu0 %v11382_v34  ;;  %v11487_v28 = vcombine.high %v948_v30, %v952_v21  ;;  %v812_v16 = vld [vmem:[#allocation5 + $0x1058] sm:$0xff]  ;;  %v11486_v36 = vcombine.low %v948_v30, %v952_v21 }
 0x450   :  { %7727 = vmatpush1.bf16.msra.mxu1 %v11510_v31  ;;  %7685 = vmatprep.subr.bf16.mxu0 %v11375_v12  ;;  %v816_v54 = vld [vmem:[#allocation5 + $0x1078] sm:$0xff] }
 0x451   :  { %7728 = vmatprep.subr.bf16.mxu1 %v11503_v19  ;;  %v940_v58 = vld [vmem:[#allocation5 + $0x1458] sm:$0xff]  ;;  %v11351_v38 = vcombine.high %v812_v16, %v816_v54  ;;  %v11350_v61 = vcombine.low %v812_v16, %v816_v54 }
 0x452   :  { %v944_v34 = vld [vmem:[#allocation5 + $0x1478] sm:$0xff] }
 0x453   :  { %7686 = vmatpush1.bf16.msra.mxu0 %v11374_v46  ;;  %v11479_v31 = vcombine.high %v940_v58, %v944_v34  ;;  %v804_v12 = vld [vmem:[#allocation5 + $0x1018] sm:$0xff]  ;;  %v11478_v2 = vcombine.low %v940_v58, %v944_v34 }
 0x454   :  { %7729 = vmatpush1.bf16.msra.mxu1 %v11502_v62  ;;  %7687 = vmatprep.subr.bf16.mxu0 %v11367_v3  ;;  %v808_v19 = vld [vmem:[#allocation5 + $0x1038] sm:$0xff] }
 0x455   :  { %7730 = vmatprep.subr.bf16.mxu1 %v11495_v45  ;;  %v932_v14 = vld [vmem:[#allocation5 + $0x1418] sm:$0xff]  ;;  %v11343_v46 = vcombine.high %v804_v12, %v808_v19  ;;  %v11342_v30 = vcombine.low %v804_v12, %v808_v19 }
 0x456   :  { %v936_v59 = vld [vmem:[#allocation5 + $0x1438] sm:$0xff] }
 0x457   :  { %7688 = vmatpush1.bf16.msra.mxu0 %v11366_v15  ;;  %v11471_v62 = vcombine.high %v932_v14, %v936_v59  ;;  %v924_v3 = vld [vmem:[#allocation5 + $0x13d8] sm:$0xff]  ;;  %v11470_v21 = vcombine.low %v932_v14, %v936_v59 }
 0x458   :  { %7731 = vmatpush1.bf16.msra.mxu1 %v11494_v25  ;;  %7689 = vmatprep.subr.bf16.mxu0 %v11359_v48  ;;  %v928_v45 = vld [vmem:[#allocation5 + $0x13f8] sm:$0xff] }
 0x459   :  { %7732 = vmatprep.subr.bf16.mxu1 %v11487_v28  ;;  %v1052_v0 = vld [vmem:[#allocation5 + $0x17d8] sm:$0xff]  ;;  %v11463_v15 = vcombine.high %v924_v3, %v928_v45  ;;  %v11462_v58 = vcombine.low %v924_v3, %v928_v45 }
 0x45a   :  { %v1056_v13 = vld [vmem:[#allocation5 + $0x17f8] sm:$0xff] }
 0x45b   :  { %7690 = vmatpush1.bf16.msra.mxu0 %v11358_v49  ;;  %v11591_v25 = vcombine.high %v1052_v0, %v1056_v13  ;;  %v916_v48 = vld [vmem:[#allocation5 + $0x1398] sm:$0xff]  ;;  %v11590_v34 = vcombine.low %v1052_v0, %v1056_v13 }
 0x45c   :  { %7733 = vmatpush1.bf16.msra.mxu1 %v11486_v36  ;;  %7691 = vmatprep.subr.bf16.mxu0 %v11351_v38  ;;  %v920_v28 = vld [vmem:[#allocation5 + $0x13b8] sm:$0xff] }
 0x45d   :  { %7734 = vmatprep.subr.bf16.mxu1 %v11479_v31  ;;  %v1044_v16 = vld [vmem:[#allocation5 + $0x1798] sm:$0xff]  ;;  %v11455_v49 = vcombine.high %v916_v48, %v920_v28  ;;  %v11454_v14 = vcombine.low %v916_v48, %v920_v28 }
 0x45e   :  { %v1048_v54 = vld [vmem:[#allocation5 + $0x17b8] sm:$0xff] }
 0x45f   :  { %7692 = vmatpush1.bf16.msra.mxu0 %v11350_v61  ;;  %v11583_v36 = vcombine.high %v1044_v16, %v1048_v54  ;;  %v908_v38 = vld [vmem:[#allocation5 + $0x1358] sm:$0xff]  ;;  %v11582_v59 = vcombine.low %v1044_v16, %v1048_v54 }
 0x460   :  { %7735 = vmatpush1.bf16.msra.mxu1 %v11478_v2  ;;  %7693 = vmatprep.subr.bf16.mxu0 %v11343_v46  ;;  %v912_v31 = vld [vmem:[#allocation5 + $0x1378] sm:$0xff] }
 0x461   :  { %7736 = vmatprep.subr.bf16.mxu1 %v11471_v62  ;;  %v1036_v12 = vld [vmem:[#allocation5 + $0x1758] sm:$0xff]  ;;  %v11447_v61 = vcombine.high %v908_v38, %v912_v31  ;;  %v11446_v0 = vcombine.low %v908_v38, %v912_v31 }
 0x462   :  { %v1040_v19 = vld [vmem:[#allocation5 + $0x1778] sm:$0xff] }
 0x463   :  { %7694 = vmatpush1.bf16.msra.mxu0 %v11342_v30  ;;  %v11575_v2 = vcombine.high %v1036_v12, %v1040_v19  ;;  %v900_v46 = vld [vmem:[#allocation5 + $0x1318] sm:$0xff]  ;;  %v11574_v13 = vcombine.low %v1036_v12, %v1040_v19 }
 0x464   :  { %7737 = vmatpush1.bf16.msra.mxu1 %v11470_v21  ;;  %7695 = vmatprep.subr.bf16.mxu0 %v11463_v15  ;;  %v904_v62 = vld [vmem:[#allocation5 + $0x1338] sm:$0xff] }
 0x465   :  { %7738 = vmatprep.subr.bf16.mxu1 %v11591_v25  ;;  %v1028_v3 = vld [vmem:[#allocation5 + $0x1718] sm:$0xff]  ;;  %v11439_v30 = vcombine.high %v900_v46, %v904_v62  ;;  %v11438_v16 = vcombine.low %v900_v46, %v904_v62 }
 0x466   :  { %v1032_v45 = vld [vmem:[#allocation5 + $0x1738] sm:$0xff] }
 0x467   :  { %7696 = vmatpush2.bf16.msra.mxu0 %v11462_v58  ;;  %v11567_v21 = vcombine.high %v1028_v3, %v1032_v45  ;;  %v892_v15 = vld [vmem:[#allocation5 + $0x12d8] sm:$0xff]  ;;  %v11566_v54 = vcombine.low %v1028_v3, %v1032_v45 }
 0x468   :  { %7739 = vmatpush2.bf16.msra.mxu1 %v11590_v34  ;;  %7697 = vmatprep.subr.bf16.mxu0 %v11455_v49  ;;  %v896_v25 = vld [vmem:[#allocation5 + $0x12f8] sm:$0xff] }
 0x469   :  { %7740 = vmatprep.subr.bf16.mxu1 %v11583_v36  ;;  %v1020_v48 = vld [vmem:[#allocation5 + $0x16d8] sm:$0xff]  ;;  %v11431_v58 = vcombine.high %v892_v15, %v896_v25  ;;  %v11430_v12 = vcombine.low %v892_v15, %v896_v25 }
 0x46a   :  { %v1024_v28 = vld [vmem:[#allocation5 + $0x16f8] sm:$0xff] }
 0x46b   :  { %7698 = vmatpush2.bf16.msra.mxu0 %v11454_v14  ;;  %v11559_v34 = vcombine.high %v1020_v48, %v1024_v28  ;;  %v884_v49 = vld [vmem:[#allocation5 + $0x1298] sm:$0xff]  ;;  %v11558_v19 = vcombine.low %v1020_v48, %v1024_v28 }
 0x46c   :  { %7741 = vmatpush2.bf16.msra.mxu1 %v11582_v59  ;;  %7699 = vmatprep.subr.bf16.mxu0 %v11447_v61  ;;  %v888_v36 = vld [vmem:[#allocation5 + $0x12b8] sm:$0xff] }
 0x46d   :  { %7742 = vmatprep.subr.bf16.mxu1 %v11575_v2  ;;  %v1012_v38 = vld [vmem:[#allocation5 + $0x1698] sm:$0xff]  ;;  %v11423_v14 = vcombine.high %v884_v49, %v888_v36  ;;  %v11422_v3 = vcombine.low %v884_v49, %v888_v36 }
 0x46e   :  { %v1016_v31 = vld [vmem:[#allocation5 + $0x16b8] sm:$0xff] }
 0x46f   :  { %7700 = vmatpush2.bf16.msra.mxu0 %v11446_v0  ;;  %v11551_v59 = vcombine.high %v1012_v38, %v1016_v31  ;;  %v876_v61 = vld [vmem:[#allocation5 + $0x1258] sm:$0xff]  ;;  %v11550_v45 = vcombine.low %v1012_v38, %v1016_v31 }
 0x470   :  { %7743 = vmatpush2.bf16.msra.mxu1 %v11574_v13  ;;  %7701 = vmatprep.subr.bf16.mxu0 %v11439_v30  ;;  %v880_v2 = vld [vmem:[#allocation5 + $0x1278] sm:$0xff] }
 0x471   :  { %7744 = vmatprep.subr.bf16.mxu1 %v11567_v21  ;;  %v1004_v46 = vld [vmem:[#allocation5 + $0x1658] sm:$0xff]  ;;  %v11415_v0 = vcombine.high %v876_v61, %v880_v2  ;;  %v11414_v48 = vcombine.low %v876_v61, %v880_v2 }
 0x472   :  { %v1008_v62 = vld [vmem:[#allocation5 + $0x1678] sm:$0xff] }
 0x473   :  { %7702 = vmatpush2.bf16.msra.mxu0 %v11438_v16  ;;  %v11543_v13 = vcombine.high %v1004_v46, %v1008_v62  ;;  %v868_v30 = vld [vmem:[#allocation5 + $0x1218] sm:$0xff]  ;;  %v11542_v28 = vcombine.low %v1004_v46, %v1008_v62  ;;  %v13617_v62 = vpop.f32.mrf.mxu0 }
 0x474   :  { %7745 = vmatpush2.bf16.msra.mxu1 %v11566_v54  ;;  %7703 = vmatprep.subr.bf16.mxu0 %v11431_v58  ;;  %v872_v21 = vld [vmem:[#allocation5 + $0x1238] sm:$0xff] }
 0x475   :  { %7746 = vmatprep.subr.bf16.mxu1 %v11559_v34  ;;  %v996_v15 = vld [vmem:[#allocation5 + $0x1618] sm:$0xff]  ;;  %v11407_v16 = vcombine.high %v868_v30, %v872_v21  ;;  %v11406_v38 = vcombine.low %v868_v30, %v872_v21 }
 0x476   :  { %v1000_v25 = vld [vmem:[#allocation5 + $0x1638] sm:$0xff] }
 0x477   :  { %7704 = vmatpush2.bf16.msra.mxu0 %v11430_v12  ;;  %v11535_v54 = vcombine.high %v996_v15, %v1000_v25  ;;  %v1116_v58 = vld [vmem:[#allocation5 + $0x19d8] sm:$0xff]  ;;  %v11534_v31 = vcombine.low %v996_v15, %v1000_v25 }
 0x478   :  { %7747 = vmatpush2.bf16.msra.mxu1 %v11558_v19  ;;  %7705 = vmatprep.subr.bf16.mxu0 %v11423_v14  ;;  %v1120_v34 = vld [vmem:[#allocation5 + $0x19f8] sm:$0xff] }
 0x479   :  { %7748 = vmatprep.subr.bf16.mxu1 %v11551_v59  ;;  %v1244_v49 = vld [vmem:[#allocation5 + $0x1dd8] sm:$0xff]  ;;  %v11655_v12 = vcombine.high %v1116_v58, %v1120_v34  ;;  %v11654_v46 = vcombine.low %v1116_v58, %v1120_v34 }
 0x47a   :  { %v1248_v36 = vld [vmem:[#allocation5 + $0x1df8] sm:$0xff] }
 0x47b   :  { %7706 = vmatpush2.bf16.msra.mxu0 %v11422_v3  ;;  %v11783_v19 = vcombine.high %v1244_v49, %v1248_v36  ;;  %v1108_v14 = vld [vmem:[#allocation5 + $0x1998] sm:$0xff]  ;;  %v11782_v3 = vcombine.low %v1244_v49, %v1248_v36 }
 0x47c   :  { %7749 = vmatpush2.bf16.msra.mxu1 %v11550_v45  ;;  %7707 = vmatprep.subr.bf16.mxu0 %v11415_v0  ;;  %v1112_v59 = vld [vmem:[#allocation5 + $0x19b8] sm:$0xff]  ;;  %v13619_v0 = vpop.f32.mrf.mxu1 }
 0x47d   :  { %7750 = vmatprep.subr.bf16.mxu1 %v11543_v13  ;;  %v1236_v61 = vld [vmem:[#allocation5 + $0x1d98] sm:$0xff]  ;;  %v11647_v45 = vcombine.high %v1108_v14, %v1112_v59 }
 0x47e   :  { %v1240_v2 = vld [vmem:[#allocation5 + $0x1db8] sm:$0xff] }
 0x47f   :  { %7708 = vmatpush2.bf16.msra.mxu0 %v11414_v48  ;;  %v11775_v13 = vcombine.high %v1236_v61, %v1240_v2  ;;  %v1100_v30 = vld [vmem:[#allocation5 + $0x1958] sm:$0xff]  ;;  %v11774_v34 = vcombine.low %v1236_v61, %v1240_v2 }
 0x480   :  { %7751 = vmatpush2.bf16.msra.mxu1 %v11542_v28  ;;  %7709 = vmatprep.subr.bf16.mxu0 %v11407_v16  ;;  %v1104_v21 = vld [vmem:[#allocation5 + $0x1978] sm:$0xff] }
 0x481   :  { %7752 = vmatprep.subr.bf16.mxu1 %v11535_v54  ;;  %v1228_v25 = vld [vmem:[#allocation5 + $0x1d58] sm:$0xff]  ;;  %v11646_v54 = vcombine.low %v1108_v14, %v1112_v59  ;;  %v11639_v49 = vcombine.high %v1100_v30, %v1104_v21  ;;  %v11638_v59 = vcombine.low %v1100_v30, %v1104_v21 }
 0x482   :  { %v1232_v48 = vld [vmem:[#allocation5 + $0x1d78] sm:$0xff] }
 0x483   :  { %7710 = vmatpush2.bf16.msra.mxu0 %v11406_v38  ;;  %v11766_v2 = vcombine.low %v1228_v25, %v1232_v48 }
 0x484   :  { %7753 = vmatpush2.bf16.msra.mxu1 %v11534_v31  ;;  %7765 = vmatprep.subr.bf16.mxu0 %v11655_v12  ;;  %v1092_v31 = vld [vmem:[#allocation5 + $0x1918] sm:$0xff] }
 0x485   :  { %7808 = vmatprep.subr.bf16.mxu1 %v11783_v19  ;;  %v1096_v12 = vld [vmem:[#allocation5 + $0x1938] sm:$0xff] }
 0x486   :  { %v7455_v15 = vpop.f32.mrf.mxu0  ;;  %7712 = vmatmul.mubr.bf16.vlgmr.msra.gmra.mxu0 %v13407_v20  ;;  %v11767_v20 = vcombine.high %v1228_v25, %v1232_v48  ;;  %v1220_v19 = vld [vmem:[#allocation5 + $0x1d18] sm:$0xff] }
 0x487   :  { %v7456_v28 = vadd.f32 %v7455_v15, %v13608_v4  ;;  %v7498_v16 = vpop.f32.mrf.mxu1  ;;  %7755 = vmatmul.mubr.bf16.vlgmr.msra.gmra.mxu1 %v13409_v22  ;;  %7766 = vmatpush1.bf16.msra.mxu0 %v11654_v46  ;;  %v1224_v22 = vld [vmem:[#allocation5 + $0x1d38] sm:$0xff]  ;;  %v11631_v46 = vcombine.high %v1092_v31, %v1096_v12 }
 0x488   :  { %7809 = vmatpush1.bf16.msra.mxu1 %v11782_v3  ;;  %v13624_v58 = vpop.f32.mrf.mxu0  ;;  %7767 = vmatprep.subr.bf16.mxu0 %v11647_v45  ;;  %v11759_v45 = vcombine.high %v1220_v19, %v1224_v22  ;;  %v1088_v15 = vld [vmem:[#allocation5 + $0x18f8] sm:$0xff] }
 0x489   :  { %v7499_v36 = vadd.f32 %v7498_v16, %v7456_v28  ;;  %v13626_v38 = vpop.f32.mrf.mxu1  ;;  %7810 = vmatprep.subr.bf16.mxu1 %v11775_v13  ;;  %7797 = vmatprep.mubr.bf16.mxu0 %v13411_v32  ;;  %v1084_v13 = vld [vmem:[#allocation5 + $0x18d8] sm:$0xff] }
 0x48a   :  { %13812 = vst [vmem:[#allocation52_spill] sm:$0xff] %v13626_v38  ;;  %v7459_v4 = vpop.f32.mrf.mxu0  ;;  %7840 = vmatprep.mubr.bf16.mxu1 %v13414_v33  ;;  %v1212_v32 = vld [vmem:[#allocation5 + $0x1cd8] sm:$0xff]  ;;  %v11630_v33 = vcombine.low %v1092_v31, %v1096_v12  ;;  %v11623_v30 = vcombine.high %v1084_v13, %v1088_v15 }
 0x48b   :  { %v7460_v14 = vadd.f32 %v7459_v4, %v13615_v27  ;;  %7768 = vmatpush1.bf16.msra.mxu0 %v11646_v54  ;;  %v7502_v61 = vpop.f32.mrf.mxu1  ;;  %v1216_v28 = vld [vmem:[#allocation5 + $0x1cf8] sm:$0xff]  ;;  %v7855_v16 = vmax.f32 %v7499_v36, 0.0  ;;  %v11758_v27 = vcombine.low %v1220_v19, %v1224_v22 }
 0x48c   :  { %7811 = vmatpush1.bf16.msra.mxu1 %v11774_v34  ;;  %7769 = vmatprep.subr.bf16.mxu0 %v11639_v49  ;;  %v11751_v25 = vcombine.high %v1212_v32, %v1216_v28  ;;  %v1076_v48 = vld [vmem:[#allocation5 + $0x1898] sm:$0xff]  ;;  %v11750_v36 = vcombine.low %v1212_v32, %v1216_v28 }
 0x48d   :  { %v7503_v3 = vadd.f32 %v7502_v61, %v7460_v14  ;;  %7812 = vmatprep.subr.bf16.mxu1 %v11767_v20  ;;  %v1080_v54 = vld [vmem:[#allocation5 + $0x18b8] sm:$0xff]  ;;  %v11622_v20 = vcombine.low %v1084_v13, %v1088_v15 }
 0x48e   :  { %v1204_v34 = vld [vmem:[#allocation5 + $0x1c98] sm:$0xff]  ;;  %v11615_v4 = vcombine.high %v1076_v48, %v1080_v54 }
 0x48f   :  { %v7863_v38 = vmax.f32 %v7503_v3, 0.0  ;;  %7770 = vmatpush1.bf16.msra.mxu0 %v11638_v59  ;;  %v1208_v49 = vld [vmem:[#allocation5 + $0x1cb8] sm:$0xff] }
 0x490   :  { %7813 = vmatpush1.bf16.msra.mxu1 %v11766_v2  ;;  %7771 = vmatprep.subr.bf16.mxu0 %v11631_v46  ;;  %v11743_v31 = vcombine.high %v1204_v34, %v1208_v49  ;;  %v1068_v12 = vld [vmem:[#allocation5 + $0x1858] sm:$0xff]  ;;  %v11742_v59 = vcombine.low %v1204_v34, %v1208_v49  ;;  %v13634_v49 = vsub.s32 1, %v13419_v41 }
 0x491   :  { %v13631_v21 = vpack.c.bf16 %v7863_v38, %v7855_v16  ;;  %7814 = vmatprep.subr.bf16.mxu1 %v11759_v45  ;;  %v1072_v14 = vld [vmem:[#allocation5 + $0x1878] sm:$0xff]  ;;  %v11614_v38 = vcombine.low %v1076_v48, %v1080_v54 }
 0x492   :  { %v1196_v19 = vld [vmem:[#allocation5 + $0x1c58] sm:$0xff]  ;;  %v11607_v61 = vcombine.high %v1068_v12, %v1072_v14  ;;  %v11606_v15 = vcombine.low %v1068_v12, %v1072_v14  ;;  %v13795_v14 = vsub.s32 3, %v13419_v41 }
 0x493   :  { %7772 = vmatpush1.bf16.msra.mxu0 %v11630_v33  ;;  %v1200_v22 = vld [vmem:[#allocation5 + $0x1c78] sm:$0xff] }
 0x494   :  { %7815 = vmatpush1.bf16.msra.mxu1 %v11758_v27  ;;  %7773 = vmatprep.subr.bf16.mxu0 %v11623_v30  ;;  %v11735_v2 = vcombine.high %v1196_v19, %v1200_v22  ;;  %v1060_v46 = vld [vmem:[#allocation5 + $0x1818] sm:$0xff]  ;;  %v11734_v32 = vcombine.low %v1196_v19, %v1200_v22 }
 0x495   :  { %7816 = vmatprep.subr.bf16.mxu1 %v11751_v25  ;;  %v1064_v3 = vld [vmem:[#allocation5 + $0x1838] sm:$0xff] }
 0x496   :  { %v1188_v45 = vld [vmem:[#allocation5 + $0x1c18] sm:$0xff]  ;;  %v11599_v28 = vcombine.high %v1060_v46, %v1064_v3  ;;  %v11598_v48 = vcombine.low %v1060_v46, %v1064_v3 }
 0x497   :  { %7774 = vmatpush1.bf16.msra.mxu0 %v11622_v20  ;;  %v1192_v13 = vld [vmem:[#allocation5 + $0x1c38] sm:$0xff] }
 0x498   :  { %7817 = vmatpush1.bf16.msra.mxu1 %v11750_v36  ;;  %7775 = vmatprep.subr.bf16.mxu0 %v11615_v4  ;;  %v11727_v16 = vcombine.high %v1188_v45, %v1192_v13  ;;  %v1180_v33 = vld [vmem:[#allocation5 + $0x1bd8] sm:$0xff]  ;;  %v11726_v54 = vcombine.low %v1188_v45, %v1192_v13 }
 0x499   :  { %7818 = vmatprep.subr.bf16.mxu1 %v11743_v31  ;;  %v1184_v27 = vld [vmem:[#allocation5 + $0x1bf8] sm:$0xff] }
 0x49a   :  { %v1308_v30 = vld [vmem:[#allocation5 + $0x1fd8] sm:$0xff]  ;;  %v11719_v34 = vcombine.high %v1180_v33, %v1184_v27  ;;  %v11718_v19 = vcombine.low %v1180_v33, %v1184_v27 }
 0x49b   :  { %7776 = vmatpush1.bf16.msra.mxu0 %v11614_v38  ;;  %v1312_v25 = vld [vmem:[#allocation5 + $0x1ff8] sm:$0xff] }
 0x49c   :  { %7819 = vmatpush1.bf16.msra.mxu1 %v11742_v59  ;;  %7777 = vmatprep.subr.bf16.mxu0 %v11607_v61  ;;  %v11847_v20 = vcombine.high %v1308_v30, %v1312_v25  ;;  %v1172_v36 = vld [vmem:[#allocation5 + $0x1b98] sm:$0xff]  ;;  %v11846_v22 = vcombine.low %v1308_v30, %v1312_v25  ;;  %v13637_v59 = vld [vmem:[#allocation7] sm:$0xff] }
 0x49d   :  { %7820 = vmatprep.subr.bf16.mxu1 %v11735_v2  ;;  %v1176_v4 = vld [vmem:[#allocation5 + $0x1bb8] sm:$0xff]  ;;  %v1322_v61 = vrot.slane %v13637_v59, %v13634_v49 }
 0x49e   :  { %v1300_v31 = vld [vmem:[#allocation5 + $0x1f98] sm:$0xff]  ;;  %v11711_v38 = vcombine.high %v1172_v36, %v1176_v4 }
 0x49f   :  { %7778 = vmatpush1.bf16.msra.mxu0 %v11606_v15  ;;  %v1304_v12 = vld [vmem:[#allocation5 + $0x1fb8] sm:$0xff]  ;;  %v1330_v15 = vrot.slane %v13637_v59, %v13795_v14  ;;  %v6512_v27 = vadd.f32 %v13431_v24, %v1322_v61 }
 0x4a0   :  { %7821 = vmatpush1.bf16.msra.mxu1 %v11734_v32  ;;  %7779 = vmatprep.subr.bf16.mxu0 %v11599_v28  ;;  %v11839_v2 = vcombine.high %v1300_v31, %v1304_v12  ;;  %v1164_v46 = vld [vmem:[#allocation5 + $0x1b58] sm:$0xff]  ;;  %v11710_v32 = vcombine.low %v1172_v36, %v1176_v4  ;;  %v6516_v28 = vadd.f32 %v13441_v18, %v1322_v61 }
 0x4a1   :  { %7822 = vmatprep.subr.bf16.mxu1 %v11727_v16  ;;  %v1168_v3 = vld [vmem:[#allocation5 + $0x1b78] sm:$0xff]  ;;  %v11838_v16 = vcombine.low %v1300_v31, %v1304_v12  ;;  %v6860_v30 = vadd.f32 %v13512_v57, %v1330_v15  ;;  %v6856_v14 = vadd.f32 %v13502_v55, %v1330_v15  ;;  %v6555_v24 = vadd.f32 %v13435_v35, %v6512_v27 }
 0x4a2   :  { %v1292_v45 = vld [vmem:[#allocation5 + $0x1f58] sm:$0xff]  ;;  %v11703_v33 = vcombine.high %v1164_v46, %v1168_v3  ;;  %v11702_v36 = vcombine.low %v1164_v46, %v1168_v3  ;;  %v6559_v18 = vadd.f32 %v13443_v26, %v6516_v28 }
 0x4a3   :  { %7780 = vmatpush1.bf16.msra.mxu0 %v11598_v48  ;;  %v1296_v13 = vld [vmem:[#allocation5 + $0x1f78] sm:$0xff]  ;;  %v6903_v57 = vadd.f32 %v13514_v53, %v6860_v30  ;;  %v6899_v26 = vadd.f32 %v13506_v42, %v6856_v14 }
 0x4a4   :  { %7823 = vmatpush1.bf16.msra.mxu1 %v11726_v54  ;;  %7781 = vmatprep.subr.bf16.mxu0 %v11719_v34  ;;  %v11831_v25 = vcombine.high %v1292_v45, %v1296_v13  ;;  %v1156_v48 = vld [vmem:[#allocation5 + $0x1b18] sm:$0xff]  ;;  %v11830_v4 = vcombine.low %v1292_v45, %v1296_v13 }
 0x4a5   :  { %7824 = vmatprep.subr.bf16.mxu1 %v11847_v20  ;;  %v1160_v54 = vld [vmem:[#allocation5 + $0x1b38] sm:$0xff]  ;;  %v6946_v46 = vadd.f32 %v13530_v29, %v6903_v57  ;;  %v6942_v45 = vadd.f32 %v13519_v23, %v6899_v26 }
 0x4a6   :  { %v1284_v34 = vld [vmem:[#allocation5 + $0x1f18] sm:$0xff]  ;;  %v11695_v31 = vcombine.high %v1156_v48, %v1160_v54  ;;  %v11694_v3 = vcombine.low %v1156_v48, %v1160_v54  ;;  %v13813_v54 = vld [vmem:[#allocation37_spill] sm:$0xff] }
 0x4a7   :  { %7782 = vmatpush2.bf16.msra.mxu0 %v11718_v19  ;;  %v1288_v20 = vld [vmem:[#allocation5 + $0x1f38] sm:$0xff]  ;;  %v6989_v29 = vadd.f32 %v13532_v10, %v6946_v46  ;;  %v6985_v27 = vadd.f32 %v13523_v39, %v6942_v45  ;;  %v13820_v45 = vld [vmem:[#allocation40_spill] sm:$0xff] }
 0x4a8   :  { %7825 = vmatpush2.bf16.msra.mxu1 %v11846_v22  ;;  %7783 = vmatprep.subr.bf16.mxu0 %v11711_v38  ;;  %v11823_v12 = vcombine.high %v1284_v34, %v1288_v20  ;;  %v1148_v19 = vld [vmem:[#allocation5 + $0x1ad8] sm:$0xff]  ;;  %v6602_v38 = vadd.f32 %v13459_v60, %v6559_v18  ;;  %v11822_v35 = vcombine.low %v1284_v34, %v1288_v20  ;;  %v13814_v20 = vld [vmem:[#allocation45_spill] sm:$0xff] }
 0x4a9   :  { %7826 = vmatprep.subr.bf16.mxu1 %v11839_v2  ;;  %v1152_v22 = vld [vmem:[#allocation5 + $0x1af8] sm:$0xff]  ;;  %v6598_v2 = vadd.f32 %v13448_v43, %v6555_v24  ;;  %v7032_v30 = vadd.f32 %v13548_v50, %v6989_v29 }
 0x4aa   :  { %v1276_v61 = vld [vmem:[#allocation5 + $0x1ed8] sm:$0xff]  ;;  %v11687_v53 = vcombine.high %v1148_v19, %v1152_v22  ;;  %v11686_v14 = vcombine.low %v1148_v19, %v1152_v22 }
 0x4ab   :  { %7784 = vmatpush2.bf16.msra.mxu0 %v11710_v32  ;;  %v1280_v55 = vld [vmem:[#allocation5 + $0x1ef8] sm:$0xff]  ;;  %v6645_v32 = vadd.f32 %v13461_v1, %v6602_v38  ;;  %v6641_v42 = vadd.f32 %v13452_v47, %v6598_v2 }
 0x4ac   :  { %7827 = vmatpush2.bf16.msra.mxu1 %v11838_v16  ;;  %7785 = vmatprep.subr.bf16.mxu0 %v11703_v33  ;;  %v11815_v13 = vcombine.high %v1276_v61, %v1280_v55  ;;  %v1140_v15 = vld [vmem:[#allocation5 + $0x1a98] sm:$0xff]  ;;  %v11814_v33 = vcombine.low %v1276_v61, %v1280_v55 }
 0x4ad   :  { %7828 = vmatprep.subr.bf16.mxu1 %v11831_v25  ;;  %v1144_v60 = vld [vmem:[#allocation5 + $0x1ab8] sm:$0xff]  ;;  %v6688_v16 = vadd.f32 %v13477_v56, %v6645_v32  ;;  %v6684_v47 = vadd.f32 %v13813_v54, %v6641_v42  ;;  %v13821_v32 = vld [vmem:[#allocation48_spill] sm:$0xff] }
 0x4ae   :  { %v1268_v28 = vld [vmem:[#allocation5 + $0x1e98] sm:$0xff]  ;;  %v11679_v23 = vcombine.high %v1140_v15, %v1144_v60  ;;  %v11678_v56 = vcombine.low %v1140_v15, %v1144_v60  ;;  %v13822_v42 = vld [vmem:[#allocation44_spill] sm:$0xff] }
 0x4af   :  { %7786 = vmatpush2.bf16.msra.mxu0 %v11702_v36  ;;  %v1272_v43 = vld [vmem:[#allocation5 + $0x1eb8] sm:$0xff]  ;;  %v7028_v36 = vadd.f32 %v13814_v20, %v6985_v27 }
 0x4b0   :  { %7829 = vmatpush2.bf16.msra.mxu1 %v11830_v4  ;;  %7787 = vmatprep.subr.bf16.mxu0 %v11695_v31  ;;  %v11807_v1 = vcombine.high %v1268_v28, %v1272_v43  ;;  %v1132_v25 = vld [vmem:[#allocation5 + $0x1a58] sm:$0xff]  ;;  %v11806_v31 = vcombine.low %v1268_v28, %v1272_v43 }
 0x4b1   :  { %7830 = vmatprep.subr.bf16.mxu1 %v11823_v12  ;;  %v1136_v48 = vld [vmem:[#allocation5 + $0x1a78] sm:$0xff] }
 0x4b2   :  { %v1260_v34 = vld [vmem:[#allocation5 + $0x1e58] sm:$0xff]  ;;  %v11671_v39 = vcombine.high %v1132_v25, %v1136_v48 }
 0x4b3   :  { %7788 = vmatpush2.bf16.msra.mxu0 %v11694_v3  ;;  %v1264_v10 = vld [vmem:[#allocation5 + $0x1e78] sm:$0xff] }
 0x4b4   :  { %7831 = vmatpush2.bf16.msra.mxu1 %v11822_v35  ;;  %7789 = vmatprep.subr.bf16.mxu0 %v11687_v53  ;;  %v13815_v18 = vld [vmem:[#allocation39_spill] sm:$0xff]  ;;  %v11799_v57 = vcombine.high %v1260_v34, %v1264_v10  ;;  %v13817_v22 = vld [vmem:[#allocation38_spill] sm:$0xff]  ;;  %v11670_v53 = vcombine.low %v1132_v25, %v1136_v48  ;;  %v11798_v15 = vcombine.low %v1260_v34, %v1264_v10 }
 0x4b5   :  { %7832 = vmatprep.subr.bf16.mxu1 %v11815_v13  ;;  %v6731_v4 = vadd.f32 %v13815_v18, %v6688_v16  ;;  %v13816_v24 = vld [vmem:[#allocation47_spill] sm:$0xff]  ;;  %v6727_v38 = vadd.f32 %v13817_v22, %v6684_v47  ;;  %v13819_v46 = vld [vmem:[#allocation46_spill] sm:$0xff] }
 0x4b6   :  { %v7075_v50 = vadd.f32 %v13816_v24, %v7032_v30  ;;  %v1124_v12 = vld [vmem:[#allocation5 + $0x1a18] sm:$0xff]  ;;  %v7071_v3 = vadd.f32 %v13819_v46, %v7028_v36  ;;  %v13824_v30 = vld [vmem:[#allocation49_spill] sm:$0xff] }
 0x4b7   :  { %7790 = vmatpush2.bf16.msra.mxu0 %v11686_v14  ;;  %v1128_v19 = vld [vmem:[#allocation5 + $0x1a38] sm:$0xff]  ;;  %v6770_v13 = vadd.f32 %v13820_v45, %v6727_v38 }
 0x4b8   :  { %7833 = vmatpush2.bf16.msra.mxu1 %v11814_v33  ;;  %7791 = vmatprep.subr.bf16.mxu0 %v11679_v23  ;;  %v13818_v61 = vld [vmem:[#allocation43_spill] sm:$0xff]  ;;  %v7118_v35 = vadd.f32 %v13565_v7, %v7075_v50  ;;  %v11663_v60 = vcombine.high %v1124_v12, %v1128_v19  ;;  %v7114_v28 = vadd.f32 %v13821_v32, %v7071_v3  ;;  %v13823_v33 = vld [vmem:[#allocation41_spill] sm:$0xff]  ;;  %v12348_v47 = vld [vmem:[#allocation8 + $0xe0] ss:$16 sps:$4 sm:$0xff]  }
 0x4b9   :  { %7834 = vmatprep.subr.bf16.mxu1 %v11807_v1  ;;  %v6774_v55 = vadd.f32 %v13818_v61, %v6731_v4  ;;  %v1252_v2 = vld [vmem:[#allocation5 + $0x1e18] sm:$0xff]  ;;  %v11662_v16 = vcombine.low %v1124_v12, %v1128_v19  ;;  %v6813_v7 = vadd.f32 %v13823_v33, %v6770_v13 }
 0x4ba   :  { %v1256_v26 = vld [vmem:[#allocation5 + $0x1e38] sm:$0xff]  ;;  %v7161_v14 = vadd.f32 %v13567_v51, %v7118_v35  ;;  %v7157_v1 = vadd.f32 %v13824_v30, %v7114_v28 }
 0x4bb   :  { %7792 = vmatpush2.bf16.msra.mxu0 %v11678_v56  ;;  %v11791_v43 = vcombine.high %v1252_v2, %v1256_v26  ;;  %v6817_v29 = vadd.f32 %v13822_v42, %v6774_v55  ;;  %v11790_v23 = vcombine.low %v1252_v2, %v1256_v26  ;;  %v12350_v27 = vld [vmem:[#allocation8 + $0xe4] ss:$16 sps:$4 sm:$0xff]   ;;  %v7852_v34 = vmax.f32 %v6813_v7, 0.0  ;;  %v12351_v51 = vld [vmem:[#allocation8 + $0x2e0] ss:$16 sps:$4 sm:$0xff]  }
 0x4bc   :  { %7835 = vmatpush2.bf16.msra.mxu1 %v11806_v31  ;;  %7793 = vmatprep.subr.bf16.mxu0 %v11671_v39  ;;  %v12353_v25 = vld [vmem:[#allocation8 + $0x2e4] ss:$16 sps:$4 sm:$0xff]   ;;  %v7862_v54 = vmax.f32 %v7161_v14, 0.0  ;;  %v7854_v10 = vmax.f32 %v7157_v1, 0.0  ;;  %v12354_v4 = vld [vmem:[#allocation8 + $0xc0] ss:$16 sps:$4 sm:$0xff]  }
 0x4bd   :  { %7836 = vmatprep.subr.bf16.mxu1 %v11799_v57  ;;  %v7860_v48 = vmax.f32 %v6817_v29, 0.0  ;;  %v12356_v20 = vld [vmem:[#allocation8 + $0xc4] ss:$16 sps:$4 sm:$0xff]   ;;  %v12357_v31 = vld [vmem:[#allocation8 + $0x2c0] ss:$16 sps:$4 sm:$0xff]   ;;  %v1337_v29 = vsub.s32 5, %v13419_v41 }
 0x4be   :  { %v12359_v56 = vld [vmem:[#allocation8 + $0x2c4] ss:$16 sps:$4 sm:$0xff]   ;;  %v13679_v18 = vpack.c.bf16 %v7862_v54, %v7854_v10  ;;  %v12360_v50 = vld [vmem:[#allocation8 + $0xa0] ss:$16 sps:$4 sm:$0xff]  }
 0x4bf   :  { %7794 = vmatpush2.bf16.msra.mxu0 %v11670_v53  ;;  %v13676_v36 = vpack.c.bf16 %v7860_v48, %v7852_v34  ;;  %v12362_v39 = vld [vmem:[#allocation8 + $0xa4] ss:$16 sps:$4 sm:$0xff]   ;;  %v12366_v12 = vld [vmem:[#allocation8 + $0x80] ss:$16 sps:$4 sm:$0xff]  }
 0x4c0   :  { %7837 = vmatpush2.bf16.msra.mxu1 %v11798_v15  ;;  %7795 = vmatprep.subr.bf16.mxu0 %v11663_v60  ;;  %v12365_v24 = vld [vmem:[#allocation8 + $0x2a4] ss:$16 sps:$4 sm:$0xff]   ;;  %v12369_v19 = vld [vmem:[#allocation8 + $0x280] ss:$16 sps:$4 sm:$0xff]  }
 0x4c1   :  { %7838 = vmatprep.subr.bf16.mxu1 %v11791_v43  ;;  %v12368_v57 = vld [vmem:[#allocation8 + $0x84] ss:$16 sps:$4 sm:$0xff]   ;;  %v12372_v61 = vld [vmem:[#allocation8 + $0x60] ss:$16 sps:$4 sm:$0xff]  }
 0x4c2   :  { %v12374_v22 = vld [vmem:[#allocation8 + $0x64] ss:$16 sps:$4 sm:$0xff]   ;;  %v12375_v55 = vld [vmem:[#allocation8 + $0x260] ss:$16 sps:$4 sm:$0xff]  }
 0x4c3   :  { %7796 = vmatpush2.bf16.msra.mxu0 %v11662_v16  ;;  %v12377_v38 = vld [vmem:[#allocation8 + $0x264] ss:$16 sps:$4 sm:$0xff]   ;;  %v12378_v46 = vld [vmem:[#allocation8 + $0x40] ss:$16 sps:$4 sm:$0xff]  }
 0x4c4   :  { %7839 = vmatpush2.bf16.msra.mxu1 %v11790_v23  ;;  %9433 = vmatprep.subr.bf16.mxu0 %v12350_v27  ;;  %v12380_v2 = vld [vmem:[#allocation8 + $0x44] ss:$16 sps:$4 sm:$0xff]   ;;  %v12381_v3 = vld [vmem:[#allocation8 + $0x240] ss:$16 sps:$4 sm:$0xff]   ;;  %v1338_v23 = vrot.slane %v13637_v59, %v1337_v29 }
 0x4c5   :  { %9476 = vmatprep.subr.bf16.mxu1 %v12353_v25  ;;  %v12383_v26 = vld [vmem:[#allocation8 + $0x244] ss:$16 sps:$4 sm:$0xff]   ;;  %v12384_v45 = vld [vmem:[#allocation8 + $0x20] ss:$16 sps:$4 sm:$0xff]  }
 0x4c6   :  { %7798 = vmatmul.mubr.bf16.vlgmr.msra.gmra.mxu0 %v13424_v6  ;;  %v12363_v6 = vld [vmem:[#allocation8 + $0x2a0] ss:$16 sps:$4 sm:$0xff]   ;;  %v12386_v35 = vld [vmem:[#allocation8 + $0x24] ss:$16 sps:$4 sm:$0xff]   ;;  %v7204_v30 = vadd.f32 %v13581_v63, %v1338_v23  ;;  %v7200_v54 = vadd.f32 %v13571_v17, %v1338_v23 }
 0x4c7   :  { %7841 = vmatmul.mubr.bf16.vlgmr.msra.gmra.mxu1 %v13427_v8  ;;  %9434 = vmatpush1.bf16.msra.mxu0 %v12348_v47  ;;  %v12371_v8 = vld [vmem:[#allocation8 + $0x284] ss:$16 sps:$4 sm:$0xff]   ;;  %v12387_v13 = vld [vmem:[#allocation8 + $0x220] ss:$16 sps:$4 sm:$0xff]  }
 0x4c8   :  { %9465 = vmatprep.mubr.bf16.mxu0 %v13676_v36  ;;  %9477 = vmatpush1.bf16.msra.mxu1 %v12351_v51  ;;  %v12389_v53 = vld [vmem:[#allocation8 + $0x224] ss:$16 sps:$4 sm:$0xff]   ;;  %v12390_v32 = vld [vmem:[#allocation8] ss:$16 sps:$4 sm:$0xff]   ;;  %v7247_v34 = vadd.f32 %v13583_v9, %v7204_v30 }
 0x4c9   :  { %9508 = vmatprep.mubr.bf16.mxu1 %v13679_v18  ;;  %9435 = vmatprep.subr.bf16.mxu0 %v12356_v20  ;;  %v12392_v15 = vld [vmem:[#allocation8 + $0x4] ss:$16 sps:$4 sm:$0xff]   ;;  %v12393_v28 = vld [vmem:[#allocation8 + $0x200] ss:$16 sps:$4 sm:$0xff]  }
 0x4ca   :  { %9478 = vmatprep.subr.bf16.mxu1 %v12359_v56  ;;  %v12395_v60 = vld [vmem:[#allocation8 + $0x204] ss:$16 sps:$4 sm:$0xff]   ;;  %v12396_v14 = vld [vmem:[#allocation8 + $0x1e0] ss:$16 sps:$4 sm:$0xff]  }
 0x4cb   :  { %9436 = vmatpush1.bf16.msra.mxu0 %v12354_v4  ;;  %v12398_v43 = vld [vmem:[#allocation8 + $0x1e4] ss:$16 sps:$4 sm:$0xff]   ;;  %v12399_v16 = vld [vmem:[#allocation8 + $0x3e0] ss:$16 sps:$4 sm:$0xff]   ;;  %v7290_v4 = vadd.f32 %v13599_v37, %v7247_v34 }
 0x4cc   :  { %9479 = vmatpush1.bf16.msra.mxu1 %v12357_v31  ;;  %9437 = vmatprep.subr.bf16.mxu0 %v12362_v39  ;;  %v12401_v42 = vld [vmem:[#allocation8 + $0x3e4] ss:$16 sps:$4 sm:$0xff]   ;;  %v12402_v27 = vld [vmem:[#allocation8 + $0x1c0] ss:$16 sps:$4 sm:$0xff]  }
 0x4cd   :  { %9480 = vmatprep.subr.bf16.mxu1 %v12365_v24  ;;  %v12404_v33 = vld [vmem:[#allocation8 + $0x1c4] ss:$16 sps:$4 sm:$0xff]   ;;  %v12405_v1 = vld [vmem:[#allocation8 + $0x3c0] ss:$16 sps:$4 sm:$0xff]  }
 0x4ce   :  { %v12407_v7 = vld [vmem:[#allocation8 + $0x3c4] ss:$16 sps:$4 sm:$0xff]   ;;  %v12408_v47 = vld [vmem:[#allocation8 + $0x1a0] ss:$16 sps:$4 sm:$0xff]  }
 0x4cf   :  { %9438 = vmatpush1.bf16.msra.mxu0 %v12360_v50  ;;  %v12410_v25 = vld [vmem:[#allocation8 + $0x1a4] ss:$16 sps:$4 sm:$0xff]   ;;  %v12411_v51 = vld [vmem:[#allocation8 + $0x3a0] ss:$16 sps:$4 sm:$0xff]   ;;  %v7333_v50 = vadd.f32 %v13601_v52, %v7290_v4 }
 0x4d0   :  { %9481 = vmatpush1.bf16.msra.mxu1 %v12363_v6  ;;  %9439 = vmatprep.subr.bf16.mxu0 %v12368_v57  ;;  %v12413_v48 = vld [vmem:[#allocation8 + $0x3a4] ss:$16 sps:$4 sm:$0xff]   ;;  %v12414_v31 = vld [vmem:[#allocation8 + $0x180] ss:$16 sps:$4 sm:$0xff]  }
 0x4d1   :  { %9482 = vmatprep.subr.bf16.mxu1 %v12371_v8  ;;  %v12416_v10 = vld [vmem:[#allocation8 + $0x184] ss:$16 sps:$4 sm:$0xff]   ;;  %v12417_v17 = vld [vmem:[#allocation8 + $0x380] ss:$16 sps:$4 sm:$0xff]   ;;  %v7376_v8 = vadd.f32 %v13617_v62, %v7333_v50 }
 0x4d2   :  { %v12419_v20 = vld [vmem:[#allocation8 + $0x384] ss:$16 sps:$4 sm:$0xff]   ;;  %v12420_v6 = vld [vmem:[#allocation8 + $0x160] ss:$16 sps:$4 sm:$0xff]  }
 0x4d3   :  { %9440 = vmatpush1.bf16.msra.mxu0 %v12366_v12  ;;  %v13825_v56 = vld [vmem:[#allocation51_spill] sm:$0xff]  ;;  %v12423_v37 = vld [vmem:[#allocation8 + $0x360] ss:$16 sps:$4 sm:$0xff]  }
 0x4d4   :  { %9483 = vmatpush1.bf16.msra.mxu1 %v12369_v19  ;;  %9441 = vmatprep.subr.bf16.mxu0 %v12374_v22  ;;  %v7243_v63 = vadd.f32 %v13825_v56, %v7200_v54  ;;  %v12422_v24 = vld [vmem:[#allocation8 + $0x164] ss:$16 sps:$4 sm:$0xff]   ;;  %v7461_v22 = vpop.f32.mrf.mxu0  ;;  %v12429_v52 = vld [vmem:[#allocation8 + $0x340] ss:$16 sps:$4 sm:$0xff]  }
 0x4d5   :  { %9484 = vmatprep.subr.bf16.mxu1 %v12377_v38  ;;  %v12425_v9 = vld [vmem:[#allocation8 + $0x364] ss:$16 sps:$4 sm:$0xff]   ;;  %v12426_v38 = vld [vmem:[#allocation8 + $0x140] ss:$16 sps:$4 sm:$0xff]  }
 0x4d6   :  { %v7286_v39 = vadd.f32 %v13588_v44, %v7243_v63  ;;  %v12428_v12 = vld [vmem:[#allocation8 + $0x144] ss:$16 sps:$4 sm:$0xff]   ;;  %v12504_v29 = vld [vmem:[#allocation8 + $0x6e0] ss:$16 sps:$4 sm:$0xff]  }
 0x4d7   :  { %9442 = vmatpush1.bf16.msra.mxu0 %v12372_v61  ;;  %v12431_v44 = vld [vmem:[#allocation8 + $0x344] ss:$16 sps:$4 sm:$0xff]   ;;  %v7419_v61 = vadd.f32 %v13619_v0, %v7376_v8  ;;  %v12447_v23 = vld [vmem:[#allocation8 + $0x4c0] ss:$16 sps:$4 sm:$0xff]  }
 0x4d8   :  { %9485 = vmatpush1.bf16.msra.mxu1 %v12375_v55  ;;  %9443 = vmatprep.subr.bf16.mxu0 %v12380_v2  ;;  %v7329_v57 = vadd.f32 %v13592_v40, %v7286_v39  ;;  %v12434_v55 = vld [vmem:[#allocation8 + $0x124] ss:$16 sps:$4 sm:$0xff]   ;;  %v12510_v30 = vld [vmem:[#allocation8 + $0x6c0] ss:$16 sps:$4 sm:$0xff]  }
 0x4d9   :  { %9486 = vmatprep.subr.bf16.mxu1 %v12383_v26  ;;  %v12437_v40 = vld [vmem:[#allocation8 + $0x324] ss:$16 sps:$4 sm:$0xff]   ;;  %v7462_v2 = vadd.f32 %v7461_v22, %v7419_v61  ;;  %v12432_v26 = vld [vmem:[#allocation8 + $0x120] ss:$16 sps:$4 sm:$0xff]  }
 0x4da   :  { %v7372_v19 = vadd.f32 %v13606_v11, %v7329_v57  ;;  %v12435_v11 = vld [vmem:[#allocation8 + $0x320] ss:$16 sps:$4 sm:$0xff]   ;;  %v12443_v0 = vld [vmem:[#allocation8 + $0x304] ss:$16 sps:$4 sm:$0xff]  }
 0x4db   :  { %9444 = vmatpush1.bf16.msra.mxu0 %v12378_v46  ;;  %v12516_v54 = vld [vmem:[#allocation8 + $0x6a0] ss:$16 sps:$4 sm:$0xff]   ;;  %v12461_v63 = vld [vmem:[#allocation8 + $0x444] ss:$16 sps:$4 sm:$0xff]  }
 0x4dc   :  { %9487 = vmatpush1.bf16.msra.mxu1 %v12381_v3  ;;  %9445 = vmatprep.subr.bf16.mxu0 %v12386_v35  ;;  %v7415_v62 = vadd.f32 %v13610_v5, %v7372_v19  ;;  %v12440_v3 = vld [vmem:[#allocation8 + $0x104] ss:$16 sps:$4 sm:$0xff]   ;;  %v7504_v35 = vpop.f32.mrf.mxu1  ;;  %v12441_v5 = vld [vmem:[#allocation8 + $0x300] ss:$16 sps:$4 sm:$0xff]  }
 0x4dd   :  { %9488 = vmatprep.subr.bf16.mxu1 %v12389_v53  ;;  %v7505_v53 = vadd.f32 %v7504_v35, %v7462_v2  ;;  %v12453_v34 = vld [vmem:[#allocation8 + $0x480] ss:$16 sps:$4 sm:$0xff]   ;;  %v12548_v8 = vld [vmem:[#allocation8 + $0x604] ss:$16 sps:$4 sm:$0xff]  }
 0x4de   :  { %v7458_v46 = vadd.f32 %v13624_v58, %v7415_v62  ;;  %v12444_v58 = vld [vmem:[#allocation8 + $0x4e0] ss:$16 sps:$4 sm:$0xff]   ;;  %v12554_v19 = vld [vmem:[#allocation8 + $0x7e4] ss:$16 sps:$4 sm:$0xff]  }
 0x4df   :  { %9446 = vmatpush1.bf16.msra.mxu0 %v12384_v45  ;;  %v12438_v45 = vld [vmem:[#allocation8 + $0x100] ss:$16 sps:$4 sm:$0xff]   ;;  %v12566_v2 = vld [vmem:[#allocation8 + $0x7a4] ss:$16 sps:$4 sm:$0xff]  }
 0x4e0   :  { %9489 = vmatpush1.bf16.msra.mxu1 %v12387_v13  ;;  %9447 = vmatprep.subr.bf16.mxu0 %v12392_v15  ;;  %v13826_v13 = vld [vmem:[#allocation52_spill] sm:$0xff] }
 0x4e1   :  { %9490 = vmatprep.subr.bf16.mxu1 %v12395_v60  ;;  %v7501_v15 = vadd.f32 %v13826_v13, %v7458_v46  ;;  %v12446_v60 = vld [vmem:[#allocation8 + $0x4e4] ss:$16 sps:$4 sm:$0xff]   ;;  %v12456_v56 = vld [vmem:[#allocation8 + $0x460] ss:$16 sps:$4 sm:$0xff]  }
 0x4e2   :  { %v12528_v4 = vld [vmem:[#allocation8 + $0x660] ss:$16 sps:$4 sm:$0xff]   ;;  %v12479_v46 = vld [vmem:[#allocation8 + $0x584] ss:$16 sps:$4 sm:$0xff]  }
 0x4e3   :  { %9448 = vmatpush1.bf16.msra.mxu0 %v12390_v32  ;;  %v12506_v32 = vld [vmem:[#allocation8 + $0x6e4] ss:$16 sps:$4 sm:$0xff]   ;;  %v12459_v39 = vld [vmem:[#allocation8 + $0x440] ss:$16 sps:$4 sm:$0xff]  }
 0x4e4   :  { %9491 = vmatpush1.bf16.msra.mxu1 %v12393_v28  ;;  %9449 = vmatprep.subr.bf16.mxu0 %v12398_v43  ;;  %v7864_v28 = vmax.f32 %v7505_v53, 0.0  ;;  %v7856_v43 = vmax.f32 %v7501_v15, 0.0  ;;  %v12462_v50 = vld [vmem:[#allocation8 + $0x420] ss:$16 sps:$4 sm:$0xff]   ;;  %v12485_v15 = vld [vmem:[#allocation8 + $0x544] ss:$16 sps:$4 sm:$0xff]  }
 0x4e5   :  { %9492 = vmatprep.subr.bf16.mxu1 %v12401_v42  ;;  %v12449_v42 = vld [vmem:[#allocation8 + $0x4c4] ss:$16 sps:$4 sm:$0xff]   ;;  %v12540_v57 = vld [vmem:[#allocation8 + $0x620] ss:$16 sps:$4 sm:$0xff]  }
 0x4e6   :  { %v12468_v22 = vld [vmem:[#allocation8 + $0x5e0] ss:$16 sps:$4 sm:$0xff]  }
 0x4e7   :  { %9450 = vmatpush2.bf16.msra.mxu0 %v12396_v14  ;;  %v13700_v14 = vpack.c.bf16 %v7864_v28, %v7856_v43  ;;  %v12552_v61 = vld [vmem:[#allocation8 + $0x7e0] ss:$16 sps:$4 sm:$0xff]   ;;  %v12488_v28 = vld [vmem:[#allocation8 + $0x524] ss:$16 sps:$4 sm:$0xff]  }
 0x4e8   :  { %9493 = vmatpush2.bf16.msra.mxu1 %v12399_v16  ;;  %9451 = vmatprep.subr.bf16.mxu0 %v12404_v33  ;;  %v13827_v16 = vld [vmem:[#allocation42_spill] sm:$0xff] }
 0x4e9   :  { %9494 = vmatprep.subr.bf16.mxu1 %v12407_v7  ;;  %v12512_v33 = vld [vmem:[#allocation8 + $0x6c4] ss:$16 sps:$4 sm:$0xff]   ;;  %v12558_v62 = vld [vmem:[#allocation8 + $0x7c0] ss:$16 sps:$4 sm:$0xff]  }
 0x4ea   :  { %v13828_v7 = vld [vmem:[#allocation50_spill] sm:$0xff] }
 0x4eb   :  { %9452 = vmatpush2.bf16.msra.mxu0 %v12402_v27  ;;  %v12452_v27 = vld [vmem:[#allocation8 + $0x4a4] ss:$16 sps:$4 sm:$0xff]   ;;  %v12477_v35 = vld [vmem:[#allocation8 + $0x580] ss:$16 sps:$4 sm:$0xff]  }
 0x4ec   :  { %9495 = vmatpush2.bf16.msra.mxu1 %v12405_v1  ;;  %9453 = vmatprep.subr.bf16.mxu0 %v12410_v25  ;;  %v12518_v1 = vld [vmem:[#allocation8 + $0x6a4] ss:$16 sps:$4 sm:$0xff]   ;;  %v12450_v25 = vld [vmem:[#allocation8 + $0x4a0] ss:$16 sps:$4 sm:$0xff]  }
 0x4ed   :  { %9496 = vmatprep.subr.bf16.mxu1 %v12413_v48  ;;  %v12455_v48 = vld [vmem:[#allocation8 + $0x484] ss:$16 sps:$4 sm:$0xff]   ;;  %v12570_v53 = vld [vmem:[#allocation8 + $0x780] ss:$16 sps:$4 sm:$0xff]  }
 0x4ee   :  { %v12480_v13 = vld [vmem:[#allocation8 + $0x560] ss:$16 sps:$4 sm:$0xff]   ;;  %v12590_v43 = vld [vmem:[#allocation8 + $0x724] ss:$16 sps:$4 sm:$0xff]  }
 0x4ef   :  { %9454 = vmatpush2.bf16.msra.mxu0 %v12408_v47  ;;  %v12524_v47 = vld [vmem:[#allocation8 + $0x684] ss:$16 sps:$4 sm:$0xff]  }
 0x4f0   :  { %9497 = vmatpush2.bf16.msra.mxu1 %v12411_v51  ;;  %9455 = vmatprep.subr.bf16.mxu0 %v12416_v10  ;;  %v12458_v51 = vld [vmem:[#allocation8 + $0x464] ss:$16 sps:$4 sm:$0xff]   ;;  %v12522_v10 = vld [vmem:[#allocation8 + $0x680] ss:$16 sps:$4 sm:$0xff]  }
 0x4f1   :  { %9498 = vmatprep.subr.bf16.mxu1 %v12419_v20  ;;  %v12530_v20 = vld [vmem:[#allocation8 + $0x664] ss:$16 sps:$4 sm:$0xff]  }
 0x4f3   :  { %9456 = vmatpush2.bf16.msra.mxu0 %v12414_v31  ;;  %v12536_v31 = vld [vmem:[#allocation8 + $0x644] ss:$16 sps:$4 sm:$0xff]  }
 0x4f4   :  { %9499 = vmatpush2.bf16.msra.mxu1 %v12417_v17  ;;  %9457 = vmatprep.subr.bf16.mxu0 %v12422_v24  ;;  %v12464_v17 = vld [vmem:[#allocation8 + $0x424] ss:$16 sps:$4 sm:$0xff]   ;;  %v12534_v24 = vld [vmem:[#allocation8 + $0x640] ss:$16 sps:$4 sm:$0xff]  }
 0x4f5   :  { %9500 = vmatprep.subr.bf16.mxu1 %v12425_v9  ;;  %v12542_v9 = vld [vmem:[#allocation8 + $0x624] ss:$16 sps:$4 sm:$0xff]  }
 0x4f7   :  { %9458 = vmatpush2.bf16.msra.mxu0 %v12420_v6  ;;  %v12467_v6 = vld [vmem:[#allocation8 + $0x404] ss:$16 sps:$4 sm:$0xff]  }
 0x4f8   :  { %9501 = vmatpush2.bf16.msra.mxu1 %v12423_v37  ;;  %9459 = vmatprep.subr.bf16.mxu0 %v12428_v12  ;;  %v12465_v37 = vld [vmem:[#allocation8 + $0x400] ss:$16 sps:$4 sm:$0xff]   ;;  %v12470_v12 = vld [vmem:[#allocation8 + $0x5e4] ss:$16 sps:$4 sm:$0xff]  }
 0x4f9   :  { %9502 = vmatprep.subr.bf16.mxu1 %v12431_v44  ;;  %v12546_v44 = vld [vmem:[#allocation8 + $0x600] ss:$16 sps:$4 sm:$0xff]  }
 0x4fb   :  { %9460 = vmatpush2.bf16.msra.mxu0 %v12426_v38  ;;  %v12473_v38 = vld [vmem:[#allocation8 + $0x5c4] ss:$16 sps:$4 sm:$0xff]  }
 0x4fc   :  { %9503 = vmatpush2.bf16.msra.mxu1 %v12429_v52  ;;  %9461 = vmatprep.subr.bf16.mxu0 %v12434_v55  ;;  %v12560_v52 = vld [vmem:[#allocation8 + $0x7c4] ss:$16 sps:$4 sm:$0xff]   ;;  %v12471_v55 = vld [vmem:[#allocation8 + $0x5c0] ss:$16 sps:$4 sm:$0xff]  }
 0x4fd   :  { %9504 = vmatprep.subr.bf16.mxu1 %v12437_v40  ;;  %v12476_v40 = vld [vmem:[#allocation8 + $0x5a4] ss:$16 sps:$4 sm:$0xff]  }
 0x4ff   :  { %9462 = vmatpush2.bf16.msra.mxu0 %v12432_v26  ;;  %v12474_v26 = vld [vmem:[#allocation8 + $0x5a0] ss:$16 sps:$4 sm:$0xff]  }
 0x500   :  { %9505 = vmatpush2.bf16.msra.mxu1 %v12435_v11  ;;  %9463 = vmatprep.subr.bf16.mxu0 %v12440_v3  ;;  %v12564_v11 = vld [vmem:[#allocation8 + $0x7a0] ss:$16 sps:$4 sm:$0xff]   ;;  %v12572_v3 = vld [vmem:[#allocation8 + $0x784] ss:$16 sps:$4 sm:$0xff]  }
 0x501   :  { %9506 = vmatprep.subr.bf16.mxu1 %v12443_v0  ;;  %v12482_v0 = vld [vmem:[#allocation8 + $0x564] ss:$16 sps:$4 sm:$0xff]  }
 0x503   :  { %9464 = vmatpush2.bf16.msra.mxu0 %v12438_v45  ;;  %v12578_v45 = vld [vmem:[#allocation8 + $0x764] ss:$16 sps:$4 sm:$0xff]  }
 0x504   :  { %9507 = vmatpush2.bf16.msra.mxu1 %v12441_v5  ;;  %9519 = vmatprep.subr.bf16.mxu0 %v12446_v60  ;;  %v12576_v5 = vld [vmem:[#allocation8 + $0x760] ss:$16 sps:$4 sm:$0xff]   ;;  %v12584_v60 = vld [vmem:[#allocation8 + $0x744] ss:$16 sps:$4 sm:$0xff]  }
 0x505   :  { %9562 = vmatprep.subr.bf16.mxu1 %v12506_v32  ;;  %v12483_v32 = vld [vmem:[#allocation8 + $0x540] ss:$16 sps:$4 sm:$0xff]  }
 0x506   :  { %9466 = vmatmul.mubr.bf16.vlgmr.msra.gmra.mxu0 %v13827_v16 }
 0x507   :  { %9509 = vmatmul.mubr.bf16.vlgmr.msra.gmra.mxu1 %v13828_v7  ;;  %9520 = vmatpush1.bf16.msra.mxu0 %v12444_v58  ;;  %v12582_v58 = vld [vmem:[#allocation8 + $0x740] ss:$16 sps:$4 sm:$0xff]  }
 0x508   :  { %9551 = vmatprep.mubr.bf16.mxu0 %v13700_v14  ;;  %9521 = vmatprep.subr.bf16.mxu0 %v12449_v42  ;;  %v12486_v42 = vld [vmem:[#allocation8 + $0x520] ss:$16 sps:$4 sm:$0xff]  }
 0x509   :  { %9563 = vmatpush1.bf16.msra.mxu1 %v12504_v29  ;;  %v12491_v29 = vld [vmem:[#allocation8 + $0x504] ss:$16 sps:$4 sm:$0xff]  }
 0x50a   :  { %9564 = vmatprep.subr.bf16.mxu1 %v12512_v33  ;;  %v12588_v33 = vld [vmem:[#allocation8 + $0x720] ss:$16 sps:$4 sm:$0xff]  }
 0x50b   :  { %9522 = vmatpush1.bf16.msra.mxu0 %v12447_v23  ;;  %v12596_v23 = vld [vmem:[#allocation8 + $0x704] ss:$16 sps:$4 sm:$0xff]  }
 0x50c   :  { %9523 = vmatprep.subr.bf16.mxu0 %v12452_v27  ;;  %v12489_v27 = vld [vmem:[#allocation8 + $0x500] ss:$16 sps:$4 sm:$0xff]  }
 0x50d   :  { %9565 = vmatpush1.bf16.msra.mxu1 %v12510_v30  ;;  %v12494_v30 = vld [vmem:[#allocation8 + $0xec] ss:$16 sps:$4 sm:$0xff]  }
 0x50e   :  { %9566 = vmatprep.subr.bf16.mxu1 %v12518_v1  ;;  %v12594_v1 = vld [vmem:[#allocation8 + $0x700] ss:$16 sps:$4 sm:$0xff]  }
 0x50f   :  { %9524 = vmatpush1.bf16.msra.mxu0 %v12450_v25  ;;  %v12602_v25 = vld [vmem:[#allocation8 + $0x2ec] ss:$16 sps:$4 sm:$0xff]  }
 0x510   :  { %9525 = vmatprep.subr.bf16.mxu0 %v12455_v48  ;;  %v12492_v48 = vld [vmem:[#allocation8 + $0xe8] ss:$16 sps:$4 sm:$0xff]  }
 0x511   :  { %9567 = vmatpush1.bf16.msra.mxu1 %v12516_v54  ;;  %v12497_v54 = vld [vmem:[#allocation8 + $0xcc] ss:$16 sps:$4 sm:$0xff]  }
 0x512   :  { %9568 = vmatprep.subr.bf16.mxu1 %v12524_v47  ;;  %v12495_v47 = vld [vmem:[#allocation8 + $0xc8] ss:$16 sps:$4 sm:$0xff]  }
 0x513   :  { %9526 = vmatpush1.bf16.msra.mxu0 %v12453_v34  ;;  %v12500_v34 = vld [vmem:[#allocation8 + $0xac] ss:$16 sps:$4 sm:$0xff]  }
 0x514   :  { %9527 = vmatprep.subr.bf16.mxu0 %v12458_v51  ;;  %v12498_v51 = vld [vmem:[#allocation8 + $0xa8] ss:$16 sps:$4 sm:$0xff]  }
 0x515   :  { %9569 = vmatpush1.bf16.msra.mxu1 %v12522_v10  ;;  %v12503_v10 = vld [vmem:[#allocation8 + $0x8c] ss:$16 sps:$4 sm:$0xff]  }
 0x516   :  { %9570 = vmatprep.subr.bf16.mxu1 %v12530_v20  ;;  %v12501_v20 = vld [vmem:[#allocation8 + $0x88] ss:$16 sps:$4 sm:$0xff]  }
 0x517   :  { %9528 = vmatpush1.bf16.msra.mxu0 %v12456_v56  ;;  %v12509_v56 = vld [vmem:[#allocation8 + $0x6c] ss:$16 sps:$4 sm:$0xff]  }
 0x518   :  { %9529 = vmatprep.subr.bf16.mxu0 %v12461_v63  ;;  %v12507_v63 = vld [vmem:[#allocation8 + $0x68] ss:$16 sps:$4 sm:$0xff]  }
 0x519   :  { %9571 = vmatpush1.bf16.msra.mxu1 %v12528_v4  ;;  %v12515_v4 = vld [vmem:[#allocation8 + $0x4c] ss:$16 sps:$4 sm:$0xff]  }
 0x51a   :  { %9572 = vmatprep.subr.bf16.mxu1 %v12536_v31  ;;  %v12513_v31 = vld [vmem:[#allocation8 + $0x48] ss:$16 sps:$4 sm:$0xff]  }
 0x51b   :  { %9530 = vmatpush1.bf16.msra.mxu0 %v12459_v39  ;;  %v12521_v39 = vld [vmem:[#allocation8 + $0x2c] ss:$16 sps:$4 sm:$0xff]  }
 0x51c   :  { %9531 = vmatprep.subr.bf16.mxu0 %v12464_v17  ;;  %v7541_v17 = vpop.f32.mrf.mxu0 }
 0x51d   :  { %9573 = vmatpush1.bf16.msra.mxu1 %v12534_v24  ;;  %v12527_v24 = vld [vmem:[#allocation8 + $0xc] ss:$16 sps:$4 sm:$0xff]  }
 0x51e   :  { %9574 = vmatprep.subr.bf16.mxu1 %v12542_v9  ;;  %v7584_v9 = vpop.f32.mrf.mxu1 }
 0x51f   :  { %9532 = vmatpush1.bf16.msra.mxu0 %v12462_v50  ;;  %v12525_v50 = vld [vmem:[#allocation8 + $0x8] ss:$16 sps:$4 sm:$0xff]  }
 0x520   :  { %9533 = vmatprep.subr.bf16.mxu0 %v12467_v6  ;;  %v7543_v6 = vpop.f32.mrf.mxu0 }
 0x521   :  { %9575 = vmatpush1.bf16.msra.mxu1 %v12540_v57  ;;  %v12533_v57 = vld [vmem:[#allocation8 + $0x1ec] ss:$16 sps:$4 sm:$0xff]  }
 0x522   :  { %9576 = vmatprep.subr.bf16.mxu1 %v12548_v8  ;;  %v7586_v8 = vpop.f32.mrf.mxu1 }
 0x523   :  { %9534 = vmatpush1.bf16.msra.mxu0 %v12465_v37  ;;  %v12531_v37 = vld [vmem:[#allocation8 + $0x1e8] ss:$16 sps:$4 sm:$0xff]  }
 0x524   :  { %9535 = vmatprep.subr.bf16.mxu0 %v12470_v12  ;;  %v7545_v12 = vpop.f32.mrf.mxu0 }
 0x525   :  { %9577 = vmatpush1.bf16.msra.mxu1 %v12546_v44  ;;  %v12539_v44 = vld [vmem:[#allocation8 + $0x1cc] ss:$16 sps:$4 sm:$0xff]  }
 0x526   :  { %9578 = vmatprep.subr.bf16.mxu1 %v12554_v19  ;;  %v7588_v19 = vpop.f32.mrf.mxu1 }
 0x527   :  { %9536 = vmatpush2.bf16.msra.mxu0 %v12468_v22  ;;  %v12537_v22 = vld [vmem:[#allocation8 + $0x1c8] ss:$16 sps:$4 sm:$0xff]  }
 0x528   :  { %9537 = vmatprep.subr.bf16.mxu0 %v12473_v38  ;;  %v7547_v38 = vpop.f32.mrf.mxu0 }
 0x529   :  { %9579 = vmatpush2.bf16.msra.mxu1 %v12552_v61  ;;  %v12545_v61 = vld [vmem:[#allocation8 + $0x1ac] ss:$16 sps:$4 sm:$0xff]  }
 0x52a   :  { %9580 = vmatprep.subr.bf16.mxu1 %v12560_v52  ;;  %v7590_v52 = vpop.f32.mrf.mxu1 }
 0x52b   :  { %9538 = vmatpush2.bf16.msra.mxu0 %v12471_v55  ;;  %v7627_v55 = vpop.f32.mrf.mxu0 }
 0x52c   :  { %9539 = vmatprep.subr.bf16.mxu0 %v12476_v40  ;;  %v7670_v40 = vpop.f32.mrf.mxu1 }
 0x52d   :  { %9581 = vmatpush2.bf16.msra.mxu1 %v12558_v62  ;;  %v12543_v62 = vld [vmem:[#allocation8 + $0x1a8] ss:$16 sps:$4 sm:$0xff]  }
 0x52e   :  { %9582 = vmatprep.subr.bf16.mxu1 %v12566_v2  ;;  %v12551_v2 = vld [vmem:[#allocation8 + $0x18c] ss:$16 sps:$4 sm:$0xff]  }
 0x52f   :  { %9540 = vmatpush2.bf16.msra.mxu0 %v12474_v26  ;;  %v7629_v26 = vpop.f32.mrf.mxu0 }
 0x530   :  { %9541 = vmatprep.subr.bf16.mxu0 %v12479_v46  ;;  %v1345_v46 = vsub.s32 7, %v13419_v41 }
 0x531   :  { %9583 = vmatpush2.bf16.msra.mxu1 %v12564_v11  ;;  %v7672_v11 = vpop.f32.mrf.mxu1 }
 0x532   :  { %9584 = vmatprep.subr.bf16.mxu1 %v12572_v3  ;;  %v12549_v3 = vld [vmem:[#allocation8 + $0x188] ss:$16 sps:$4 sm:$0xff]  }
 0x533   :  { %9542 = vmatpush2.bf16.msra.mxu0 %v12477_v35  ;;  %v1341_v35 = vsub.s32 6, %v13419_v41 }
 0x534   :  { %9543 = vmatprep.subr.bf16.mxu0 %v12482_v0  ;;  %v12557_v0 = vld [vmem:[#allocation8 + $0x16c] ss:$16 sps:$4 sm:$0xff]  }
 0x535   :  { %9585 = vmatpush2.bf16.msra.mxu1 %v12570_v53  ;;  %v7631_v53 = vpop.f32.mrf.mxu0 }
 0x536   :  { %9586 = vmatprep.subr.bf16.mxu1 %v12578_v45  ;;  %v1346_v45 = vrot.slane %v13637_v59, %v1345_v46 }
 0x537   :  { %9544 = vmatpush2.bf16.msra.mxu0 %v12480_v13  ;;  %v7674_v13 = vpop.f32.mrf.mxu1 }
 0x538   :  { %9545 = vmatprep.subr.bf16.mxu0 %v12485_v15  ;;  %v12555_v15 = vld [vmem:[#allocation8 + $0x168] ss:$16 sps:$4 sm:$0xff]  }
 0x539   :  { %9587 = vmatpush2.bf16.msra.mxu1 %v12576_v5  ;;  %v1342_v5 = vrot.slane %v13637_v59, %v1341_v35  ;;  %v12575_v59 = vld [vmem:[#allocation8 + $0x10c] ss:$16 sps:$4 sm:$0xff]  }
 0x53a   :  { %9588 = vmatprep.subr.bf16.mxu1 %v12584_v60  ;;  %v12563_v60 = vld [vmem:[#allocation8 + $0x14c] ss:$16 sps:$4 sm:$0xff]  }
 0x53b   :  { %9546 = vmatpush2.bf16.msra.mxu0 %v12483_v32  ;;  %v7633_v32 = vpop.f32.mrf.mxu0 }
 0x53c   :  { %9547 = vmatprep.subr.bf16.mxu0 %v12488_v28  ;;  %v7544_v28 = vadd.f32 %v7543_v6, %v1346_v45  ;;  %v12579_v6 = vld [vmem:[#allocation8 + $0x4e8] ss:$16 sps:$4 sm:$0xff]  }
 0x53d   :  { %9589 = vmatpush2.bf16.msra.mxu1 %v12582_v58  ;;  %v7676_v58 = vpop.f32.mrf.mxu1 }
 0x53e   :  { %9590 = vmatprep.subr.bf16.mxu1 %v12590_v43  ;;  %v12561_v43 = vld [vmem:[#allocation8 + $0x148] ss:$16 sps:$4 sm:$0xff]  }
 0x53f   :  { %9548 = vmatpush2.bf16.msra.mxu0 %v12486_v42  ;;  %v7542_v42 = vadd.f32 %v7541_v17, %v1342_v5 }
 0x540   :  { %9549 = vmatprep.subr.bf16.mxu0 %v12491_v29 }
 0x541   :  { %9591 = vmatpush2.bf16.msra.mxu1 %v12588_v33  ;;  %v12569_v33 = vld [vmem:[#allocation8 + $0x12c] ss:$16 sps:$4 sm:$0xff]  }
 0x542   :  { %9592 = vmatprep.subr.bf16.mxu1 %v12596_v23  ;;  %v7546_v23 = vadd.f32 %v7545_v12, %v1342_v5 }
 0x543   :  { %9550 = vmatpush2.bf16.msra.mxu0 %v12489_v27 }
 0x544   :  { %9605 = vmatprep.subr.bf16.mxu0 %v12494_v30  ;;  %v7587_v30 = vadd.f32 %v7586_v8, %v7544_v28 }
 0x545   :  { %9593 = vmatpush2.bf16.msra.mxu1 %v12594_v1  ;;  %v7548_v1 = vadd.f32 %v7547_v38, %v1346_v45 }
 0x546   :  { %9552 = vmatmul.mubr.bf16.vlgmr.msra.gmra.mxu0 %v13631_v21  ;;  %9648 = vmatprep.subr.bf16.mxu1 %v12602_v25  ;;  %v7713_v29 = vpop.f32.mrf.mxu0  ;;  %v12567_v25 = vld [vmem:[#allocation8 + $0x128] ss:$16 sps:$4 sm:$0xff]  }
 0x547   :  { %9606 = vmatpush1.bf16.msra.mxu0 %v12492_v48  ;;  %9637 = vmatprep.mubr.bf16.mxu0 %v13676_v36  ;;  %v12519_v36 = vld [vmem:[#allocation8 + $0x28] ss:$16 sps:$4 sm:$0xff]   ;;  %v7756_v27 = vpop.f32.mrf.mxu1  ;;  %v7585_v48 = vadd.f32 %v7584_v9, %v7542_v42 }
 0x548   :  { %9607 = vmatprep.subr.bf16.mxu0 %v12497_v54  ;;  %v7715_v54 = vpop.f32.mrf.mxu0 }
 0x54b   :  { %9608 = vmatpush1.bf16.msra.mxu0 %v12495_v47  ;;  %v7589_v47 = vadd.f32 %v7588_v19, %v7546_v23 }
 0x54c   :  { %9609 = vmatprep.subr.bf16.mxu0 %v12500_v34  ;;  %v7630_v34 = vadd.f32 %v7629_v26, %v7587_v30 }
 0x54f   :  { %9610 = vmatpush1.bf16.msra.mxu0 %v12498_v51  ;;  %v7758_v51 = vpop.f32.mrf.mxu1 }
 0x550   :  { %9611 = vmatprep.subr.bf16.mxu0 %v12503_v10  ;;  %v7628_v10 = vadd.f32 %v7627_v55, %v7585_v48  ;;  %v12585_v55 = vld [vmem:[#allocation8 + $0x4c8] ss:$16 sps:$4 sm:$0xff]  }
 0x551   :  { %v7760_v17 = vpop.f32.mrf.mxu1  ;;  %v12603_v48 = vld [vmem:[#allocation8 + $0x468] ss:$16 sps:$4 sm:$0xff]  }
 0x553   :  { %9612 = vmatpush1.bf16.msra.mxu0 %v12501_v20  ;;  %v7591_v20 = vadd.f32 %v7590_v52, %v7548_v1  ;;  %v7762_v19 = vpop.f32.mrf.mxu1  ;;  %v12600_v1 = vld [vmem:[#allocation8 + $0x2e8] ss:$16 sps:$4 sm:$0xff]  }
 0x554   :  { %9613 = vmatprep.subr.bf16.mxu0 %v12509_v56  ;;  %v7632_v56 = vadd.f32 %v7631_v53, %v7589_v47  ;;  %v12606_v47 = vld [vmem:[#allocation8 + $0x2c8] ss:$16 sps:$4 sm:$0xff]  }
 0x557   :  { %9614 = vmatpush1.bf16.msra.mxu0 %v12507_v63  ;;  %v12573_v63 = vld [vmem:[#allocation8 + $0x108] ss:$16 sps:$4 sm:$0xff]  }
 0x558   :  { %9615 = vmatprep.subr.bf16.mxu0 %v12515_v4  ;;  %v7717_v4 = vpop.f32.mrf.mxu0 }
 0x55a   :  { %v7719_v8 = vpop.f32.mrf.mxu0 }
 0x55b   :  { %9616 = vmatpush1.bf16.msra.mxu0 %v12513_v31  ;;  %v12581_v31 = vld [vmem:[#allocation8 + $0x4ec] ss:$16 sps:$4 sm:$0xff]  }
 0x55c   :  { %9617 = vmatprep.subr.bf16.mxu0 %v12521_v39  ;;  %v7673_v39 = vadd.f32 %v7672_v11, %v7630_v34  ;;  %v12609_v34 = vld [vmem:[#allocation8 + $0x448] ss:$16 sps:$4 sm:$0xff]  }
 0x55e   :  { %v7716_v9 = vadd.f32 %v7715_v54, %v7673_v39  ;;  %v12608_v54 = vld [vmem:[#allocation8 + $0x2cc] ss:$16 sps:$4 sm:$0xff]  }
 0x55f   :  { %9618 = vmatpush1.bf16.msra.mxu0 %v12519_v36  ;;  %v7634_v36 = vadd.f32 %v7633_v32, %v7591_v20  ;;  %v12612_v20 = vld [vmem:[#allocation8 + $0x2a8] ss:$16 sps:$4 sm:$0xff]   ;;  %v12626_v39 = vld [vmem:[#allocation8 + $0x26c] ss:$16 sps:$4 sm:$0xff]  }
 0x560   :  { %9619 = vmatprep.subr.bf16.mxu0 %v12527_v24  ;;  %v7671_v24 = vadd.f32 %v7670_v40, %v7628_v10  ;;  %v7759_v38 = vadd.f32 %v7758_v51, %v7716_v9  ;;  %v12614_v51 = vld [vmem:[#allocation8 + $0x2ac] ss:$16 sps:$4 sm:$0xff]  }
 0x561   :  { %v7677_v12 = vadd.f32 %v7676_v58, %v7634_v36  ;;  %v12617_v10 = vld [vmem:[#allocation8 + $0x42c] ss:$16 sps:$4 sm:$0xff]  }
 0x562   :  { %v12629_v36 = vld [vmem:[#allocation8 + $0x5ec] ss:$16 sps:$4 sm:$0xff]  }
 0x563   :  { %9620 = vmatpush1.bf16.msra.mxu0 %v12525_v50  ;;  %v7675_v50 = vadd.f32 %v7674_v13, %v7632_v56  ;;  %v12615_v56 = vld [vmem:[#allocation8 + $0x428] ss:$16 sps:$4 sm:$0xff]   ;;  %v12635_v9 = vld [vmem:[#allocation8 + $0x5cc] ss:$16 sps:$4 sm:$0xff]  }
 0x564   :  { %9621 = vmatprep.subr.bf16.mxu0 %v12533_v57  ;;  %v7714_v57 = vadd.f32 %v7713_v29, %v7671_v24  ;;  %v12605_v29 = vld [vmem:[#allocation8 + $0x46c] ss:$16 sps:$4 sm:$0xff]   ;;  %v12627_v24 = vld [vmem:[#allocation8 + $0x5e8] ss:$16 sps:$4 sm:$0xff]  }
 0x566   :  { %v7757_v40 = vadd.f32 %v7756_v27, %v7714_v57  ;;  %v12633_v57 = vld [vmem:[#allocation8 + $0x5c8] ss:$16 sps:$4 sm:$0xff]  }
 0x567   :  { %9622 = vmatpush2.bf16.msra.mxu0 %v12531_v37  ;;  %v12587_v37 = vld [vmem:[#allocation8 + $0x4cc] ss:$16 sps:$4 sm:$0xff]  }
 0x568   :  { %9623 = vmatprep.subr.bf16.mxu0 %v12539_v44  ;;  %v7718_v44 = vadd.f32 %v7717_v4, %v7675_v50  ;;  %v12623_v4 = vld [vmem:[#allocation8 + $0x40c] ss:$16 sps:$4 sm:$0xff]  }
 0x569   :  { %v12632_v50 = vld [vmem:[#allocation8 + $0x24c] ss:$16 sps:$4 sm:$0xff]  }
 0x56a   :  { %v7761_v26 = vadd.f32 %v7760_v17, %v7718_v44  ;;  %v12624_v17 = vld [vmem:[#allocation8 + $0x268] ss:$16 sps:$4 sm:$0xff]  }
 0x56b   :  { %9624 = vmatpush2.bf16.msra.mxu0 %v12537_v22  ;;  %v12639_v44 = vld [vmem:[#allocation8 + $0x5a8] ss:$16 sps:$4 sm:$0xff]  }
 0x56c   :  { %9625 = vmatprep.subr.bf16.mxu0 %v12545_v61  ;;  %v7720_v61 = vadd.f32 %v7719_v8, %v7677_v12  ;;  %v12638_v8 = vld [vmem:[#allocation8 + $0x22c] ss:$16 sps:$4 sm:$0xff]   ;;  %v12636_v12 = vld [vmem:[#allocation8 + $0x228] ss:$16 sps:$4 sm:$0xff]  }
 0x56f   :  { %9626 = vmatpush2.bf16.msra.mxu0 %v12543_v62 }
 0x570   :  { %9627 = vmatprep.subr.bf16.mxu0 %v12551_v2  ;;  %v12593_v2 = vld [vmem:[#allocation8 + $0x4ac] ss:$16 sps:$4 sm:$0xff]  }
 0x573   :  { %9628 = vmatpush2.bf16.msra.mxu0 %v12549_v3 }
 0x574   :  { %9629 = vmatprep.subr.bf16.mxu0 %v12557_v0  ;;  %v7763_v0 = vadd.f32 %v7762_v19, %v7720_v61  ;;  %v12644_v19 = vld [vmem:[#allocation8 + $0x20c] ss:$16 sps:$4 sm:$0xff]   ;;  %v12645_v61 = vld [vmem:[#allocation8 + $0x588] ss:$16 sps:$4 sm:$0xff]  }
 0x577   :  { %9630 = vmatpush2.bf16.msra.mxu0 %v12555_v15  ;;  %v12599_v15 = vld [vmem:[#allocation8 + $0x48c] ss:$16 sps:$4 sm:$0xff]  }
 0x578   :  { %9631 = vmatprep.subr.bf16.mxu0 %v12563_v60 }
 0x57b   :  { %9632 = vmatpush2.bf16.msra.mxu0 %v12561_v43  ;;  %v12597_v43 = vld [vmem:[#allocation8 + $0x488] ss:$16 sps:$4 sm:$0xff]  }
 0x57c   :  { %9633 = vmatprep.subr.bf16.mxu0 %v12569_v33 }
 0x57f   :  { %9634 = vmatpush2.bf16.msra.mxu0 %v12567_v25 }
 0x580   :  { %9635 = vmatprep.subr.bf16.mxu0 %v12575_v59  ;;  %v12611_v59 = vld [vmem:[#allocation8 + $0x44c] ss:$16 sps:$4 sm:$0xff]  }
 0x583   :  { %9636 = vmatpush2.bf16.msra.mxu0 %v12573_v63  ;;  %v12620_v63 = vld [vmem:[#allocation8 + $0x28c] ss:$16 sps:$4 sm:$0xff]  }
 0x584   :  { %9691 = vmatprep.subr.bf16.mxu0 %v12581_v31  ;;  %v12618_v31 = vld [vmem:[#allocation8 + $0x288] ss:$16 sps:$4 sm:$0xff]  }
 0x586   :  { %v7799_v22 = vpop.f32.mrf.mxu0  ;;  %9638 = vmatmul.mubr.bf16.vlgmr.msra.gmra.mxu0 %v13827_v16  ;;  %v12591_v16 = vld [vmem:[#allocation8 + $0x4a8] ss:$16 sps:$4 sm:$0xff]  }
 0x587   :  { %v7842_v52 = vpop.f32.mrf.mxu1  ;;  %9692 = vmatpush1.bf16.msra.mxu0 %v12579_v6  ;;  %9723 = vmatprep.mubr.bf16.mxu0 %v13700_v14  ;;  %v7800_v3 = vadd.f32 %v7799_v22, %v7757_v40  ;;  %v12630_v6 = vld [vmem:[#allocation8 + $0x248] ss:$16 sps:$4 sm:$0xff]   ;;  %v12647_v22 = vld [vmem:[#allocation8 + $0x58c] ss:$16 sps:$4 sm:$0xff]  }
 0x588   :  { %v7801_v62 = vpop.f32.mrf.mxu0  ;;  %9693 = vmatprep.subr.bf16.mxu0 %v12587_v37  ;;  %v12641_v37 = vld [vmem:[#allocation8 + $0x5ac] ss:$16 sps:$4 sm:$0xff]   ;;  %v12648_v40 = vld [vmem:[#allocation8 + $0x3e8] ss:$16 sps:$4 sm:$0xff]  }
 0x589   :  { %v7802_v46 = vadd.f32 %v7801_v62, %v7759_v38  ;;  %v7844_v11 = vpop.f32.mrf.mxu1  ;;  %v7843_v32 = vadd.f32 %v7842_v52, %v7800_v3  ;;  %v12642_v38 = vld [vmem:[#allocation8 + $0x208] ss:$16 sps:$4 sm:$0xff]   ;;  %v12650_v52 = vld [vmem:[#allocation8 + $0x3ec] ss:$16 sps:$4 sm:$0xff]  }
 0x58a   :  { %v7803_v35 = vpop.f32.mrf.mxu0  ;;  %v12651_v62 = vld [vmem:[#allocation8 + $0x568] ss:$16 sps:$4 sm:$0xff]   ;;  %v12662_v3 = vld [vmem:[#allocation8 + $0x3ac] ss:$16 sps:$4 sm:$0xff]  }
 0x58b   :  { %v7804_v53 = vadd.f32 %v7803_v35, %v7761_v26  ;;  %v7846_v45 = vpop.f32.mrf.mxu1  ;;  %9694 = vmatpush1.bf16.msra.mxu0 %v12585_v55  ;;  %v7845_v5 = vadd.f32 %v7844_v11, %v7802_v46  ;;  %v7857_v27 = vmax.f32 %v7843_v32, 0.0  ;;  %v12653_v55 = vld [vmem:[#allocation8 + $0x56c] ss:$16 sps:$4 sm:$0xff]   ;;  %v12654_v46 = vld [vmem:[#allocation8 + $0x3c8] ss:$16 sps:$4 sm:$0xff]  }
 0x58c   :  { %v7805_v13 = vpop.f32.mrf.mxu0  ;;  %9695 = vmatprep.subr.bf16.mxu0 %v12593_v2  ;;  %v12656_v2 = vld [vmem:[#allocation8 + $0x3cc] ss:$16 sps:$4 sm:$0xff]   ;;  %v12657_v11 = vld [vmem:[#allocation8 + $0x548] ss:$16 sps:$4 sm:$0xff]  }
 0x58d   :  { %v7847_v14 = vadd.f32 %v7846_v45, %v7804_v53  ;;  %v7806_v60 = vadd.f32 %v7805_v13, %v7763_v0  ;;  %v7848_v28 = vpop.f32.mrf.mxu1  ;;  %v7858_v33 = vmax.f32 %v7845_v5, 0.0  ;;  %v12659_v26 = vld [vmem:[#allocation8 + $0x54c] ss:$16 sps:$4 sm:$0xff]   ;;  %v12660_v0 = vld [vmem:[#allocation8 + $0x3a8] ss:$16 sps:$4 sm:$0xff]  }
 0x58e   :  { %v12665_v35 = vld [vmem:[#allocation8 + $0x52c] ss:$16 sps:$4 sm:$0xff]   ;;  %v12663_v53 = vld [vmem:[#allocation8 + $0x528] ss:$16 sps:$4 sm:$0xff]  }
 0x58f   :  { %v7849_v58 = vadd.f32 %v7848_v28, %v7806_v60  ;;  %9696 = vmatpush1.bf16.msra.mxu0 %v12591_v16  ;;  %v7865_v42 = vmax.f32 %v7847_v14, 0.0  ;;  %v12668_v45 = vld [vmem:[#allocation8 + $0x38c] ss:$16 sps:$4 sm:$0xff]   ;;  %v12666_v13 = vld [vmem:[#allocation8 + $0x388] ss:$16 sps:$4 sm:$0xff]  }
 0x590   :  { %9697 = vmatprep.subr.bf16.mxu0 %v12599_v15  ;;  %v12671_v16 = vld [vmem:[#allocation8 + $0x50c] ss:$16 sps:$4 sm:$0xff]   ;;  %v12669_v15 = vld [vmem:[#allocation8 + $0x508] ss:$16 sps:$4 sm:$0xff]  }
 0x591   :  { %v7866_v23 = vmax.f32 %v7849_v58, 0.0  ;;  %v13715_v25 = vpack.c.bf16 %v7865_v42, %v7857_v27  ;;  %v12674_v5 = vld [vmem:[#allocation8 + $0x36c] ss:$16 sps:$4 sm:$0xff]   ;;  %v12734_v14 = vld [vmem:[#allocation11 + $0x74] ss:$8 sps:$4 sm:$0xff]  }
 0x592   :  { %v12672_v60 = vld [vmem:[#allocation8 + $0x368] ss:$16 sps:$4 sm:$0xff]   ;;  %v12677_v32 = vld [vmem:[#allocation8 + $0x34c] ss:$16 sps:$4 sm:$0xff]  }
 0x593   :  { %v13713_v30 = vpack.c.bf16 %v7866_v23, %v7858_v33  ;;  %9698 = vmatpush1.bf16.msra.mxu0 %v12597_v43  ;;  %v12732_v28 = vld [vmem:[#allocation11 + $0x70] ss:$8 sps:$4 sm:$0xff]   ;;  %v12737_v58 = vld [vmem:[#allocation11 + $0x64] ss:$8 sps:$4 sm:$0xff]   ;;  %v12740_v33 = vld [vmem:[#allocation11 + $0x54] ss:$8 sps:$4 sm:$0xff]  }
 0x594   :  { %9699 = vmatprep.subr.bf16.mxu0 %v12605_v29  ;;  %v12675_v43 = vld [vmem:[#allocation8 + $0x348] ss:$16 sps:$4 sm:$0xff]   ;;  %v12680_v42 = vld [vmem:[#allocation8 + $0x32c] ss:$16 sps:$4 sm:$0xff]  }
 0x595   :  { %9594 = vmatprep.mubr.bf16.mxu1 %v13713_v30  ;;  %v12735_v29 = vld [vmem:[#allocation11 + $0x60] ss:$8 sps:$4 sm:$0xff]   ;;  %v12678_v23 = vld [vmem:[#allocation8 + $0x328] ss:$16 sps:$4 sm:$0xff]  }
 0x596   :  { %9595 = vmatmul.mubr.bf16.vlgmr.msra.gmra.mxu1 %v13715_v25  ;;  %v12683_v27 = vld [vmem:[#allocation8 + $0x30c] ss:$16 sps:$4 sm:$0xff]  }
 0x597   :  { %9649 = vmatpush1.bf16.msra.mxu1 %v12600_v1  ;;  %9680 = vmatprep.mubr.bf16.mxu1 %v13679_v18  ;;  %v12621_v18 = vld [vmem:[#allocation8 + $0x408] ss:$16 sps:$4 sm:$0xff]   ;;  %v12738_v1 = vld [vmem:[#allocation11 + $0x50] ss:$8 sps:$4 sm:$0xff]  }
 0x598   :  { %9700 = vmatpush1.bf16.msra.mxu0 %v12603_v48  ;;  %9650 = vmatprep.subr.bf16.mxu1 %v12608_v54  ;;  %v12743_v48 = vld [vmem:[#allocation11 + $0x44] ss:$8 sps:$4 sm:$0xff]  }
 0x599   :  { %9701 = vmatprep.subr.bf16.mxu0 %v12611_v59  ;;  %v12681_v54 = vld [vmem:[#allocation8 + $0x308] ss:$16 sps:$4 sm:$0xff]   ;;  %v12686_v59 = vld [vmem:[#allocation8 + $0x6ec] ss:$16 sps:$4 sm:$0xff]  }
 0x59b   :  { %9651 = vmatpush1.bf16.msra.mxu1 %v12606_v47  ;;  %v12746_v47 = vld [vmem:[#allocation11 + $0x34] ss:$8 sps:$4 sm:$0xff]  }
 0x59c   :  { %9702 = vmatpush1.bf16.msra.mxu0 %v12609_v34  ;;  %9652 = vmatprep.subr.bf16.mxu1 %v12614_v51  ;;  %v12684_v34 = vld [vmem:[#allocation8 + $0x6e8] ss:$16 sps:$4 sm:$0xff]   ;;  %v12689_v51 = vld [vmem:[#allocation8 + $0x6cc] ss:$16 sps:$4 sm:$0xff]  }
 0x59d   :  { %9703 = vmatprep.subr.bf16.mxu0 %v12617_v10  ;;  %v12744_v10 = vld [vmem:[#allocation11 + $0x30] ss:$8 sps:$4 sm:$0xff]  }
 0x59f   :  { %9653 = vmatpush1.bf16.msra.mxu1 %v12612_v20  ;;  %v12749_v20 = vld [vmem:[#allocation11 + $0x24] ss:$8 sps:$4 sm:$0xff]  }
 0x5a0   :  { %9704 = vmatpush1.bf16.msra.mxu0 %v12615_v56  ;;  %9654 = vmatprep.subr.bf16.mxu1 %v12620_v63  ;;  %v12687_v56 = vld [vmem:[#allocation8 + $0x6c8] ss:$16 sps:$4 sm:$0xff]   ;;  %v12692_v63 = vld [vmem:[#allocation8 + $0x6ac] ss:$16 sps:$4 sm:$0xff]  }
 0x5a1   :  { %9705 = vmatprep.subr.bf16.mxu0 %v12623_v4  ;;  %v12747_v4 = vld [vmem:[#allocation11 + $0x20] ss:$8 sps:$4 sm:$0xff]  }
 0x5a3   :  { %9655 = vmatpush1.bf16.msra.mxu1 %v12618_v31  ;;  %v12752_v31 = vld [vmem:[#allocation11 + $0x14] ss:$8 sps:$4 sm:$0xff]  }
 0x5a4   :  { %9706 = vmatpush1.bf16.msra.mxu0 %v12621_v18  ;;  %9656 = vmatprep.subr.bf16.mxu1 %v12626_v39  ;;  %v12690_v18 = vld [vmem:[#allocation8 + $0x6a8] ss:$16 sps:$4 sm:$0xff]   ;;  %v12695_v39 = vld [vmem:[#allocation8 + $0x68c] ss:$16 sps:$4 sm:$0xff]  }
 0x5a5   :  { %9707 = vmatprep.subr.bf16.mxu0 %v12629_v36  ;;  %v12750_v36 = vld [vmem:[#allocation11 + $0x10] ss:$8 sps:$4 sm:$0xff]  }
 0x5a7   :  { %9657 = vmatpush1.bf16.msra.mxu1 %v12624_v17  ;;  %v12755_v17 = vld [vmem:[#allocation11 + $0x4] ss:$8 sps:$4 sm:$0xff]  }
 0x5a8   :  { %9708 = vmatpush2.bf16.msra.mxu0 %v12627_v24  ;;  %9658 = vmatprep.subr.bf16.mxu1 %v12632_v50  ;;  %v12698_v24 = vld [vmem:[#allocation8 + $0x66c] ss:$16 sps:$4 sm:$0xff]   ;;  %v12758_v50 = vld [vmem:[#allocation11 + $0xf4] ss:$8 sps:$4 sm:$0xff]  }
 0x5a9   :  { %9709 = vmatprep.subr.bf16.mxu0 %v12635_v9  ;;  %v12696_v9 = vld [vmem:[#allocation8 + $0x668] ss:$16 sps:$4 sm:$0xff]  }
 0x5ab   :  { %9659 = vmatpush1.bf16.msra.mxu1 %v12630_v6  ;;  %v12701_v6 = vld [vmem:[#allocation8 + $0x64c] ss:$16 sps:$4 sm:$0xff]  }
 0x5ac   :  { %9710 = vmatpush2.bf16.msra.mxu0 %v12633_v57  ;;  %9660 = vmatprep.subr.bf16.mxu1 %v12638_v8  ;;  %v12756_v57 = vld [vmem:[#allocation11 + $0xf0] ss:$8 sps:$4 sm:$0xff]   ;;  %v12761_v8 = vld [vmem:[#allocation11 + $0xe4] ss:$8 sps:$4 sm:$0xff]  }
 0x5ad   :  { %9711 = vmatprep.subr.bf16.mxu0 %v12641_v37  ;;  %v12699_v37 = vld [vmem:[#allocation8 + $0x648] ss:$16 sps:$4 sm:$0xff]  }
 0x5af   :  { %9661 = vmatpush1.bf16.msra.mxu1 %v12636_v12  ;;  %v12704_v12 = vld [vmem:[#allocation8 + $0x62c] ss:$16 sps:$4 sm:$0xff]  }
 0x5b0   :  { %9712 = vmatpush2.bf16.msra.mxu0 %v12639_v44  ;;  %9662 = vmatprep.subr.bf16.mxu1 %v12644_v19  ;;  %v12759_v44 = vld [vmem:[#allocation11 + $0xe0] ss:$8 sps:$4 sm:$0xff]   ;;  %v12764_v19 = vld [vmem:[#allocation11 + $0xd4] ss:$8 sps:$4 sm:$0xff]  }
 0x5b1   :  { %9713 = vmatprep.subr.bf16.mxu0 %v12647_v22  ;;  %v12702_v22 = vld [vmem:[#allocation8 + $0x628] ss:$16 sps:$4 sm:$0xff]  }
 0x5b3   :  { %9663 = vmatpush1.bf16.msra.mxu1 %v12642_v38  ;;  %v12707_v38 = vld [vmem:[#allocation8 + $0x60c] ss:$16 sps:$4 sm:$0xff]  }
 0x5b4   :  { %9714 = vmatpush2.bf16.msra.mxu0 %v12645_v61  ;;  %9664 = vmatprep.subr.bf16.mxu1 %v12650_v52  ;;  %v12762_v61 = vld [vmem:[#allocation11 + $0xd0] ss:$8 sps:$4 sm:$0xff]   ;;  %v12767_v52 = vld [vmem:[#allocation11 + $0xc4] ss:$8 sps:$4 sm:$0xff]  }
 0x5b5   :  { %9715 = vmatprep.subr.bf16.mxu0 %v12653_v55  ;;  %v12705_v55 = vld [vmem:[#allocation8 + $0x608] ss:$16 sps:$4 sm:$0xff]  }
 0x5b7   :  { %9665 = vmatpush2.bf16.msra.mxu1 %v12648_v40  ;;  %v12710_v40 = vld [vmem:[#allocation8 + $0x7ec] ss:$16 sps:$4 sm:$0xff]  }
 0x5b8   :  { %9716 = vmatpush2.bf16.msra.mxu0 %v12651_v62  ;;  %9666 = vmatprep.subr.bf16.mxu1 %v12656_v2  ;;  %v12765_v62 = vld [vmem:[#allocation11 + $0xc0] ss:$8 sps:$4 sm:$0xff]   ;;  %v12770_v2 = vld [vmem:[#allocation11 + $0xb4] ss:$8 sps:$4 sm:$0xff]  }
 0x5b9   :  { %9717 = vmatprep.subr.bf16.mxu0 %v12659_v26  ;;  %v12708_v26 = vld [vmem:[#allocation8 + $0x7e8] ss:$16 sps:$4 sm:$0xff]  }
 0x5bb   :  { %9667 = vmatpush2.bf16.msra.mxu1 %v12654_v46  ;;  %v12713_v46 = vld [vmem:[#allocation8 + $0x7cc] ss:$16 sps:$4 sm:$0xff]  }
 0x5bc   :  { %9718 = vmatpush2.bf16.msra.mxu0 %v12657_v11  ;;  %9668 = vmatprep.subr.bf16.mxu1 %v12662_v3  ;;  %v12768_v11 = vld [vmem:[#allocation11 + $0xb0] ss:$8 sps:$4 sm:$0xff]   ;;  %v12773_v3 = vld [vmem:[#allocation11 + $0xa4] ss:$8 sps:$4 sm:$0xff]  }
 0x5bd   :  { %9719 = vmatprep.subr.bf16.mxu0 %v12665_v35  ;;  %v12711_v35 = vld [vmem:[#allocation8 + $0x7c8] ss:$16 sps:$4 sm:$0xff]  }
 0x5bf   :  { %9669 = vmatpush2.bf16.msra.mxu1 %v12660_v0  ;;  %v12716_v0 = vld [vmem:[#allocation8 + $0x7ac] ss:$16 sps:$4 sm:$0xff]  }
 0x5c0   :  { %9720 = vmatpush2.bf16.msra.mxu0 %v12663_v53  ;;  %9670 = vmatprep.subr.bf16.mxu1 %v12668_v45  ;;  %v12771_v53 = vld [vmem:[#allocation11 + $0xa0] ss:$8 sps:$4 sm:$0xff]   ;;  %v12776_v45 = vld [vmem:[#allocation11 + $0x94] ss:$8 sps:$4 sm:$0xff]  }
 0x5c1   :  { %9721 = vmatprep.subr.bf16.mxu0 %v12671_v16  ;;  %v12714_v16 = vld [vmem:[#allocation8 + $0x7a8] ss:$16 sps:$4 sm:$0xff]  }
 0x5c3   :  { %9671 = vmatpush2.bf16.msra.mxu1 %v12666_v13  ;;  %v12719_v13 = vld [vmem:[#allocation8 + $0x78c] ss:$16 sps:$4 sm:$0xff]  }
 0x5c4   :  { %9722 = vmatpush2.bf16.msra.mxu0 %v12669_v15  ;;  %9672 = vmatprep.subr.bf16.mxu1 %v12674_v5  ;;  %v12774_v15 = vld [vmem:[#allocation11 + $0x90] ss:$8 sps:$4 sm:$0xff]   ;;  %v12779_v5 = vld [vmem:[#allocation11 + $0x84] ss:$8 sps:$4 sm:$0xff]  }
 0x5c5   :  { %10185 = vmatprep.subr.bf16.mxu0 %v12734_v14  ;;  %v12717_v14 = vld [vmem:[#allocation8 + $0x788] ss:$16 sps:$4 sm:$0xff]  }
 0x5c7   :  { %9673 = vmatpush2.bf16.msra.mxu1 %v12672_v60  ;;  %9724 = vmatmul.mubr.bf16.vlgmr.msra.gmra.mxu0 %v13631_v21  ;;  %v12741_v21 = vld [vmem:[#allocation11 + $0x40] ss:$8 sps:$4 sm:$0xff]  }
 0x5c8   :  { %9674 = vmatprep.subr.bf16.mxu1 %v12677_v32  ;;  %10186 = vmatpush1.bf16.msra.mxu0 %v12732_v28  ;;  %v12722_v60 = vld [vmem:[#allocation8 + $0x76c] ss:$16 sps:$4 sm:$0xff]   ;;  %v12720_v28 = vld [vmem:[#allocation8 + $0x768] ss:$16 sps:$4 sm:$0xff]  }
 0x5c9   :  { %10187 = vmatprep.subr.bf16.mxu0 %v12737_v58  ;;  %v12777_v32 = vld [vmem:[#allocation11 + $0x80] ss:$8 sps:$4 sm:$0xff]  }
 0x5ca   :  { %v12725_v58 = vld [vmem:[#allocation8 + $0x74c] ss:$16 sps:$4 sm:$0xff]  }
 0x5cb   :  { %9675 = vmatpush2.bf16.msra.mxu1 %v12675_v43  ;;  %v12723_v43 = vld [vmem:[#allocation8 + $0x748] ss:$16 sps:$4 sm:$0xff]  }
 0x5cc   :  { %9676 = vmatprep.subr.bf16.mxu1 %v12680_v42  ;;  %10188 = vmatpush1.bf16.msra.mxu0 %v12735_v29  ;;  %v12728_v42 = vld [vmem:[#allocation8 + $0x72c] ss:$16 sps:$4 sm:$0xff]   ;;  %v12726_v29 = vld [vmem:[#allocation8 + $0x728] ss:$16 sps:$4 sm:$0xff]  }
 0x5cd   :  { %10189 = vmatprep.subr.bf16.mxu0 %v12740_v33  ;;  %v12731_v33 = vld [vmem:[#allocation8 + $0x70c] ss:$16 sps:$4 sm:$0xff]  }
 0x5cf   :  { %9677 = vmatpush2.bf16.msra.mxu1 %v12678_v23  ;;  %v12729_v23 = vld [vmem:[#allocation8 + $0x708] ss:$16 sps:$4 sm:$0xff]  }
 0x5d0   :  { %9678 = vmatprep.subr.bf16.mxu1 %v12683_v27  ;;  %10190 = vmatpush1.bf16.msra.mxu0 %v12738_v1  ;;  %v12780_v27 = vld [vmem:[#allocation11 + $0x170] ss:$8 sps:$4 sm:$0xff]   ;;  %v12782_v1 = vld [vmem:[#allocation11 + $0x174] ss:$8 sps:$4 sm:$0xff]  }
 0x5d1   :  { %10191 = vmatprep.subr.bf16.mxu0 %v12743_v48  ;;  %v12785_v48 = vld [vmem:[#allocation11 + $0x164] ss:$8 sps:$4 sm:$0xff]  }
 0x5d3   :  { %9679 = vmatpush2.bf16.msra.mxu1 %v12681_v54  ;;  %v12783_v54 = vld [vmem:[#allocation11 + $0x160] ss:$8 sps:$4 sm:$0xff]  }
 0x5d4   :  { %9734 = vmatprep.subr.bf16.mxu1 %v12686_v59  ;;  %10192 = vmatpush1.bf16.msra.mxu0 %v12741_v21  ;;  %v12788_v59 = vld [vmem:[#allocation11 + $0x154] ss:$8 sps:$4 sm:$0xff]   ;;  %v12786_v21 = vld [vmem:[#allocation11 + $0x150] ss:$8 sps:$4 sm:$0xff]  }
 0x5d5   :  { %10193 = vmatprep.subr.bf16.mxu0 %v12746_v47  ;;  %v12791_v47 = vld [vmem:[#allocation11 + $0x144] ss:$8 sps:$4 sm:$0xff]  }
 0x5d6   :  { %9681 = vmatmul.mubr.bf16.vlgmr.msra.gmra.mxu1 %v13828_v7  ;;  %v12693_v7 = vld [vmem:[#allocation8 + $0x688] ss:$16 sps:$4 sm:$0xff]  }
 0x5d7   :  { %9735 = vmatpush1.bf16.msra.mxu1 %v12684_v34  ;;  %9766 = vmatprep.mubr.bf16.mxu1 %v13713_v30  ;;  %v12753_v30 = vld [vmem:[#allocation11] ss:$8 sps:$4 sm:$0xff]  }
 0x5d8   :  { %9736 = vmatprep.subr.bf16.mxu1 %v12689_v51  ;;  %10194 = vmatpush1.bf16.msra.mxu0 %v12744_v10  ;;  %v12789_v34 = vld [vmem:[#allocation11 + $0x140] ss:$8 sps:$4 sm:$0xff]   ;;  %v12794_v51 = vld [vmem:[#allocation11 + $0x134] ss:$8 sps:$4 sm:$0xff]   ;;  %v12792_v10 = vld [vmem:[#allocation11 + $0x130] ss:$8 sps:$4 sm:$0xff]  }
 0x5d9   :  { %10195 = vmatprep.subr.bf16.mxu0 %v12749_v20  ;;  %v12795_v20 = vld [vmem:[#allocation11 + $0x120] ss:$8 sps:$4 sm:$0xff]  }
 0x5db   :  { %9737 = vmatpush1.bf16.msra.mxu1 %v12687_v56  ;;  %v12800_v56 = vld [vmem:[#allocation11 + $0x114] ss:$8 sps:$4 sm:$0xff]  }
 0x5dc   :  { %9738 = vmatprep.subr.bf16.mxu1 %v12692_v63  ;;  %10196 = vmatpush1.bf16.msra.mxu0 %v12747_v4  ;;  %v12798_v63 = vld [vmem:[#allocation11 + $0x110] ss:$8 sps:$4 sm:$0xff]   ;;  %v12803_v4 = vld [vmem:[#allocation11 + $0x104] ss:$8 sps:$4 sm:$0xff]  }
 0x5dd   :  { %10197 = vmatprep.subr.bf16.mxu0 %v12752_v31  ;;  %v12801_v31 = vld [vmem:[#allocation11 + $0x100] ss:$8 sps:$4 sm:$0xff]  }
 0x5df   :  { %9739 = vmatpush1.bf16.msra.mxu1 %v12690_v18  ;;  %v12806_v18 = vld [vmem:[#allocation11 + $0x1f4] ss:$8 sps:$4 sm:$0xff]  }
 0x5e0   :  { %9740 = vmatprep.subr.bf16.mxu1 %v12695_v39  ;;  %10198 = vmatpush1.bf16.msra.mxu0 %v12750_v36  ;;  %v12804_v39 = vld [vmem:[#allocation11 + $0x1f0] ss:$8 sps:$4 sm:$0xff]   ;;  %v12809_v36 = vld [vmem:[#allocation11 + $0x1e4] ss:$8 sps:$4 sm:$0xff]  }
 0x5e1   :  { %10199 = vmatprep.subr.bf16.mxu0 %v12755_v17  ;;  %v9467_v17 = vpop.f32.mrf.mxu0 }
 0x5e3   :  { %9741 = vmatpush1.bf16.msra.mxu1 %v12693_v7  ;;  %v12807_v7 = vld [vmem:[#allocation11 + $0x1e0] ss:$8 sps:$4 sm:$0xff]  }
 0x5e4   :  { %9742 = vmatprep.subr.bf16.mxu1 %v12698_v24  ;;  %10200 = vmatpush1.bf16.msra.mxu0 %v12753_v30  ;;  %v12812_v24 = vld [vmem:[#allocation11 + $0x1d4] ss:$8 sps:$4 sm:$0xff]   ;;  %v9469_v30 = vpop.f32.mrf.mxu0 }
 0x5e5   :  { %10201 = vmatprep.subr.bf16.mxu0 %v12758_v50  ;;  %v12810_v50 = vld [vmem:[#allocation11 + $0x1d0] ss:$8 sps:$4 sm:$0xff]  }
 0x5e7   :  { %9743 = vmatpush1.bf16.msra.mxu1 %v12696_v9  ;;  %v12815_v9 = vld [vmem:[#allocation11 + $0x1c4] ss:$8 sps:$4 sm:$0xff]  }
 0x5e8   :  { %9744 = vmatprep.subr.bf16.mxu1 %v12701_v6  ;;  %10202 = vmatpush2.bf16.msra.mxu0 %v12756_v57  ;;  %v9471_v6 = vpop.f32.mrf.mxu0  ;;  %v9510_v57 = vpop.f32.mrf.mxu1 }
 0x5e9   :  { %10203 = vmatprep.subr.bf16.mxu0 %v12761_v8  ;;  %v12813_v8 = vld [vmem:[#allocation11 + $0x1c0] ss:$8 sps:$4 sm:$0xff]  }
 0x5eb   :  { %9745 = vmatpush1.bf16.msra.mxu1 %v12699_v37  ;;  %v12818_v37 = vld [vmem:[#allocation11 + $0x1b4] ss:$8 sps:$4 sm:$0xff]  }
 0x5ec   :  { %9746 = vmatprep.subr.bf16.mxu1 %v12704_v12  ;;  %10204 = vmatpush2.bf16.msra.mxu0 %v12759_v44  ;;  %v9473_v12 = vpop.f32.mrf.mxu0  ;;  %v9512_v44 = vpop.f32.mrf.mxu1 }
 0x5ed   :  { %10205 = vmatprep.subr.bf16.mxu0 %v12764_v19 }
 0x5ef   :  { %9747 = vmatpush1.bf16.msra.mxu1 %v12702_v22  ;;  %v12816_v22 = vld [vmem:[#allocation11 + $0x1b0] ss:$8 sps:$4 sm:$0xff]  }
 0x5f0   :  { %9748 = vmatprep.subr.bf16.mxu1 %v12707_v38  ;;  %10206 = vmatpush2.bf16.msra.mxu0 %v12762_v61  ;;  %v13724_v38 = vld [vmem:[#allocation10] sm:$0xf] }
 0x5f1   :  { %10207 = vmatprep.subr.bf16.mxu0 %v12767_v52  ;;  %v8140_v61 = vrot.slane %v13724_v38, %v13634_v49  ;;  %v13829_v52 = vld [vmem:[#allocation36_spill] sm:$0xff] }
 0x5f3   :  { %9749 = vmatpush1.bf16.msra.mxu1 %v12705_v55  ;;  %v8136_v55 = vrot.slane %v13724_v38, %v13829_v52 }
 0x5f4   :  { %9750 = vmatprep.subr.bf16.mxu1 %v12710_v40  ;;  %10208 = vmatpush2.bf16.msra.mxu0 %v12765_v62  ;;  %v9514_v40 = vpop.f32.mrf.mxu1 }
 0x5f5   :  { %10209 = vmatprep.subr.bf16.mxu0 %v12770_v2  ;;  %v9470_v2 = vadd.f32 %v9469_v30, %v8140_v61 }
 0x5f7   :  { %9751 = vmatpush2.bf16.msra.mxu1 %v12708_v26  ;;  %v9472_v26 = vadd.f32 %v9471_v6, %v8136_v55 }
 0x5f8   :  { %9752 = vmatprep.subr.bf16.mxu1 %v12713_v46  ;;  %10210 = vmatpush2.bf16.msra.mxu0 %v12768_v11  ;;  %v9468_v46 = vadd.f32 %v9467_v17, %v8136_v55  ;;  %v9516_v11 = vpop.f32.mrf.mxu1  ;;  %v12835_v17 = vld [vmem:[#allocation14 + $0x20] sm:$0xff]  }
 0x5f9   :  { %10211 = vmatprep.subr.bf16.mxu0 %v12773_v3 }
 0x5fb   :  { %9753 = vmatpush2.bf16.msra.mxu1 %v12711_v35  ;;  %v9474_v35 = vadd.f32 %v9473_v12, %v8140_v61  ;;  %v13830_v12 = vsub.s32 3, %v13419_v41 }
 0x5fc   :  { %9754 = vmatprep.subr.bf16.mxu1 %v12716_v0  ;;  %10212 = vmatpush2.bf16.msra.mxu0 %v12771_v53  ;;  %v9513_v53 = vadd.f32 %v9512_v44, %v9470_v2 }
 0x5fd   :  { %10213 = vmatprep.subr.bf16.mxu0 %v12776_v45  ;;  %v9515_v45 = vadd.f32 %v9514_v40, %v9472_v26  ;;  %v8148_v44 = vrot.slane %v13724_v38, %v13830_v12 }
 0x5ff   :  { %9755 = vmatpush2.bf16.msra.mxu1 %v12714_v16  ;;  %v12821_v16 = vld [vmem:[#allocation11 + $0x1a4] ss:$8 sps:$4 sm:$0xff]  }
 0x600   :  { %9756 = vmatprep.subr.bf16.mxu1 %v12719_v13  ;;  %10214 = vmatpush2.bf16.msra.mxu0 %v12774_v15  ;;  %v9511_v13 = vadd.f32 %v9510_v57, %v9468_v46 }
 0x601   :  { %10215 = vmatprep.subr.bf16.mxu0 %v12779_v5 }
 0x603   :  { %9757 = vmatpush2.bf16.msra.mxu1 %v12717_v14  ;;  %v12819_v14 = vld [vmem:[#allocation11 + $0x1a0] ss:$8 sps:$4 sm:$0xff]  }
 0x604   :  { %9758 = vmatprep.subr.bf16.mxu1 %v12722_v60  ;;  %10216 = vmatpush2.bf16.msra.mxu0 %v12777_v32  ;;  %v9517_v60 = vadd.f32 %v9516_v11, %v9474_v35 }
 0x606   :  { %v9553_v19 = vpop.f32.mrf.mxu0 }
 0x607   :  { %9759 = vmatpush2.bf16.msra.mxu1 %v12720_v28 }
 0x608   :  { %9760 = vmatprep.subr.bf16.mxu1 %v12725_v58  ;;  %v9555_v62 = vpop.f32.mrf.mxu0  ;;  %v9554_v58 = vadd.f32 %v9553_v19, %v9511_v13  ;;  %v13831_v19 = vsub.s32 2, %v13419_v41 }
 0x609   :  { %v9556_v32 = vadd.f32 %v9555_v62, %v9513_v53 }
 0x60a   :  { %v9557_v3 = vpop.f32.mrf.mxu0 }
 0x60b   :  { %9761 = vmatpush2.bf16.msra.mxu1 %v12723_v43  ;;  %v9558_v28 = vadd.f32 %v9557_v3, %v9515_v45 }
 0x60c   :  { %9762 = vmatprep.subr.bf16.mxu1 %v12728_v42  ;;  %v9559_v15 = vpop.f32.mrf.mxu0 }
 0x60d   :  { %v9560_v42 = vadd.f32 %v9559_v15, %v9517_v60 }
 0x60f   :  { %9763 = vmatpush2.bf16.msra.mxu1 %v12726_v29 }
 0x610   :  { %9764 = vmatprep.subr.bf16.mxu1 %v12731_v33 }
 0x613   :  { %9765 = vmatpush2.bf16.msra.mxu1 %v12729_v23  ;;  %v12824_v23 = vld [vmem:[#allocation11 + $0x194] ss:$8 sps:$4 sm:$0xff]  }
 0x614   :  { %10228 = vmatprep.subr.bf16.mxu1 %v12782_v1 }
 0x616   :  { %9767 = vmatmul.mubr.bf16.vlgmr.msra.gmra.mxu1 %v13715_v25  ;;  %v12797_v25 = vld [vmem:[#allocation11 + $0x124] ss:$8 sps:$4 sm:$0xff]  }
 0x617   :  { %10229 = vmatpush1.bf16.msra.mxu1 %v12780_v27 }
 0x618   :  { %10230 = vmatprep.subr.bf16.mxu1 %v12785_v48  ;;  %v12822_v48 = vld [vmem:[#allocation11 + $0x190] ss:$8 sps:$4 sm:$0xff]  }
 0x61b   :  { %10231 = vmatpush1.bf16.msra.mxu1 %v12783_v54 }
 0x61c   :  { %10232 = vmatprep.subr.bf16.mxu1 %v12788_v59 }
 0x61f   :  { %10233 = vmatpush1.bf16.msra.mxu1 %v12786_v21 }
 0x620   :  { %10234 = vmatprep.subr.bf16.mxu1 %v12791_v47 }
 0x623   :  { %10235 = vmatpush1.bf16.msra.mxu1 %v12789_v34  ;;  %v12827_v34 = vld [vmem:[#allocation11 + $0x184] ss:$8 sps:$4 sm:$0xff]  }
 0x624   :  { %10236 = vmatprep.subr.bf16.mxu1 %v12794_v51 }
 0x627   :  { %10237 = vmatpush1.bf16.msra.mxu1 %v12792_v10  ;;  %v12825_v10 = vld [vmem:[#allocation11 + $0x180] ss:$8 sps:$4 sm:$0xff]  }
 0x628   :  { %10238 = vmatprep.subr.bf16.mxu1 %v12797_v25 }
 0x62b   :  { %10239 = vmatpush1.bf16.msra.mxu1 %v12795_v20 }
 0x62c   :  { %10240 = vmatprep.subr.bf16.mxu1 %v12800_v56  ;;  %v12828_v56 = vld [vmem:[#allocation14 + $0x78] sm:$0xff]  }
 0x62d   :  { %12212 = vmatprep.subr.bf16.mxu0 %v12828_v56  ;;  %v12847_v56 = vld [vmem:[#allocation17 + $0x20] sm:$0xff]  }
 0x62f   :  { %10241 = vmatpush1.bf16.msra.mxu1 %v12798_v63  ;;  %v12829_v63 = vld [vmem:[#allocation14 + $0x38] sm:$0xff]  }
 0x630   :  { %10242 = vmatprep.subr.bf16.mxu1 %v12803_v4  ;;  %v12830_v4 = vld [vmem:[#allocation14 + $0x70] sm:$0xff]  }
 0x633   :  { %10243 = vmatpush1.bf16.msra.mxu1 %v12801_v31  ;;  %v12831_v31 = vld [vmem:[#allocation14 + $0x30] sm:$0xff]  }
 0x634   :  { %10244 = vmatprep.subr.bf16.mxu1 %v12806_v18  ;;  %v12832_v18 = vld [vmem:[#allocation14 + $0x68] sm:$0xff]  }
 0x637   :  { %10245 = vmatpush2.bf16.msra.mxu1 %v12804_v39  ;;  %v12833_v39 = vld [vmem:[#allocation14 + $0x28] sm:$0xff]  }
 0x638   :  { %10246 = vmatprep.subr.bf16.mxu1 %v12809_v36  ;;  %v12834_v36 = vld [vmem:[#allocation14 + $0x60] sm:$0xff]  }
 0x63b   :  { %10247 = vmatpush2.bf16.msra.mxu1 %v12807_v7  ;;  %v12836_v7 = vld [vmem:[#allocation14 + $0x58] sm:$0xff]  }
 0x63c   :  { %10248 = vmatprep.subr.bf16.mxu1 %v12812_v24  ;;  %v12837_v24 = vld [vmem:[#allocation14 + $0x18] sm:$0xff]  }
 0x63f   :  { %10249 = vmatpush2.bf16.msra.mxu1 %v12810_v50 }
 0x640   :  { %10250 = vmatprep.subr.bf16.mxu1 %v12815_v9 }
 0x643   :  { %10251 = vmatpush2.bf16.msra.mxu1 %v12813_v8 }
 0x644   :  { %10252 = vmatprep.subr.bf16.mxu1 %v12818_v37 }
 0x646   :  { %v9639_v30 = vpop.f32.mrf.mxu0 }
 0x647   :  { %10253 = vmatpush2.bf16.msra.mxu1 %v12816_v22  ;;  %v8144_v22 = vrot.slane %v13724_v38, %v13831_v19 }
 0x648   :  { %10254 = vmatprep.subr.bf16.mxu1 %v12821_v16  ;;  %v9641_v50 = vpop.f32.mrf.mxu0 }
 0x649   :  { %v9642_v40 = vadd.f32 %v9641_v50, %v8148_v44  ;;  %v9640_v2 = vadd.f32 %v9639_v30, %v8144_v22 }
 0x64a   :  { %v9643_v9 = vpop.f32.mrf.mxu0 }
 0x64b   :  { %10255 = vmatpush2.bf16.msra.mxu1 %v12819_v14  ;;  %v9644_v62 = vadd.f32 %v9643_v9, %v8144_v22 }
 0x64c   :  { %10256 = vmatprep.subr.bf16.mxu1 %v12824_v23  ;;  %v9645_v57 = vpop.f32.mrf.mxu0 }
 0x64d   :  { %v9646_v46 = vadd.f32 %v9645_v57, %v8148_v44 }
 0x64f   :  { %10257 = vmatpush2.bf16.msra.mxu1 %v12822_v48  ;;  %v12838_v48 = vld [vmem:[#allocation14 + $0x50] sm:$0xff]  }
 0x650   :  { %10258 = vmatprep.subr.bf16.mxu1 %v12827_v34  ;;  %v12843_v34 = vld [vmem:[#allocation14] sm:$0xff]  }
 0x653   :  { %10259 = vmatpush2.bf16.msra.mxu1 %v12825_v10  ;;  %v13233_v10 = vmov 0.0  }
 0x654   :  { %12261 = vmatprep.subr.bf16.mxu1 %v13233_v10 }
 0x656   :  { %v9596_v0 = vpop.f32.mrf.mxu1 }
 0x657   :  { %v9597_v27 = vadd.f32 %v9596_v0, %v9554_v58 }
 0x658   :  { %v9598_v5 = vpop.f32.mrf.mxu1 }
 0x659   :  { %v9599_v29 = vadd.f32 %v9598_v5, %v9556_v32  ;;  %v9777_v51 = vmax.f32 %v9597_v27, 0.0 }
 0x65a   :  { %v9600_v43 = vpop.f32.mrf.mxu1 }
 0x65b   :  { %v9601_v33 = vadd.f32 %v9600_v43, %v9558_v28  ;;  %v9778_v21 = vmax.f32 %v9599_v29, 0.0 }
 0x65c   :  { %v9602_v1 = vpop.f32.mrf.mxu1 }
 0x65d   :  { %v9603_v54 = vadd.f32 %v9602_v1, %v9560_v42  ;;  %v9781_v59 = vmax.f32 %v9601_v33, 0.0 }
 0x65f   :  { %v9782_v47 = vmax.f32 %v9603_v54, 0.0  ;;  %v9785_v20 = vpack.c.bf16 %v9781_v59, %v9777_v51  ;;  %v12839_v54 = vld [vmem:[#allocation14 + $0x10] sm:$0xff]   ;;  %v12840_v59 = vld [vmem:[#allocation14 + $0x48] sm:$0xff]   ;;  %v12844_v51 = vld [vmem:[#allocation17 + $0x38] sm:$0xff]  }
 0x661   :  { %v9786_v25 = vpack.c.bf16 %v9782_v47, %v9778_v21  ;;  %v12841_v21 = vld [vmem:[#allocation14 + $0x8] sm:$0xff]   ;;  %v12842_v47 = vld [vmem:[#allocation14 + $0x40] sm:$0xff]  }
 0x663   :  { %10217 = vmatprep.mubr.bf16.mxu0 %v9786_v25  ;;  %v12845_v25 = vld [vmem:[#allocation17 + $0x30] sm:$0xff]  }
 0x664   :  { %10218 = vmatmul.mubr.bf16.vlgmr.msra.gmra.mxu0 %v9785_v20  ;;  %v12846_v20 = vld [vmem:[#allocation17 + $0x28] sm:$0xff]  }
 0x665   :  { %12213 = vmatpush3.bf16.msra.mxu0 %v12829_v63 }
 0x666   :  { %12214 = vmatprep.subr.bf16.mxu0 %v12830_v4 }
 0x669   :  { %12215 = vmatpush3.bf16.msra.mxu0 %v12831_v31  ;;  %v9853_v31 = vld [vmem:[#allocation13] sm:$0x3] }
 0x66a   :  { %12216 = vmatprep.subr.bf16.mxu0 %v12832_v18 }
 0x66d   :  { %12217 = vmatpush3.bf16.msra.mxu0 %v12833_v39  ;;  %v9862_v39 = vrot.slane %v9853_v31, %v13634_v49 }
 0x66e   :  { %12218 = vmatprep.subr.bf16.mxu0 %v12834_v36  ;;  %v9858_v36 = vrot.slane %v9853_v31, %v13829_v52  ;;  %v12848_v52 = vld [vmem:[#allocation17 + $0x18] sm:$0xff]   ;;  %v12866_v31 = vld [vmem:[#allocation23 + $0x8] sm:$0xff]  }
 0x671   :  { %12219 = vmatpush3.bf16.msra.mxu0 %v12835_v17 }
 0x672   :  { %12220 = vmatprep.subr.bf16.mxu0 %v12836_v7 }
 0x675   :  { %12221 = vmatpush3.bf16.msra.mxu0 %v12837_v24 }
 0x676   :  { %12222 = vmatprep.subr.bf16.mxu0 %v12838_v48  ;;  %v12864_v48 = vld [vmem:[#allocation23 + $0x18] sm:$0xff]  }
 0x679   :  { %12223 = vmatpush3.bf16.msra.mxu0 %v12839_v54  ;;  %v12185_v54 = vld [vmem:[#allocation19] ss:$0 sm:$0xff] }
 0x67a   :  { %12224 = vmatprep.subr.bf16.mxu0 %v12840_v59 }
 0x67d   :  { %12225 = vmatpush3.bf16.msra.mxu0 %v12841_v21 }
 0x67e   :  { %12226 = vmatprep.subr.bf16.mxu0 %v12842_v47 }
 0x681   :  { %12227 = vmatpush3.bf16.msra.mxu0 %v12843_v34 }
 0x682   :  { %12281 = vmatprep.subr.bf16.mxu0 %v13233_v10 }
 0x687   :  { %v9725_v37 = vpop.f32.mrf.mxu0 }
 0x689   :  { %v9727_v55 = vpop.f32.mrf.mxu0 }
 0x68b   :  { %v9729_v35 = vpop.f32.mrf.mxu0 }
 0x68d   :  { %v9731_v5 = vpop.f32.mrf.mxu0 }
 0x696   :  { %v9682_v6 = vpop.f32.mrf.mxu1 }
 0x697   :  { %v9683_v0 = vadd.f32 %v9682_v6, %v9640_v2  ;;  %v12849_v2 = vld [vmem:[#allocation17 + $0x10] sm:$0xff]  }
 0x698   :  { %v9684_v8 = vpop.f32.mrf.mxu1 }
 0x699   :  { %v9685_v11 = vadd.f32 %v9684_v8, %v9642_v40  ;;  %v9726_v41 = vadd.f32 %v9725_v37, %v9683_v0  ;;  %v12855_v0 = vld [vmem:[#allocation20 + $0x20] sm:$0xff]  }
 0x69a   :  { %v9686_v61 = vpop.f32.mrf.mxu1 }
 0x69b   :  { %v9687_v3 = vadd.f32 %v9686_v61, %v9644_v62  ;;  %v9728_v13 = vadd.f32 %v9727_v55, %v9685_v11  ;;  %v12852_v11 = vld [vmem:[#allocation20 + $0x38] sm:$0xff]  }
 0x69c   :  { %v9688_v26 = vpop.f32.mrf.mxu1 }
 0x69d   :  { %v9689_v45 = vadd.f32 %v9688_v26, %v9646_v46  ;;  %v9730_v15 = vadd.f32 %v9729_v35, %v9687_v3  ;;  %v12850_v26 = vld [vmem:[#allocation17 + $0x8] sm:$0xff]   ;;  %v12851_v46 = vld [vmem:[#allocation17] sm:$0xff]   ;;  %v12853_v3 = vld [vmem:[#allocation20 + $0x30] sm:$0xff]  }
 0x69e   :  { %v12854_v35 = vld [vmem:[#allocation20 + $0x28] sm:$0xff]  }
 0x69f   :  { %v9732_v32 = vadd.f32 %v9731_v5, %v9689_v45 }
 0x6d6   :  { %v9768_v53 = vpop.f32.mrf.mxu1 }
 0x6d7   :  { %v9769_v28 = vadd.f32 %v9768_v53, %v9726_v41  ;;  %v12856_v53 = vld [vmem:[#allocation20 + $0x18] sm:$0xff]  }
 0x6d8   :  { %v9770_v16 = vpop.f32.mrf.mxu1 }
 0x6d9   :  { %v9771_v38 = vadd.f32 %v9770_v16, %v9728_v13  ;;  %v9779_v23 = vmax.f32 %v9769_v28, 0.0 }
 0x6da   :  { %v9772_v14 = vpop.f32.mrf.mxu1 }
 0x6db   :  { %v9773_v60 = vadd.f32 %v9772_v14, %v9730_v15  ;;  %v9780_v29 = vmax.f32 %v9771_v38, 0.0  ;;  %v12168_v15 = vld [vmem:[#allocation16] ss:$0 sm:$0xff] }
 0x6dc   :  { %v9774_v58 = vpop.f32.mrf.mxu1 }
 0x6dd   :  { %v9775_v43 = vadd.f32 %v9774_v58, %v9732_v32  ;;  %v9783_v42 = vmax.f32 %v9773_v60, 0.0 }
 0x6df   :  { %v9784_v33 = vmax.f32 %v9775_v43, 0.0  ;;  %v9787_v1 = vpack.c.bf16 %v9783_v42, %v9779_v23  ;;  %v12857_v43 = vld [vmem:[#allocation20 + $0x10] sm:$0xff]   ;;  %v12858_v42 = vld [vmem:[#allocation20 + $0x8] sm:$0xff]  }
 0x6e0   :  { %v12861_v23 = vld [vmem:[#allocation23 + $0x30] sm:$0xff]  }
 0x6e1   :  { %v9788_v27 = vpack.c.bf16 %v9784_v33, %v9780_v29  ;;  %v12859_v29 = vld [vmem:[#allocation20] sm:$0xff]  }
 0x6e2   :  { %v12860_v33 = vld [vmem:[#allocation23 + $0x38] sm:$0xff]  }
 0x6e3   :  { %10260 = vmatprep.mubr.bf16.mxu1 %v9788_v27  ;;  %v12862_v27 = vld [vmem:[#allocation23 + $0x28] sm:$0xff]  }
 0x6e4   :  { %10261 = vmatmul.mubr.bf16.vlgmr.msra.gmra.mxu1 %v9787_v1  ;;  %v12863_v1 = vld [vmem:[#allocation23 + $0x20] sm:$0xff]  }
 0x6e5   :  { %12262 = vmatpush3.bf16.msra.mxu1 %v12844_v51  ;;  %12277 = vmatprep.mubr.msk.bf16.mxu1 %vm13234_vm0, %v13233_v10 }
 0x6e6   :  { %12263 = vmatprep.subr.bf16.mxu1 %v13233_v10 }
 0x6e9   :  { %12264 = vmatpush3.bf16.msra.mxu1 %v12845_v25 }
 0x6ea   :  { %12265 = vmatprep.subr.bf16.mxu1 %v13233_v10 }
 0x6ed   :  { %12266 = vmatpush3.bf16.msra.mxu1 %v12846_v20 }
 0x6ee   :  { %12267 = vmatprep.subr.bf16.mxu1 %v13233_v10 }
 0x6f1   :  { %12268 = vmatpush3.bf16.msra.mxu1 %v12847_v56 }
 0x6f2   :  { %12269 = vmatprep.subr.bf16.mxu1 %v13233_v10 }
 0x6f5   :  { %12270 = vmatpush3.bf16.msra.mxu1 %v12848_v52 }
 0x6f6   :  { %12271 = vmatprep.subr.bf16.mxu1 %v13233_v10 }
 0x6f9   :  { %12272 = vmatpush3.bf16.msra.mxu1 %v12849_v2 }
 0x6fa   :  { %12273 = vmatprep.subr.bf16.mxu1 %v13233_v10 }
 0x6fd   :  { %12274 = vmatpush3.bf16.msra.mxu1 %v12850_v26 }
 0x6fe   :  { %12275 = vmatprep.subr.bf16.mxu1 %v13233_v10 }
 0x701   :  { %12276 = vmatpush3.bf16.msra.mxu1 %v12851_v46 }
 0x702   :  { %12301 = vmatprep.subr.bf16.mxu1 %v13233_v10 }
 0x724   :  { %v10219_v63 = vpop.f32.mrf.mxu0 }
 0x725   :  { %v10220_v9 = vadd.f32 %v10219_v63, %v9858_v36 }
 0x726   :  { %v10221_v4 = vpop.f32.mrf.mxu0 }
 0x727   :  { %v10222_v30 = vadd.f32 %v10221_v4, %v9862_v39  ;;  %v12865_v4 = vld [vmem:[#allocation23 + $0x10] sm:$0xff]  }
 0x728   :  { %v10223_v18 = vpop.f32.mrf.mxu0 }
 0x729   :  { %v10224_v50 = vadd.f32 %v10223_v18, %v9858_v36  ;;  %v12867_v18 = vld [vmem:[#allocation23] sm:$0xff]  }
 0x72a   :  { %v10225_v7 = vpop.f32.mrf.mxu0 }
 0x72b   :  { %v10226_v57 = vadd.f32 %v10225_v7, %v9862_v39  ;;  %v12194_v39 = vld [vmem:[#allocation22] ss:$0 sm:$0xff] }
 0x7a4   :  { %v10262_v17 = vpop.f32.mrf.mxu1 }
 0x7a5   :  { %v10263_v12 = vadd.f32 %v10262_v17, %v10220_v9 }
 0x7a6   :  { %v10264_v24 = vpop.f32.mrf.mxu1 }
 0x7a7   :  { %v10265_v8 = vadd.f32 %v10264_v24, %v10222_v30  ;;  %v10271_v40 = vmax.f32 %v10263_v12, 0.0 }
 0x7a8   :  { %v10266_v6 = vpop.f32.mrf.mxu1 }
 0x7a9   :  { %v10267_v37 = vadd.f32 %v10266_v6, %v10224_v50  ;;  %v10272_v61 = vmax.f32 %v10265_v8, 0.0  ;;  %v12203_v8 = vld [vmem:[#allocation25] ss:$0 sm:$0xff] }
 0x7aa   :  { %v10268_v44 = vpop.f32.mrf.mxu1 }
 0x7ab   :  { %v10269_v19 = vadd.f32 %v10268_v44, %v10226_v57  ;;  %v10273_v22 = vmax.f32 %v10267_v37, 0.0 }
 0x7ad   :  { %v10274_v55 = vmax.f32 %v10269_v19, 0.0  ;;  %v10275_v62 = vpack.c.bf16 %v10273_v22, %v10271_v40 }
 0x7af   :  { %v10276_v49 = vpack.c.bf16 %v10274_v55, %v10272_v61 }
 0x7b1   :  { %10444 = vmatprep.mubr.bf16.mxu0 %v10276_v49 }
 0x7b2   :  { %10445 = vmatmul.mubr.bf16.vlgmr.msra.gmra.mxu0 %v10275_v62 }
 0x7b3   :  { %12297 = vmatprep.mubr.msk.bf16.mxu0 %vm13234_vm0, %v13233_v10  ;;  %12282 = vmatpush3.bf16.msra.mxu0 %v12852_v11 }
 0x7b4   :  { %12283 = vmatprep.subr.bf16.mxu0 %v13233_v10 }
 0x7b7   :  { %12284 = vmatpush3.bf16.msra.mxu0 %v12853_v3 }
 0x7b8   :  { %12285 = vmatprep.subr.bf16.mxu0 %v13233_v10 }
 0x7bb   :  { %12286 = vmatpush3.bf16.msra.mxu0 %v12854_v35 }
 0x7bc   :  { %12287 = vmatprep.subr.bf16.mxu0 %v13233_v10 }
 0x7bf   :  { %12288 = vmatpush3.bf16.msra.mxu0 %v12855_v0 }
 0x7c0   :  { %12289 = vmatprep.subr.bf16.mxu0 %v13233_v10 }
 0x7c3   :  { %12290 = vmatpush3.bf16.msra.mxu0 %v12856_v53 }
 0x7c4   :  { %12291 = vmatprep.subr.bf16.mxu0 %v13233_v10 }
 0x7c7   :  { %12292 = vmatpush3.bf16.msra.mxu0 %v12857_v43 }
 0x7c8   :  { %12293 = vmatprep.subr.bf16.mxu0 %v13233_v10 }
 0x7cb   :  { %12294 = vmatpush3.bf16.msra.mxu0 %v12858_v42 }
 0x7cc   :  { %12295 = vmatprep.subr.bf16.mxu0 %v13233_v10 }
 0x7cf   :  { %12296 = vmatpush3.bf16.msra.mxu0 %v12859_v29 }
 0x872   :  { %v12228_v45 = vpop.f32.mrf.mxu0 }
 0x874   :  { %v12229_v16 = vpop.f32.mrf.mxu0 }
 0x875   :  { %v12230_v13 = vadd.f32 %v12229_v16, %v12228_v45 }
 0x876   :  { %v12231_v5 = vpop.f32.mrf.mxu0 }
 0x877   :  { %v10447_v14 = vadd.f32 %v12230_v13, %v12168_v15 }
 0x878   :  { %v12232_v41 = vpop.f32.mrf.mxu0 }
 0x879   :  { %v12233_v38 = vadd.f32 %v12232_v41, %v12231_v5  ;;  %v10453_v32 = vmax.f32 %v10447_v14, 0.0 }
 0x87b   :  { %v10450_v60 = vadd.f32 %v12233_v38, %v12168_v15 }
 0x87d   :  { %v10454_v28 = vmax.f32 %v10450_v60, 0.0 }
 0x87f   :  { %v10455_v58 = vpack.c.bf16 %v10454_v28, %v10453_v32 }
 0x881   :  { %12278 = vmatmul.mubr.bf16.vlgmr.msra.gmra.mxu1 %v10455_v58 }
 0x882   :  { %12317 = vmatprep.mubr.msk.bf16.mxu1 %vm13234_vm0, %v13233_v10  ;;  %12302 = vmatpush3.bf16.msra.mxu1 %v12860_v33 }
 0x883   :  { %12303 = vmatprep.subr.bf16.mxu1 %v13233_v10 }
 0x886   :  { %12304 = vmatpush3.bf16.msra.mxu1 %v12861_v23 }
 0x887   :  { %12305 = vmatprep.subr.bf16.mxu1 %v13233_v10 }
 0x88a   :  { %12306 = vmatpush3.bf16.msra.mxu1 %v12862_v27 }
 0x88b   :  { %12307 = vmatprep.subr.bf16.mxu1 %v13233_v10 }
 0x88e   :  { %12308 = vmatpush3.bf16.msra.mxu1 %v12863_v1 }
 0x88f   :  { %12309 = vmatprep.subr.bf16.mxu1 %v13233_v10 }
 0x892   :  { %12310 = vmatpush3.bf16.msra.mxu1 %v12864_v48 }
 0x893   :  { %12311 = vmatprep.subr.bf16.mxu1 %v13233_v10 }
 0x896   :  { %12312 = vmatpush3.bf16.msra.mxu1 %v12865_v4 }
 0x897   :  { %12313 = vmatprep.subr.bf16.mxu1 %v13233_v10 }
 0x89a   :  { %12314 = vmatpush3.bf16.msra.mxu1 %v12866_v31 }
 0x89b   :  { %12315 = vmatprep.subr.bf16.mxu1 %v13233_v10 }
 0x89e   :  { %12316 = vmatpush3.bf16.msra.mxu1 %v12867_v18 }
 0x941   :  { %v10561_v59 = vpop.f32.mrf.mxu1 }
 0x942   :  { %v10562_v47 = vadd.f32 %v12185_v54, %v10561_v59 }
 0x943   :  { %v12279_v21 = vpop.f32.mrf.mxu1 }
 0x944   :  { %v10568_v20 = vmax.f32 %v10562_v47, 0.0 }
 0x945   :  { %v10564_v34 = vpop.f32.mrf.mxu1 }
 0x946   :  { %v10565_v51 = vadd.f32 %v12185_v54, %v10564_v34 }
 0x947   :  { %v12280_v25 = vpop.f32.mrf.mxu1 }
 0x948   :  { %v10569_v56 = vmax.f32 %v10565_v51, 0.0 }
 0x94a   :  { %v10570_v63 = vpack.c.bf16 %v10569_v56, %v10568_v20 }
 0x94c   :  { %12298 = vmatmul.mubr.bf16.vlgmr.msra.gmra.mxu0 %v10570_v63 }
 0xa0c   :  { %v10676_v36 = vpop.f32.mrf.mxu0 }
 0xa0d   :  { %v10677_v7 = vadd.f32 %v12194_v39, %v10676_v36 }
 0xa0e   :  { %v12299_v17 = vpop.f32.mrf.mxu0 }
 0xa0f   :  { %v10683_v9 = vmax.f32 %v10677_v7, 0.0 }
 0xa10   :  { %v10679_v24 = vpop.f32.mrf.mxu0 }
 0xa11   :  { %v10680_v30 = vadd.f32 %v12194_v39, %v10679_v24 }
 0xa12   :  { %v12300_v50 = vpop.f32.mrf.mxu0 }
 0xa13   :  { %v10684_v6 = vmax.f32 %v10680_v30, 0.0 }
 0xa15   :  { %v10685_v57 = vpack.c.bf16 %v10684_v6, %v10683_v9 }
 0xa17   :  { %12318 = vmatmul.mubr.bf16.vlgmr.msra.gmra.mxu1 %v10685_v57 }
 0xad7   :  { %v10791_v37 = vpop.f32.mrf.mxu1 }
 0xad8   :  { %v10792_v12 = vadd.f32 %v12203_v8, %v10791_v37 }
 0xad9   :  { %v12319_v44 = vpop.f32.mrf.mxu1 }
 0xada   :  { %10798 = vst [vmem:[#allocation26] sm:$0xff] %v10792_v12 }
 0xadb   :  { %v10794_v10 = vpop.f32.mrf.mxu1 }
 0xadc   :  { %v10795_v19 = vadd.f32 %v12203_v8, %v10794_v10 }
 0xadd   :  { %v12320_v22 = vpop.f32.mrf.mxu1 }
 0xade   :  { %10799 = vst [vmem:[#allocation26 + $0x8] sm:$0xff] %v10795_v19 }
 0xadf   :  { %13182 = shalt.err (!%p13179_p9)
}
 0xae0   :  { %10811 = dma.vmem_to_hbm [thread:$0]  %s10806_s14, 256, %s13789_s15, [#allocation4], %s13216_s19, %s13216_s19, %s13217_s20  }
 0xae1   :  { %13207 = dma.done.wait [#allocation4], 256  }
 0xae2   :  { %13208 = vsyncadd [#allocation4], 4294967040 }
 0xae3   :  { %10815 = vsyncpa [#allocation3], 1 }
 0xae4   :  { %10816 = vsyncpa [#allocation6], 1 }
 0xae5   :  { %10817 = vsyncpa [#allocation9], 1 }
 0xae6   :  { %10818 = vsyncpa [#allocation12], 1 }
 0xae7   :  { %10819 = vsyncpa [#allocation15], 1 }
 0xae8   :  { %10820 = vsyncpa [#allocation18], 1 }
 0xae9   :  { %10821 = vsyncpa [#allocation21], 1 }
 0xaea   :  { %10822 = vsyncpa [#allocation24], 1 }
 0xaeb   :  { %10823 = vsyncpa [#allocation4], 1 }

</bundles_post_ra>
